<compile_context>
chip_gen: v7x
topology: tpu7x:2x2x1
jax: 0.10.0
libtpu: 0.0.40
codegen_flags: <defaults>
</compile_context>

<pallas_src>
import functools

import jax
import jax.numpy as jnp
from jax.experimental import pallas as pl
from jax.experimental.pallas import tpu as pltpu


_CONV_SPECS = ((32, 8, 4), (64, 4, 2), (64, 3, 1))   # (out_ch, kernel, stride)


def _round_up(x, m):
    return (x + m - 1) // m * m


def _batch_tiling(batch):
    """Rows-per-block (multiple of 16 keeps every row slice tile-aligned) and
    padded batch.  >= 2 blocks once batch >= 32 so v7x megacore engages."""
    bp = _round_up(max(batch, 1), 16)
    tb = 16 if bp <= 32 else min(32, _round_up(bp // 2, 16))
    bp = _round_up(bp, tb)
    return tb, bp


# ----------------------------------------------------------------------------
# The fused kernel: conv0 + conv1 + conv2 + fc1 + fc2, one batch tile per step.
# Activations are kept as 2-D (spatial_pos*tb, channels) GEMM slabs in VMEM;
# patch rows are built with static slices + concatenations (no HBM im2col).
# ----------------------------------------------------------------------------
def _dqn_fused_kernel(x_ref, w0_ref, b0_ref, w1_ref, b1_ref, w2_ref, b2_ref,
                      wf1_ref, bf1_ref, wf2_ref, bf2_ref, o_ref):
    _, ph, pw, tb, _ = x_ref.shape          # space-to-depth input block

    # ---- conv0: 8x8 / stride-4 conv as implicit GEMM on the s2d input. ----
    # s2d[P, Q, b, :] holds the 4x4xC input block at (4P, 4Q); an 8x8 window
    # is the 2x2 neighbourhood of s2d blocks -> 4 lane-concatenated pieces.
    oh, ow = ph - 1, pw - 1
    pieces = []
    for p in range(oh):
        for q in range(ow):
            win = [x_ref[0, p, q], x_ref[0, p, q + 1],
                   x_ref[0, p + 1, q], x_ref[0, p + 1, q + 1]]
            pieces.append(jnp.concatenate(win, axis=-1))      # (tb, 64*C)
    patches = jnp.concatenate(pieces, axis=0)                 # (oh*ow*tb, 64*C)
    y = jnp.dot(patches, w0_ref[...], preferred_element_type=jnp.float32)
    y = jnp.maximum(y + b0_ref[...], 0.0).astype(jnp.bfloat16)

    # ---- conv1 (4x4 / 2) and conv2 (3x3 / 1): generic implicit GEMM. ----
    for kh, kw, st, w_ref, b_ref in ((4, 4, 2, w1_ref, b1_ref),
                                     (3, 3, 1, w2_ref, b2_ref)):
        h_in, w_in = oh, ow
        oh = (h_in - kh) // st + 1
        ow = (w_in - kw) // st + 1

        def row(r, c, y=y, w_in=w_in):      # (tb, C_in) slab at spatial (r, c)
            s = (r * w_in + c) * tb
            return y[s:s + tb, :]

        pieces = []
        for p in range(oh):
            for q in range(ow):
                win = [row(p * st + i, q * st + j)
                       for i in range(kh) for j in range(kw)]
                pieces.append(jnp.concatenate(win, axis=-1))  # (tb, kh*kw*Cin)
        patches = (pieces[0] if len(pieces) == 1
                   else jnp.concatenate(pieces, axis=0))
        y = jnp.dot(patches, w_ref[...], preferred_element_type=jnp.float32)
        y = jnp.maximum(y + b_ref[...], 0.0).astype(jnp.bfloat16)

    # ---- flatten (NHWC order; fc1 rows were permuted to match at init). ----
    if oh * ow > 1:
        y = jnp.concatenate([y[k * tb:(k + 1) * tb, :] for k in range(oh * ow)],
                            axis=-1)
    # y: (tb, flat_dim) bf16, one row per batch element.

    # ---- fused FC head: Linear(512) + ReLU + Linear(n_actions, padded). ----
    h = jnp.dot(y, wf1_ref[...], preferred_element_type=jnp.float32)
    h = jnp.maximum(h + bf1_ref[...], 0.0).astype(jnp.bfloat16)
    q = jnp.dot(h, wf2_ref[...], preferred_element_type=jnp.float32)
    o_ref[0] = (q + bf2_ref[...]).astype(o_ref.dtype)


# ----------------------------------------------------------------------------
# Parameter init (PyTorch layouts) and one-time packing to kernel layouts.
# ----------------------------------------------------------------------------
def init_dqn_params(key, in_channels, n_actions, h, w):
    """Deterministic synthetic init matching the PyTorch module's shapes."""
    ks = jax.random.split(key, 10)

    def lin_init(kk, shape, fan_in):
        bound = 1.0 / jnp.sqrt(fan_in)
        return jax.random.uniform(kk, shape, jnp.float32, -bound, bound)

    params = {}
    c_in = in_channels
    oh, ow = h, w
    for idx, (c_out, k, s) in enumerate(_CONV_SPECS):
        fan_in = c_in * k * k
        params[f"conv{idx}_w"] = lin_init(ks[2 * idx], (c_out, c_in, k, k), fan_in)
        params[f"conv{idx}_b"] = lin_init(ks[2 * idx + 1], (c_out,), fan_in)
        oh = (oh - k) // s + 1
        ow = (ow - k) // s + 1
        c_in = c_out
    flat_dim = c_in * oh * ow
    params["fc1_w"] = lin_init(ks[6], (flat_dim, 512), flat_dim)
    params["fc1_b"] = lin_init(ks[7], (512,), flat_dim)
    params["fc2_w"] = lin_init(ks[8], (512, n_actions), 512)
    params["fc2_b"] = lin_init(ks[9], (n_actions,), 512)
    return params, flat_dim


def pack_dqn_params(raw, n_actions, h, w):
    """Pack weights ONCE into the kernel's GEMM layouts (bf16, row-permuted,
    action dim padded to 128).  Runs outside the jitted forward."""
    c_in = raw["conv0_w"].shape[1]
    o0 = raw["conv0_w"].shape[0]

    # conv0 -> (64*C, 32); rows ordered (di, dj, ii, jj, c) to match the
    # in-kernel 2x2 space-to-depth block concatenation (kh = 4*di+ii, ...).
    w0 = jnp.transpose(raw["conv0_w"], (2, 3, 1, 0))          # (kh, kw, C, O)
    w0 = w0.reshape(2, 4, 2, 4, c_in, o0)
    w0 = jnp.transpose(w0, (0, 2, 1, 3, 4, 5)).reshape(64 * c_in, o0)

    def conv_flat(wc):      # (O, C, kh, kw) -> (kh*kw*C, O), rows (kh, kw, c)
        o, c, kh, kw = wc.shape
        return jnp.transpose(wc, (2, 3, 1, 0)).reshape(kh * kw * c, o)

    w1 = conv_flat(raw["conv1_w"])
    w2 = conv_flat(raw["conv2_w"])

    # Permute fc1 rows from PyTorch NCHW-flatten order (c, oh, ow) to the
    # kernel's NHWC-flatten order (oh, ow, c).  Identity for 1x1 spatial.
    oh, ow = h, w
    for _, k, s in _CONV_SPECS:
        oh = (oh - k) // s + 1
        ow = (ow - k) // s + 1
    c_last = _CONV_SPECS[-1][0]
    wf1 = raw["fc1_w"].reshape(c_last, oh, ow, -1)
    wf1 = jnp.transpose(wf1, (1, 2, 0, 3)).reshape(c_last * oh * ow, -1)

    act_pad = _round_up(max(n_actions, 1), 128)
    wf2 = jnp.pad(raw["fc2_w"], ((0, 0), (0, act_pad - n_actions)))
    bf2 = jnp.pad(raw["fc2_b"], (0, act_pad - n_actions))

    return {
        "w0": w0.astype(jnp.bfloat16),
        "b0": raw["conv0_b"].reshape(1, -1).astype(jnp.float32),
        "w1": w1.astype(jnp.bfloat16),
        "b1": raw["conv1_b"].reshape(1, -1).astype(jnp.float32),
        "w2": w2.astype(jnp.bfloat16),
        "b2": raw["conv2_b"].reshape(1, -1).astype(jnp.float32),
        "wf1": wf1.astype(jnp.bfloat16),
        "bf1": raw["fc1_b"].reshape(1, -1).astype(jnp.float32),
        "wf2": wf2.astype(jnp.bfloat16),
        "bf2": bf2.reshape(1, -1).astype(jnp.float32),
    }


# ----------------------------------------------------------------------------
# Forward: one fused pallas_call, gridded over batch tiles.
# ----------------------------------------------------------------------------
def dqn_forward(packed, obs, *, n_actions):
    """obs: (B, C, H, W) float32 -> Q values (B, n_actions) float32."""
    B, C, H, W = obs.shape
    assert H % 4 == 0 and W % 4 == 0, "conv0 space-to-depth needs H, W % 4 == 0"
    tb, bp = _batch_tiling(B)
    nb = bp // tb
    ph, pw = H // 4, W // 4

    x = obs.astype(jnp.float32)
    if bp != B:
        x = jnp.pad(x, ((0, bp - B), (0, 0), (0, 0), (0, 0)))
    # NCHW -> space-to-depth (nb, H/4, W/4, tb, 16*C), bf16.  A single fused
    # XLA transpose/copy; this is the only out-of-kernel activation pass.
    x = x.reshape(nb, tb, C, ph, 4, pw, 4)
    x = jnp.transpose(x, (0, 3, 5, 1, 4, 6, 2))
    x = x.reshape(nb, ph, pw, tb, 16 * C).astype(jnp.bfloat16)

    wlist = [packed[k] for k in ("w0", "b0", "w1", "b1", "w2", "b2",
                                 "wf1", "bf1", "wf2", "bf2")]
    act_pad = packed["wf2"].shape[1]

    in_specs = [pl.BlockSpec((1, ph, pw, tb, 16 * C),
                             lambda i: (i, 0, 0, 0, 0))]
    # Weights/biases: full-array blocks; constant index maps so Pallas keeps
    # them resident in VMEM across grid steps (no re-DMA).
    in_specs += [pl.BlockSpec(w.shape, lambda i: (0, 0)) for w in wlist]

    out = pl.pallas_call(
        _dqn_fused_kernel,
        out_shape=jax.ShapeDtypeStruct((nb, tb, act_pad), jnp.float32),
        grid=(nb,),
        in_specs=in_specs,
        out_specs=pl.BlockSpec((1, tb, act_pad), lambda i: (i, 0, 0)),
        compiler_params=pltpu.CompilerParams(
            dimension_semantics=("parallel",),
            vmem_limit_bytes=16 * 1024 * 1024,   # working set is ~1-3 MiB
        ),
    )(x, *wlist)

    return out.reshape(nb * tb, act_pad)[:B, :n_actions]


# ----------------------------------------------------------------------------
# Plain-JAX f32 reference (for the correctness sanity check).
# ----------------------------------------------------------------------------
def dqn_forward_ref(params, obs):
    x = obs.astype(jnp.float32)
    for idx, (_, k, s) in enumerate(_CONV_SPECS):
        w = params[f"conv{idx}_w"]
        bias = params[f"conv{idx}_b"]
        x = jax.lax.conv_general_dilated(
            x, w, window_strides=(s, s), padding="VALID",
            dimension_numbers=("NCHW", "OIHW", "NCHW"))
        x = jnp.maximum(x + bias[None, :, None, None], 0.0)
    b = x.shape[0]
    x = x.reshape(b, -1)
    x = jnp.maximum(x @ params["fc1_w"] + params["fc1_b"], 0.0)
    return x @ params["fc2_w"] + params["fc2_b"]


if __name__ == "__main__":
    # state_shape=(4, 36, 36), action_shape=Discrete(6).
    # 36x36 is the smallest-ish input the 8/4 -> 4/2 -> 3/1 stack accepts
    # cleanly: 36 -> 8 -> 3 -> 1.
    # TODO(synk): for large spatial inputs (e.g. 84x84) the fully-unrolled
    # per-position patch assembly should move onto a grid axis over output
    # rows to keep compile time and VMEM live values bounded.
    C, H, W = 4, 36, 36
    N_ACTIONS = 6

    key = jax.random.PRNGKey(0)
    k_obs, k_par = jax.random.split(key)
    raw_params, _ = init_dqn_params(k_par, C, N_ACTIONS, H, W)
    packed_params = pack_dqn_params(raw_params, N_ACTIONS, H, W)

    fwd = jax.jit(functools.partial(dqn_forward, n_actions=N_ACTIONS))
    ref = jax.jit(dqn_forward_ref)

    # B=2: small-shape check (single grid block).  B=32: two batch blocks,
    # exercising the parallel grid / megacore path.
    for B in (2, 32):
        obs = jax.random.normal(jax.random.fold_in(k_obs, B),
                                (B, C, H, W), dtype=jnp.float32)
        q = jax.block_until_ready(fwd(packed_params, obs))
        q_ref = jax.block_until_ready(ref(raw_params, obs))
        assert q.shape == (B, N_ACTIONS)
        # bf16 MXU operands (f32 accumulation) -> ~1e-2-level agreement with
        # the all-f32 reference.
        err = float(jnp.max(jnp.abs(q - q_ref)))
        assert jnp.allclose(q, q_ref, atol=3e-2, rtol=3e-2), ("max abs diff", err)

    print("KERNEL_OK")
</pallas_src>

<mosaic_0001>
module attributes {stable_mosaic.version = 11 : i64} {
  func.func @_dqn_fused_kernel(%arg0: i32, %arg1: memref<1x9x9x16x64xbf16, #tpu.memory_space<vmem>>, %arg2: memref<256x32xbf16, #tpu.memory_space<vmem>>, %arg3: memref<1x32xf32, #tpu.memory_space<vmem>>, %arg4: memref<512x64xbf16, #tpu.memory_space<vmem>>, %arg5: memref<1x64xf32, #tpu.memory_space<vmem>>, %arg6: memref<576x64xbf16, #tpu.memory_space<vmem>>, %arg7: memref<1x64xf32, #tpu.memory_space<vmem>>, %arg8: memref<64x512xbf16, #tpu.memory_space<vmem>>, %arg9: memref<1x512xf32, #tpu.memory_space<vmem>>, %arg10: memref<512x128xbf16, #tpu.memory_space<vmem>>, %arg11: memref<1x128xf32, #tpu.memory_space<vmem>>, %arg12: memref<1x16x128xf32, #tpu.memory_space<vmem>>) attributes {dimension_semantics = [#tpu.dimension_semantics<parallel>], iteration_bounds = array<i64: 1>, scalar_prefetch = 0 : i64, scratch_operands = 0 : i64, tpu.core_type = #tpu.core_type<tc>, window_params = [{transform_indices = @transform_0, window_bounds = array<i64: 1, 9, 9, 16, 64>}, {pipeline_mode = #tpu.pipeline_mode<synchronous>, transform_indices = @transform_1, window_bounds = array<i64: 256, 32>}, {pipeline_mode = #tpu.pipeline_mode<synchronous>, transform_indices = @transform_2, window_bounds = array<i64: 1, 32>}, {pipeline_mode = #tpu.pipeline_mode<synchronous>, transform_indices = @transform_3, window_bounds = array<i64: 512, 64>}, {pipeline_mode = #tpu.pipeline_mode<synchronous>, transform_indices = @transform_4, window_bounds = array<i64: 1, 64>}, {pipeline_mode = #tpu.pipeline_mode<synchronous>, transform_indices = @transform_5, window_bounds = array<i64: 576, 64>}, {pipeline_mode = #tpu.pipeline_mode<synchronous>, transform_indices = @transform_6, window_bounds = array<i64: 1, 64>}, {pipeline_mode = #tpu.pipeline_mode<synchronous>, transform_indices = @transform_7, window_bounds = array<i64: 64, 512>}, {pipeline_mode = #tpu.pipeline_mode<synchronous>, transform_indices = @transform_8, window_bounds = array<i64: 1, 512>}, {pipeline_mode = #tpu.pipeline_mode<synchronous>, transform_indices = @transform_9, window_bounds = array<i64: 512, 128>}, {pipeline_mode = #tpu.pipeline_mode<synchronous>, transform_indices = @transform_10, window_bounds = array<i64: 1, 128>}, {transform_indices = @transform_11, window_bounds = array<i64: 1, 16, 128>}]} {
    %c0 = arith.constant 0 : index
    %c0_0 = arith.constant 0 : index
    %c0_1 = arith.constant 0 : index
    %c0_2 = arith.constant 0 : index
    %c0_3 = arith.constant 0 : index
    %0 = vector.load %arg1[%c0, %c0_0, %c0_1, %c0_2, %c0_3] : memref<1x9x9x16x64xbf16, #tpu.memory_space<vmem>>, vector<1x1x1x16x64xbf16>
    %1 = vector.shape_cast %0 : vector<1x1x1x16x64xbf16> to vector<16x64xbf16>
    %c0_4 = arith.constant 0 : index
    %c0_5 = arith.constant 0 : index
    %c1 = arith.constant 1 : index
    %c0_6 = arith.constant 0 : index
    %c0_7 = arith.constant 0 : index
    %2 = vector.load %arg1[%c0_4, %c0_5, %c1, %c0_6, %c0_7] : memref<1x9x9x16x64xbf16, #tpu.memory_space<vmem>>, vector<1x1x1x16x64xbf16>
    %3 = vector.shape_cast %2 : vector<1x1x1x16x64xbf16> to vector<16x64xbf16>
    %c0_8 = arith.constant 0 : index
    %c1_9 = arith.constant 1 : index
    %c0_10 = arith.constant 0 : index
    %c0_11 = arith.constant 0 : index
    %c0_12 = arith.constant 0 : index
    %4 = vector.load %arg1[%c0_8, %c1_9, %c0_10, %c0_11, %c0_12] : memref<1x9x9x16x64xbf16, #tpu.memory_space<vmem>>, vector<1x1x1x16x64xbf16>
    %5 = vector.shape_cast %4 : vector<1x1x1x16x64xbf16> to vector<16x64xbf16>
    %c0_13 = arith.constant 0 : index
    %c1_14 = arith.constant 1 : index
    %c1_15 = arith.constant 1 : index
    %c0_16 = arith.constant 0 : index
    %c0_17 = arith.constant 0 : index
    %6 = vector.load %arg1[%c0_13, %c1_14, %c1_15, %c0_16, %c0_17] : memref<1x9x9x16x64xbf16, #tpu.memory_space<vmem>>, vector<1x1x1x16x64xbf16>
    %7 = vector.shape_cast %6 : vector<1x1x1x16x64xbf16> to vector<16x64xbf16>
    %8 = tpu.concatenate %1, %3, %5, %7 in 1 : vector<16x64xbf16>, vector<16x64xbf16>, vector<16x64xbf16>, vector<16x64xbf16> -> vector<16x256xbf16>
    %c0_18 = arith.constant 0 : index
    %c0_19 = arith.constant 0 : index
    %c1_20 = arith.constant 1 : index
    %c0_21 = arith.constant 0 : index
    %c0_22 = arith.constant 0 : index
    %9 = vector.load %arg1[%c0_18, %c0_19, %c1_20, %c0_21, %c0_22] : memref<1x9x9x16x64xbf16, #tpu.memory_space<vmem>>, vector<1x1x1x16x64xbf16>
    %10 = vector.shape_cast %9 : vector<1x1x1x16x64xbf16> to vector<16x64xbf16>
    %c0_23 = arith.constant 0 : index
    %c0_24 = arith.constant 0 : index
    %c2 = arith.constant 2 : index
    %c0_25 = arith.constant 0 : index
    %c0_26 = arith.constant 0 : index
    %11 = vector.load %arg1[%c0_23, %c0_24, %c2, %c0_25, %c0_26] : memref<1x9x9x16x64xbf16, #tpu.memory_space<vmem>>, vector<1x1x1x16x64xbf16>
    %12 = vector.shape_cast %11 : vector<1x1x1x16x64xbf16> to vector<16x64xbf16>
    %c0_27 = arith.constant 0 : index
    %c1_28 = arith.constant 1 : index
    %c1_29 = arith.constant 1 : index
    %c0_30 = arith.constant 0 : index
    %c0_31 = arith.constant 0 : index
    %13 = vector.load %arg1[%c0_27, %c1_28, %c1_29, %c0_30, %c0_31] : memref<1x9x9x16x64xbf16, #tpu.memory_space<vmem>>, vector<1x1x1x16x64xbf16>
    %14 = vector.shape_cast %13 : vector<1x1x1x16x64xbf16> to vector<16x64xbf16>
    %c0_32 = arith.constant 0 : index
    %c1_33 = arith.constant 1 : index
    %c2_34 = arith.constant 2 : index
    %c0_35 = arith.constant 0 : index
    %c0_36 = arith.constant 0 : index
    %15 = vector.load %arg1[%c0_32, %c1_33, %c2_34, %c0_35, %c0_36] : memref<1x9x9x16x64xbf16, #tpu.memory_space<vmem>>, vector<1x1x1x16x64xbf16>
    %16 = vector.shape_cast %15 : vector<1x1x1x16x64xbf16> to vector<16x64xbf16>
    %17 = tpu.concatenate %10, %12, %14, %16 in 1 : vector<16x64xbf16>, vector<16x64xbf16>, vector<16x64xbf16>, vector<16x64xbf16> -> vector<16x256xbf16>
    %c0_37 = arith.constant 0 : index
    %c0_38 = arith.constant 0 : index
    %c2_39 = arith.constant 2 : index
    %c0_40 = arith.constant 0 : index
    %c0_41 = arith.constant 0 : index
    %18 = vector.load %arg1[%c0_37, %c0_38, %c2_39, %c0_40, %c0_41] : memref<1x9x9x16x64xbf16, #tpu.memory_space<vmem>>, vector<1x1x1x16x64xbf16>
    %19 = vector.shape_cast %18 : vector<1x1x1x16x64xbf16> to vector<16x64xbf16>
    %c0_42 = arith.constant 0 : index
    %c0_43 = arith.constant 0 : index
    %c3 = arith.constant 3 : index
    %c0_44 = arith.constant 0 : index
    %c0_45 = arith.constant 0 : index
    %20 = vector.load %arg1[%c0_42, %c0_43, %c3, %c0_44, %c0_45] : memref<1x9x9x16x64xbf16, #tpu.memory_space<vmem>>, vector<1x1x1x16x64xbf16>
    %21 = vector.shape_cast %20 : vector<1x1x1x16x64xbf16> to vector<16x64xbf16>
    %c0_46 = arith.constant 0 : index
    %c1_47 = arith.constant 1 : index
    %c2_48 = arith.constant 2 : index
    %c0_49 = arith.constant 0 : index
    %c0_50 = arith.constant 0 : index
    %22 = vector.load %arg1[%c0_46, %c1_47, %c2_48, %c0_49, %c0_50] : memref<1x9x9x16x64xbf16, #tpu.memory_space<vmem>>, vector<1x1x1x16x64xbf16>
    %23 = vector.shape_cast %22 : vector<1x1x1x16x64xbf16> to vector<16x64xbf16>
    %c0_51 = arith.constant 0 : index
    %c1_52 = arith.constant 1 : index
    %c3_53 = arith.constant 3 : index
    %c0_54 = arith.constant 0 : index
    %c0_55 = arith.constant 0 : index
    %24 = vector.load %arg1[%c0_51, %c1_52, %c3_53, %c0_54, %c0_55] : memref<1x9x9x16x64xbf16, #tpu.memory_space<vmem>>, vector<1x1x1x16x64xbf16>
    %25 = vector.shape_cast %24 : vector<1x1x1x16x64xbf16> to vector<16x64xbf16>
    %26 = tpu.concatenate %19, %21, %23, %25 in 1 : vector<16x64xbf16>, vector<16x64xbf16>, vector<16x64xbf16>, vector<16x64xbf16> -> vector<16x256xbf16>
    %c0_56 = arith.constant 0 : index
    %c0_57 = arith.constant 0 : index
    %c3_58 = arith.constant 3 : index
    %c0_59 = arith.constant 0 : index
    %c0_60 = arith.constant 0 : index
    %27 = vector.load %arg1[%c0_56, %c0_57, %c3_58, %c0_59, %c0_60] : memref<1x9x9x16x64xbf16, #tpu.memory_space<vmem>>, vector<1x1x1x16x64xbf16>
    %28 = vector.shape_cast %27 : vector<1x1x1x16x64xbf16> to vector<16x64xbf16>
    %c0_61 = arith.constant 0 : index
    %c0_62 = arith.constant 0 : index
    %c4 = arith.constant 4 : index
    %c0_63 = arith.constant 0 : index
    %c0_64 = arith.constant 0 : index
    %29 = vector.load %arg1[%c0_61, %c0_62, %c4, %c0_63, %c0_64] : memref<1x9x9x16x64xbf16, #tpu.memory_space<vmem>>, vector<1x1x1x16x64xbf16>
    %30 = vector.shape_cast %29 : vector<1x1x1x16x64xbf16> to vector<16x64xbf16>
    %c0_65 = arith.constant 0 : index
    %c1_66 = arith.constant 1 : index
    %c3_67 = arith.constant 3 : index
    %c0_68 = arith.constant 0 : index
    %c0_69 = arith.constant 0 : index
    %31 = vector.load %arg1[%c0_65, %c1_66, %c3_67, %c0_68, %c0_69] : memref<1x9x9x16x64xbf16, #tpu.memory_space<vmem>>, vector<1x1x1x16x64xbf16>
    %32 = vector.shape_cast %31 : vector<1x1x1x16x64xbf16> to vector<16x64xbf16>
    %c0_70 = arith.constant 0 : index
    %c1_71 = arith.constant 1 : index
    %c4_72 = arith.constant 4 : index
    %c0_73 = arith.constant 0 : index
    %c0_74 = arith.constant 0 : index
    %33 = vector.load %arg1[%c0_70, %c1_71, %c4_72, %c0_73, %c0_74] : memref<1x9x9x16x64xbf16, #tpu.memory_space<vmem>>, vector<1x1x1x16x64xbf16>
    %34 = vector.shape_cast %33 : vector<1x1x1x16x64xbf16> to vector<16x64xbf16>
    %35 = tpu.concatenate %28, %30, %32, %34 in 1 : vector<16x64xbf16>, vector<16x64xbf16>, vector<16x64xbf16>, vector<16x64xbf16> -> vector<16x256xbf16>
    %c0_75 = arith.constant 0 : index
    %c0_76 = arith.constant 0 : index
    %c4_77 = arith.constant 4 : index
    %c0_78 = arith.constant 0 : index
    %c0_79 = arith.constant 0 : index
    %36 = vector.load %arg1[%c0_75, %c0_76, %c4_77, %c0_78, %c0_79] : memref<1x9x9x16x64xbf16, #tpu.memory_space<vmem>>, vector<1x1x1x16x64xbf16>
    %37 = vector.shape_cast %36 : vector<1x1x1x16x64xbf16> to vector<16x64xbf16>
    %c0_80 = arith.constant 0 : index
    %c0_81 = arith.constant 0 : index
    %c5 = arith.constant 5 : index
    %c0_82 = arith.constant 0 : index
    %c0_83 = arith.constant 0 : index
    %38 = vector.load %arg1[%c0_80, %c0_81, %c5, %c0_82, %c0_83] : memref<1x9x9x16x64xbf16, #tpu.memory_space<vmem>>, vector<1x1x1x16x64xbf16>
    %39 = vector.shape_cast %38 : vector<1x1x1x16x64xbf16> to vector<16x64xbf16>
    %c0_84 = arith.constant 0 : index
    %c1_85 = arith.constant 1 : index
    %c4_86 = arith.constant 4 : index
    %c0_87 = arith.constant 0 : index
    %c0_88 = arith.constant 0 : index
    %40 = vector.load %arg1[%c0_84, %c1_85, %c4_86, %c0_87, %c0_88] : memref<1x9x9x16x64xbf16, #tpu.memory_space<vmem>>, vector<1x1x1x16x64xbf16>
    %41 = vector.shape_cast %40 : vector<1x1x1x16x64xbf16> to vector<16x64xbf16>
    %c0_89 = arith.constant 0 : index
    %c1_90 = arith.constant 1 : index
    %c5_91 = arith.constant 5 : index
    %c0_92 = arith.constant 0 : index
    %c0_93 = arith.constant 0 : index
    %42 = vector.load %arg1[%c0_89, %c1_90, %c5_91, %c0_92, %c0_93] : memref<1x9x9x16x64xbf16, #tpu.memory_space<vmem>>, vector<1x1x1x16x64xbf16>
    %43 = vector.shape_cast %42 : vector<1x1x1x16x64xbf16> to vector<16x64xbf16>
    %44 = tpu.concatenate %37, %39, %41, %43 in 1 : vector<16x64xbf16>, vector<16x64xbf16>, vector<16x64xbf16>, vector<16x64xbf16> -> vector<16x256xbf16>
    %c0_94 = arith.constant 0 : index
    %c0_95 = arith.constant 0 : index
    %c5_96 = arith.constant 5 : index
    %c0_97 = arith.constant 0 : index
    %c0_98 = arith.constant 0 : index
    %45 = vector.load %arg1[%c0_94, %c0_95, %c5_96, %c0_97, %c0_98] : memref<1x9x9x16x64xbf16, #tpu.memory_space<vmem>>, vector<1x1x1x16x64xbf16>
    %46 = vector.shape_cast %45 : vector<1x1x1x16x64xbf16> to vector<16x64xbf16>
    %c0_99 = arith.constant 0 : index
    %c0_100 = arith.constant 0 : index
    %c6 = arith.constant 6 : index
    %c0_101 = arith.constant 0 : index
    %c0_102 = arith.constant 0 : index
    %47 = vector.load %arg1[%c0_99, %c0_100, %c6, %c0_101, %c0_102] : memref<1x9x9x16x64xbf16, #tpu.memory_space<vmem>>, vector<1x1x1x16x64xbf16>
    %48 = vector.shape_cast %47 : vector<1x1x1x16x64xbf16> to vector<16x64xbf16>
    %c0_103 = arith.constant 0 : index
    %c1_104 = arith.constant 1 : index
    %c5_105 = arith.constant 5 : index
    %c0_106 = arith.constant 0 : index
    %c0_107 = arith.constant 0 : index
    %49 = vector.load %arg1[%c0_103, %c1_104, %c5_105, %c0_106, %c0_107] : memref<1x9x9x16x64xbf16, #tpu.memory_space<vmem>>, vector<1x1x1x16x64xbf16>
    %50 = vector.shape_cast %49 : vector<1x1x1x16x64xbf16> to vector<16x64xbf16>
    %c0_108 = arith.constant 0 : index
    %c1_109 = arith.constant 1 : index
    %c6_110 = arith.constant 6 : index
    %c0_111 = arith.constant 0 : index
    %c0_112 = arith.constant 0 : index
    %51 = vector.load %arg1[%c0_108, %c1_109, %c6_110, %c0_111, %c0_112] : memref<1x9x9x16x64xbf16, #tpu.memory_space<vmem>>, vector<1x1x1x16x64xbf16>
    %52 = vector.shape_cast %51 : vector<1x1x1x16x64xbf16> to vector<16x64xbf16>
    %53 = tpu.concatenate %46, %48, %50, %52 in 1 : vector<16x64xbf16>, vector<16x64xbf16>, vector<16x64xbf16>, vector<16x64xbf16> -> vector<16x256xbf16>
    %c0_113 = arith.constant 0 : index
    %c0_114 = arith.constant 0 : index
    %c6_115 = arith.constant 6 : index
    %c0_116 = arith.constant 0 : index
    %c0_117 = arith.constant 0 : index
    %54 = vector.load %arg1[%c0_113, %c0_114, %c6_115, %c0_116, %c0_117] : memref<1x9x9x16x64xbf16, #tpu.memory_space<vmem>>, vector<1x1x1x16x64xbf16>
    %55 = vector.shape_cast %54 : vector<1x1x1x16x64xbf16> to vector<16x64xbf16>
    %c0_118 = arith.constant 0 : index
    %c0_119 = arith.constant 0 : index
    %c7 = arith.constant 7 : index
    %c0_120 = arith.constant 0 : index
    %c0_121 = arith.constant 0 : index
    %56 = vector.load %arg1[%c0_118, %c0_119, %c7, %c0_120, %c0_121] : memref<1x9x9x16x64xbf16, #tpu.memory_space<vmem>>, vector<1x1x1x16x64xbf16>
    %57 = vector.shape_cast %56 : vector<1x1x1x16x64xbf16> to vector<16x64xbf16>
    %c0_122 = arith.constant 0 : index
    %c1_123 = arith.constant 1 : index
    %c6_124 = arith.constant 6 : index
    %c0_125 = arith.constant 0 : index
    %c0_126 = arith.constant 0 : index
    %58 = vector.load %arg1[%c0_122, %c1_123, %c6_124, %c0_125, %c0_126] : memref<1x9x9x16x64xbf16, #tpu.memory_space<vmem>>, vector<1x1x1x16x64xbf16>
    %59 = vector.shape_cast %58 : vector<1x1x1x16x64xbf16> to vector<16x64xbf16>
    %c0_127 = arith.constant 0 : index
    %c1_128 = arith.constant 1 : index
    %c7_129 = arith.constant 7 : index
    %c0_130 = arith.constant 0 : index
    %c0_131 = arith.constant 0 : index
    %60 = vector.load %arg1[%c0_127, %c1_128, %c7_129, %c0_130, %c0_131] : memref<1x9x9x16x64xbf16, #tpu.memory_space<vmem>>, vector<1x1x1x16x64xbf16>
    %61 = vector.shape_cast %60 : vector<1x1x1x16x64xbf16> to vector<16x64xbf16>
    %62 = tpu.concatenate %55, %57, %59, %61 in 1 : vector<16x64xbf16>, vector<16x64xbf16>, vector<16x64xbf16>, vector<16x64xbf16> -> vector<16x256xbf16>
    %c0_132 = arith.constant 0 : index
    %c0_133 = arith.constant 0 : index
    %c7_134 = arith.constant 7 : index
    %c0_135 = arith.constant 0 : index
    %c0_136 = arith.constant 0 : index
    %63 = vector.load %arg1[%c0_132, %c0_133, %c7_134, %c0_135, %c0_136] : memref<1x9x9x16x64xbf16, #tpu.memory_space<vmem>>, vector<1x1x1x16x64xbf16>
    %64 = vector.shape_cast %63 : vector<1x1x1x16x64xbf16> to vector<16x64xbf16>
    %c0_137 = arith.constant 0 : index
    %c0_138 = arith.constant 0 : index
    %c8 = arith.constant 8 : index
    %c0_139 = arith.constant 0 : index
    %c0_140 = arith.constant 0 : index
    %65 = vector.load %arg1[%c0_137, %c0_138, %c8, %c0_139, %c0_140] : memref<1x9x9x16x64xbf16, #tpu.memory_space<vmem>>, vector<1x1x1x16x64xbf16>
    %66 = vector.shape_cast %65 : vector<1x1x1x16x64xbf16> to vector<16x64xbf16>
    %c0_141 = arith.constant 0 : index
    %c1_142 = arith.constant 1 : index
    %c7_143 = arith.constant 7 : index
    %c0_144 = arith.constant 0 : index
    %c0_145 = arith.constant 0 : index
    %67 = vector.load %arg1[%c0_141, %c1_142, %c7_143, %c0_144, %c0_145] : memref<1x9x9x16x64xbf16, #tpu.memory_space<vmem>>, vector<1x1x1x16x64xbf16>
    %68 = vector.shape_cast %67 : vector<1x1x1x16x64xbf16> to vector<16x64xbf16>
    %c0_146 = arith.constant 0 : index
    %c1_147 = arith.constant 1 : index
    %c8_148 = arith.constant 8 : index
    %c0_149 = arith.constant 0 : index
    %c0_150 = arith.constant 0 : index
    %69 = vector.load %arg1[%c0_146, %c1_147, %c8_148, %c0_149, %c0_150] : memref<1x9x9x16x64xbf16, #tpu.memory_space<vmem>>, vector<1x1x1x16x64xbf16>
    %70 = vector.shape_cast %69 : vector<1x1x1x16x64xbf16> to vector<16x64xbf16>
    %71 = tpu.concatenate %64, %66, %68, %70 in 1 : vector<16x64xbf16>, vector<16x64xbf16>, vector<16x64xbf16>, vector<16x64xbf16> -> vector<16x256xbf16>
    %c0_151 = arith.constant 0 : index
    %c1_152 = arith.constant 1 : index
    %c0_153 = arith.constant 0 : index
    %c0_154 = arith.constant 0 : index
    %c0_155 = arith.constant 0 : index
    %72 = vector.load %arg1[%c0_151, %c1_152, %c0_153, %c0_154, %c0_155] : memref<1x9x9x16x64xbf16, #tpu.memory_space<vmem>>, vector<1x1x1x16x64xbf16>
    %73 = vector.shape_cast %72 : vector<1x1x1x16x64xbf16> to vector<16x64xbf16>
    %c0_156 = arith.constant 0 : index
    %c1_157 = arith.constant 1 : index
    %c1_158 = arith.constant 1 : index
    %c0_159 = arith.constant 0 : index
    %c0_160 = arith.constant 0 : index
    %74 = vector.load %arg1[%c0_156, %c1_157, %c1_158, %c0_159, %c0_160] : memref<1x9x9x16x64xbf16, #tpu.memory_space<vmem>>, vector<1x1x1x16x64xbf16>
    %75 = vector.shape_cast %74 : vector<1x1x1x16x64xbf16> to vector<16x64xbf16>
    %c0_161 = arith.constant 0 : index
    %c2_162 = arith.constant 2 : index
    %c0_163 = arith.constant 0 : index
    %c0_164 = arith.constant 0 : index
    %c0_165 = arith.constant 0 : index
    %76 = vector.load %arg1[%c0_161, %c2_162, %c0_163, %c0_164, %c0_165] : memref<1x9x9x16x64xbf16, #tpu.memory_space<vmem>>, vector<1x1x1x16x64xbf16>
    %77 = vector.shape_cast %76 : vector<1x1x1x16x64xbf16> to vector<16x64xbf16>
    %c0_166 = arith.constant 0 : index
    %c2_167 = arith.constant 2 : index
    %c1_168 = arith.constant 1 : index
    %c0_169 = arith.constant 0 : index
    %c0_170 = arith.constant 0 : index
    %78 = vector.load %arg1[%c0_166, %c2_167, %c1_168, %c0_169, %c0_170] : memref<1x9x9x16x64xbf16, #tpu.memory_space<vmem>>, vector<1x1x1x16x64xbf16>
    %79 = vector.shape_cast %78 : vector<1x1x1x16x64xbf16> to vector<16x64xbf16>
    %80 = tpu.concatenate %73, %75, %77, %79 in 1 : vector<16x64xbf16>, vector<16x64xbf16>, vector<16x64xbf16>, vector<16x64xbf16> -> vector<16x256xbf16>
    %c0_171 = arith.constant 0 : index
    %c1_172 = arith.constant 1 : index
    %c1_173 = arith.constant 1 : index
    %c0_174 = arith.constant 0 : index
    %c0_175 = arith.constant 0 : index
    %81 = vector.load %arg1[%c0_171, %c1_172, %c1_173, %c0_174, %c0_175] : memref<1x9x9x16x64xbf16, #tpu.memory_space<vmem>>, vector<1x1x1x16x64xbf16>
    %82 = vector.shape_cast %81 : vector<1x1x1x16x64xbf16> to vector<16x64xbf16>
    %c0_176 = arith.constant 0 : index
    %c1_177 = arith.constant 1 : index
    %c2_178 = arith.constant 2 : index
    %c0_179 = arith.constant 0 : index
    %c0_180 = arith.constant 0 : index
    %83 = vector.load %arg1[%c0_176, %c1_177, %c2_178, %c0_179, %c0_180] : memref<1x9x9x16x64xbf16, #tpu.memory_space<vmem>>, vector<1x1x1x16x64xbf16>
    %84 = vector.shape_cast %83 : vector<1x1x1x16x64xbf16> to vector<16x64xbf16>
    %c0_181 = arith.constant 0 : index
    %c2_182 = arith.constant 2 : index
    %c1_183 = arith.constant 1 : index
    %c0_184 = arith.constant 0 : index
    %c0_185 = arith.constant 0 : index
    %85 = vector.load %arg1[%c0_181, %c2_182, %c1_183, %c0_184, %c0_185] : memref<1x9x9x16x64xbf16, #tpu.memory_space<vmem>>, vector<1x1x1x16x64xbf16>
    %86 = vector.shape_cast %85 : vector<1x1x1x16x64xbf16> to vector<16x64xbf16>
    %c0_186 = arith.constant 0 : index
    %c2_187 = arith.constant 2 : index
    %c2_188 = arith.constant 2 : index
    %c0_189 = arith.constant 0 : index
    %c0_190 = arith.constant 0 : index
    %87 = vector.load %arg1[%c0_186, %c2_187, %c2_188, %c0_189, %c0_190] : memref<1x9x9x16x64xbf16, #tpu.memory_space<vmem>>, vector<1x1x1x16x64xbf16>
    %88 = vector.shape_cast %87 : vector<1x1x1x16x64xbf16> to vector<16x64xbf16>
    %89 = tpu.concatenate %82, %84, %86, %88 in 1 : vector<16x64xbf16>, vector<16x64xbf16>, vector<16x64xbf16>, vector<16x64xbf16> -> vector<16x256xbf16>
    %c0_191 = arith.constant 0 : index
    %c1_192 = arith.constant 1 : index
    %c2_193 = arith.constant 2 : index
    %c0_194 = arith.constant 0 : index
    %c0_195 = arith.constant 0 : index
    %90 = vector.load %arg1[%c0_191, %c1_192, %c2_193, %c0_194, %c0_195] : memref<1x9x9x16x64xbf16, #tpu.memory_space<vmem>>, vector<1x1x1x16x64xbf16>
    %91 = vector.shape_cast %90 : vector<1x1x1x16x64xbf16> to vector<16x64xbf16>
    %c0_196 = arith.constant 0 : index
    %c1_197 = arith.constant 1 : index
    %c3_198 = arith.constant 3 : index
    %c0_199 = arith.constant 0 : index
    %c0_200 = arith.constant 0 : index
    %92 = vector.load %arg1[%c0_196, %c1_197, %c3_198, %c0_199, %c0_200] : memref<1x9x9x16x64xbf16, #tpu.memory_space<vmem>>, vector<1x1x1x16x64xbf16>
    %93 = vector.shape_cast %92 : vector<1x1x1x16x64xbf16> to vector<16x64xbf16>
    %c0_201 = arith.constant 0 : index
    %c2_202 = arith.constant 2 : index
    %c2_203 = arith.constant 2 : index
    %c0_204 = arith.constant 0 : index
    %c0_205 = arith.constant 0 : index
    %94 = vector.load %arg1[%c0_201, %c2_202, %c2_203, %c0_204, %c0_205] : memref<1x9x9x16x64xbf16, #tpu.memory_space<vmem>>, vector<1x1x1x16x64xbf16>
    %95 = vector.shape_cast %94 : vector<1x1x1x16x64xbf16> to vector<16x64xbf16>
    %c0_206 = arith.constant 0 : index
    %c2_207 = arith.constant 2 : index
    %c3_208 = arith.constant 3 : index
    %c0_209 = arith.constant 0 : index
    %c0_210 = arith.constant 0 : index
    %96 = vector.load %arg1[%c0_206, %c2_207, %c3_208, %c0_209, %c0_210] : memref<1x9x9x16x64xbf16, #tpu.memory_space<vmem>>, vector<1x1x1x16x64xbf16>
    %97 = vector.shape_cast %96 : vector<1x1x1x16x64xbf16> to vector<16x64xbf16>
    %98 = tpu.concatenate %91, %93, %95, %97 in 1 : vector<16x64xbf16>, vector<16x64xbf16>, vector<16x64xbf16>, vector<16x64xbf16> -> vector<16x256xbf16>
    %c0_211 = arith.constant 0 : index
    %c1_212 = arith.constant 1 : index
    %c3_213 = arith.constant 3 : index
    %c0_214 = arith.constant 0 : index
    %c0_215 = arith.constant 0 : index
    %99 = vector.load %arg1[%c0_211, %c1_212, %c3_213, %c0_214, %c0_215] : memref<1x9x9x16x64xbf16, #tpu.memory_space<vmem>>, vector<1x1x1x16x64xbf16>
    %100 = vector.shape_cast %99 : vector<1x1x1x16x64xbf16> to vector<16x64xbf16>
    %c0_216 = arith.constant 0 : index
    %c1_217 = arith.constant 1 : index
    %c4_218 = arith.constant 4 : index
    %c0_219 = arith.constant 0 : index
    %c0_220 = arith.constant 0 : index
    %101 = vector.load %arg1[%c0_216, %c1_217, %c4_218, %c0_219, %c0_220] : memref<1x9x9x16x64xbf16, #tpu.memory_space<vmem>>, vector<1x1x1x16x64xbf16>
    %102 = vector.shape_cast %101 : vector<1x1x1x16x64xbf16> to vector<16x64xbf16>
    %c0_221 = arith.constant 0 : index
    %c2_222 = arith.constant 2 : index
    %c3_223 = arith.constant 3 : index
    %c0_224 = arith.constant 0 : index
    %c0_225 = arith.constant 0 : index
    %103 = vector.load %arg1[%c0_221, %c2_222, %c3_223, %c0_224, %c0_225] : memref<1x9x9x16x64xbf16, #tpu.memory_space<vmem>>, vector<1x1x1x16x64xbf16>
    %104 = vector.shape_cast %103 : vector<1x1x1x16x64xbf16> to vector<16x64xbf16>
    %c0_226 = arith.constant 0 : index
    %c2_227 = arith.constant 2 : index
    %c4_228 = arith.constant 4 : index
    %c0_229 = arith.constant 0 : index
    %c0_230 = arith.constant 0 : index
    %105 = vector.load %arg1[%c0_226, %c2_227, %c4_228, %c0_229, %c0_230] : memref<1x9x9x16x64xbf16, #tpu.memory_space<vmem>>, vector<1x1x1x16x64xbf16>
    %106 = vector.shape_cast %105 : vector<1x1x1x16x64xbf16> to vector<16x64xbf16>
    %107 = tpu.concatenate %100, %102, %104, %106 in 1 : vector<16x64xbf16>, vector<16x64xbf16>, vector<16x64xbf16>, vector<16x64xbf16> -> vector<16x256xbf16>
    %c0_231 = arith.constant 0 : index
    %c1_232 = arith.constant 1 : index
    %c4_233 = arith.constant 4 : index
    %c0_234 = arith.constant 0 : index
    %c0_235 = arith.constant 0 : index
    %108 = vector.load %arg1[%c0_231, %c1_232, %c4_233, %c0_234, %c0_235] : memref<1x9x9x16x64xbf16, #tpu.memory_space<vmem>>, vector<1x1x1x16x64xbf16>
    %109 = vector.shape_cast %108 : vector<1x1x1x16x64xbf16> to vector<16x64xbf16>
    %c0_236 = arith.constant 0 : index
    %c1_237 = arith.constant 1 : index
    %c5_238 = arith.constant 5 : index
    %c0_239 = arith.constant 0 : index
    %c0_240 = arith.constant 0 : index
    %110 = vector.load %arg1[%c0_236, %c1_237, %c5_238, %c0_239, %c0_240] : memref<1x9x9x16x64xbf16, #tpu.memory_space<vmem>>, vector<1x1x1x16x64xbf16>
    %111 = vector.shape_cast %110 : vector<1x1x1x16x64xbf16> to vector<16x64xbf16>
    %c0_241 = arith.constant 0 : index
    %c2_242 = arith.constant 2 : index
    %c4_243 = arith.constant 4 : index
    %c0_244 = arith.constant 0 : index
    %c0_245 = arith.constant 0 : index
    %112 = vector.load %arg1[%c0_241, %c2_242, %c4_243, %c0_244, %c0_245] : memref<1x9x9x16x64xbf16, #tpu.memory_space<vmem>>, vector<1x1x1x16x64xbf16>
    %113 = vector.shape_cast %112 : vector<1x1x1x16x64xbf16> to vector<16x64xbf16>
    %c0_246 = arith.constant 0 : index
    %c2_247 = arith.constant 2 : index
    %c5_248 = arith.constant 5 : index
    %c0_249 = arith.constant 0 : index
    %c0_250 = arith.constant 0 : index
    %114 = vector.load %arg1[%c0_246, %c2_247, %c5_248, %c0_249, %c0_250] : memref<1x9x9x16x64xbf16, #tpu.memory_space<vmem>>, vector<1x1x1x16x64xbf16>
    %115 = vector.shape_cast %114 : vector<1x1x1x16x64xbf16> to vector<16x64xbf16>
    %116 = tpu.concatenate %109, %111, %113, %115 in 1 : vector<16x64xbf16>, vector<16x64xbf16>, vector<16x64xbf16>, vector<16x64xbf16> -> vector<16x256xbf16>
    %c0_251 = arith.constant 0 : index
    %c1_252 = arith.constant 1 : index
    %c5_253 = arith.constant 5 : index
    %c0_254 = arith.constant 0 : index
    %c0_255 = arith.constant 0 : index
    %117 = vector.load %arg1[%c0_251, %c1_252, %c5_253, %c0_254, %c0_255] : memref<1x9x9x16x64xbf16, #tpu.memory_space<vmem>>, vector<1x1x1x16x64xbf16>
    %118 = vector.shape_cast %117 : vector<1x1x1x16x64xbf16> to vector<16x64xbf16>
    %c0_256 = arith.constant 0 : index
    %c1_257 = arith.constant 1 : index
    %c6_258 = arith.constant 6 : index
    %c0_259 = arith.constant 0 : index
    %c0_260 = arith.constant 0 : index
    %119 = vector.load %arg1[%c0_256, %c1_257, %c6_258, %c0_259, %c0_260] : memref<1x9x9x16x64xbf16, #tpu.memory_space<vmem>>, vector<1x1x1x16x64xbf16>
    %120 = vector.shape_cast %119 : vector<1x1x1x16x64xbf16> to vector<16x64xbf16>
    %c0_261 = arith.constant 0 : index
    %c2_262 = arith.constant 2 : index
    %c5_263 = arith.constant 5 : index
    %c0_264 = arith.constant 0 : index
    %c0_265 = arith.constant 0 : index
    %121 = vector.load %arg1[%c0_261, %c2_262, %c5_263, %c0_264, %c0_265] : memref<1x9x9x16x64xbf16, #tpu.memory_space<vmem>>, vector<1x1x1x16x64xbf16>
    %122 = vector.shape_cast %121 : vector<1x1x1x16x64xbf16> to vector<16x64xbf16>
    %c0_266 = arith.constant 0 : index
    %c2_267 = arith.constant 2 : index
    %c6_268 = arith.constant 6 : index
    %c0_269 = arith.constant 0 : index
    %c0_270 = arith.constant 0 : index
    %123 = vector.load %arg1[%c0_266, %c2_267, %c6_268, %c0_269, %c0_270] : memref<1x9x9x16x64xbf16, #tpu.memory_space<vmem>>, vector<1x1x1x16x64xbf16>
    %124 = vector.shape_cast %123 : vector<1x1x1x16x64xbf16> to vector<16x64xbf16>
    %125 = tpu.concatenate %118, %120, %122, %124 in 1 : vector<16x64xbf16>, vector<16x64xbf16>, vector<16x64xbf16>, vector<16x64xbf16> -> vector<16x256xbf16>
    %c0_271 = arith.constant 0 : index
    %c1_272 = arith.constant 1 : index
    %c6_273 = arith.constant 6 : index
    %c0_274 = arith.constant 0 : index
    %c0_275 = arith.constant 0 : index
    %126 = vector.load %arg1[%c0_271, %c1_272, %c6_273, %c0_274, %c0_275] : memref<1x9x9x16x64xbf16, #tpu.memory_space<vmem>>, vector<1x1x1x16x64xbf16>
    %127 = vector.shape_cast %126 : vector<1x1x1x16x64xbf16> to vector<16x64xbf16>
    %c0_276 = arith.constant 0 : index
    %c1_277 = arith.constant 1 : index
    %c7_278 = arith.constant 7 : index
    %c0_279 = arith.constant 0 : index
    %c0_280 = arith.constant 0 : index
    %128 = vector.load %arg1[%c0_276, %c1_277, %c7_278, %c0_279, %c0_280] : memref<1x9x9x16x64xbf16, #tpu.memory_space<vmem>>, vector<1x1x1x16x64xbf16>
    %129 = vector.shape_cast %128 : vector<1x1x1x16x64xbf16> to vector<16x64xbf16>
    %c0_281 = arith.constant 0 : index
    %c2_282 = arith.constant 2 : index
    %c6_283 = arith.constant 6 : index
    %c0_284 = arith.constant 0 : index
    %c0_285 = arith.constant 0 : index
    %130 = vector.load %arg1[%c0_281, %c2_282, %c6_283, %c0_284, %c0_285] : memref<1x9x9x16x64xbf16, #tpu.memory_space<vmem>>, vector<1x1x1x16x64xbf16>
    %131 = vector.shape_cast %130 : vector<1x1x1x16x64xbf16> to vector<16x64xbf16>
    %c0_286 = arith.constant 0 : index
    %c2_287 = arith.constant 2 : index
    %c7_288 = arith.constant 7 : index
    %c0_289 = arith.constant 0 : index
    %c0_290 = arith.constant 0 : index
    %132 = vector.load %arg1[%c0_286, %c2_287, %c7_288, %c0_289, %c0_290] : memref<1x9x9x16x64xbf16, #tpu.memory_space<vmem>>, vector<1x1x1x16x64xbf16>
    %133 = vector.shape_cast %132 : vector<1x1x1x16x64xbf16> to vector<16x64xbf16>
    %134 = tpu.concatenate %127, %129, %131, %133 in 1 : vector<16x64xbf16>, vector<16x64xbf16>, vector<16x64xbf16>, vector<16x64xbf16> -> vector<16x256xbf16>
    %c0_291 = arith.constant 0 : index
    %c1_292 = arith.constant 1 : index
    %c7_293 = arith.constant 7 : index
    %c0_294 = arith.constant 0 : index
    %c0_295 = arith.constant 0 : index
    %135 = vector.load %arg1[%c0_291, %c1_292, %c7_293, %c0_294, %c0_295] : memref<1x9x9x16x64xbf16, #tpu.memory_space<vmem>>, vector<1x1x1x16x64xbf16>
    %136 = vector.shape_cast %135 : vector<1x1x1x16x64xbf16> to vector<16x64xbf16>
    %c0_296 = arith.constant 0 : index
    %c1_297 = arith.constant 1 : index
    %c8_298 = arith.constant 8 : index
    %c0_299 = arith.constant 0 : index
    %c0_300 = arith.constant 0 : index
    %137 = vector.load %arg1[%c0_296, %c1_297, %c8_298, %c0_299, %c0_300] : memref<1x9x9x16x64xbf16, #tpu.memory_space<vmem>>, vector<1x1x1x16x64xbf16>
    %138 = vector.shape_cast %137 : vector<1x1x1x16x64xbf16> to vector<16x64xbf16>
    %c0_301 = arith.constant 0 : index
    %c2_302 = arith.constant 2 : index
    %c7_303 = arith.constant 7 : index
    %c0_304 = arith.constant 0 : index
    %c0_305 = arith.constant 0 : index
    %139 = vector.load %arg1[%c0_301, %c2_302, %c7_303, %c0_304, %c0_305] : memref<1x9x9x16x64xbf16, #tpu.memory_space<vmem>>, vector<1x1x1x16x64xbf16>
    %140 = vector.shape_cast %139 : vector<1x1x1x16x64xbf16> to vector<16x64xbf16>
    %c0_306 = arith.constant 0 : index
    %c2_307 = arith.constant 2 : index
    %c8_308 = arith.constant 8 : index
    %c0_309 = arith.constant 0 : index
    %c0_310 = arith.constant 0 : index
    %141 = vector.load %arg1[%c0_306, %c2_307, %c8_308, %c0_309, %c0_310] : memref<1x9x9x16x64xbf16, #tpu.memory_space<vmem>>, vector<1x1x1x16x64xbf16>
    %142 = vector.shape_cast %141 : vector<1x1x1x16x64xbf16> to vector<16x64xbf16>
    %143 = tpu.concatenate %136, %138, %140, %142 in 1 : vector<16x64xbf16>, vector<16x64xbf16>, vector<16x64xbf16>, vector<16x64xbf16> -> vector<16x256xbf16>
    %c0_311 = arith.constant 0 : index
    %c2_312 = arith.constant 2 : index
    %c0_313 = arith.constant 0 : index
    %c0_314 = arith.constant 0 : index
    %c0_315 = arith.constant 0 : index
    %144 = vector.load %arg1[%c0_311, %c2_312, %c0_313, %c0_314, %c0_315] : memref<1x9x9x16x64xbf16, #tpu.memory_space<vmem>>, vector<1x1x1x16x64xbf16>
    %145 = vector.shape_cast %144 : vector<1x1x1x16x64xbf16> to vector<16x64xbf16>
    %c0_316 = arith.constant 0 : index
    %c2_317 = arith.constant 2 : index
    %c1_318 = arith.constant 1 : index
    %c0_319 = arith.constant 0 : index
    %c0_320 = arith.constant 0 : index
    %146 = vector.load %arg1[%c0_316, %c2_317, %c1_318, %c0_319, %c0_320] : memref<1x9x9x16x64xbf16, #tpu.memory_space<vmem>>, vector<1x1x1x16x64xbf16>
    %147 = vector.shape_cast %146 : vector<1x1x1x16x64xbf16> to vector<16x64xbf16>
    %c0_321 = arith.constant 0 : index
    %c3_322 = arith.constant 3 : index
    %c0_323 = arith.constant 0 : index
    %c0_324 = arith.constant 0 : index
    %c0_325 = arith.constant 0 : index
    %148 = vector.load %arg1[%c0_321, %c3_322, %c0_323, %c0_324, %c0_325] : memref<1x9x9x16x64xbf16, #tpu.memory_space<vmem>>, vector<1x1x1x16x64xbf16>
    %149 = vector.shape_cast %148 : vector<1x1x1x16x64xbf16> to vector<16x64xbf16>
    %c0_326 = arith.constant 0 : index
    %c3_327 = arith.constant 3 : index
    %c1_328 = arith.constant 1 : index
    %c0_329 = arith.constant 0 : index
    %c0_330 = arith.constant 0 : index
    %150 = vector.load %arg1[%c0_326, %c3_327, %c1_328, %c0_329, %c0_330] : memref<1x9x9x16x64xbf16, #tpu.memory_space<vmem>>, vector<1x1x1x16x64xbf16>
    %151 = vector.shape_cast %150 : vector<1x1x1x16x64xbf16> to vector<16x64xbf16>
    %152 = tpu.concatenate %145, %147, %149, %151 in 1 : vector<16x64xbf16>, vector<16x64xbf16>, vector<16x64xbf16>, vector<16x64xbf16> -> vector<16x256xbf16>
    %c0_331 = arith.constant 0 : index
    %c2_332 = arith.constant 2 : index
    %c1_333 = arith.constant 1 : index
    %c0_334 = arith.constant 0 : index
    %c0_335 = arith.constant 0 : index
    %153 = vector.load %arg1[%c0_331, %c2_332, %c1_333, %c0_334, %c0_335] : memref<1x9x9x16x64xbf16, #tpu.memory_space<vmem>>, vector<1x1x1x16x64xbf16>
    %154 = vector.shape_cast %153 : vector<1x1x1x16x64xbf16> to vector<16x64xbf16>
    %c0_336 = arith.constant 0 : index
    %c2_337 = arith.constant 2 : index
    %c2_338 = arith.constant 2 : index
    %c0_339 = arith.constant 0 : index
    %c0_340 = arith.constant 0 : index
    %155 = vector.load %arg1[%c0_336, %c2_337, %c2_338, %c0_339, %c0_340] : memref<1x9x9x16x64xbf16, #tpu.memory_space<vmem>>, vector<1x1x1x16x64xbf16>
    %156 = vector.shape_cast %155 : vector<1x1x1x16x64xbf16> to vector<16x64xbf16>
    %c0_341 = arith.constant 0 : index
    %c3_342 = arith.constant 3 : index
    %c1_343 = arith.constant 1 : index
    %c0_344 = arith.constant 0 : index
    %c0_345 = arith.constant 0 : index
    %157 = vector.load %arg1[%c0_341, %c3_342, %c1_343, %c0_344, %c0_345] : memref<1x9x9x16x64xbf16, #tpu.memory_space<vmem>>, vector<1x1x1x16x64xbf16>
    %158 = vector.shape_cast %157 : vector<1x1x1x16x64xbf16> to vector<16x64xbf16>
    %c0_346 = arith.constant 0 : index
    %c3_347 = arith.constant 3 : index
    %c2_348 = arith.constant 2 : index
    %c0_349 = arith.constant 0 : index
    %c0_350 = arith.constant 0 : index
    %159 = vector.load %arg1[%c0_346, %c3_347, %c2_348, %c0_349, %c0_350] : memref<1x9x9x16x64xbf16, #tpu.memory_space<vmem>>, vector<1x1x1x16x64xbf16>
    %160 = vector.shape_cast %159 : vector<1x1x1x16x64xbf16> to vector<16x64xbf16>
    %161 = tpu.concatenate %154, %156, %158, %160 in 1 : vector<16x64xbf16>, vector<16x64xbf16>, vector<16x64xbf16>, vector<16x64xbf16> -> vector<16x256xbf16>
    %c0_351 = arith.constant 0 : index
    %c2_352 = arith.constant 2 : index
    %c2_353 = arith.constant 2 : index
    %c0_354 = arith.constant 0 : index
    %c0_355 = arith.constant 0 : index
    %162 = vector.load %arg1[%c0_351, %c2_352, %c2_353, %c0_354, %c0_355] : memref<1x9x9x16x64xbf16, #tpu.memory_space<vmem>>, vector<1x1x1x16x64xbf16>
    %163 = vector.shape_cast %162 : vector<1x1x1x16x64xbf16> to vector<16x64xbf16>
    %c0_356 = arith.constant 0 : index
    %c2_357 = arith.constant 2 : index
    %c3_358 = arith.constant 3 : index
    %c0_359 = arith.constant 0 : index
    %c0_360 = arith.constant 0 : index
    %164 = vector.load %arg1[%c0_356, %c2_357, %c3_358, %c0_359, %c0_360] : memref<1x9x9x16x64xbf16, #tpu.memory_space<vmem>>, vector<1x1x1x16x64xbf16>
    %165 = vector.shape_cast %164 : vector<1x1x1x16x64xbf16> to vector<16x64xbf16>
    %c0_361 = arith.constant 0 : index
    %c3_362 = arith.constant 3 : index
    %c2_363 = arith.constant 2 : index
    %c0_364 = arith.constant 0 : index
    %c0_365 = arith.constant 0 : index
    %166 = vector.load %arg1[%c0_361, %c3_362, %c2_363, %c0_364, %c0_365] : memref<1x9x9x16x64xbf16, #tpu.memory_space<vmem>>, vector<1x1x1x16x64xbf16>
    %167 = vector.shape_cast %166 : vector<1x1x1x16x64xbf16> to vector<16x64xbf16>
    %c0_366 = arith.constant 0 : index
    %c3_367 = arith.constant 3 : index
    %c3_368 = arith.constant 3 : index
    %c0_369 = arith.constant 0 : index
    %c0_370 = arith.constant 0 : index
    %168 = vector.load %arg1[%c0_366, %c3_367, %c3_368, %c0_369, %c0_370] : memref<1x9x9x16x64xbf16, #tpu.memory_space<vmem>>, vector<1x1x1x16x64xbf16>
    %169 = vector.shape_cast %168 : vector<1x1x1x16x64xbf16> to vector<16x64xbf16>
    %170 = tpu.concatenate %163, %165, %167, %169 in 1 : vector<16x64xbf16>, vector<16x64xbf16>, vector<16x64xbf16>, vector<16x64xbf16> -> vector<16x256xbf16>
    %c0_371 = arith.constant 0 : index
    %c2_372 = arith.constant 2 : index
    %c3_373 = arith.constant 3 : index
    %c0_374 = arith.constant 0 : index
    %c0_375 = arith.constant 0 : index
    %171 = vector.load %arg1[%c0_371, %c2_372, %c3_373, %c0_374, %c0_375] : memref<1x9x9x16x64xbf16, #tpu.memory_space<vmem>>, vector<1x1x1x16x64xbf16>
    %172 = vector.shape_cast %171 : vector<1x1x1x16x64xbf16> to vector<16x64xbf16>
    %c0_376 = arith.constant 0 : index
    %c2_377 = arith.constant 2 : index
    %c4_378 = arith.constant 4 : index
    %c0_379 = arith.constant 0 : index
    %c0_380 = arith.constant 0 : index
    %173 = vector.load %arg1[%c0_376, %c2_377, %c4_378, %c0_379, %c0_380] : memref<1x9x9x16x64xbf16, #tpu.memory_space<vmem>>, vector<1x1x1x16x64xbf16>
    %174 = vector.shape_cast %173 : vector<1x1x1x16x64xbf16> to vector<16x64xbf16>
    %c0_381 = arith.constant 0 : index
    %c3_382 = arith.constant 3 : index
    %c3_383 = arith.constant 3 : index
    %c0_384 = arith.constant 0 : index
    %c0_385 = arith.constant 0 : index
    %175 = vector.load %arg1[%c0_381, %c3_382, %c3_383, %c0_384, %c0_385] : memref<1x9x9x16x64xbf16, #tpu.memory_space<vmem>>, vector<1x1x1x16x64xbf16>
    %176 = vector.shape_cast %175 : vector<1x1x1x16x64xbf16> to vector<16x64xbf16>
    %c0_386 = arith.constant 0 : index
    %c3_387 = arith.constant 3 : index
    %c4_388 = arith.constant 4 : index
    %c0_389 = arith.constant 0 : index
    %c0_390 = arith.constant 0 : index
    %177 = vector.load %arg1[%c0_386, %c3_387, %c4_388, %c0_389, %c0_390] : memref<1x9x9x16x64xbf16, #tpu.memory_space<vmem>>, vector<1x1x1x16x64xbf16>
    %178 = vector.shape_cast %177 : vector<1x1x1x16x64xbf16> to vector<16x64xbf16>
    %179 = tpu.concatenate %172, %174, %176, %178 in 1 : vector<16x64xbf16>, vector<16x64xbf16>, vector<16x64xbf16>, vector<16x64xbf16> -> vector<16x256xbf16>
    %c0_391 = arith.constant 0 : index
    %c2_392 = arith.constant 2 : index
    %c4_393 = arith.constant 4 : index
    %c0_394 = arith.constant 0 : index
    %c0_395 = arith.constant 0 : index
    %180 = vector.load %arg1[%c0_391, %c2_392, %c4_393, %c0_394, %c0_395] : memref<1x9x9x16x64xbf16, #tpu.memory_space<vmem>>, vector<1x1x1x16x64xbf16>
    %181 = vector.shape_cast %180 : vector<1x1x1x16x64xbf16> to vector<16x64xbf16>
    %c0_396 = arith.constant 0 : index
    %c2_397 = arith.constant 2 : index
    %c5_398 = arith.constant 5 : index
    %c0_399 = arith.constant 0 : index
    %c0_400 = arith.constant 0 : index
    %182 = vector.load %arg1[%c0_396, %c2_397, %c5_398, %c0_399, %c0_400] : memref<1x9x9x16x64xbf16, #tpu.memory_space<vmem>>, vector<1x1x1x16x64xbf16>
    %183 = vector.shape_cast %182 : vector<1x1x1x16x64xbf16> to vector<16x64xbf16>
    %c0_401 = arith.constant 0 : index
    %c3_402 = arith.constant 3 : index
    %c4_403 = arith.constant 4 : index
    %c0_404 = arith.constant 0 : index
    %c0_405 = arith.constant 0 : index
    %184 = vector.load %arg1[%c0_401, %c3_402, %c4_403, %c0_404, %c0_405] : memref<1x9x9x16x64xbf16, #tpu.memory_space<vmem>>, vector<1x1x1x16x64xbf16>
    %185 = vector.shape_cast %184 : vector<1x1x1x16x64xbf16> to vector<16x64xbf16>
    %c0_406 = arith.constant 0 : index
    %c3_407 = arith.constant 3 : index
    %c5_408 = arith.constant 5 : index
    %c0_409 = arith.constant 0 : index
    %c0_410 = arith.constant 0 : index
    %186 = vector.load %arg1[%c0_406, %c3_407, %c5_408, %c0_409, %c0_410] : memref<1x9x9x16x64xbf16, #tpu.memory_space<vmem>>, vector<1x1x1x16x64xbf16>
    %187 = vector.shape_cast %186 : vector<1x1x1x16x64xbf16> to vector<16x64xbf16>
    %188 = tpu.concatenate %181, %183, %185, %187 in 1 : vector<16x64xbf16>, vector<16x64xbf16>, vector<16x64xbf16>, vector<16x64xbf16> -> vector<16x256xbf16>
    %c0_411 = arith.constant 0 : index
    %c2_412 = arith.constant 2 : index
    %c5_413 = arith.constant 5 : index
    %c0_414 = arith.constant 0 : index
    %c0_415 = arith.constant 0 : index
    %189 = vector.load %arg1[%c0_411, %c2_412, %c5_413, %c0_414, %c0_415] : memref<1x9x9x16x64xbf16, #tpu.memory_space<vmem>>, vector<1x1x1x16x64xbf16>
    %190 = vector.shape_cast %189 : vector<1x1x1x16x64xbf16> to vector<16x64xbf16>
    %c0_416 = arith.constant 0 : index
    %c2_417 = arith.constant 2 : index
    %c6_418 = arith.constant 6 : index
    %c0_419 = arith.constant 0 : index
    %c0_420 = arith.constant 0 : index
    %191 = vector.load %arg1[%c0_416, %c2_417, %c6_418, %c0_419, %c0_420] : memref<1x9x9x16x64xbf16, #tpu.memory_space<vmem>>, vector<1x1x1x16x64xbf16>
    %192 = vector.shape_cast %191 : vector<1x1x1x16x64xbf16> to vector<16x64xbf16>
    %c0_421 = arith.constant 0 : index
    %c3_422 = arith.constant 3 : index
    %c5_423 = arith.constant 5 : index
    %c0_424 = arith.constant 0 : index
    %c0_425 = arith.constant 0 : index
    %193 = vector.load %arg1[%c0_421, %c3_422, %c5_423, %c0_424, %c0_425] : memref<1x9x9x16x64xbf16, #tpu.memory_space<vmem>>, vector<1x1x1x16x64xbf16>
    %194 = vector.shape_cast %193 : vector<1x1x1x16x64xbf16> to vector<16x64xbf16>
    %c0_426 = arith.constant 0 : index
    %c3_427 = arith.constant 3 : index
    %c6_428 = arith.constant 6 : index
    %c0_429 = arith.constant 0 : index
    %c0_430 = arith.constant 0 : index
    %195 = vector.load %arg1[%c0_426, %c3_427, %c6_428, %c0_429, %c0_430] : memref<1x9x9x16x64xbf16, #tpu.memory_space<vmem>>, vector<1x1x1x16x64xbf16>
    %196 = vector.shape_cast %195 : vector<1x1x1x16x64xbf16> to vector<16x64xbf16>
    %197 = tpu.concatenate %190, %192, %194, %196 in 1 : vector<16x64xbf16>, vector<16x64xbf16>, vector<16x64xbf16>, vector<16x64xbf16> -> vector<16x256xbf16>
    %c0_431 = arith.constant 0 : index
    %c2_432 = arith.constant 2 : index
    %c6_433 = arith.constant 6 : index
    %c0_434 = arith.constant 0 : index
    %c0_435 = arith.constant 0 : index
    %198 = vector.load %arg1[%c0_431, %c2_432, %c6_433, %c0_434, %c0_435] : memref<1x9x9x16x64xbf16, #tpu.memory_space<vmem>>, vector<1x1x1x16x64xbf16>
    %199 = vector.shape_cast %198 : vector<1x1x1x16x64xbf16> to vector<16x64xbf16>
    %c0_436 = arith.constant 0 : index
    %c2_437 = arith.constant 2 : index
    %c7_438 = arith.constant 7 : index
    %c0_439 = arith.constant 0 : index
    %c0_440 = arith.constant 0 : index
    %200 = vector.load %arg1[%c0_436, %c2_437, %c7_438, %c0_439, %c0_440] : memref<1x9x9x16x64xbf16, #tpu.memory_space<vmem>>, vector<1x1x1x16x64xbf16>
    %201 = vector.shape_cast %200 : vector<1x1x1x16x64xbf16> to vector<16x64xbf16>
    %c0_441 = arith.constant 0 : index
    %c3_442 = arith.constant 3 : index
    %c6_443 = arith.constant 6 : index
    %c0_444 = arith.constant 0 : index
    %c0_445 = arith.constant 0 : index
    %202 = vector.load %arg1[%c0_441, %c3_442, %c6_443, %c0_444, %c0_445] : memref<1x9x9x16x64xbf16, #tpu.memory_space<vmem>>, vector<1x1x1x16x64xbf16>
    %203 = vector.shape_cast %202 : vector<1x1x1x16x64xbf16> to vector<16x64xbf16>
    %c0_446 = arith.constant 0 : index
    %c3_447 = arith.constant 3 : index
    %c7_448 = arith.constant 7 : index
    %c0_449 = arith.constant 0 : index
    %c0_450 = arith.constant 0 : index
    %204 = vector.load %arg1[%c0_446, %c3_447, %c7_448, %c0_449, %c0_450] : memref<1x9x9x16x64xbf16, #tpu.memory_space<vmem>>, vector<1x1x1x16x64xbf16>
    %205 = vector.shape_cast %204 : vector<1x1x1x16x64xbf16> to vector<16x64xbf16>
    %206 = tpu.concatenate %199, %201, %203, %205 in 1 : vector<16x64xbf16>, vector<16x64xbf16>, vector<16x64xbf16>, vector<16x64xbf16> -> vector<16x256xbf16>
    %c0_451 = arith.constant 0 : index
    %c2_452 = arith.constant 2 : index
    %c7_453 = arith.constant 7 : index
    %c0_454 = arith.constant 0 : index
    %c0_455 = arith.constant 0 : index
    %207 = vector.load %arg1[%c0_451, %c2_452, %c7_453, %c0_454, %c0_455] : memref<1x9x9x16x64xbf16, #tpu.memory_space<vmem>>, vector<1x1x1x16x64xbf16>
    %208 = vector.shape_cast %207 : vector<1x1x1x16x64xbf16> to vector<16x64xbf16>
    %c0_456 = arith.constant 0 : index
    %c2_457 = arith.constant 2 : index
    %c8_458 = arith.constant 8 : index
    %c0_459 = arith.constant 0 : index
    %c0_460 = arith.constant 0 : index
    %209 = vector.load %arg1[%c0_456, %c2_457, %c8_458, %c0_459, %c0_460] : memref<1x9x9x16x64xbf16, #tpu.memory_space<vmem>>, vector<1x1x1x16x64xbf16>
    %210 = vector.shape_cast %209 : vector<1x1x1x16x64xbf16> to vector<16x64xbf16>
    %c0_461 = arith.constant 0 : index
    %c3_462 = arith.constant 3 : index
    %c7_463 = arith.constant 7 : index
    %c0_464 = arith.constant 0 : index
    %c0_465 = arith.constant 0 : index
    %211 = vector.load %arg1[%c0_461, %c3_462, %c7_463, %c0_464, %c0_465] : memref<1x9x9x16x64xbf16, #tpu.memory_space<vmem>>, vector<1x1x1x16x64xbf16>
    %212 = vector.shape_cast %211 : vector<1x1x1x16x64xbf16> to vector<16x64xbf16>
    %c0_466 = arith.constant 0 : index
    %c3_467 = arith.constant 3 : index
    %c8_468 = arith.constant 8 : index
    %c0_469 = arith.constant 0 : index
    %c0_470 = arith.constant 0 : index
    %213 = vector.load %arg1[%c0_466, %c3_467, %c8_468, %c0_469, %c0_470] : memref<1x9x9x16x64xbf16, #tpu.memory_space<vmem>>, vector<1x1x1x16x64xbf16>
    %214 = vector.shape_cast %213 : vector<1x1x1x16x64xbf16> to vector<16x64xbf16>
    %215 = tpu.concatenate %208, %210, %212, %214 in 1 : vector<16x64xbf16>, vector<16x64xbf16>, vector<16x64xbf16>, vector<16x64xbf16> -> vector<16x256xbf16>
    %c0_471 = arith.constant 0 : index
    %c3_472 = arith.constant 3 : index
    %c0_473 = arith.constant 0 : index
    %c0_474 = arith.constant 0 : index
    %c0_475 = arith.constant 0 : index
    %216 = vector.load %arg1[%c0_471, %c3_472, %c0_473, %c0_474, %c0_475] : memref<1x9x9x16x64xbf16, #tpu.memory_space<vmem>>, vector<1x1x1x16x64xbf16>
    %217 = vector.shape_cast %216 : vector<1x1x1x16x64xbf16> to vector<16x64xbf16>
    %c0_476 = arith.constant 0 : index
    %c3_477 = arith.constant 3 : index
    %c1_478 = arith.constant 1 : index
    %c0_479 = arith.constant 0 : index
    %c0_480 = arith.constant 0 : index
    %218 = vector.load %arg1[%c0_476, %c3_477, %c1_478, %c0_479, %c0_480] : memref<1x9x9x16x64xbf16, #tpu.memory_space<vmem>>, vector<1x1x1x16x64xbf16>
    %219 = vector.shape_cast %218 : vector<1x1x1x16x64xbf16> to vector<16x64xbf16>
    %c0_481 = arith.constant 0 : index
    %c4_482 = arith.constant 4 : index
    %c0_483 = arith.constant 0 : index
    %c0_484 = arith.constant 0 : index
    %c0_485 = arith.constant 0 : index
    %220 = vector.load %arg1[%c0_481, %c4_482, %c0_483, %c0_484, %c0_485] : memref<1x9x9x16x64xbf16, #tpu.memory_space<vmem>>, vector<1x1x1x16x64xbf16>
    %221 = vector.shape_cast %220 : vector<1x1x1x16x64xbf16> to vector<16x64xbf16>
    %c0_486 = arith.constant 0 : index
    %c4_487 = arith.constant 4 : index
    %c1_488 = arith.constant 1 : index
    %c0_489 = arith.constant 0 : index
    %c0_490 = arith.constant 0 : index
    %222 = vector.load %arg1[%c0_486, %c4_487, %c1_488, %c0_489, %c0_490] : memref<1x9x9x16x64xbf16, #tpu.memory_space<vmem>>, vector<1x1x1x16x64xbf16>
    %223 = vector.shape_cast %222 : vector<1x1x1x16x64xbf16> to vector<16x64xbf16>
    %224 = tpu.concatenate %217, %219, %221, %223 in 1 : vector<16x64xbf16>, vector<16x64xbf16>, vector<16x64xbf16>, vector<16x64xbf16> -> vector<16x256xbf16>
    %c0_491 = arith.constant 0 : index
    %c3_492 = arith.constant 3 : index
    %c1_493 = arith.constant 1 : index
    %c0_494 = arith.constant 0 : index
    %c0_495 = arith.constant 0 : index
    %225 = vector.load %arg1[%c0_491, %c3_492, %c1_493, %c0_494, %c0_495] : memref<1x9x9x16x64xbf16, #tpu.memory_space<vmem>>, vector<1x1x1x16x64xbf16>
    %226 = vector.shape_cast %225 : vector<1x1x1x16x64xbf16> to vector<16x64xbf16>
    %c0_496 = arith.constant 0 : index
    %c3_497 = arith.constant 3 : index
    %c2_498 = arith.constant 2 : index
    %c0_499 = arith.constant 0 : index
    %c0_500 = arith.constant 0 : index
    %227 = vector.load %arg1[%c0_496, %c3_497, %c2_498, %c0_499, %c0_500] : memref<1x9x9x16x64xbf16, #tpu.memory_space<vmem>>, vector<1x1x1x16x64xbf16>
    %228 = vector.shape_cast %227 : vector<1x1x1x16x64xbf16> to vector<16x64xbf16>
    %c0_501 = arith.constant 0 : index
    %c4_502 = arith.constant 4 : index
    %c1_503 = arith.constant 1 : index
    %c0_504 = arith.constant 0 : index
    %c0_505 = arith.constant 0 : index
    %229 = vector.load %arg1[%c0_501, %c4_502, %c1_503, %c0_504, %c0_505] : memref<1x9x9x16x64xbf16, #tpu.memory_space<vmem>>, vector<1x1x1x16x64xbf16>
    %230 = vector.shape_cast %229 : vector<1x1x1x16x64xbf16> to vector<16x64xbf16>
    %c0_506 = arith.constant 0 : index
    %c4_507 = arith.constant 4 : index
    %c2_508 = arith.constant 2 : index
    %c0_509 = arith.constant 0 : index
    %c0_510 = arith.constant 0 : index
    %231 = vector.load %arg1[%c0_506, %c4_507, %c2_508, %c0_509, %c0_510] : memref<1x9x9x16x64xbf16, #tpu.memory_space<vmem>>, vector<1x1x1x16x64xbf16>
    %232 = vector.shape_cast %231 : vector<1x1x1x16x64xbf16> to vector<16x64xbf16>
    %233 = tpu.concatenate %226, %228, %230, %232 in 1 : vector<16x64xbf16>, vector<16x64xbf16>, vector<16x64xbf16>, vector<16x64xbf16> -> vector<16x256xbf16>
    %c0_511 = arith.constant 0 : index
    %c3_512 = arith.constant 3 : index
    %c2_513 = arith.constant 2 : index
    %c0_514 = arith.constant 0 : index
    %c0_515 = arith.constant 0 : index
    %234 = vector.load %arg1[%c0_511, %c3_512, %c2_513, %c0_514, %c0_515] : memref<1x9x9x16x64xbf16, #tpu.memory_space<vmem>>, vector<1x1x1x16x64xbf16>
    %235 = vector.shape_cast %234 : vector<1x1x1x16x64xbf16> to vector<16x64xbf16>
    %c0_516 = arith.constant 0 : index
    %c3_517 = arith.constant 3 : index
    %c3_518 = arith.constant 3 : index
    %c0_519 = arith.constant 0 : index
    %c0_520 = arith.constant 0 : index
    %236 = vector.load %arg1[%c0_516, %c3_517, %c3_518, %c0_519, %c0_520] : memref<1x9x9x16x64xbf16, #tpu.memory_space<vmem>>, vector<1x1x1x16x64xbf16>
    %237 = vector.shape_cast %236 : vector<1x1x1x16x64xbf16> to vector<16x64xbf16>
    %c0_521 = arith.constant 0 : index
    %c4_522 = arith.constant 4 : index
    %c2_523 = arith.constant 2 : index
    %c0_524 = arith.constant 0 : index
    %c0_525 = arith.constant 0 : index
    %238 = vector.load %arg1[%c0_521, %c4_522, %c2_523, %c0_524, %c0_525] : memref<1x9x9x16x64xbf16, #tpu.memory_space<vmem>>, vector<1x1x1x16x64xbf16>
    %239 = vector.shape_cast %238 : vector<1x1x1x16x64xbf16> to vector<16x64xbf16>
    %c0_526 = arith.constant 0 : index
    %c4_527 = arith.constant 4 : index
    %c3_528 = arith.constant 3 : index
    %c0_529 = arith.constant 0 : index
    %c0_530 = arith.constant 0 : index
    %240 = vector.load %arg1[%c0_526, %c4_527, %c3_528, %c0_529, %c0_530] : memref<1x9x9x16x64xbf16, #tpu.memory_space<vmem>>, vector<1x1x1x16x64xbf16>
    %241 = vector.shape_cast %240 : vector<1x1x1x16x64xbf16> to vector<16x64xbf16>
    %242 = tpu.concatenate %235, %237, %239, %241 in 1 : vector<16x64xbf16>, vector<16x64xbf16>, vector<16x64xbf16>, vector<16x64xbf16> -> vector<16x256xbf16>
    %c0_531 = arith.constant 0 : index
    %c3_532 = arith.constant 3 : index
    %c3_533 = arith.constant 3 : index
    %c0_534 = arith.constant 0 : index
    %c0_535 = arith.constant 0 : index
    %243 = vector.load %arg1[%c0_531, %c3_532, %c3_533, %c0_534, %c0_535] : memref<1x9x9x16x64xbf16, #tpu.memory_space<vmem>>, vector<1x1x1x16x64xbf16>
    %244 = vector.shape_cast %243 : vector<1x1x1x16x64xbf16> to vector<16x64xbf16>
    %c0_536 = arith.constant 0 : index
    %c3_537 = arith.constant 3 : index
    %c4_538 = arith.constant 4 : index
    %c0_539 = arith.constant 0 : index
    %c0_540 = arith.constant 0 : index
    %245 = vector.load %arg1[%c0_536, %c3_537, %c4_538, %c0_539, %c0_540] : memref<1x9x9x16x64xbf16, #tpu.memory_space<vmem>>, vector<1x1x1x16x64xbf16>
    %246 = vector.shape_cast %245 : vector<1x1x1x16x64xbf16> to vector<16x64xbf16>
    %c0_541 = arith.constant 0 : index
    %c4_542 = arith.constant 4 : index
    %c3_543 = arith.constant 3 : index
    %c0_544 = arith.constant 0 : index
    %c0_545 = arith.constant 0 : index
    %247 = vector.load %arg1[%c0_541, %c4_542, %c3_543, %c0_544, %c0_545] : memref<1x9x9x16x64xbf16, #tpu.memory_space<vmem>>, vector<1x1x1x16x64xbf16>
    %248 = vector.shape_cast %247 : vector<1x1x1x16x64xbf16> to vector<16x64xbf16>
    %c0_546 = arith.constant 0 : index
    %c4_547 = arith.constant 4 : index
    %c4_548 = arith.constant 4 : index
    %c0_549 = arith.constant 0 : index
    %c0_550 = arith.constant 0 : index
    %249 = vector.load %arg1[%c0_546, %c4_547, %c4_548, %c0_549, %c0_550] : memref<1x9x9x16x64xbf16, #tpu.memory_space<vmem>>, vector<1x1x1x16x64xbf16>
    %250 = vector.shape_cast %249 : vector<1x1x1x16x64xbf16> to vector<16x64xbf16>
    %251 = tpu.concatenate %244, %246, %248, %250 in 1 : vector<16x64xbf16>, vector<16x64xbf16>, vector<16x64xbf16>, vector<16x64xbf16> -> vector<16x256xbf16>
    %c0_551 = arith.constant 0 : index
    %c3_552 = arith.constant 3 : index
    %c4_553 = arith.constant 4 : index
    %c0_554 = arith.constant 0 : index
    %c0_555 = arith.constant 0 : index
    %252 = vector.load %arg1[%c0_551, %c3_552, %c4_553, %c0_554, %c0_555] : memref<1x9x9x16x64xbf16, #tpu.memory_space<vmem>>, vector<1x1x1x16x64xbf16>
    %253 = vector.shape_cast %252 : vector<1x1x1x16x64xbf16> to vector<16x64xbf16>
    %c0_556 = arith.constant 0 : index
    %c3_557 = arith.constant 3 : index
    %c5_558 = arith.constant 5 : index
    %c0_559 = arith.constant 0 : index
    %c0_560 = arith.constant 0 : index
    %254 = vector.load %arg1[%c0_556, %c3_557, %c5_558, %c0_559, %c0_560] : memref<1x9x9x16x64xbf16, #tpu.memory_space<vmem>>, vector<1x1x1x16x64xbf16>
    %255 = vector.shape_cast %254 : vector<1x1x1x16x64xbf16> to vector<16x64xbf16>
    %c0_561 = arith.constant 0 : index
    %c4_562 = arith.constant 4 : index
    %c4_563 = arith.constant 4 : index
    %c0_564 = arith.constant 0 : index
    %c0_565 = arith.constant 0 : index
    %256 = vector.load %arg1[%c0_561, %c4_562, %c4_563, %c0_564, %c0_565] : memref<1x9x9x16x64xbf16, #tpu.memory_space<vmem>>, vector<1x1x1x16x64xbf16>
    %257 = vector.shape_cast %256 : vector<1x1x1x16x64xbf16> to vector<16x64xbf16>
    %c0_566 = arith.constant 0 : index
    %c4_567 = arith.constant 4 : index
    %c5_568 = arith.constant 5 : index
    %c0_569 = arith.constant 0 : index
    %c0_570 = arith.constant 0 : index
    %258 = vector.load %arg1[%c0_566, %c4_567, %c5_568, %c0_569, %c0_570] : memref<1x9x9x16x64xbf16, #tpu.memory_space<vmem>>, vector<1x1x1x16x64xbf16>
    %259 = vector.shape_cast %258 : vector<1x1x1x16x64xbf16> to vector<16x64xbf16>
    %260 = tpu.concatenate %253, %255, %257, %259 in 1 : vector<16x64xbf16>, vector<16x64xbf16>, vector<16x64xbf16>, vector<16x64xbf16> -> vector<16x256xbf16>
    %c0_571 = arith.constant 0 : index
    %c3_572 = arith.constant 3 : index
    %c5_573 = arith.constant 5 : index
    %c0_574 = arith.constant 0 : index
    %c0_575 = arith.constant 0 : index
    %261 = vector.load %arg1[%c0_571, %c3_572, %c5_573, %c0_574, %c0_575] : memref<1x9x9x16x64xbf16, #tpu.memory_space<vmem>>, vector<1x1x1x16x64xbf16>
    %262 = vector.shape_cast %261 : vector<1x1x1x16x64xbf16> to vector<16x64xbf16>
    %c0_576 = arith.constant 0 : index
    %c3_577 = arith.constant 3 : index
    %c6_578 = arith.constant 6 : index
    %c0_579 = arith.constant 0 : index
    %c0_580 = arith.constant 0 : index
    %263 = vector.load %arg1[%c0_576, %c3_577, %c6_578, %c0_579, %c0_580] : memref<1x9x9x16x64xbf16, #tpu.memory_space<vmem>>, vector<1x1x1x16x64xbf16>
    %264 = vector.shape_cast %263 : vector<1x1x1x16x64xbf16> to vector<16x64xbf16>
    %c0_581 = arith.constant 0 : index
    %c4_582 = arith.constant 4 : index
    %c5_583 = arith.constant 5 : index
    %c0_584 = arith.constant 0 : index
    %c0_585 = arith.constant 0 : index
    %265 = vector.load %arg1[%c0_581, %c4_582, %c5_583, %c0_584, %c0_585] : memref<1x9x9x16x64xbf16, #tpu.memory_space<vmem>>, vector<1x1x1x16x64xbf16>
    %266 = vector.shape_cast %265 : vector<1x1x1x16x64xbf16> to vector<16x64xbf16>
    %c0_586 = arith.constant 0 : index
    %c4_587 = arith.constant 4 : index
    %c6_588 = arith.constant 6 : index
    %c0_589 = arith.constant 0 : index
    %c0_590 = arith.constant 0 : index
    %267 = vector.load %arg1[%c0_586, %c4_587, %c6_588, %c0_589, %c0_590] : memref<1x9x9x16x64xbf16, #tpu.memory_space<vmem>>, vector<1x1x1x16x64xbf16>
    %268 = vector.shape_cast %267 : vector<1x1x1x16x64xbf16> to vector<16x64xbf16>
    %269 = tpu.concatenate %262, %264, %266, %268 in 1 : vector<16x64xbf16>, vector<16x64xbf16>, vector<16x64xbf16>, vector<16x64xbf16> -> vector<16x256xbf16>
    %c0_591 = arith.constant 0 : index
    %c3_592 = arith.constant 3 : index
    %c6_593 = arith.constant 6 : index
    %c0_594 = arith.constant 0 : index
    %c0_595 = arith.constant 0 : index
    %270 = vector.load %arg1[%c0_591, %c3_592, %c6_593, %c0_594, %c0_595] : memref<1x9x9x16x64xbf16, #tpu.memory_space<vmem>>, vector<1x1x1x16x64xbf16>
    %271 = vector.shape_cast %270 : vector<1x1x1x16x64xbf16> to vector<16x64xbf16>
    %c0_596 = arith.constant 0 : index
    %c3_597 = arith.constant 3 : index
    %c7_598 = arith.constant 7 : index
    %c0_599 = arith.constant 0 : index
    %c0_600 = arith.constant 0 : index
    %272 = vector.load %arg1[%c0_596, %c3_597, %c7_598, %c0_599, %c0_600] : memref<1x9x9x16x64xbf16, #tpu.memory_space<vmem>>, vector<1x1x1x16x64xbf16>
    %273 = vector.shape_cast %272 : vector<1x1x1x16x64xbf16> to vector<16x64xbf16>
    %c0_601 = arith.constant 0 : index
    %c4_602 = arith.constant 4 : index
    %c6_603 = arith.constant 6 : index
    %c0_604 = arith.constant 0 : index
    %c0_605 = arith.constant 0 : index
    %274 = vector.load %arg1[%c0_601, %c4_602, %c6_603, %c0_604, %c0_605] : memref<1x9x9x16x64xbf16, #tpu.memory_space<vmem>>, vector<1x1x1x16x64xbf16>
    %275 = vector.shape_cast %274 : vector<1x1x1x16x64xbf16> to vector<16x64xbf16>
    %c0_606 = arith.constant 0 : index
    %c4_607 = arith.constant 4 : index
    %c7_608 = arith.constant 7 : index
    %c0_609 = arith.constant 0 : index
    %c0_610 = arith.constant 0 : index
    %276 = vector.load %arg1[%c0_606, %c4_607, %c7_608, %c0_609, %c0_610] : memref<1x9x9x16x64xbf16, #tpu.memory_space<vmem>>, vector<1x1x1x16x64xbf16>
    %277 = vector.shape_cast %276 : vector<1x1x1x16x64xbf16> to vector<16x64xbf16>
    %278 = tpu.concatenate %271, %273, %275, %277 in 1 : vector<16x64xbf16>, vector<16x64xbf16>, vector<16x64xbf16>, vector<16x64xbf16> -> vector<16x256xbf16>
    %c0_611 = arith.constant 0 : index
    %c3_612 = arith.constant 3 : index
    %c7_613 = arith.constant 7 : index
    %c0_614 = arith.constant 0 : index
    %c0_615 = arith.constant 0 : index
    %279 = vector.load %arg1[%c0_611, %c3_612, %c7_613, %c0_614, %c0_615] : memref<1x9x9x16x64xbf16, #tpu.memory_space<vmem>>, vector<1x1x1x16x64xbf16>
    %280 = vector.shape_cast %279 : vector<1x1x1x16x64xbf16> to vector<16x64xbf16>
    %c0_616 = arith.constant 0 : index
    %c3_617 = arith.constant 3 : index
    %c8_618 = arith.constant 8 : index
    %c0_619 = arith.constant 0 : index
    %c0_620 = arith.constant 0 : index
    %281 = vector.load %arg1[%c0_616, %c3_617, %c8_618, %c0_619, %c0_620] : memref<1x9x9x16x64xbf16, #tpu.memory_space<vmem>>, vector<1x1x1x16x64xbf16>
    %282 = vector.shape_cast %281 : vector<1x1x1x16x64xbf16> to vector<16x64xbf16>
    %c0_621 = arith.constant 0 : index
    %c4_622 = arith.constant 4 : index
    %c7_623 = arith.constant 7 : index
    %c0_624 = arith.constant 0 : index
    %c0_625 = arith.constant 0 : index
    %283 = vector.load %arg1[%c0_621, %c4_622, %c7_623, %c0_624, %c0_625] : memref<1x9x9x16x64xbf16, #tpu.memory_space<vmem>>, vector<1x1x1x16x64xbf16>
    %284 = vector.shape_cast %283 : vector<1x1x1x16x64xbf16> to vector<16x64xbf16>
    %c0_626 = arith.constant 0 : index
    %c4_627 = arith.constant 4 : index
    %c8_628 = arith.constant 8 : index
    %c0_629 = arith.constant 0 : index
    %c0_630 = arith.constant 0 : index
    %285 = vector.load %arg1[%c0_626, %c4_627, %c8_628, %c0_629, %c0_630] : memref<1x9x9x16x64xbf16, #tpu.memory_space<vmem>>, vector<1x1x1x16x64xbf16>
    %286 = vector.shape_cast %285 : vector<1x1x1x16x64xbf16> to vector<16x64xbf16>
    %287 = tpu.concatenate %280, %282, %284, %286 in 1 : vector<16x64xbf16>, vector<16x64xbf16>, vector<16x64xbf16>, vector<16x64xbf16> -> vector<16x256xbf16>
    %c0_631 = arith.constant 0 : index
    %c4_632 = arith.constant 4 : index
    %c0_633 = arith.constant 0 : index
    %c0_634 = arith.constant 0 : index
    %c0_635 = arith.constant 0 : index
    %288 = vector.load %arg1[%c0_631, %c4_632, %c0_633, %c0_634, %c0_635] : memref<1x9x9x16x64xbf16, #tpu.memory_space<vmem>>, vector<1x1x1x16x64xbf16>
    %289 = vector.shape_cast %288 : vector<1x1x1x16x64xbf16> to vector<16x64xbf16>
    %c0_636 = arith.constant 0 : index
    %c4_637 = arith.constant 4 : index
    %c1_638 = arith.constant 1 : index
    %c0_639 = arith.constant 0 : index
    %c0_640 = arith.constant 0 : index
    %290 = vector.load %arg1[%c0_636, %c4_637, %c1_638, %c0_639, %c0_640] : memref<1x9x9x16x64xbf16, #tpu.memory_space<vmem>>, vector<1x1x1x16x64xbf16>
    %291 = vector.shape_cast %290 : vector<1x1x1x16x64xbf16> to vector<16x64xbf16>
    %c0_641 = arith.constant 0 : index
    %c5_642 = arith.constant 5 : index
    %c0_643 = arith.constant 0 : index
    %c0_644 = arith.constant 0 : index
    %c0_645 = arith.constant 0 : index
    %292 = vector.load %arg1[%c0_641, %c5_642, %c0_643, %c0_644, %c0_645] : memref<1x9x9x16x64xbf16, #tpu.memory_space<vmem>>, vector<1x1x1x16x64xbf16>
    %293 = vector.shape_cast %292 : vector<1x1x1x16x64xbf16> to vector<16x64xbf16>
    %c0_646 = arith.constant 0 : index
    %c5_647 = arith.constant 5 : index
    %c1_648 = arith.constant 1 : index
    %c0_649 = arith.constant 0 : index
    %c0_650 = arith.constant 0 : index
    %294 = vector.load %arg1[%c0_646, %c5_647, %c1_648, %c0_649, %c0_650] : memref<1x9x9x16x64xbf16, #tpu.memory_space<vmem>>, vector<1x1x1x16x64xbf16>
    %295 = vector.shape_cast %294 : vector<1x1x1x16x64xbf16> to vector<16x64xbf16>
    %296 = tpu.concatenate %289, %291, %293, %295 in 1 : vector<16x64xbf16>, vector<16x64xbf16>, vector<16x64xbf16>, vector<16x64xbf16> -> vector<16x256xbf16>
    %c0_651 = arith.constant 0 : index
    %c4_652 = arith.constant 4 : index
    %c1_653 = arith.constant 1 : index
    %c0_654 = arith.constant 0 : index
    %c0_655 = arith.constant 0 : index
    %297 = vector.load %arg1[%c0_651, %c4_652, %c1_653, %c0_654, %c0_655] : memref<1x9x9x16x64xbf16, #tpu.memory_space<vmem>>, vector<1x1x1x16x64xbf16>
    %298 = vector.shape_cast %297 : vector<1x1x1x16x64xbf16> to vector<16x64xbf16>
    %c0_656 = arith.constant 0 : index
    %c4_657 = arith.constant 4 : index
    %c2_658 = arith.constant 2 : index
    %c0_659 = arith.constant 0 : index
    %c0_660 = arith.constant 0 : index
    %299 = vector.load %arg1[%c0_656, %c4_657, %c2_658, %c0_659, %c0_660] : memref<1x9x9x16x64xbf16, #tpu.memory_space<vmem>>, vector<1x1x1x16x64xbf16>
    %300 = vector.shape_cast %299 : vector<1x1x1x16x64xbf16> to vector<16x64xbf16>
    %c0_661 = arith.constant 0 : index
    %c5_662 = arith.constant 5 : index
    %c1_663 = arith.constant 1 : index
    %c0_664 = arith.constant 0 : index
    %c0_665 = arith.constant 0 : index
    %301 = vector.load %arg1[%c0_661, %c5_662, %c1_663, %c0_664, %c0_665] : memref<1x9x9x16x64xbf16, #tpu.memory_space<vmem>>, vector<1x1x1x16x64xbf16>
    %302 = vector.shape_cast %301 : vector<1x1x1x16x64xbf16> to vector<16x64xbf16>
    %c0_666 = arith.constant 0 : index
    %c5_667 = arith.constant 5 : index
    %c2_668 = arith.constant 2 : index
    %c0_669 = arith.constant 0 : index
    %c0_670 = arith.constant 0 : index
    %303 = vector.load %arg1[%c0_666, %c5_667, %c2_668, %c0_669, %c0_670] : memref<1x9x9x16x64xbf16, #tpu.memory_space<vmem>>, vector<1x1x1x16x64xbf16>
    %304 = vector.shape_cast %303 : vector<1x1x1x16x64xbf16> to vector<16x64xbf16>
    %305 = tpu.concatenate %298, %300, %302, %304 in 1 : vector<16x64xbf16>, vector<16x64xbf16>, vector<16x64xbf16>, vector<16x64xbf16> -> vector<16x256xbf16>
    %c0_671 = arith.constant 0 : index
    %c4_672 = arith.constant 4 : index
    %c2_673 = arith.constant 2 : index
    %c0_674 = arith.constant 0 : index
    %c0_675 = arith.constant 0 : index
    %306 = vector.load %arg1[%c0_671, %c4_672, %c2_673, %c0_674, %c0_675] : memref<1x9x9x16x64xbf16, #tpu.memory_space<vmem>>, vector<1x1x1x16x64xbf16>
    %307 = vector.shape_cast %306 : vector<1x1x1x16x64xbf16> to vector<16x64xbf16>
    %c0_676 = arith.constant 0 : index
    %c4_677 = arith.constant 4 : index
    %c3_678 = arith.constant 3 : index
    %c0_679 = arith.constant 0 : index
    %c0_680 = arith.constant 0 : index
    %308 = vector.load %arg1[%c0_676, %c4_677, %c3_678, %c0_679, %c0_680] : memref<1x9x9x16x64xbf16, #tpu.memory_space<vmem>>, vector<1x1x1x16x64xbf16>
    %309 = vector.shape_cast %308 : vector<1x1x1x16x64xbf16> to vector<16x64xbf16>
    %c0_681 = arith.constant 0 : index
    %c5_682 = arith.constant 5 : index
    %c2_683 = arith.constant 2 : index
    %c0_684 = arith.constant 0 : index
    %c0_685 = arith.constant 0 : index
    %310 = vector.load %arg1[%c0_681, %c5_682, %c2_683, %c0_684, %c0_685] : memref<1x9x9x16x64xbf16, #tpu.memory_space<vmem>>, vector<1x1x1x16x64xbf16>
    %311 = vector.shape_cast %310 : vector<1x1x1x16x64xbf16> to vector<16x64xbf16>
    %c0_686 = arith.constant 0 : index
    %c5_687 = arith.constant 5 : index
    %c3_688 = arith.constant 3 : index
    %c0_689 = arith.constant 0 : index
    %c0_690 = arith.constant 0 : index
    %312 = vector.load %arg1[%c0_686, %c5_687, %c3_688, %c0_689, %c0_690] : memref<1x9x9x16x64xbf16, #tpu.memory_space<vmem>>, vector<1x1x1x16x64xbf16>
    %313 = vector.shape_cast %312 : vector<1x1x1x16x64xbf16> to vector<16x64xbf16>
    %314 = tpu.concatenate %307, %309, %311, %313 in 1 : vector<16x64xbf16>, vector<16x64xbf16>, vector<16x64xbf16>, vector<16x64xbf16> -> vector<16x256xbf16>
    %c0_691 = arith.constant 0 : index
    %c4_692 = arith.constant 4 : index
    %c3_693 = arith.constant 3 : index
    %c0_694 = arith.constant 0 : index
    %c0_695 = arith.constant 0 : index
    %315 = vector.load %arg1[%c0_691, %c4_692, %c3_693, %c0_694, %c0_695] : memref<1x9x9x16x64xbf16, #tpu.memory_space<vmem>>, vector<1x1x1x16x64xbf16>
    %316 = vector.shape_cast %315 : vector<1x1x1x16x64xbf16> to vector<16x64xbf16>
    %c0_696 = arith.constant 0 : index
    %c4_697 = arith.constant 4 : index
    %c4_698 = arith.constant 4 : index
    %c0_699 = arith.constant 0 : index
    %c0_700 = arith.constant 0 : index
    %317 = vector.load %arg1[%c0_696, %c4_697, %c4_698, %c0_699, %c0_700] : memref<1x9x9x16x64xbf16, #tpu.memory_space<vmem>>, vector<1x1x1x16x64xbf16>
    %318 = vector.shape_cast %317 : vector<1x1x1x16x64xbf16> to vector<16x64xbf16>
    %c0_701 = arith.constant 0 : index
    %c5_702 = arith.constant 5 : index
    %c3_703 = arith.constant 3 : index
    %c0_704 = arith.constant 0 : index
    %c0_705 = arith.constant 0 : index
    %319 = vector.load %arg1[%c0_701, %c5_702, %c3_703, %c0_704, %c0_705] : memref<1x9x9x16x64xbf16, #tpu.memory_space<vmem>>, vector<1x1x1x16x64xbf16>
    %320 = vector.shape_cast %319 : vector<1x1x1x16x64xbf16> to vector<16x64xbf16>
    %c0_706 = arith.constant 0 : index
    %c5_707 = arith.constant 5 : index
    %c4_708 = arith.constant 4 : index
    %c0_709 = arith.constant 0 : index
    %c0_710 = arith.constant 0 : index
    %321 = vector.load %arg1[%c0_706, %c5_707, %c4_708, %c0_709, %c0_710] : memref<1x9x9x16x64xbf16, #tpu.memory_space<vmem>>, vector<1x1x1x16x64xbf16>
    %322 = vector.shape_cast %321 : vector<1x1x1x16x64xbf16> to vector<16x64xbf16>
    %323 = tpu.concatenate %316, %318, %320, %322 in 1 : vector<16x64xbf16>, vector<16x64xbf16>, vector<16x64xbf16>, vector<16x64xbf16> -> vector<16x256xbf16>
    %c0_711 = arith.constant 0 : index
    %c4_712 = arith.constant 4 : index
    %c4_713 = arith.constant 4 : index
    %c0_714 = arith.constant 0 : index
    %c0_715 = arith.constant 0 : index
    %324 = vector.load %arg1[%c0_711, %c4_712, %c4_713, %c0_714, %c0_715] : memref<1x9x9x16x64xbf16, #tpu.memory_space<vmem>>, vector<1x1x1x16x64xbf16>
    %325 = vector.shape_cast %324 : vector<1x1x1x16x64xbf16> to vector<16x64xbf16>
    %c0_716 = arith.constant 0 : index
    %c4_717 = arith.constant 4 : index
    %c5_718 = arith.constant 5 : index
    %c0_719 = arith.constant 0 : index
    %c0_720 = arith.constant 0 : index
    %326 = vector.load %arg1[%c0_716, %c4_717, %c5_718, %c0_719, %c0_720] : memref<1x9x9x16x64xbf16, #tpu.memory_space<vmem>>, vector<1x1x1x16x64xbf16>
    %327 = vector.shape_cast %326 : vector<1x1x1x16x64xbf16> to vector<16x64xbf16>
    %c0_721 = arith.constant 0 : index
    %c5_722 = arith.constant 5 : index
    %c4_723 = arith.constant 4 : index
    %c0_724 = arith.constant 0 : index
    %c0_725 = arith.constant 0 : index
    %328 = vector.load %arg1[%c0_721, %c5_722, %c4_723, %c0_724, %c0_725] : memref<1x9x9x16x64xbf16, #tpu.memory_space<vmem>>, vector<1x1x1x16x64xbf16>
    %329 = vector.shape_cast %328 : vector<1x1x1x16x64xbf16> to vector<16x64xbf16>
    %c0_726 = arith.constant 0 : index
    %c5_727 = arith.constant 5 : index
    %c5_728 = arith.constant 5 : index
    %c0_729 = arith.constant 0 : index
    %c0_730 = arith.constant 0 : index
    %330 = vector.load %arg1[%c0_726, %c5_727, %c5_728, %c0_729, %c0_730] : memref<1x9x9x16x64xbf16, #tpu.memory_space<vmem>>, vector<1x1x1x16x64xbf16>
    %331 = vector.shape_cast %330 : vector<1x1x1x16x64xbf16> to vector<16x64xbf16>
    %332 = tpu.concatenate %325, %327, %329, %331 in 1 : vector<16x64xbf16>, vector<16x64xbf16>, vector<16x64xbf16>, vector<16x64xbf16> -> vector<16x256xbf16>
    %c0_731 = arith.constant 0 : index
    %c4_732 = arith.constant 4 : index
    %c5_733 = arith.constant 5 : index
    %c0_734 = arith.constant 0 : index
    %c0_735 = arith.constant 0 : index
    %333 = vector.load %arg1[%c0_731, %c4_732, %c5_733, %c0_734, %c0_735] : memref<1x9x9x16x64xbf16, #tpu.memory_space<vmem>>, vector<1x1x1x16x64xbf16>
    %334 = vector.shape_cast %333 : vector<1x1x1x16x64xbf16> to vector<16x64xbf16>
    %c0_736 = arith.constant 0 : index
    %c4_737 = arith.constant 4 : index
    %c6_738 = arith.constant 6 : index
    %c0_739 = arith.constant 0 : index
    %c0_740 = arith.constant 0 : index
    %335 = vector.load %arg1[%c0_736, %c4_737, %c6_738, %c0_739, %c0_740] : memref<1x9x9x16x64xbf16, #tpu.memory_space<vmem>>, vector<1x1x1x16x64xbf16>
    %336 = vector.shape_cast %335 : vector<1x1x1x16x64xbf16> to vector<16x64xbf16>
    %c0_741 = arith.constant 0 : index
    %c5_742 = arith.constant 5 : index
    %c5_743 = arith.constant 5 : index
    %c0_744 = arith.constant 0 : index
    %c0_745 = arith.constant 0 : index
    %337 = vector.load %arg1[%c0_741, %c5_742, %c5_743, %c0_744, %c0_745] : memref<1x9x9x16x64xbf16, #tpu.memory_space<vmem>>, vector<1x1x1x16x64xbf16>
    %338 = vector.shape_cast %337 : vector<1x1x1x16x64xbf16> to vector<16x64xbf16>
    %c0_746 = arith.constant 0 : index
    %c5_747 = arith.constant 5 : index
    %c6_748 = arith.constant 6 : index
    %c0_749 = arith.constant 0 : index
    %c0_750 = arith.constant 0 : index
    %339 = vector.load %arg1[%c0_746, %c5_747, %c6_748, %c0_749, %c0_750] : memref<1x9x9x16x64xbf16, #tpu.memory_space<vmem>>, vector<1x1x1x16x64xbf16>
    %340 = vector.shape_cast %339 : vector<1x1x1x16x64xbf16> to vector<16x64xbf16>
    %341 = tpu.concatenate %334, %336, %338, %340 in 1 : vector<16x64xbf16>, vector<16x64xbf16>, vector<16x64xbf16>, vector<16x64xbf16> -> vector<16x256xbf16>
    %c0_751 = arith.constant 0 : index
    %c4_752 = arith.constant 4 : index
    %c6_753 = arith.constant 6 : index
    %c0_754 = arith.constant 0 : index
    %c0_755 = arith.constant 0 : index
    %342 = vector.load %arg1[%c0_751, %c4_752, %c6_753, %c0_754, %c0_755] : memref<1x9x9x16x64xbf16, #tpu.memory_space<vmem>>, vector<1x1x1x16x64xbf16>
    %343 = vector.shape_cast %342 : vector<1x1x1x16x64xbf16> to vector<16x64xbf16>
    %c0_756 = arith.constant 0 : index
    %c4_757 = arith.constant 4 : index
    %c7_758 = arith.constant 7 : index
    %c0_759 = arith.constant 0 : index
    %c0_760 = arith.constant 0 : index
    %344 = vector.load %arg1[%c0_756, %c4_757, %c7_758, %c0_759, %c0_760] : memref<1x9x9x16x64xbf16, #tpu.memory_space<vmem>>, vector<1x1x1x16x64xbf16>
    %345 = vector.shape_cast %344 : vector<1x1x1x16x64xbf16> to vector<16x64xbf16>
    %c0_761 = arith.constant 0 : index
    %c5_762 = arith.constant 5 : index
    %c6_763 = arith.constant 6 : index
    %c0_764 = arith.constant 0 : index
    %c0_765 = arith.constant 0 : index
    %346 = vector.load %arg1[%c0_761, %c5_762, %c6_763, %c0_764, %c0_765] : memref<1x9x9x16x64xbf16, #tpu.memory_space<vmem>>, vector<1x1x1x16x64xbf16>
    %347 = vector.shape_cast %346 : vector<1x1x1x16x64xbf16> to vector<16x64xbf16>
    %c0_766 = arith.constant 0 : index
    %c5_767 = arith.constant 5 : index
    %c7_768 = arith.constant 7 : index
    %c0_769 = arith.constant 0 : index
    %c0_770 = arith.constant 0 : index
    %348 = vector.load %arg1[%c0_766, %c5_767, %c7_768, %c0_769, %c0_770] : memref<1x9x9x16x64xbf16, #tpu.memory_space<vmem>>, vector<1x1x1x16x64xbf16>
    %349 = vector.shape_cast %348 : vector<1x1x1x16x64xbf16> to vector<16x64xbf16>
    %350 = tpu.concatenate %343, %345, %347, %349 in 1 : vector<16x64xbf16>, vector<16x64xbf16>, vector<16x64xbf16>, vector<16x64xbf16> -> vector<16x256xbf16>
    %c0_771 = arith.constant 0 : index
    %c4_772 = arith.constant 4 : index
    %c7_773 = arith.constant 7 : index
    %c0_774 = arith.constant 0 : index
    %c0_775 = arith.constant 0 : index
    %351 = vector.load %arg1[%c0_771, %c4_772, %c7_773, %c0_774, %c0_775] : memref<1x9x9x16x64xbf16, #tpu.memory_space<vmem>>, vector<1x1x1x16x64xbf16>
    %352 = vector.shape_cast %351 : vector<1x1x1x16x64xbf16> to vector<16x64xbf16>
    %c0_776 = arith.constant 0 : index
    %c4_777 = arith.constant 4 : index
    %c8_778 = arith.constant 8 : index
    %c0_779 = arith.constant 0 : index
    %c0_780 = arith.constant 0 : index
    %353 = vector.load %arg1[%c0_776, %c4_777, %c8_778, %c0_779, %c0_780] : memref<1x9x9x16x64xbf16, #tpu.memory_space<vmem>>, vector<1x1x1x16x64xbf16>
    %354 = vector.shape_cast %353 : vector<1x1x1x16x64xbf16> to vector<16x64xbf16>
    %c0_781 = arith.constant 0 : index
    %c5_782 = arith.constant 5 : index
    %c7_783 = arith.constant 7 : index
    %c0_784 = arith.constant 0 : index
    %c0_785 = arith.constant 0 : index
    %355 = vector.load %arg1[%c0_781, %c5_782, %c7_783, %c0_784, %c0_785] : memref<1x9x9x16x64xbf16, #tpu.memory_space<vmem>>, vector<1x1x1x16x64xbf16>
    %356 = vector.shape_cast %355 : vector<1x1x1x16x64xbf16> to vector<16x64xbf16>
    %c0_786 = arith.constant 0 : index
    %c5_787 = arith.constant 5 : index
    %c8_788 = arith.constant 8 : index
    %c0_789 = arith.constant 0 : index
    %c0_790 = arith.constant 0 : index
    %357 = vector.load %arg1[%c0_786, %c5_787, %c8_788, %c0_789, %c0_790] : memref<1x9x9x16x64xbf16, #tpu.memory_space<vmem>>, vector<1x1x1x16x64xbf16>
    %358 = vector.shape_cast %357 : vector<1x1x1x16x64xbf16> to vector<16x64xbf16>
    %359 = tpu.concatenate %352, %354, %356, %358 in 1 : vector<16x64xbf16>, vector<16x64xbf16>, vector<16x64xbf16>, vector<16x64xbf16> -> vector<16x256xbf16>
    %c0_791 = arith.constant 0 : index
    %c5_792 = arith.constant 5 : index
    %c0_793 = arith.constant 0 : index
    %c0_794 = arith.constant 0 : index
    %c0_795 = arith.constant 0 : index
    %360 = vector.load %arg1[%c0_791, %c5_792, %c0_793, %c0_794, %c0_795] : memref<1x9x9x16x64xbf16, #tpu.memory_space<vmem>>, vector<1x1x1x16x64xbf16>
    %361 = vector.shape_cast %360 : vector<1x1x1x16x64xbf16> to vector<16x64xbf16>
    %c0_796 = arith.constant 0 : index
    %c5_797 = arith.constant 5 : index
    %c1_798 = arith.constant 1 : index
    %c0_799 = arith.constant 0 : index
    %c0_800 = arith.constant 0 : index
    %362 = vector.load %arg1[%c0_796, %c5_797, %c1_798, %c0_799, %c0_800] : memref<1x9x9x16x64xbf16, #tpu.memory_space<vmem>>, vector<1x1x1x16x64xbf16>
    %363 = vector.shape_cast %362 : vector<1x1x1x16x64xbf16> to vector<16x64xbf16>
    %c0_801 = arith.constant 0 : index
    %c6_802 = arith.constant 6 : index
    %c0_803 = arith.constant 0 : index
    %c0_804 = arith.constant 0 : index
    %c0_805 = arith.constant 0 : index
    %364 = vector.load %arg1[%c0_801, %c6_802, %c0_803, %c0_804, %c0_805] : memref<1x9x9x16x64xbf16, #tpu.memory_space<vmem>>, vector<1x1x1x16x64xbf16>
    %365 = vector.shape_cast %364 : vector<1x1x1x16x64xbf16> to vector<16x64xbf16>
    %c0_806 = arith.constant 0 : index
    %c6_807 = arith.constant 6 : index
    %c1_808 = arith.constant 1 : index
    %c0_809 = arith.constant 0 : index
    %c0_810 = arith.constant 0 : index
    %366 = vector.load %arg1[%c0_806, %c6_807, %c1_808, %c0_809, %c0_810] : memref<1x9x9x16x64xbf16, #tpu.memory_space<vmem>>, vector<1x1x1x16x64xbf16>
    %367 = vector.shape_cast %366 : vector<1x1x1x16x64xbf16> to vector<16x64xbf16>
    %368 = tpu.concatenate %361, %363, %365, %367 in 1 : vector<16x64xbf16>, vector<16x64xbf16>, vector<16x64xbf16>, vector<16x64xbf16> -> vector<16x256xbf16>
    %c0_811 = arith.constant 0 : index
    %c5_812 = arith.constant 5 : index
    %c1_813 = arith.constant 1 : index
    %c0_814 = arith.constant 0 : index
    %c0_815 = arith.constant 0 : index
    %369 = vector.load %arg1[%c0_811, %c5_812, %c1_813, %c0_814, %c0_815] : memref<1x9x9x16x64xbf16, #tpu.memory_space<vmem>>, vector<1x1x1x16x64xbf16>
    %370 = vector.shape_cast %369 : vector<1x1x1x16x64xbf16> to vector<16x64xbf16>
    %c0_816 = arith.constant 0 : index
    %c5_817 = arith.constant 5 : index
    %c2_818 = arith.constant 2 : index
    %c0_819 = arith.constant 0 : index
    %c0_820 = arith.constant 0 : index
    %371 = vector.load %arg1[%c0_816, %c5_817, %c2_818, %c0_819, %c0_820] : memref<1x9x9x16x64xbf16, #tpu.memory_space<vmem>>, vector<1x1x1x16x64xbf16>
    %372 = vector.shape_cast %371 : vector<1x1x1x16x64xbf16> to vector<16x64xbf16>
    %c0_821 = arith.constant 0 : index
    %c6_822 = arith.constant 6 : index
    %c1_823 = arith.constant 1 : index
    %c0_824 = arith.constant 0 : index
    %c0_825 = arith.constant 0 : index
    %373 = vector.load %arg1[%c0_821, %c6_822, %c1_823, %c0_824, %c0_825] : memref<1x9x9x16x64xbf16, #tpu.memory_space<vmem>>, vector<1x1x1x16x64xbf16>
    %374 = vector.shape_cast %373 : vector<1x1x1x16x64xbf16> to vector<16x64xbf16>
    %c0_826 = arith.constant 0 : index
    %c6_827 = arith.constant 6 : index
    %c2_828 = arith.constant 2 : index
    %c0_829 = arith.constant 0 : index
    %c0_830 = arith.constant 0 : index
    %375 = vector.load %arg1[%c0_826, %c6_827, %c2_828, %c0_829, %c0_830] : memref<1x9x9x16x64xbf16, #tpu.memory_space<vmem>>, vector<1x1x1x16x64xbf16>
    %376 = vector.shape_cast %375 : vector<1x1x1x16x64xbf16> to vector<16x64xbf16>
    %377 = tpu.concatenate %370, %372, %374, %376 in 1 : vector<16x64xbf16>, vector<16x64xbf16>, vector<16x64xbf16>, vector<16x64xbf16> -> vector<16x256xbf16>
    %c0_831 = arith.constant 0 : index
    %c5_832 = arith.constant 5 : index
    %c2_833 = arith.constant 2 : index
    %c0_834 = arith.constant 0 : index
    %c0_835 = arith.constant 0 : index
    %378 = vector.load %arg1[%c0_831, %c5_832, %c2_833, %c0_834, %c0_835] : memref<1x9x9x16x64xbf16, #tpu.memory_space<vmem>>, vector<1x1x1x16x64xbf16>
    %379 = vector.shape_cast %378 : vector<1x1x1x16x64xbf16> to vector<16x64xbf16>
    %c0_836 = arith.constant 0 : index
    %c5_837 = arith.constant 5 : index
    %c3_838 = arith.constant 3 : index
    %c0_839 = arith.constant 0 : index
    %c0_840 = arith.constant 0 : index
    %380 = vector.load %arg1[%c0_836, %c5_837, %c3_838, %c0_839, %c0_840] : memref<1x9x9x16x64xbf16, #tpu.memory_space<vmem>>, vector<1x1x1x16x64xbf16>
    %381 = vector.shape_cast %380 : vector<1x1x1x16x64xbf16> to vector<16x64xbf16>
    %c0_841 = arith.constant 0 : index
    %c6_842 = arith.constant 6 : index
    %c2_843 = arith.constant 2 : index
    %c0_844 = arith.constant 0 : index
    %c0_845 = arith.constant 0 : index
    %382 = vector.load %arg1[%c0_841, %c6_842, %c2_843, %c0_844, %c0_845] : memref<1x9x9x16x64xbf16, #tpu.memory_space<vmem>>, vector<1x1x1x16x64xbf16>
    %383 = vector.shape_cast %382 : vector<1x1x1x16x64xbf16> to vector<16x64xbf16>
    %c0_846 = arith.constant 0 : index
    %c6_847 = arith.constant 6 : index
    %c3_848 = arith.constant 3 : index
    %c0_849 = arith.constant 0 : index
    %c0_850 = arith.constant 0 : index
    %384 = vector.load %arg1[%c0_846, %c6_847, %c3_848, %c0_849, %c0_850] : memref<1x9x9x16x64xbf16, #tpu.memory_space<vmem>>, vector<1x1x1x16x64xbf16>
    %385 = vector.shape_cast %384 : vector<1x1x1x16x64xbf16> to vector<16x64xbf16>
    %386 = tpu.concatenate %379, %381, %383, %385 in 1 : vector<16x64xbf16>, vector<16x64xbf16>, vector<16x64xbf16>, vector<16x64xbf16> -> vector<16x256xbf16>
    %c0_851 = arith.constant 0 : index
    %c5_852 = arith.constant 5 : index
    %c3_853 = arith.constant 3 : index
    %c0_854 = arith.constant 0 : index
    %c0_855 = arith.constant 0 : index
    %387 = vector.load %arg1[%c0_851, %c5_852, %c3_853, %c0_854, %c0_855] : memref<1x9x9x16x64xbf16, #tpu.memory_space<vmem>>, vector<1x1x1x16x64xbf16>
    %388 = vector.shape_cast %387 : vector<1x1x1x16x64xbf16> to vector<16x64xbf16>
    %c0_856 = arith.constant 0 : index
    %c5_857 = arith.constant 5 : index
    %c4_858 = arith.constant 4 : index
    %c0_859 = arith.constant 0 : index
    %c0_860 = arith.constant 0 : index
    %389 = vector.load %arg1[%c0_856, %c5_857, %c4_858, %c0_859, %c0_860] : memref<1x9x9x16x64xbf16, #tpu.memory_space<vmem>>, vector<1x1x1x16x64xbf16>
    %390 = vector.shape_cast %389 : vector<1x1x1x16x64xbf16> to vector<16x64xbf16>
    %c0_861 = arith.constant 0 : index
    %c6_862 = arith.constant 6 : index
    %c3_863 = arith.constant 3 : index
    %c0_864 = arith.constant 0 : index
    %c0_865 = arith.constant 0 : index
    %391 = vector.load %arg1[%c0_861, %c6_862, %c3_863, %c0_864, %c0_865] : memref<1x9x9x16x64xbf16, #tpu.memory_space<vmem>>, vector<1x1x1x16x64xbf16>
    %392 = vector.shape_cast %391 : vector<1x1x1x16x64xbf16> to vector<16x64xbf16>
    %c0_866 = arith.constant 0 : index
    %c6_867 = arith.constant 6 : index
    %c4_868 = arith.constant 4 : index
    %c0_869 = arith.constant 0 : index
    %c0_870 = arith.constant 0 : index
    %393 = vector.load %arg1[%c0_866, %c6_867, %c4_868, %c0_869, %c0_870] : memref<1x9x9x16x64xbf16, #tpu.memory_space<vmem>>, vector<1x1x1x16x64xbf16>
    %394 = vector.shape_cast %393 : vector<1x1x1x16x64xbf16> to vector<16x64xbf16>
    %395 = tpu.concatenate %388, %390, %392, %394 in 1 : vector<16x64xbf16>, vector<16x64xbf16>, vector<16x64xbf16>, vector<16x64xbf16> -> vector<16x256xbf16>
    %c0_871 = arith.constant 0 : index
    %c5_872 = arith.constant 5 : index
    %c4_873 = arith.constant 4 : index
    %c0_874 = arith.constant 0 : index
    %c0_875 = arith.constant 0 : index
    %396 = vector.load %arg1[%c0_871, %c5_872, %c4_873, %c0_874, %c0_875] : memref<1x9x9x16x64xbf16, #tpu.memory_space<vmem>>, vector<1x1x1x16x64xbf16>
    %397 = vector.shape_cast %396 : vector<1x1x1x16x64xbf16> to vector<16x64xbf16>
    %c0_876 = arith.constant 0 : index
    %c5_877 = arith.constant 5 : index
    %c5_878 = arith.constant 5 : index
    %c0_879 = arith.constant 0 : index
    %c0_880 = arith.constant 0 : index
    %398 = vector.load %arg1[%c0_876, %c5_877, %c5_878, %c0_879, %c0_880] : memref<1x9x9x16x64xbf16, #tpu.memory_space<vmem>>, vector<1x1x1x16x64xbf16>
    %399 = vector.shape_cast %398 : vector<1x1x1x16x64xbf16> to vector<16x64xbf16>
    %c0_881 = arith.constant 0 : index
    %c6_882 = arith.constant 6 : index
    %c4_883 = arith.constant 4 : index
    %c0_884 = arith.constant 0 : index
    %c0_885 = arith.constant 0 : index
    %400 = vector.load %arg1[%c0_881, %c6_882, %c4_883, %c0_884, %c0_885] : memref<1x9x9x16x64xbf16, #tpu.memory_space<vmem>>, vector<1x1x1x16x64xbf16>
    %401 = vector.shape_cast %400 : vector<1x1x1x16x64xbf16> to vector<16x64xbf16>
    %c0_886 = arith.constant 0 : index
    %c6_887 = arith.constant 6 : index
    %c5_888 = arith.constant 5 : index
    %c0_889 = arith.constant 0 : index
    %c0_890 = arith.constant 0 : index
    %402 = vector.load %arg1[%c0_886, %c6_887, %c5_888, %c0_889, %c0_890] : memref<1x9x9x16x64xbf16, #tpu.memory_space<vmem>>, vector<1x1x1x16x64xbf16>
    %403 = vector.shape_cast %402 : vector<1x1x1x16x64xbf16> to vector<16x64xbf16>
    %404 = tpu.concatenate %397, %399, %401, %403 in 1 : vector<16x64xbf16>, vector<16x64xbf16>, vector<16x64xbf16>, vector<16x64xbf16> -> vector<16x256xbf16>
    %c0_891 = arith.constant 0 : index
    %c5_892 = arith.constant 5 : index
    %c5_893 = arith.constant 5 : index
    %c0_894 = arith.constant 0 : index
    %c0_895 = arith.constant 0 : index
    %405 = vector.load %arg1[%c0_891, %c5_892, %c5_893, %c0_894, %c0_895] : memref<1x9x9x16x64xbf16, #tpu.memory_space<vmem>>, vector<1x1x1x16x64xbf16>
    %406 = vector.shape_cast %405 : vector<1x1x1x16x64xbf16> to vector<16x64xbf16>
    %c0_896 = arith.constant 0 : index
    %c5_897 = arith.constant 5 : index
    %c6_898 = arith.constant 6 : index
    %c0_899 = arith.constant 0 : index
    %c0_900 = arith.constant 0 : index
    %407 = vector.load %arg1[%c0_896, %c5_897, %c6_898, %c0_899, %c0_900] : memref<1x9x9x16x64xbf16, #tpu.memory_space<vmem>>, vector<1x1x1x16x64xbf16>
    %408 = vector.shape_cast %407 : vector<1x1x1x16x64xbf16> to vector<16x64xbf16>
    %c0_901 = arith.constant 0 : index
    %c6_902 = arith.constant 6 : index
    %c5_903 = arith.constant 5 : index
    %c0_904 = arith.constant 0 : index
    %c0_905 = arith.constant 0 : index
    %409 = vector.load %arg1[%c0_901, %c6_902, %c5_903, %c0_904, %c0_905] : memref<1x9x9x16x64xbf16, #tpu.memory_space<vmem>>, vector<1x1x1x16x64xbf16>
    %410 = vector.shape_cast %409 : vector<1x1x1x16x64xbf16> to vector<16x64xbf16>
    %c0_906 = arith.constant 0 : index
    %c6_907 = arith.constant 6 : index
    %c6_908 = arith.constant 6 : index
    %c0_909 = arith.constant 0 : index
    %c0_910 = arith.constant 0 : index
    %411 = vector.load %arg1[%c0_906, %c6_907, %c6_908, %c0_909, %c0_910] : memref<1x9x9x16x64xbf16, #tpu.memory_space<vmem>>, vector<1x1x1x16x64xbf16>
    %412 = vector.shape_cast %411 : vector<1x1x1x16x64xbf16> to vector<16x64xbf16>
    %413 = tpu.concatenate %406, %408, %410, %412 in 1 : vector<16x64xbf16>, vector<16x64xbf16>, vector<16x64xbf16>, vector<16x64xbf16> -> vector<16x256xbf16>
    %c0_911 = arith.constant 0 : index
    %c5_912 = arith.constant 5 : index
    %c6_913 = arith.constant 6 : index
    %c0_914 = arith.constant 0 : index
    %c0_915 = arith.constant 0 : index
    %414 = vector.load %arg1[%c0_911, %c5_912, %c6_913, %c0_914, %c0_915] : memref<1x9x9x16x64xbf16, #tpu.memory_space<vmem>>, vector<1x1x1x16x64xbf16>
    %415 = vector.shape_cast %414 : vector<1x1x1x16x64xbf16> to vector<16x64xbf16>
    %c0_916 = arith.constant 0 : index
    %c5_917 = arith.constant 5 : index
    %c7_918 = arith.constant 7 : index
    %c0_919 = arith.constant 0 : index
    %c0_920 = arith.constant 0 : index
    %416 = vector.load %arg1[%c0_916, %c5_917, %c7_918, %c0_919, %c0_920] : memref<1x9x9x16x64xbf16, #tpu.memory_space<vmem>>, vector<1x1x1x16x64xbf16>
    %417 = vector.shape_cast %416 : vector<1x1x1x16x64xbf16> to vector<16x64xbf16>
    %c0_921 = arith.constant 0 : index
    %c6_922 = arith.constant 6 : index
    %c6_923 = arith.constant 6 : index
    %c0_924 = arith.constant 0 : index
    %c0_925 = arith.constant 0 : index
    %418 = vector.load %arg1[%c0_921, %c6_922, %c6_923, %c0_924, %c0_925] : memref<1x9x9x16x64xbf16, #tpu.memory_space<vmem>>, vector<1x1x1x16x64xbf16>
    %419 = vector.shape_cast %418 : vector<1x1x1x16x64xbf16> to vector<16x64xbf16>
    %c0_926 = arith.constant 0 : index
    %c6_927 = arith.constant 6 : index
    %c7_928 = arith.constant 7 : index
    %c0_929 = arith.constant 0 : index
    %c0_930 = arith.constant 0 : index
    %420 = vector.load %arg1[%c0_926, %c6_927, %c7_928, %c0_929, %c0_930] : memref<1x9x9x16x64xbf16, #tpu.memory_space<vmem>>, vector<1x1x1x16x64xbf16>
    %421 = vector.shape_cast %420 : vector<1x1x1x16x64xbf16> to vector<16x64xbf16>
    %422 = tpu.concatenate %415, %417, %419, %421 in 1 : vector<16x64xbf16>, vector<16x64xbf16>, vector<16x64xbf16>, vector<16x64xbf16> -> vector<16x256xbf16>
    %c0_931 = arith.constant 0 : index
    %c5_932 = arith.constant 5 : index
    %c7_933 = arith.constant 7 : index
    %c0_934 = arith.constant 0 : index
    %c0_935 = arith.constant 0 : index
    %423 = vector.load %arg1[%c0_931, %c5_932, %c7_933, %c0_934, %c0_935] : memref<1x9x9x16x64xbf16, #tpu.memory_space<vmem>>, vector<1x1x1x16x64xbf16>
    %424 = vector.shape_cast %423 : vector<1x1x1x16x64xbf16> to vector<16x64xbf16>
    %c0_936 = arith.constant 0 : index
    %c5_937 = arith.constant 5 : index
    %c8_938 = arith.constant 8 : index
    %c0_939 = arith.constant 0 : index
    %c0_940 = arith.constant 0 : index
    %425 = vector.load %arg1[%c0_936, %c5_937, %c8_938, %c0_939, %c0_940] : memref<1x9x9x16x64xbf16, #tpu.memory_space<vmem>>, vector<1x1x1x16x64xbf16>
    %426 = vector.shape_cast %425 : vector<1x1x1x16x64xbf16> to vector<16x64xbf16>
    %c0_941 = arith.constant 0 : index
    %c6_942 = arith.constant 6 : index
    %c7_943 = arith.constant 7 : index
    %c0_944 = arith.constant 0 : index
    %c0_945 = arith.constant 0 : index
    %427 = vector.load %arg1[%c0_941, %c6_942, %c7_943, %c0_944, %c0_945] : memref<1x9x9x16x64xbf16, #tpu.memory_space<vmem>>, vector<1x1x1x16x64xbf16>
    %428 = vector.shape_cast %427 : vector<1x1x1x16x64xbf16> to vector<16x64xbf16>
    %c0_946 = arith.constant 0 : index
    %c6_947 = arith.constant 6 : index
    %c8_948 = arith.constant 8 : index
    %c0_949 = arith.constant 0 : index
    %c0_950 = arith.constant 0 : index
    %429 = vector.load %arg1[%c0_946, %c6_947, %c8_948, %c0_949, %c0_950] : memref<1x9x9x16x64xbf16, #tpu.memory_space<vmem>>, vector<1x1x1x16x64xbf16>
    %430 = vector.shape_cast %429 : vector<1x1x1x16x64xbf16> to vector<16x64xbf16>
    %431 = tpu.concatenate %424, %426, %428, %430 in 1 : vector<16x64xbf16>, vector<16x64xbf16>, vector<16x64xbf16>, vector<16x64xbf16> -> vector<16x256xbf16>
    %c0_951 = arith.constant 0 : index
    %c6_952 = arith.constant 6 : index
    %c0_953 = arith.constant 0 : index
    %c0_954 = arith.constant 0 : index
    %c0_955 = arith.constant 0 : index
    %432 = vector.load %arg1[%c0_951, %c6_952, %c0_953, %c0_954, %c0_955] : memref<1x9x9x16x64xbf16, #tpu.memory_space<vmem>>, vector<1x1x1x16x64xbf16>
    %433 = vector.shape_cast %432 : vector<1x1x1x16x64xbf16> to vector<16x64xbf16>
    %c0_956 = arith.constant 0 : index
    %c6_957 = arith.constant 6 : index
    %c1_958 = arith.constant 1 : index
    %c0_959 = arith.constant 0 : index
    %c0_960 = arith.constant 0 : index
    %434 = vector.load %arg1[%c0_956, %c6_957, %c1_958, %c0_959, %c0_960] : memref<1x9x9x16x64xbf16, #tpu.memory_space<vmem>>, vector<1x1x1x16x64xbf16>
    %435 = vector.shape_cast %434 : vector<1x1x1x16x64xbf16> to vector<16x64xbf16>
    %c0_961 = arith.constant 0 : index
    %c7_962 = arith.constant 7 : index
    %c0_963 = arith.constant 0 : index
    %c0_964 = arith.constant 0 : index
    %c0_965 = arith.constant 0 : index
    %436 = vector.load %arg1[%c0_961, %c7_962, %c0_963, %c0_964, %c0_965] : memref<1x9x9x16x64xbf16, #tpu.memory_space<vmem>>, vector<1x1x1x16x64xbf16>
    %437 = vector.shape_cast %436 : vector<1x1x1x16x64xbf16> to vector<16x64xbf16>
    %c0_966 = arith.constant 0 : index
    %c7_967 = arith.constant 7 : index
    %c1_968 = arith.constant 1 : index
    %c0_969 = arith.constant 0 : index
    %c0_970 = arith.constant 0 : index
    %438 = vector.load %arg1[%c0_966, %c7_967, %c1_968, %c0_969, %c0_970] : memref<1x9x9x16x64xbf16, #tpu.memory_space<vmem>>, vector<1x1x1x16x64xbf16>
    %439 = vector.shape_cast %438 : vector<1x1x1x16x64xbf16> to vector<16x64xbf16>
    %440 = tpu.concatenate %433, %435, %437, %439 in 1 : vector<16x64xbf16>, vector<16x64xbf16>, vector<16x64xbf16>, vector<16x64xbf16> -> vector<16x256xbf16>
    %c0_971 = arith.constant 0 : index
    %c6_972 = arith.constant 6 : index
    %c1_973 = arith.constant 1 : index
    %c0_974 = arith.constant 0 : index
    %c0_975 = arith.constant 0 : index
    %441 = vector.load %arg1[%c0_971, %c6_972, %c1_973, %c0_974, %c0_975] : memref<1x9x9x16x64xbf16, #tpu.memory_space<vmem>>, vector<1x1x1x16x64xbf16>
    %442 = vector.shape_cast %441 : vector<1x1x1x16x64xbf16> to vector<16x64xbf16>
    %c0_976 = arith.constant 0 : index
    %c6_977 = arith.constant 6 : index
    %c2_978 = arith.constant 2 : index
    %c0_979 = arith.constant 0 : index
    %c0_980 = arith.constant 0 : index
    %443 = vector.load %arg1[%c0_976, %c6_977, %c2_978, %c0_979, %c0_980] : memref<1x9x9x16x64xbf16, #tpu.memory_space<vmem>>, vector<1x1x1x16x64xbf16>
    %444 = vector.shape_cast %443 : vector<1x1x1x16x64xbf16> to vector<16x64xbf16>
    %c0_981 = arith.constant 0 : index
    %c7_982 = arith.constant 7 : index
    %c1_983 = arith.constant 1 : index
    %c0_984 = arith.constant 0 : index
    %c0_985 = arith.constant 0 : index
    %445 = vector.load %arg1[%c0_981, %c7_982, %c1_983, %c0_984, %c0_985] : memref<1x9x9x16x64xbf16, #tpu.memory_space<vmem>>, vector<1x1x1x16x64xbf16>
    %446 = vector.shape_cast %445 : vector<1x1x1x16x64xbf16> to vector<16x64xbf16>
    %c0_986 = arith.constant 0 : index
    %c7_987 = arith.constant 7 : index
    %c2_988 = arith.constant 2 : index
    %c0_989 = arith.constant 0 : index
    %c0_990 = arith.constant 0 : index
    %447 = vector.load %arg1[%c0_986, %c7_987, %c2_988, %c0_989, %c0_990] : memref<1x9x9x16x64xbf16, #tpu.memory_space<vmem>>, vector<1x1x1x16x64xbf16>
    %448 = vector.shape_cast %447 : vector<1x1x1x16x64xbf16> to vector<16x64xbf16>
    %449 = tpu.concatenate %442, %444, %446, %448 in 1 : vector<16x64xbf16>, vector<16x64xbf16>, vector<16x64xbf16>, vector<16x64xbf16> -> vector<16x256xbf16>
    %c0_991 = arith.constant 0 : index
    %c6_992 = arith.constant 6 : index
    %c2_993 = arith.constant 2 : index
    %c0_994 = arith.constant 0 : index
    %c0_995 = arith.constant 0 : index
    %450 = vector.load %arg1[%c0_991, %c6_992, %c2_993, %c0_994, %c0_995] : memref<1x9x9x16x64xbf16, #tpu.memory_space<vmem>>, vector<1x1x1x16x64xbf16>
    %451 = vector.shape_cast %450 : vector<1x1x1x16x64xbf16> to vector<16x64xbf16>
    %c0_996 = arith.constant 0 : index
    %c6_997 = arith.constant 6 : index
    %c3_998 = arith.constant 3 : index
    %c0_999 = arith.constant 0 : index
    %c0_1000 = arith.constant 0 : index
    %452 = vector.load %arg1[%c0_996, %c6_997, %c3_998, %c0_999, %c0_1000] : memref<1x9x9x16x64xbf16, #tpu.memory_space<vmem>>, vector<1x1x1x16x64xbf16>
    %453 = vector.shape_cast %452 : vector<1x1x1x16x64xbf16> to vector<16x64xbf16>
    %c0_1001 = arith.constant 0 : index
    %c7_1002 = arith.constant 7 : index
    %c2_1003 = arith.constant 2 : index
    %c0_1004 = arith.constant 0 : index
    %c0_1005 = arith.constant 0 : index
    %454 = vector.load %arg1[%c0_1001, %c7_1002, %c2_1003, %c0_1004, %c0_1005] : memref<1x9x9x16x64xbf16, #tpu.memory_space<vmem>>, vector<1x1x1x16x64xbf16>
    %455 = vector.shape_cast %454 : vector<1x1x1x16x64xbf16> to vector<16x64xbf16>
    %c0_1006 = arith.constant 0 : index
    %c7_1007 = arith.constant 7 : index
    %c3_1008 = arith.constant 3 : index
    %c0_1009 = arith.constant 0 : index
    %c0_1010 = arith.constant 0 : index
    %456 = vector.load %arg1[%c0_1006, %c7_1007, %c3_1008, %c0_1009, %c0_1010] : memref<1x9x9x16x64xbf16, #tpu.memory_space<vmem>>, vector<1x1x1x16x64xbf16>
    %457 = vector.shape_cast %456 : vector<1x1x1x16x64xbf16> to vector<16x64xbf16>
    %458 = tpu.concatenate %451, %453, %455, %457 in 1 : vector<16x64xbf16>, vector<16x64xbf16>, vector<16x64xbf16>, vector<16x64xbf16> -> vector<16x256xbf16>
    %c0_1011 = arith.constant 0 : index
    %c6_1012 = arith.constant 6 : index
    %c3_1013 = arith.constant 3 : index
    %c0_1014 = arith.constant 0 : index
    %c0_1015 = arith.constant 0 : index
    %459 = vector.load %arg1[%c0_1011, %c6_1012, %c3_1013, %c0_1014, %c0_1015] : memref<1x9x9x16x64xbf16, #tpu.memory_space<vmem>>, vector<1x1x1x16x64xbf16>
    %460 = vector.shape_cast %459 : vector<1x1x1x16x64xbf16> to vector<16x64xbf16>
    %c0_1016 = arith.constant 0 : index
    %c6_1017 = arith.constant 6 : index
    %c4_1018 = arith.constant 4 : index
    %c0_1019 = arith.constant 0 : index
    %c0_1020 = arith.constant 0 : index
    %461 = vector.load %arg1[%c0_1016, %c6_1017, %c4_1018, %c0_1019, %c0_1020] : memref<1x9x9x16x64xbf16, #tpu.memory_space<vmem>>, vector<1x1x1x16x64xbf16>
    %462 = vector.shape_cast %461 : vector<1x1x1x16x64xbf16> to vector<16x64xbf16>
    %c0_1021 = arith.constant 0 : index
    %c7_1022 = arith.constant 7 : index
    %c3_1023 = arith.constant 3 : index
    %c0_1024 = arith.constant 0 : index
    %c0_1025 = arith.constant 0 : index
    %463 = vector.load %arg1[%c0_1021, %c7_1022, %c3_1023, %c0_1024, %c0_1025] : memref<1x9x9x16x64xbf16, #tpu.memory_space<vmem>>, vector<1x1x1x16x64xbf16>
    %464 = vector.shape_cast %463 : vector<1x1x1x16x64xbf16> to vector<16x64xbf16>
    %c0_1026 = arith.constant 0 : index
    %c7_1027 = arith.constant 7 : index
    %c4_1028 = arith.constant 4 : index
    %c0_1029 = arith.constant 0 : index
    %c0_1030 = arith.constant 0 : index
    %465 = vector.load %arg1[%c0_1026, %c7_1027, %c4_1028, %c0_1029, %c0_1030] : memref<1x9x9x16x64xbf16, #tpu.memory_space<vmem>>, vector<1x1x1x16x64xbf16>
    %466 = vector.shape_cast %465 : vector<1x1x1x16x64xbf16> to vector<16x64xbf16>
    %467 = tpu.concatenate %460, %462, %464, %466 in 1 : vector<16x64xbf16>, vector<16x64xbf16>, vector<16x64xbf16>, vector<16x64xbf16> -> vector<16x256xbf16>
    %c0_1031 = arith.constant 0 : index
    %c6_1032 = arith.constant 6 : index
    %c4_1033 = arith.constant 4 : index
    %c0_1034 = arith.constant 0 : index
    %c0_1035 = arith.constant 0 : index
    %468 = vector.load %arg1[%c0_1031, %c6_1032, %c4_1033, %c0_1034, %c0_1035] : memref<1x9x9x16x64xbf16, #tpu.memory_space<vmem>>, vector<1x1x1x16x64xbf16>
    %469 = vector.shape_cast %468 : vector<1x1x1x16x64xbf16> to vector<16x64xbf16>
    %c0_1036 = arith.constant 0 : index
    %c6_1037 = arith.constant 6 : index
    %c5_1038 = arith.constant 5 : index
    %c0_1039 = arith.constant 0 : index
    %c0_1040 = arith.constant 0 : index
    %470 = vector.load %arg1[%c0_1036, %c6_1037, %c5_1038, %c0_1039, %c0_1040] : memref<1x9x9x16x64xbf16, #tpu.memory_space<vmem>>, vector<1x1x1x16x64xbf16>
    %471 = vector.shape_cast %470 : vector<1x1x1x16x64xbf16> to vector<16x64xbf16>
    %c0_1041 = arith.constant 0 : index
    %c7_1042 = arith.constant 7 : index
    %c4_1043 = arith.constant 4 : index
    %c0_1044 = arith.constant 0 : index
    %c0_1045 = arith.constant 0 : index
    %472 = vector.load %arg1[%c0_1041, %c7_1042, %c4_1043, %c0_1044, %c0_1045] : memref<1x9x9x16x64xbf16, #tpu.memory_space<vmem>>, vector<1x1x1x16x64xbf16>
    %473 = vector.shape_cast %472 : vector<1x1x1x16x64xbf16> to vector<16x64xbf16>
    %c0_1046 = arith.constant 0 : index
    %c7_1047 = arith.constant 7 : index
    %c5_1048 = arith.constant 5 : index
    %c0_1049 = arith.constant 0 : index
    %c0_1050 = arith.constant 0 : index
    %474 = vector.load %arg1[%c0_1046, %c7_1047, %c5_1048, %c0_1049, %c0_1050] : memref<1x9x9x16x64xbf16, #tpu.memory_space<vmem>>, vector<1x1x1x16x64xbf16>
    %475 = vector.shape_cast %474 : vector<1x1x1x16x64xbf16> to vector<16x64xbf16>
    %476 = tpu.concatenate %469, %471, %473, %475 in 1 : vector<16x64xbf16>, vector<16x64xbf16>, vector<16x64xbf16>, vector<16x64xbf16> -> vector<16x256xbf16>
    %c0_1051 = arith.constant 0 : index
    %c6_1052 = arith.constant 6 : index
    %c5_1053 = arith.constant 5 : index
    %c0_1054 = arith.constant 0 : index
    %c0_1055 = arith.constant 0 : index
    %477 = vector.load %arg1[%c0_1051, %c6_1052, %c5_1053, %c0_1054, %c0_1055] : memref<1x9x9x16x64xbf16, #tpu.memory_space<vmem>>, vector<1x1x1x16x64xbf16>
    %478 = vector.shape_cast %477 : vector<1x1x1x16x64xbf16> to vector<16x64xbf16>
    %c0_1056 = arith.constant 0 : index
    %c6_1057 = arith.constant 6 : index
    %c6_1058 = arith.constant 6 : index
    %c0_1059 = arith.constant 0 : index
    %c0_1060 = arith.constant 0 : index
    %479 = vector.load %arg1[%c0_1056, %c6_1057, %c6_1058, %c0_1059, %c0_1060] : memref<1x9x9x16x64xbf16, #tpu.memory_space<vmem>>, vector<1x1x1x16x64xbf16>
    %480 = vector.shape_cast %479 : vector<1x1x1x16x64xbf16> to vector<16x64xbf16>
    %c0_1061 = arith.constant 0 : index
    %c7_1062 = arith.constant 7 : index
    %c5_1063 = arith.constant 5 : index
    %c0_1064 = arith.constant 0 : index
    %c0_1065 = arith.constant 0 : index
    %481 = vector.load %arg1[%c0_1061, %c7_1062, %c5_1063, %c0_1064, %c0_1065] : memref<1x9x9x16x64xbf16, #tpu.memory_space<vmem>>, vector<1x1x1x16x64xbf16>
    %482 = vector.shape_cast %481 : vector<1x1x1x16x64xbf16> to vector<16x64xbf16>
    %c0_1066 = arith.constant 0 : index
    %c7_1067 = arith.constant 7 : index
    %c6_1068 = arith.constant 6 : index
    %c0_1069 = arith.constant 0 : index
    %c0_1070 = arith.constant 0 : index
    %483 = vector.load %arg1[%c0_1066, %c7_1067, %c6_1068, %c0_1069, %c0_1070] : memref<1x9x9x16x64xbf16, #tpu.memory_space<vmem>>, vector<1x1x1x16x64xbf16>
    %484 = vector.shape_cast %483 : vector<1x1x1x16x64xbf16> to vector<16x64xbf16>
    %485 = tpu.concatenate %478, %480, %482, %484 in 1 : vector<16x64xbf16>, vector<16x64xbf16>, vector<16x64xbf16>, vector<16x64xbf16> -> vector<16x256xbf16>
    %c0_1071 = arith.constant 0 : index
    %c6_1072 = arith.constant 6 : index
    %c6_1073 = arith.constant 6 : index
    %c0_1074 = arith.constant 0 : index
    %c0_1075 = arith.constant 0 : index
    %486 = vector.load %arg1[%c0_1071, %c6_1072, %c6_1073, %c0_1074, %c0_1075] : memref<1x9x9x16x64xbf16, #tpu.memory_space<vmem>>, vector<1x1x1x16x64xbf16>
    %487 = vector.shape_cast %486 : vector<1x1x1x16x64xbf16> to vector<16x64xbf16>
    %c0_1076 = arith.constant 0 : index
    %c6_1077 = arith.constant 6 : index
    %c7_1078 = arith.constant 7 : index
    %c0_1079 = arith.constant 0 : index
    %c0_1080 = arith.constant 0 : index
    %488 = vector.load %arg1[%c0_1076, %c6_1077, %c7_1078, %c0_1079, %c0_1080] : memref<1x9x9x16x64xbf16, #tpu.memory_space<vmem>>, vector<1x1x1x16x64xbf16>
    %489 = vector.shape_cast %488 : vector<1x1x1x16x64xbf16> to vector<16x64xbf16>
    %c0_1081 = arith.constant 0 : index
    %c7_1082 = arith.constant 7 : index
    %c6_1083 = arith.constant 6 : index
    %c0_1084 = arith.constant 0 : index
    %c0_1085 = arith.constant 0 : index
    %490 = vector.load %arg1[%c0_1081, %c7_1082, %c6_1083, %c0_1084, %c0_1085] : memref<1x9x9x16x64xbf16, #tpu.memory_space<vmem>>, vector<1x1x1x16x64xbf16>
    %491 = vector.shape_cast %490 : vector<1x1x1x16x64xbf16> to vector<16x64xbf16>
    %c0_1086 = arith.constant 0 : index
    %c7_1087 = arith.constant 7 : index
    %c7_1088 = arith.constant 7 : index
    %c0_1089 = arith.constant 0 : index
    %c0_1090 = arith.constant 0 : index
    %492 = vector.load %arg1[%c0_1086, %c7_1087, %c7_1088, %c0_1089, %c0_1090] : memref<1x9x9x16x64xbf16, #tpu.memory_space<vmem>>, vector<1x1x1x16x64xbf16>
    %493 = vector.shape_cast %492 : vector<1x1x1x16x64xbf16> to vector<16x64xbf16>
    %494 = tpu.concatenate %487, %489, %491, %493 in 1 : vector<16x64xbf16>, vector<16x64xbf16>, vector<16x64xbf16>, vector<16x64xbf16> -> vector<16x256xbf16>
    %c0_1091 = arith.constant 0 : index
    %c6_1092 = arith.constant 6 : index
    %c7_1093 = arith.constant 7 : index
    %c0_1094 = arith.constant 0 : index
    %c0_1095 = arith.constant 0 : index
    %495 = vector.load %arg1[%c0_1091, %c6_1092, %c7_1093, %c0_1094, %c0_1095] : memref<1x9x9x16x64xbf16, #tpu.memory_space<vmem>>, vector<1x1x1x16x64xbf16>
    %496 = vector.shape_cast %495 : vector<1x1x1x16x64xbf16> to vector<16x64xbf16>
    %c0_1096 = arith.constant 0 : index
    %c6_1097 = arith.constant 6 : index
    %c8_1098 = arith.constant 8 : index
    %c0_1099 = arith.constant 0 : index
    %c0_1100 = arith.constant 0 : index
    %497 = vector.load %arg1[%c0_1096, %c6_1097, %c8_1098, %c0_1099, %c0_1100] : memref<1x9x9x16x64xbf16, #tpu.memory_space<vmem>>, vector<1x1x1x16x64xbf16>
    %498 = vector.shape_cast %497 : vector<1x1x1x16x64xbf16> to vector<16x64xbf16>
    %c0_1101 = arith.constant 0 : index
    %c7_1102 = arith.constant 7 : index
    %c7_1103 = arith.constant 7 : index
    %c0_1104 = arith.constant 0 : index
    %c0_1105 = arith.constant 0 : index
    %499 = vector.load %arg1[%c0_1101, %c7_1102, %c7_1103, %c0_1104, %c0_1105] : memref<1x9x9x16x64xbf16, #tpu.memory_space<vmem>>, vector<1x1x1x16x64xbf16>
    %500 = vector.shape_cast %499 : vector<1x1x1x16x64xbf16> to vector<16x64xbf16>
    %c0_1106 = arith.constant 0 : index
    %c7_1107 = arith.constant 7 : index
    %c8_1108 = arith.constant 8 : index
    %c0_1109 = arith.constant 0 : index
    %c0_1110 = arith.constant 0 : index
    %501 = vector.load %arg1[%c0_1106, %c7_1107, %c8_1108, %c0_1109, %c0_1110] : memref<1x9x9x16x64xbf16, #tpu.memory_space<vmem>>, vector<1x1x1x16x64xbf16>
    %502 = vector.shape_cast %501 : vector<1x1x1x16x64xbf16> to vector<16x64xbf16>
    %503 = tpu.concatenate %496, %498, %500, %502 in 1 : vector<16x64xbf16>, vector<16x64xbf16>, vector<16x64xbf16>, vector<16x64xbf16> -> vector<16x256xbf16>
    %c0_1111 = arith.constant 0 : index
    %c7_1112 = arith.constant 7 : index
    %c0_1113 = arith.constant 0 : index
    %c0_1114 = arith.constant 0 : index
    %c0_1115 = arith.constant 0 : index
    %504 = vector.load %arg1[%c0_1111, %c7_1112, %c0_1113, %c0_1114, %c0_1115] : memref<1x9x9x16x64xbf16, #tpu.memory_space<vmem>>, vector<1x1x1x16x64xbf16>
    %505 = vector.shape_cast %504 : vector<1x1x1x16x64xbf16> to vector<16x64xbf16>
    %c0_1116 = arith.constant 0 : index
    %c7_1117 = arith.constant 7 : index
    %c1_1118 = arith.constant 1 : index
    %c0_1119 = arith.constant 0 : index
    %c0_1120 = arith.constant 0 : index
    %506 = vector.load %arg1[%c0_1116, %c7_1117, %c1_1118, %c0_1119, %c0_1120] : memref<1x9x9x16x64xbf16, #tpu.memory_space<vmem>>, vector<1x1x1x16x64xbf16>
    %507 = vector.shape_cast %506 : vector<1x1x1x16x64xbf16> to vector<16x64xbf16>
    %c0_1121 = arith.constant 0 : index
    %c8_1122 = arith.constant 8 : index
    %c0_1123 = arith.constant 0 : index
    %c0_1124 = arith.constant 0 : index
    %c0_1125 = arith.constant 0 : index
    %508 = vector.load %arg1[%c0_1121, %c8_1122, %c0_1123, %c0_1124, %c0_1125] : memref<1x9x9x16x64xbf16, #tpu.memory_space<vmem>>, vector<1x1x1x16x64xbf16>
    %509 = vector.shape_cast %508 : vector<1x1x1x16x64xbf16> to vector<16x64xbf16>
    %c0_1126 = arith.constant 0 : index
    %c8_1127 = arith.constant 8 : index
    %c1_1128 = arith.constant 1 : index
    %c0_1129 = arith.constant 0 : index
    %c0_1130 = arith.constant 0 : index
    %510 = vector.load %arg1[%c0_1126, %c8_1127, %c1_1128, %c0_1129, %c0_1130] : memref<1x9x9x16x64xbf16, #tpu.memory_space<vmem>>, vector<1x1x1x16x64xbf16>
    %511 = vector.shape_cast %510 : vector<1x1x1x16x64xbf16> to vector<16x64xbf16>
    %512 = tpu.concatenate %505, %507, %509, %511 in 1 : vector<16x64xbf16>, vector<16x64xbf16>, vector<16x64xbf16>, vector<16x64xbf16> -> vector<16x256xbf16>
    %c0_1131 = arith.constant 0 : index
    %c7_1132 = arith.constant 7 : index
    %c1_1133 = arith.constant 1 : index
    %c0_1134 = arith.constant 0 : index
    %c0_1135 = arith.constant 0 : index
    %513 = vector.load %arg1[%c0_1131, %c7_1132, %c1_1133, %c0_1134, %c0_1135] : memref<1x9x9x16x64xbf16, #tpu.memory_space<vmem>>, vector<1x1x1x16x64xbf16>
    %514 = vector.shape_cast %513 : vector<1x1x1x16x64xbf16> to vector<16x64xbf16>
    %c0_1136 = arith.constant 0 : index
    %c7_1137 = arith.constant 7 : index
    %c2_1138 = arith.constant 2 : index
    %c0_1139 = arith.constant 0 : index
    %c0_1140 = arith.constant 0 : index
    %515 = vector.load %arg1[%c0_1136, %c7_1137, %c2_1138, %c0_1139, %c0_1140] : memref<1x9x9x16x64xbf16, #tpu.memory_space<vmem>>, vector<1x1x1x16x64xbf16>
    %516 = vector.shape_cast %515 : vector<1x1x1x16x64xbf16> to vector<16x64xbf16>
    %c0_1141 = arith.constant 0 : index
    %c8_1142 = arith.constant 8 : index
    %c1_1143 = arith.constant 1 : index
    %c0_1144 = arith.constant 0 : index
    %c0_1145 = arith.constant 0 : index
    %517 = vector.load %arg1[%c0_1141, %c8_1142, %c1_1143, %c0_1144, %c0_1145] : memref<1x9x9x16x64xbf16, #tpu.memory_space<vmem>>, vector<1x1x1x16x64xbf16>
    %518 = vector.shape_cast %517 : vector<1x1x1x16x64xbf16> to vector<16x64xbf16>
    %c0_1146 = arith.constant 0 : index
    %c8_1147 = arith.constant 8 : index
    %c2_1148 = arith.constant 2 : index
    %c0_1149 = arith.constant 0 : index
    %c0_1150 = arith.constant 0 : index
    %519 = vector.load %arg1[%c0_1146, %c8_1147, %c2_1148, %c0_1149, %c0_1150] : memref<1x9x9x16x64xbf16, #tpu.memory_space<vmem>>, vector<1x1x1x16x64xbf16>
    %520 = vector.shape_cast %519 : vector<1x1x1x16x64xbf16> to vector<16x64xbf16>
    %521 = tpu.concatenate %514, %516, %518, %520 in 1 : vector<16x64xbf16>, vector<16x64xbf16>, vector<16x64xbf16>, vector<16x64xbf16> -> vector<16x256xbf16>
    %c0_1151 = arith.constant 0 : index
    %c7_1152 = arith.constant 7 : index
    %c2_1153 = arith.constant 2 : index
    %c0_1154 = arith.constant 0 : index
    %c0_1155 = arith.constant 0 : index
    %522 = vector.load %arg1[%c0_1151, %c7_1152, %c2_1153, %c0_1154, %c0_1155] : memref<1x9x9x16x64xbf16, #tpu.memory_space<vmem>>, vector<1x1x1x16x64xbf16>
    %523 = vector.shape_cast %522 : vector<1x1x1x16x64xbf16> to vector<16x64xbf16>
    %c0_1156 = arith.constant 0 : index
    %c7_1157 = arith.constant 7 : index
    %c3_1158 = arith.constant 3 : index
    %c0_1159 = arith.constant 0 : index
    %c0_1160 = arith.constant 0 : index
    %524 = vector.load %arg1[%c0_1156, %c7_1157, %c3_1158, %c0_1159, %c0_1160] : memref<1x9x9x16x64xbf16, #tpu.memory_space<vmem>>, vector<1x1x1x16x64xbf16>
    %525 = vector.shape_cast %524 : vector<1x1x1x16x64xbf16> to vector<16x64xbf16>
    %c0_1161 = arith.constant 0 : index
    %c8_1162 = arith.constant 8 : index
    %c2_1163 = arith.constant 2 : index
    %c0_1164 = arith.constant 0 : index
    %c0_1165 = arith.constant 0 : index
    %526 = vector.load %arg1[%c0_1161, %c8_1162, %c2_1163, %c0_1164, %c0_1165] : memref<1x9x9x16x64xbf16, #tpu.memory_space<vmem>>, vector<1x1x1x16x64xbf16>
    %527 = vector.shape_cast %526 : vector<1x1x1x16x64xbf16> to vector<16x64xbf16>
    %c0_1166 = arith.constant 0 : index
    %c8_1167 = arith.constant 8 : index
    %c3_1168 = arith.constant 3 : index
    %c0_1169 = arith.constant 0 : index
    %c0_1170 = arith.constant 0 : index
    %528 = vector.load %arg1[%c0_1166, %c8_1167, %c3_1168, %c0_1169, %c0_1170] : memref<1x9x9x16x64xbf16, #tpu.memory_space<vmem>>, vector<1x1x1x16x64xbf16>
    %529 = vector.shape_cast %528 : vector<1x1x1x16x64xbf16> to vector<16x64xbf16>
    %530 = tpu.concatenate %523, %525, %527, %529 in 1 : vector<16x64xbf16>, vector<16x64xbf16>, vector<16x64xbf16>, vector<16x64xbf16> -> vector<16x256xbf16>
    %c0_1171 = arith.constant 0 : index
    %c7_1172 = arith.constant 7 : index
    %c3_1173 = arith.constant 3 : index
    %c0_1174 = arith.constant 0 : index
    %c0_1175 = arith.constant 0 : index
    %531 = vector.load %arg1[%c0_1171, %c7_1172, %c3_1173, %c0_1174, %c0_1175] : memref<1x9x9x16x64xbf16, #tpu.memory_space<vmem>>, vector<1x1x1x16x64xbf16>
    %532 = vector.shape_cast %531 : vector<1x1x1x16x64xbf16> to vector<16x64xbf16>
    %c0_1176 = arith.constant 0 : index
    %c7_1177 = arith.constant 7 : index
    %c4_1178 = arith.constant 4 : index
    %c0_1179 = arith.constant 0 : index
    %c0_1180 = arith.constant 0 : index
    %533 = vector.load %arg1[%c0_1176, %c7_1177, %c4_1178, %c0_1179, %c0_1180] : memref<1x9x9x16x64xbf16, #tpu.memory_space<vmem>>, vector<1x1x1x16x64xbf16>
    %534 = vector.shape_cast %533 : vector<1x1x1x16x64xbf16> to vector<16x64xbf16>
    %c0_1181 = arith.constant 0 : index
    %c8_1182 = arith.constant 8 : index
    %c3_1183 = arith.constant 3 : index
    %c0_1184 = arith.constant 0 : index
    %c0_1185 = arith.constant 0 : index
    %535 = vector.load %arg1[%c0_1181, %c8_1182, %c3_1183, %c0_1184, %c0_1185] : memref<1x9x9x16x64xbf16, #tpu.memory_space<vmem>>, vector<1x1x1x16x64xbf16>
    %536 = vector.shape_cast %535 : vector<1x1x1x16x64xbf16> to vector<16x64xbf16>
    %c0_1186 = arith.constant 0 : index
    %c8_1187 = arith.constant 8 : index
    %c4_1188 = arith.constant 4 : index
    %c0_1189 = arith.constant 0 : index
    %c0_1190 = arith.constant 0 : index
    %537 = vector.load %arg1[%c0_1186, %c8_1187, %c4_1188, %c0_1189, %c0_1190] : memref<1x9x9x16x64xbf16, #tpu.memory_space<vmem>>, vector<1x1x1x16x64xbf16>
    %538 = vector.shape_cast %537 : vector<1x1x1x16x64xbf16> to vector<16x64xbf16>
    %539 = tpu.concatenate %532, %534, %536, %538 in 1 : vector<16x64xbf16>, vector<16x64xbf16>, vector<16x64xbf16>, vector<16x64xbf16> -> vector<16x256xbf16>
    %c0_1191 = arith.constant 0 : index
    %c7_1192 = arith.constant 7 : index
    %c4_1193 = arith.constant 4 : index
    %c0_1194 = arith.constant 0 : index
    %c0_1195 = arith.constant 0 : index
    %540 = vector.load %arg1[%c0_1191, %c7_1192, %c4_1193, %c0_1194, %c0_1195] : memref<1x9x9x16x64xbf16, #tpu.memory_space<vmem>>, vector<1x1x1x16x64xbf16>
    %541 = vector.shape_cast %540 : vector<1x1x1x16x64xbf16> to vector<16x64xbf16>
    %c0_1196 = arith.constant 0 : index
    %c7_1197 = arith.constant 7 : index
    %c5_1198 = arith.constant 5 : index
    %c0_1199 = arith.constant 0 : index
    %c0_1200 = arith.constant 0 : index
    %542 = vector.load %arg1[%c0_1196, %c7_1197, %c5_1198, %c0_1199, %c0_1200] : memref<1x9x9x16x64xbf16, #tpu.memory_space<vmem>>, vector<1x1x1x16x64xbf16>
    %543 = vector.shape_cast %542 : vector<1x1x1x16x64xbf16> to vector<16x64xbf16>
    %c0_1201 = arith.constant 0 : index
    %c8_1202 = arith.constant 8 : index
    %c4_1203 = arith.constant 4 : index
    %c0_1204 = arith.constant 0 : index
    %c0_1205 = arith.constant 0 : index
    %544 = vector.load %arg1[%c0_1201, %c8_1202, %c4_1203, %c0_1204, %c0_1205] : memref<1x9x9x16x64xbf16, #tpu.memory_space<vmem>>, vector<1x1x1x16x64xbf16>
    %545 = vector.shape_cast %544 : vector<1x1x1x16x64xbf16> to vector<16x64xbf16>
    %c0_1206 = arith.constant 0 : index
    %c8_1207 = arith.constant 8 : index
    %c5_1208 = arith.constant 5 : index
    %c0_1209 = arith.constant 0 : index
    %c0_1210 = arith.constant 0 : index
    %546 = vector.load %arg1[%c0_1206, %c8_1207, %c5_1208, %c0_1209, %c0_1210] : memref<1x9x9x16x64xbf16, #tpu.memory_space<vmem>>, vector<1x1x1x16x64xbf16>
    %547 = vector.shape_cast %546 : vector<1x1x1x16x64xbf16> to vector<16x64xbf16>
    %548 = tpu.concatenate %541, %543, %545, %547 in 1 : vector<16x64xbf16>, vector<16x64xbf16>, vector<16x64xbf16>, vector<16x64xbf16> -> vector<16x256xbf16>
    %c0_1211 = arith.constant 0 : index
    %c7_1212 = arith.constant 7 : index
    %c5_1213 = arith.constant 5 : index
    %c0_1214 = arith.constant 0 : index
    %c0_1215 = arith.constant 0 : index
    %549 = vector.load %arg1[%c0_1211, %c7_1212, %c5_1213, %c0_1214, %c0_1215] : memref<1x9x9x16x64xbf16, #tpu.memory_space<vmem>>, vector<1x1x1x16x64xbf16>
    %550 = vector.shape_cast %549 : vector<1x1x1x16x64xbf16> to vector<16x64xbf16>
    %c0_1216 = arith.constant 0 : index
    %c7_1217 = arith.constant 7 : index
    %c6_1218 = arith.constant 6 : index
    %c0_1219 = arith.constant 0 : index
    %c0_1220 = arith.constant 0 : index
    %551 = vector.load %arg1[%c0_1216, %c7_1217, %c6_1218, %c0_1219, %c0_1220] : memref<1x9x9x16x64xbf16, #tpu.memory_space<vmem>>, vector<1x1x1x16x64xbf16>
    %552 = vector.shape_cast %551 : vector<1x1x1x16x64xbf16> to vector<16x64xbf16>
    %c0_1221 = arith.constant 0 : index
    %c8_1222 = arith.constant 8 : index
    %c5_1223 = arith.constant 5 : index
    %c0_1224 = arith.constant 0 : index
    %c0_1225 = arith.constant 0 : index
    %553 = vector.load %arg1[%c0_1221, %c8_1222, %c5_1223, %c0_1224, %c0_1225] : memref<1x9x9x16x64xbf16, #tpu.memory_space<vmem>>, vector<1x1x1x16x64xbf16>
    %554 = vector.shape_cast %553 : vector<1x1x1x16x64xbf16> to vector<16x64xbf16>
    %c0_1226 = arith.constant 0 : index
    %c8_1227 = arith.constant 8 : index
    %c6_1228 = arith.constant 6 : index
    %c0_1229 = arith.constant 0 : index
    %c0_1230 = arith.constant 0 : index
    %555 = vector.load %arg1[%c0_1226, %c8_1227, %c6_1228, %c0_1229, %c0_1230] : memref<1x9x9x16x64xbf16, #tpu.memory_space<vmem>>, vector<1x1x1x16x64xbf16>
    %556 = vector.shape_cast %555 : vector<1x1x1x16x64xbf16> to vector<16x64xbf16>
    %557 = tpu.concatenate %550, %552, %554, %556 in 1 : vector<16x64xbf16>, vector<16x64xbf16>, vector<16x64xbf16>, vector<16x64xbf16> -> vector<16x256xbf16>
    %c0_1231 = arith.constant 0 : index
    %c7_1232 = arith.constant 7 : index
    %c6_1233 = arith.constant 6 : index
    %c0_1234 = arith.constant 0 : index
    %c0_1235 = arith.constant 0 : index
    %558 = vector.load %arg1[%c0_1231, %c7_1232, %c6_1233, %c0_1234, %c0_1235] : memref<1x9x9x16x64xbf16, #tpu.memory_space<vmem>>, vector<1x1x1x16x64xbf16>
    %559 = vector.shape_cast %558 : vector<1x1x1x16x64xbf16> to vector<16x64xbf16>
    %c0_1236 = arith.constant 0 : index
    %c7_1237 = arith.constant 7 : index
    %c7_1238 = arith.constant 7 : index
    %c0_1239 = arith.constant 0 : index
    %c0_1240 = arith.constant 0 : index
    %560 = vector.load %arg1[%c0_1236, %c7_1237, %c7_1238, %c0_1239, %c0_1240] : memref<1x9x9x16x64xbf16, #tpu.memory_space<vmem>>, vector<1x1x1x16x64xbf16>
    %561 = vector.shape_cast %560 : vector<1x1x1x16x64xbf16> to vector<16x64xbf16>
    %c0_1241 = arith.constant 0 : index
    %c8_1242 = arith.constant 8 : index
    %c6_1243 = arith.constant 6 : index
    %c0_1244 = arith.constant 0 : index
    %c0_1245 = arith.constant 0 : index
    %562 = vector.load %arg1[%c0_1241, %c8_1242, %c6_1243, %c0_1244, %c0_1245] : memref<1x9x9x16x64xbf16, #tpu.memory_space<vmem>>, vector<1x1x1x16x64xbf16>
    %563 = vector.shape_cast %562 : vector<1x1x1x16x64xbf16> to vector<16x64xbf16>
    %c0_1246 = arith.constant 0 : index
    %c8_1247 = arith.constant 8 : index
    %c7_1248 = arith.constant 7 : index
    %c0_1249 = arith.constant 0 : index
    %c0_1250 = arith.constant 0 : index
    %564 = vector.load %arg1[%c0_1246, %c8_1247, %c7_1248, %c0_1249, %c0_1250] : memref<1x9x9x16x64xbf16, #tpu.memory_space<vmem>>, vector<1x1x1x16x64xbf16>
    %565 = vector.shape_cast %564 : vector<1x1x1x16x64xbf16> to vector<16x64xbf16>
    %566 = tpu.concatenate %559, %561, %563, %565 in 1 : vector<16x64xbf16>, vector<16x64xbf16>, vector<16x64xbf16>, vector<16x64xbf16> -> vector<16x256xbf16>
    %c0_1251 = arith.constant 0 : index
    %c7_1252 = arith.constant 7 : index
    %c7_1253 = arith.constant 7 : index
    %c0_1254 = arith.constant 0 : index
    %c0_1255 = arith.constant 0 : index
    %567 = vector.load %arg1[%c0_1251, %c7_1252, %c7_1253, %c0_1254, %c0_1255] : memref<1x9x9x16x64xbf16, #tpu.memory_space<vmem>>, vector<1x1x1x16x64xbf16>
    %568 = vector.shape_cast %567 : vector<1x1x1x16x64xbf16> to vector<16x64xbf16>
    %c0_1256 = arith.constant 0 : index
    %c7_1257 = arith.constant 7 : index
    %c8_1258 = arith.constant 8 : index
    %c0_1259 = arith.constant 0 : index
    %c0_1260 = arith.constant 0 : index
    %569 = vector.load %arg1[%c0_1256, %c7_1257, %c8_1258, %c0_1259, %c0_1260] : memref<1x9x9x16x64xbf16, #tpu.memory_space<vmem>>, vector<1x1x1x16x64xbf16>
    %570 = vector.shape_cast %569 : vector<1x1x1x16x64xbf16> to vector<16x64xbf16>
    %c0_1261 = arith.constant 0 : index
    %c8_1262 = arith.constant 8 : index
    %c7_1263 = arith.constant 7 : index
    %c0_1264 = arith.constant 0 : index
    %c0_1265 = arith.constant 0 : index
    %571 = vector.load %arg1[%c0_1261, %c8_1262, %c7_1263, %c0_1264, %c0_1265] : memref<1x9x9x16x64xbf16, #tpu.memory_space<vmem>>, vector<1x1x1x16x64xbf16>
    %572 = vector.shape_cast %571 : vector<1x1x1x16x64xbf16> to vector<16x64xbf16>
    %c0_1266 = arith.constant 0 : index
    %c8_1267 = arith.constant 8 : index
    %c8_1268 = arith.constant 8 : index
    %c0_1269 = arith.constant 0 : index
    %c0_1270 = arith.constant 0 : index
    %573 = vector.load %arg1[%c0_1266, %c8_1267, %c8_1268, %c0_1269, %c0_1270] : memref<1x9x9x16x64xbf16, #tpu.memory_space<vmem>>, vector<1x1x1x16x64xbf16>
    %574 = vector.shape_cast %573 : vector<1x1x1x16x64xbf16> to vector<16x64xbf16>
    %575 = tpu.concatenate %568, %570, %572, %574 in 1 : vector<16x64xbf16>, vector<16x64xbf16>, vector<16x64xbf16>, vector<16x64xbf16> -> vector<16x256xbf16>
    %576 = tpu.concatenate %8, %17, %26, %35, %44, %53, %62, %71, %80, %89, %98, %107, %116, %125, %134, %143 in 0 : vector<16x256xbf16>, vector<16x256xbf16>, vector<16x256xbf16>, vector<16x256xbf16>, vector<16x256xbf16>, vector<16x256xbf16>, vector<16x256xbf16>, vector<16x256xbf16>, vector<16x256xbf16>, vector<16x256xbf16>, vector<16x256xbf16>, vector<16x256xbf16>, vector<16x256xbf16>, vector<16x256xbf16>, vector<16x256xbf16>, vector<16x256xbf16> -> vector<256x256xbf16>
    %577 = tpu.concatenate %152, %161, %170, %179, %188, %197, %206, %215, %224, %233, %242, %251, %260, %269, %278, %287 in 0 : vector<16x256xbf16>, vector<16x256xbf16>, vector<16x256xbf16>, vector<16x256xbf16>, vector<16x256xbf16>, vector<16x256xbf16>, vector<16x256xbf16>, vector<16x256xbf16>, vector<16x256xbf16>, vector<16x256xbf16>, vector<16x256xbf16>, vector<16x256xbf16>, vector<16x256xbf16>, vector<16x256xbf16>, vector<16x256xbf16>, vector<16x256xbf16> -> vector<256x256xbf16>
    %578 = tpu.concatenate %296, %305, %314, %323, %332, %341, %350, %359, %368, %377, %386, %395, %404, %413, %422, %431 in 0 : vector<16x256xbf16>, vector<16x256xbf16>, vector<16x256xbf16>, vector<16x256xbf16>, vector<16x256xbf16>, vector<16x256xbf16>, vector<16x256xbf16>, vector<16x256xbf16>, vector<16x256xbf16>, vector<16x256xbf16>, vector<16x256xbf16>, vector<16x256xbf16>, vector<16x256xbf16>, vector<16x256xbf16>, vector<16x256xbf16>, vector<16x256xbf16> -> vector<256x256xbf16>
    %579 = tpu.concatenate %440, %449, %458, %467, %476, %485, %494, %503, %512, %521, %530, %539, %548, %557, %566, %575 in 0 : vector<16x256xbf16>, vector<16x256xbf16>, vector<16x256xbf16>, vector<16x256xbf16>, vector<16x256xbf16>, vector<16x256xbf16>, vector<16x256xbf16>, vector<16x256xbf16>, vector<16x256xbf16>, vector<16x256xbf16>, vector<16x256xbf16>, vector<16x256xbf16>, vector<16x256xbf16>, vector<16x256xbf16>, vector<16x256xbf16>, vector<16x256xbf16> -> vector<256x256xbf16>
    %580 = tpu.concatenate %576, %577, %578, %579 in 0 : vector<256x256xbf16>, vector<256x256xbf16>, vector<256x256xbf16>, vector<256x256xbf16> -> vector<1024x256xbf16>
    %c0_1271 = arith.constant 0 : index
    %c0_1272 = arith.constant 0 : index
    %581 = vector.load %arg2[%c0_1271, %c0_1272] : memref<256x32xbf16, #tpu.memory_space<vmem>>, vector<256x32xbf16>
    %cst = arith.constant dense<0.000000e+00> : vector<1024x32xf32>
    %582 = tpu.matmul %580, %581, %cst {dimension_numbers = #tpu.dot_dimension_numbers<[1], [0], [0], [1], [0, 0, 1, 1], [], []>} : vector<1024x256xbf16>, vector<256x32xbf16>, vector<1024x32xf32> -> vector<1024x32xf32>
    %c0_1273 = arith.constant 0 : index
    %c0_1274 = arith.constant 0 : index
    %583 = vector.load %arg3[%c0_1273, %c0_1274] : memref<1x32xf32, #tpu.memory_space<vmem>>, vector<1x32xf32>
    %584 = vector.broadcast %583 : vector<1x32xf32> to vector<1024x32xf32>
    %585 = arith.addf %582, %584 : vector<1024x32xf32>
    %cst_1275 = arith.constant 0.000000e+00 : f32
    %586 = vector.broadcast %cst_1275 : f32 to vector<1024x32xf32>
    %587 = arith.maximumf %585, %586 : vector<1024x32xf32>
    %588 = arith.truncf %587 : vector<1024x32xf32> to vector<1024x32xbf16>
    %589 = vector.extract_strided_slice %588 {offsets = [0, 0], sizes = [16, 32], strides = [1, 1]} : vector<1024x32xbf16> to vector<16x32xbf16>
    %590 = vector.extract_strided_slice %588 {offsets = [16, 0], sizes = [16, 32], strides = [1, 1]} : vector<1024x32xbf16> to vector<16x32xbf16>
    %591 = vector.extract_strided_slice %588 {offsets = [32, 0], sizes = [16, 32], strides = [1, 1]} : vector<1024x32xbf16> to vector<16x32xbf16>
    %592 = vector.extract_strided_slice %588 {offsets = [48, 0], sizes = [16, 32], strides = [1, 1]} : vector<1024x32xbf16> to vector<16x32xbf16>
    %593 = vector.extract_strided_slice %588 {offsets = [128, 0], sizes = [16, 32], strides = [1, 1]} : vector<1024x32xbf16> to vector<16x32xbf16>
    %594 = vector.extract_strided_slice %588 {offsets = [144, 0], sizes = [16, 32], strides = [1, 1]} : vector<1024x32xbf16> to vector<16x32xbf16>
    %595 = vector.extract_strided_slice %588 {offsets = [160, 0], sizes = [16, 32], strides = [1, 1]} : vector<1024x32xbf16> to vector<16x32xbf16>
    %596 = vector.extract_strided_slice %588 {offsets = [176, 0], sizes = [16, 32], strides = [1, 1]} : vector<1024x32xbf16> to vector<16x32xbf16>
    %597 = vector.extract_strided_slice %588 {offsets = [256, 0], sizes = [16, 32], strides = [1, 1]} : vector<1024x32xbf16> to vector<16x32xbf16>
    %598 = vector.extract_strided_slice %588 {offsets = [272, 0], sizes = [16, 32], strides = [1, 1]} : vector<1024x32xbf16> to vector<16x32xbf16>
    %599 = vector.extract_strided_slice %588 {offsets = [288, 0], sizes = [16, 32], strides = [1, 1]} : vector<1024x32xbf16> to vector<16x32xbf16>
    %600 = vector.extract_strided_slice %588 {offsets = [304, 0], sizes = [16, 32], strides = [1, 1]} : vector<1024x32xbf16> to vector<16x32xbf16>
    %601 = vector.extract_strided_slice %588 {offsets = [384, 0], sizes = [16, 32], strides = [1, 1]} : vector<1024x32xbf16> to vector<16x32xbf16>
    %602 = vector.extract_strided_slice %588 {offsets = [400, 0], sizes = [16, 32], strides = [1, 1]} : vector<1024x32xbf16> to vector<16x32xbf16>
    %603 = vector.extract_strided_slice %588 {offsets = [416, 0], sizes = [16, 32], strides = [1, 1]} : vector<1024x32xbf16> to vector<16x32xbf16>
    %604 = vector.extract_strided_slice %588 {offsets = [432, 0], sizes = [16, 32], strides = [1, 1]} : vector<1024x32xbf16> to vector<16x32xbf16>
    %605 = tpu.concatenate %589, %590, %591, %592, %593, %594, %595, %596, %597, %598, %599, %600, %601, %602, %603, %604 in 1 : vector<16x32xbf16>, vector<16x32xbf16>, vector<16x32xbf16>, vector<16x32xbf16>, vector<16x32xbf16>, vector<16x32xbf16>, vector<16x32xbf16>, vector<16x32xbf16>, vector<16x32xbf16>, vector<16x32xbf16>, vector<16x32xbf16>, vector<16x32xbf16>, vector<16x32xbf16>, vector<16x32xbf16>, vector<16x32xbf16>, vector<16x32xbf16> -> vector<16x512xbf16>
    %606 = vector.extract_strided_slice %588 {offsets = [32, 0], sizes = [16, 32], strides = [1, 1]} : vector<1024x32xbf16> to vector<16x32xbf16>
    %607 = vector.extract_strided_slice %588 {offsets = [48, 0], sizes = [16, 32], strides = [1, 1]} : vector<1024x32xbf16> to vector<16x32xbf16>
    %608 = vector.extract_strided_slice %588 {offsets = [64, 0], sizes = [16, 32], strides = [1, 1]} : vector<1024x32xbf16> to vector<16x32xbf16>
    %609 = vector.extract_strided_slice %588 {offsets = [80, 0], sizes = [16, 32], strides = [1, 1]} : vector<1024x32xbf16> to vector<16x32xbf16>
    %610 = vector.extract_strided_slice %588 {offsets = [160, 0], sizes = [16, 32], strides = [1, 1]} : vector<1024x32xbf16> to vector<16x32xbf16>
    %611 = vector.extract_strided_slice %588 {offsets = [176, 0], sizes = [16, 32], strides = [1, 1]} : vector<1024x32xbf16> to vector<16x32xbf16>
    %612 = vector.extract_strided_slice %588 {offsets = [192, 0], sizes = [16, 32], strides = [1, 1]} : vector<1024x32xbf16> to vector<16x32xbf16>
    %613 = vector.extract_strided_slice %588 {offsets = [208, 0], sizes = [16, 32], strides = [1, 1]} : vector<1024x32xbf16> to vector<16x32xbf16>
    %614 = vector.extract_strided_slice %588 {offsets = [288, 0], sizes = [16, 32], strides = [1, 1]} : vector<1024x32xbf16> to vector<16x32xbf16>
    %615 = vector.extract_strided_slice %588 {offsets = [304, 0], sizes = [16, 32], strides = [1, 1]} : vector<1024x32xbf16> to vector<16x32xbf16>
    %616 = vector.extract_strided_slice %588 {offsets = [320, 0], sizes = [16, 32], strides = [1, 1]} : vector<1024x32xbf16> to vector<16x32xbf16>
    %617 = vector.extract_strided_slice %588 {offsets = [336, 0], sizes = [16, 32], strides = [1, 1]} : vector<1024x32xbf16> to vector<16x32xbf16>
    %618 = vector.extract_strided_slice %588 {offsets = [416, 0], sizes = [16, 32], strides = [1, 1]} : vector<1024x32xbf16> to vector<16x32xbf16>
    %619 = vector.extract_strided_slice %588 {offsets = [432, 0], sizes = [16, 32], strides = [1, 1]} : vector<1024x32xbf16> to vector<16x32xbf16>
    %620 = vector.extract_strided_slice %588 {offsets = [448, 0], sizes = [16, 32], strides = [1, 1]} : vector<1024x32xbf16> to vector<16x32xbf16>
    %621 = vector.extract_strided_slice %588 {offsets = [464, 0], sizes = [16, 32], strides = [1, 1]} : vector<1024x32xbf16> to vector<16x32xbf16>
    %622 = tpu.concatenate %606, %607, %608, %609, %610, %611, %612, %613, %614, %615, %616, %617, %618, %619, %620, %621 in 1 : vector<16x32xbf16>, vector<16x32xbf16>, vector<16x32xbf16>, vector<16x32xbf16>, vector<16x32xbf16>, vector<16x32xbf16>, vector<16x32xbf16>, vector<16x32xbf16>, vector<16x32xbf16>, vector<16x32xbf16>, vector<16x32xbf16>, vector<16x32xbf16>, vector<16x32xbf16>, vector<16x32xbf16>, vector<16x32xbf16>, vector<16x32xbf16> -> vector<16x512xbf16>
    %623 = vector.extract_strided_slice %588 {offsets = [64, 0], sizes = [16, 32], strides = [1, 1]} : vector<1024x32xbf16> to vector<16x32xbf16>
    %624 = vector.extract_strided_slice %588 {offsets = [80, 0], sizes = [16, 32], strides = [1, 1]} : vector<1024x32xbf16> to vector<16x32xbf16>
    %625 = vector.extract_strided_slice %588 {offsets = [96, 0], sizes = [16, 32], strides = [1, 1]} : vector<1024x32xbf16> to vector<16x32xbf16>
    %626 = vector.extract_strided_slice %588 {offsets = [112, 0], sizes = [16, 32], strides = [1, 1]} : vector<1024x32xbf16> to vector<16x32xbf16>
    %627 = vector.extract_strided_slice %588 {offsets = [192, 0], sizes = [16, 32], strides = [1, 1]} : vector<1024x32xbf16> to vector<16x32xbf16>
    %628 = vector.extract_strided_slice %588 {offsets = [208, 0], sizes = [16, 32], strides = [1, 1]} : vector<1024x32xbf16> to vector<16x32xbf16>
    %629 = vector.extract_strided_slice %588 {offsets = [224, 0], sizes = [16, 32], strides = [1, 1]} : vector<1024x32xbf16> to vector<16x32xbf16>
    %630 = vector.extract_strided_slice %588 {offsets = [240, 0], sizes = [16, 32], strides = [1, 1]} : vector<1024x32xbf16> to vector<16x32xbf16>
    %631 = vector.extract_strided_slice %588 {offsets = [320, 0], sizes = [16, 32], strides = [1, 1]} : vector<1024x32xbf16> to vector<16x32xbf16>
    %632 = vector.extract_strided_slice %588 {offsets = [336, 0], sizes = [16, 32], strides = [1, 1]} : vector<1024x32xbf16> to vector<16x32xbf16>
    %633 = vector.extract_strided_slice %588 {offsets = [352, 0], sizes = [16, 32], strides = [1, 1]} : vector<1024x32xbf16> to vector<16x32xbf16>
    %634 = vector.extract_strided_slice %588 {offsets = [368, 0], sizes = [16, 32], strides = [1, 1]} : vector<1024x32xbf16> to vector<16x32xbf16>
    %635 = vector.extract_strided_slice %588 {offsets = [448, 0], sizes = [16, 32], strides = [1, 1]} : vector<1024x32xbf16> to vector<16x32xbf16>
    %636 = vector.extract_strided_slice %588 {offsets = [464, 0], sizes = [16, 32], strides = [1, 1]} : vector<1024x32xbf16> to vector<16x32xbf16>
    %637 = vector.extract_strided_slice %588 {offsets = [480, 0], sizes = [16, 32], strides = [1, 1]} : vector<1024x32xbf16> to vector<16x32xbf16>
    %638 = vector.extract_strided_slice %588 {offsets = [496, 0], sizes = [16, 32], strides = [1, 1]} : vector<1024x32xbf16> to vector<16x32xbf16>
    %639 = tpu.concatenate %623, %624, %625, %626, %627, %628, %629, %630, %631, %632, %633, %634, %635, %636, %637, %638 in 1 : vector<16x32xbf16>, vector<16x32xbf16>, vector<16x32xbf16>, vector<16x32xbf16>, vector<16x32xbf16>, vector<16x32xbf16>, vector<16x32xbf16>, vector<16x32xbf16>, vector<16x32xbf16>, vector<16x32xbf16>, vector<16x32xbf16>, vector<16x32xbf16>, vector<16x32xbf16>, vector<16x32xbf16>, vector<16x32xbf16>, vector<16x32xbf16> -> vector<16x512xbf16>
    %640 = vector.extract_strided_slice %588 {offsets = [256, 0], sizes = [16, 32], strides = [1, 1]} : vector<1024x32xbf16> to vector<16x32xbf16>
    %641 = vector.extract_strided_slice %588 {offsets = [272, 0], sizes = [16, 32], strides = [1, 1]} : vector<1024x32xbf16> to vector<16x32xbf16>
    %642 = vector.extract_strided_slice %588 {offsets = [288, 0], sizes = [16, 32], strides = [1, 1]} : vector<1024x32xbf16> to vector<16x32xbf16>
    %643 = vector.extract_strided_slice %588 {offsets = [304, 0], sizes = [16, 32], strides = [1, 1]} : vector<1024x32xbf16> to vector<16x32xbf16>
    %644 = vector.extract_strided_slice %588 {offsets = [384, 0], sizes = [16, 32], strides = [1, 1]} : vector<1024x32xbf16> to vector<16x32xbf16>
    %645 = vector.extract_strided_slice %588 {offsets = [400, 0], sizes = [16, 32], strides = [1, 1]} : vector<1024x32xbf16> to vector<16x32xbf16>
    %646 = vector.extract_strided_slice %588 {offsets = [416, 0], sizes = [16, 32], strides = [1, 1]} : vector<1024x32xbf16> to vector<16x32xbf16>
    %647 = vector.extract_strided_slice %588 {offsets = [432, 0], sizes = [16, 32], strides = [1, 1]} : vector<1024x32xbf16> to vector<16x32xbf16>
    %648 = vector.extract_strided_slice %588 {offsets = [512, 0], sizes = [16, 32], strides = [1, 1]} : vector<1024x32xbf16> to vector<16x32xbf16>
    %649 = vector.extract_strided_slice %588 {offsets = [528, 0], sizes = [16, 32], strides = [1, 1]} : vector<1024x32xbf16> to vector<16x32xbf16>
    %650 = vector.extract_strided_slice %588 {offsets = [544, 0], sizes = [16, 32], strides = [1, 1]} : vector<1024x32xbf16> to vector<16x32xbf16>
    %651 = vector.extract_strided_slice %588 {offsets = [560, 0], sizes = [16, 32], strides = [1, 1]} : vector<1024x32xbf16> to vector<16x32xbf16>
    %652 = vector.extract_strided_slice %588 {offsets = [640, 0], sizes = [16, 32], strides = [1, 1]} : vector<1024x32xbf16> to vector<16x32xbf16>
    %653 = vector.extract_strided_slice %588 {offsets = [656, 0], sizes = [16, 32], strides = [1, 1]} : vector<1024x32xbf16> to vector<16x32xbf16>
    %654 = vector.extract_strided_slice %588 {offsets = [672, 0], sizes = [16, 32], strides = [1, 1]} : vector<1024x32xbf16> to vector<16x32xbf16>
    %655 = vector.extract_strided_slice %588 {offsets = [688, 0], sizes = [16, 32], strides = [1, 1]} : vector<1024x32xbf16> to vector<16x32xbf16>
    %656 = tpu.concatenate %640, %641, %642, %643, %644, %645, %646, %647, %648, %649, %650, %651, %652, %653, %654, %655 in 1 : vector<16x32xbf16>, vector<16x32xbf16>, vector<16x32xbf16>, vector<16x32xbf16>, vector<16x32xbf16>, vector<16x32xbf16>, vector<16x32xbf16>, vector<16x32xbf16>, vector<16x32xbf16>, vector<16x32xbf16>, vector<16x32xbf16>, vector<16x32xbf16>, vector<16x32xbf16>, vector<16x32xbf16>, vector<16x32xbf16>, vector<16x32xbf16> -> vector<16x512xbf16>
    %657 = vector.extract_strided_slice %588 {offsets = [288, 0], sizes = [16, 32], strides = [1, 1]} : vector<1024x32xbf16> to vector<16x32xbf16>
    %658 = vector.extract_strided_slice %588 {offsets = [304, 0], sizes = [16, 32], strides = [1, 1]} : vector<1024x32xbf16> to vector<16x32xbf16>
    %659 = vector.extract_strided_slice %588 {offsets = [320, 0], sizes = [16, 32], strides = [1, 1]} : vector<1024x32xbf16> to vector<16x32xbf16>
    %660 = vector.extract_strided_slice %588 {offsets = [336, 0], sizes = [16, 32], strides = [1, 1]} : vector<1024x32xbf16> to vector<16x32xbf16>
    %661 = vector.extract_strided_slice %588 {offsets = [416, 0], sizes = [16, 32], strides = [1, 1]} : vector<1024x32xbf16> to vector<16x32xbf16>
    %662 = vector.extract_strided_slice %588 {offsets = [432, 0], sizes = [16, 32], strides = [1, 1]} : vector<1024x32xbf16> to vector<16x32xbf16>
    %663 = vector.extract_strided_slice %588 {offsets = [448, 0], sizes = [16, 32], strides = [1, 1]} : vector<1024x32xbf16> to vector<16x32xbf16>
    %664 = vector.extract_strided_slice %588 {offsets = [464, 0], sizes = [16, 32], strides = [1, 1]} : vector<1024x32xbf16> to vector<16x32xbf16>
    %665 = vector.extract_strided_slice %588 {offsets = [544, 0], sizes = [16, 32], strides = [1, 1]} : vector<1024x32xbf16> to vector<16x32xbf16>
    %666 = vector.extract_strided_slice %588 {offsets = [560, 0], sizes = [16, 32], strides = [1, 1]} : vector<1024x32xbf16> to vector<16x32xbf16>
    %667 = vector.extract_strided_slice %588 {offsets = [576, 0], sizes = [16, 32], strides = [1, 1]} : vector<1024x32xbf16> to vector<16x32xbf16>
    %668 = vector.extract_strided_slice %588 {offsets = [592, 0], sizes = [16, 32], strides = [1, 1]} : vector<1024x32xbf16> to vector<16x32xbf16>
    %669 = vector.extract_strided_slice %588 {offsets = [672, 0], sizes = [16, 32], strides = [1, 1]} : vector<1024x32xbf16> to vector<16x32xbf16>
    %670 = vector.extract_strided_slice %588 {offsets = [688, 0], sizes = [16, 32], strides = [1, 1]} : vector<1024x32xbf16> to vector<16x32xbf16>
    %671 = vector.extract_strided_slice %588 {offsets = [704, 0], sizes = [16, 32], strides = [1, 1]} : vector<1024x32xbf16> to vector<16x32xbf16>
    %672 = vector.extract_strided_slice %588 {offsets = [720, 0], sizes = [16, 32], strides = [1, 1]} : vector<1024x32xbf16> to vector<16x32xbf16>
    %673 = tpu.concatenate %657, %658, %659, %660, %661, %662, %663, %664, %665, %666, %667, %668, %669, %670, %671, %672 in 1 : vector<16x32xbf16>, vector<16x32xbf16>, vector<16x32xbf16>, vector<16x32xbf16>, vector<16x32xbf16>, vector<16x32xbf16>, vector<16x32xbf16>, vector<16x32xbf16>, vector<16x32xbf16>, vector<16x32xbf16>, vector<16x32xbf16>, vector<16x32xbf16>, vector<16x32xbf16>, vector<16x32xbf16>, vector<16x32xbf16>, vector<16x32xbf16> -> vector<16x512xbf16>
    %674 = vector.extract_strided_slice %588 {offsets = [320, 0], sizes = [16, 32], strides = [1, 1]} : vector<1024x32xbf16> to vector<16x32xbf16>
    %675 = vector.extract_strided_slice %588 {offsets = [336, 0], sizes = [16, 32], strides = [1, 1]} : vector<1024x32xbf16> to vector<16x32xbf16>
    %676 = vector.extract_strided_slice %588 {offsets = [352, 0], sizes = [16, 32], strides = [1, 1]} : vector<1024x32xbf16> to vector<16x32xbf16>
    %677 = vector.extract_strided_slice %588 {offsets = [368, 0], sizes = [16, 32], strides = [1, 1]} : vector<1024x32xbf16> to vector<16x32xbf16>
    %678 = vector.extract_strided_slice %588 {offsets = [448, 0], sizes = [16, 32], strides = [1, 1]} : vector<1024x32xbf16> to vector<16x32xbf16>
    %679 = vector.extract_strided_slice %588 {offsets = [464, 0], sizes = [16, 32], strides = [1, 1]} : vector<1024x32xbf16> to vector<16x32xbf16>
    %680 = vector.extract_strided_slice %588 {offsets = [480, 0], sizes = [16, 32], strides = [1, 1]} : vector<1024x32xbf16> to vector<16x32xbf16>
    %681 = vector.extract_strided_slice %588 {offsets = [496, 0], sizes = [16, 32], strides = [1, 1]} : vector<1024x32xbf16> to vector<16x32xbf16>
    %682 = vector.extract_strided_slice %588 {offsets = [576, 0], sizes = [16, 32], strides = [1, 1]} : vector<1024x32xbf16> to vector<16x32xbf16>
    %683 = vector.extract_strided_slice %588 {offsets = [592, 0], sizes = [16, 32], strides = [1, 1]} : vector<1024x32xbf16> to vector<16x32xbf16>
    %684 = vector.extract_strided_slice %588 {offsets = [608, 0], sizes = [16, 32], strides = [1, 1]} : vector<1024x32xbf16> to vector<16x32xbf16>
    %685 = vector.extract_strided_slice %588 {offsets = [624, 0], sizes = [16, 32], strides = [1, 1]} : vector<1024x32xbf16> to vector<16x32xbf16>
    %686 = vector.extract_strided_slice %588 {offsets = [704, 0], sizes = [16, 32], strides = [1, 1]} : vector<1024x32xbf16> to vector<16x32xbf16>
    %687 = vector.extract_strided_slice %588 {offsets = [720, 0], sizes = [16, 32], strides = [1, 1]} : vector<1024x32xbf16> to vector<16x32xbf16>
    %688 = vector.extract_strided_slice %588 {offsets = [736, 0], sizes = [16, 32], strides = [1, 1]} : vector<1024x32xbf16> to vector<16x32xbf16>
    %689 = vector.extract_strided_slice %588 {offsets = [752, 0], sizes = [16, 32], strides = [1, 1]} : vector<1024x32xbf16> to vector<16x32xbf16>
    %690 = tpu.concatenate %674, %675, %676, %677, %678, %679, %680, %681, %682, %683, %684, %685, %686, %687, %688, %689 in 1 : vector<16x32xbf16>, vector<16x32xbf16>, vector<16x32xbf16>, vector<16x32xbf16>, vector<16x32xbf16>, vector<16x32xbf16>, vector<16x32xbf16>, vector<16x32xbf16>, vector<16x32xbf16>, vector<16x32xbf16>, vector<16x32xbf16>, vector<16x32xbf16>, vector<16x32xbf16>, vector<16x32xbf16>, vector<16x32xbf16>, vector<16x32xbf16> -> vector<16x512xbf16>
    %691 = vector.extract_strided_slice %588 {offsets = [512, 0], sizes = [16, 32], strides = [1, 1]} : vector<1024x32xbf16> to vector<16x32xbf16>
    %692 = vector.extract_strided_slice %588 {offsets = [528, 0], sizes = [16, 32], strides = [1, 1]} : vector<1024x32xbf16> to vector<16x32xbf16>
    %693 = vector.extract_strided_slice %588 {offsets = [544, 0], sizes = [16, 32], strides = [1, 1]} : vector<1024x32xbf16> to vector<16x32xbf16>
    %694 = vector.extract_strided_slice %588 {offsets = [560, 0], sizes = [16, 32], strides = [1, 1]} : vector<1024x32xbf16> to vector<16x32xbf16>
    %695 = vector.extract_strided_slice %588 {offsets = [640, 0], sizes = [16, 32], strides = [1, 1]} : vector<1024x32xbf16> to vector<16x32xbf16>
    %696 = vector.extract_strided_slice %588 {offsets = [656, 0], sizes = [16, 32], strides = [1, 1]} : vector<1024x32xbf16> to vector<16x32xbf16>
    %697 = vector.extract_strided_slice %588 {offsets = [672, 0], sizes = [16, 32], strides = [1, 1]} : vector<1024x32xbf16> to vector<16x32xbf16>
    %698 = vector.extract_strided_slice %588 {offsets = [688, 0], sizes = [16, 32], strides = [1, 1]} : vector<1024x32xbf16> to vector<16x32xbf16>
    %699 = vector.extract_strided_slice %588 {offsets = [768, 0], sizes = [16, 32], strides = [1, 1]} : vector<1024x32xbf16> to vector<16x32xbf16>
    %700 = vector.extract_strided_slice %588 {offsets = [784, 0], sizes = [16, 32], strides = [1, 1]} : vector<1024x32xbf16> to vector<16x32xbf16>
    %701 = vector.extract_strided_slice %588 {offsets = [800, 0], sizes = [16, 32], strides = [1, 1]} : vector<1024x32xbf16> to vector<16x32xbf16>
    %702 = vector.extract_strided_slice %588 {offsets = [816, 0], sizes = [16, 32], strides = [1, 1]} : vector<1024x32xbf16> to vector<16x32xbf16>
    %703 = vector.extract_strided_slice %588 {offsets = [896, 0], sizes = [16, 32], strides = [1, 1]} : vector<1024x32xbf16> to vector<16x32xbf16>
    %704 = vector.extract_strided_slice %588 {offsets = [912, 0], sizes = [16, 32], strides = [1, 1]} : vector<1024x32xbf16> to vector<16x32xbf16>
    %705 = vector.extract_strided_slice %588 {offsets = [928, 0], sizes = [16, 32], strides = [1, 1]} : vector<1024x32xbf16> to vector<16x32xbf16>
    %706 = vector.extract_strided_slice %588 {offsets = [944, 0], sizes = [16, 32], strides = [1, 1]} : vector<1024x32xbf16> to vector<16x32xbf16>
    %707 = tpu.concatenate %691, %692, %693, %694, %695, %696, %697, %698, %699, %700, %701, %702, %703, %704, %705, %706 in 1 : vector<16x32xbf16>, vector<16x32xbf16>, vector<16x32xbf16>, vector<16x32xbf16>, vector<16x32xbf16>, vector<16x32xbf16>, vector<16x32xbf16>, vector<16x32xbf16>, vector<16x32xbf16>, vector<16x32xbf16>, vector<16x32xbf16>, vector<16x32xbf16>, vector<16x32xbf16>, vector<16x32xbf16>, vector<16x32xbf16>, vector<16x32xbf16> -> vector<16x512xbf16>
    %708 = vector.extract_strided_slice %588 {offsets = [544, 0], sizes = [16, 32], strides = [1, 1]} : vector<1024x32xbf16> to vector<16x32xbf16>
    %709 = vector.extract_strided_slice %588 {offsets = [560, 0], sizes = [16, 32], strides = [1, 1]} : vector<1024x32xbf16> to vector<16x32xbf16>
    %710 = vector.extract_strided_slice %588 {offsets = [576, 0], sizes = [16, 32], strides = [1, 1]} : vector<1024x32xbf16> to vector<16x32xbf16>
    %711 = vector.extract_strided_slice %588 {offsets = [592, 0], sizes = [16, 32], strides = [1, 1]} : vector<1024x32xbf16> to vector<16x32xbf16>
    %712 = vector.extract_strided_slice %588 {offsets = [672, 0], sizes = [16, 32], strides = [1, 1]} : vector<1024x32xbf16> to vector<16x32xbf16>
    %713 = vector.extract_strided_slice %588 {offsets = [688, 0], sizes = [16, 32], strides = [1, 1]} : vector<1024x32xbf16> to vector<16x32xbf16>
    %714 = vector.extract_strided_slice %588 {offsets = [704, 0], sizes = [16, 32], strides = [1, 1]} : vector<1024x32xbf16> to vector<16x32xbf16>
    %715 = vector.extract_strided_slice %588 {offsets = [720, 0], sizes = [16, 32], strides = [1, 1]} : vector<1024x32xbf16> to vector<16x32xbf16>
    %716 = vector.extract_strided_slice %588 {offsets = [800, 0], sizes = [16, 32], strides = [1, 1]} : vector<1024x32xbf16> to vector<16x32xbf16>
    %717 = vector.extract_strided_slice %588 {offsets = [816, 0], sizes = [16, 32], strides = [1, 1]} : vector<1024x32xbf16> to vector<16x32xbf16>
    %718 = vector.extract_strided_slice %588 {offsets = [832, 0], sizes = [16, 32], strides = [1, 1]} : vector<1024x32xbf16> to vector<16x32xbf16>
    %719 = vector.extract_strided_slice %588 {offsets = [848, 0], sizes = [16, 32], strides = [1, 1]} : vector<1024x32xbf16> to vector<16x32xbf16>
    %720 = vector.extract_strided_slice %588 {offsets = [928, 0], sizes = [16, 32], strides = [1, 1]} : vector<1024x32xbf16> to vector<16x32xbf16>
    %721 = vector.extract_strided_slice %588 {offsets = [944, 0], sizes = [16, 32], strides = [1, 1]} : vector<1024x32xbf16> to vector<16x32xbf16>
    %722 = vector.extract_strided_slice %588 {offsets = [960, 0], sizes = [16, 32], strides = [1, 1]} : vector<1024x32xbf16> to vector<16x32xbf16>
    %723 = vector.extract_strided_slice %588 {offsets = [976, 0], sizes = [16, 32], strides = [1, 1]} : vector<1024x32xbf16> to vector<16x32xbf16>
    %724 = tpu.concatenate %708, %709, %710, %711, %712, %713, %714, %715, %716, %717, %718, %719, %720, %721, %722, %723 in 1 : vector<16x32xbf16>, vector<16x32xbf16>, vector<16x32xbf16>, vector<16x32xbf16>, vector<16x32xbf16>, vector<16x32xbf16>, vector<16x32xbf16>, vector<16x32xbf16>, vector<16x32xbf16>, vector<16x32xbf16>, vector<16x32xbf16>, vector<16x32xbf16>, vector<16x32xbf16>, vector<16x32xbf16>, vector<16x32xbf16>, vector<16x32xbf16> -> vector<16x512xbf16>
    %725 = vector.extract_strided_slice %588 {offsets = [576, 0], sizes = [16, 32], strides = [1, 1]} : vector<1024x32xbf16> to vector<16x32xbf16>
    %726 = vector.extract_strided_slice %588 {offsets = [592, 0], sizes = [16, 32], strides = [1, 1]} : vector<1024x32xbf16> to vector<16x32xbf16>
    %727 = vector.extract_strided_slice %588 {offsets = [608, 0], sizes = [16, 32], strides = [1, 1]} : vector<1024x32xbf16> to vector<16x32xbf16>
    %728 = vector.extract_strided_slice %588 {offsets = [624, 0], sizes = [16, 32], strides = [1, 1]} : vector<1024x32xbf16> to vector<16x32xbf16>
    %729 = vector.extract_strided_slice %588 {offsets = [704, 0], sizes = [16, 32], strides = [1, 1]} : vector<1024x32xbf16> to vector<16x32xbf16>
    %730 = vector.extract_strided_slice %588 {offsets = [720, 0], sizes = [16, 32], strides = [1, 1]} : vector<1024x32xbf16> to vector<16x32xbf16>
    %731 = vector.extract_strided_slice %588 {offsets = [736, 0], sizes = [16, 32], strides = [1, 1]} : vector<1024x32xbf16> to vector<16x32xbf16>
    %732 = vector.extract_strided_slice %588 {offsets = [752, 0], sizes = [16, 32], strides = [1, 1]} : vector<1024x32xbf16> to vector<16x32xbf16>
    %733 = vector.extract_strided_slice %588 {offsets = [832, 0], sizes = [16, 32], strides = [1, 1]} : vector<1024x32xbf16> to vector<16x32xbf16>
    %734 = vector.extract_strided_slice %588 {offsets = [848, 0], sizes = [16, 32], strides = [1, 1]} : vector<1024x32xbf16> to vector<16x32xbf16>
    %735 = vector.extract_strided_slice %588 {offsets = [864, 0], sizes = [16, 32], strides = [1, 1]} : vector<1024x32xbf16> to vector<16x32xbf16>
    %736 = vector.extract_strided_slice %588 {offsets = [880, 0], sizes = [16, 32], strides = [1, 1]} : vector<1024x32xbf16> to vector<16x32xbf16>
    %737 = vector.extract_strided_slice %588 {offsets = [960, 0], sizes = [16, 32], strides = [1, 1]} : vector<1024x32xbf16> to vector<16x32xbf16>
    %738 = vector.extract_strided_slice %588 {offsets = [976, 0], sizes = [16, 32], strides = [1, 1]} : vector<1024x32xbf16> to vector<16x32xbf16>
    %739 = vector.extract_strided_slice %588 {offsets = [992, 0], sizes = [16, 32], strides = [1, 1]} : vector<1024x32xbf16> to vector<16x32xbf16>
    %740 = vector.extract_strided_slice %588 {offsets = [1008, 0], sizes = [16, 32], strides = [1, 1]} : vector<1024x32xbf16> to vector<16x32xbf16>
    %741 = tpu.concatenate %725, %726, %727, %728, %729, %730, %731, %732, %733, %734, %735, %736, %737, %738, %739, %740 in 1 : vector<16x32xbf16>, vector<16x32xbf16>, vector<16x32xbf16>, vector<16x32xbf16>, vector<16x32xbf16>, vector<16x32xbf16>, vector<16x32xbf16>, vector<16x32xbf16>, vector<16x32xbf16>, vector<16x32xbf16>, vector<16x32xbf16>, vector<16x32xbf16>, vector<16x32xbf16>, vector<16x32xbf16>, vector<16x32xbf16>, vector<16x32xbf16> -> vector<16x512xbf16>
    %742 = tpu.concatenate %605, %622, %639, %656, %673, %690, %707, %724, %741 in 0 : vector<16x512xbf16>, vector<16x512xbf16>, vector<16x512xbf16>, vector<16x512xbf16>, vector<16x512xbf16>, vector<16x512xbf16>, vector<16x512xbf16>, vector<16x512xbf16>, vector<16x512xbf16> -> vector<144x512xbf16>
    %c0_1276 = arith.constant 0 : index
    %c0_1277 = arith.constant 0 : index
    %743 = vector.load %arg4[%c0_1276, %c0_1277] : memref<512x64xbf16, #tpu.memory_space<vmem>>, vector<512x64xbf16>
    %cst_1278 = arith.constant dense<0.000000e+00> : vector<144x64xf32>
    %744 = tpu.matmul %742, %743, %cst_1278 {dimension_numbers = #tpu.dot_dimension_numbers<[1], [0], [0], [1], [0, 0, 1, 1], [], []>} : vector<144x512xbf16>, vector<512x64xbf16>, vector<144x64xf32> -> vector<144x64xf32>
    %c0_1279 = arith.constant 0 : index
    %c0_1280 = arith.constant 0 : index
    %745 = vector.load %arg5[%c0_1279, %c0_1280] : memref<1x64xf32, #tpu.memory_space<vmem>>, vector<1x64xf32>
    %746 = vector.broadcast %745 : vector<1x64xf32> to vector<144x64xf32>
    %747 = arith.addf %744, %746 : vector<144x64xf32>
    %cst_1281 = arith.constant 0.000000e+00 : f32
    %748 = vector.broadcast %cst_1281 : f32 to vector<144x64xf32>
    %749 = arith.maximumf %747, %748 : vector<144x64xf32>
    %750 = arith.truncf %749 : vector<144x64xf32> to vector<144x64xbf16>
    %751 = vector.extract_strided_slice %750 {offsets = [0, 0], sizes = [16, 64], strides = [1, 1]} : vector<144x64xbf16> to vector<16x64xbf16>
    %752 = vector.extract_strided_slice %750 {offsets = [16, 0], sizes = [16, 64], strides = [1, 1]} : vector<144x64xbf16> to vector<16x64xbf16>
    %753 = vector.extract_strided_slice %750 {offsets = [32, 0], sizes = [16, 64], strides = [1, 1]} : vector<144x64xbf16> to vector<16x64xbf16>
    %754 = vector.extract_strided_slice %750 {offsets = [48, 0], sizes = [16, 64], strides = [1, 1]} : vector<144x64xbf16> to vector<16x64xbf16>
    %755 = vector.extract_strided_slice %750 {offsets = [64, 0], sizes = [16, 64], strides = [1, 1]} : vector<144x64xbf16> to vector<16x64xbf16>
    %756 = vector.extract_strided_slice %750 {offsets = [80, 0], sizes = [16, 64], strides = [1, 1]} : vector<144x64xbf16> to vector<16x64xbf16>
    %757 = vector.extract_strided_slice %750 {offsets = [96, 0], sizes = [16, 64], strides = [1, 1]} : vector<144x64xbf16> to vector<16x64xbf16>
    %758 = vector.extract_strided_slice %750 {offsets = [112, 0], sizes = [16, 64], strides = [1, 1]} : vector<144x64xbf16> to vector<16x64xbf16>
    %759 = vector.extract_strided_slice %750 {offsets = [128, 0], sizes = [16, 64], strides = [1, 1]} : vector<144x64xbf16> to vector<16x64xbf16>
    %760 = tpu.concatenate %751, %752, %753, %754, %755, %756, %757, %758, %759 in 1 : vector<16x64xbf16>, vector<16x64xbf16>, vector<16x64xbf16>, vector<16x64xbf16>, vector<16x64xbf16>, vector<16x64xbf16>, vector<16x64xbf16>, vector<16x64xbf16>, vector<16x64xbf16> -> vector<16x576xbf16>
    %c0_1282 = arith.constant 0 : index
    %c0_1283 = arith.constant 0 : index
    %761 = vector.load %arg6[%c0_1282, %c0_1283] : memref<576x64xbf16, #tpu.memory_space<vmem>>, vector<576x64xbf16>
    %cst_1284 = arith.constant dense<0.000000e+00> : vector<16x64xf32>
    %762 = tpu.matmul %760, %761, %cst_1284 {dimension_numbers = #tpu.dot_dimension_numbers<[1], [0], [0], [1], [0, 0, 1, 1], [], []>} : vector<16x576xbf16>, vector<576x64xbf16>, vector<16x64xf32> -> vector<16x64xf32>
    %c0_1285 = arith.constant 0 : index
    %c0_1286 = arith.constant 0 : index
    %763 = vector.load %arg7[%c0_1285, %c0_1286] : memref<1x64xf32, #tpu.memory_space<vmem>>, vector<1x64xf32>
    %764 = vector.broadcast %763 : vector<1x64xf32> to vector<16x64xf32>
    %765 = arith.addf %762, %764 : vector<16x64xf32>
    %cst_1287 = arith.constant 0.000000e+00 : f32
    %766 = vector.broadcast %cst_1287 : f32 to vector<16x64xf32>
    %767 = arith.maximumf %765, %766 : vector<16x64xf32>
    %768 = arith.truncf %767 : vector<16x64xf32> to vector<16x64xbf16>
    %c0_1288 = arith.constant 0 : index
    %c0_1289 = arith.constant 0 : index
    %769 = vector.load %arg8[%c0_1288, %c0_1289] : memref<64x512xbf16, #tpu.memory_space<vmem>>, vector<64x512xbf16>
    %cst_1290 = arith.constant dense<0.000000e+00> : vector<16x512xf32>
    %770 = tpu.matmul %768, %769, %cst_1290 {dimension_numbers = #tpu.dot_dimension_numbers<[1], [0], [0], [1], [0, 0, 1, 1], [], []>} : vector<16x64xbf16>, vector<64x512xbf16>, vector<16x512xf32> -> vector<16x512xf32>
    %c0_1291 = arith.constant 0 : index
    %c0_1292 = arith.constant 0 : index
    %771 = vector.load %arg9[%c0_1291, %c0_1292] : memref<1x512xf32, #tpu.memory_space<vmem>>, vector<1x512xf32>
    %772 = vector.broadcast %771 : vector<1x512xf32> to vector<16x512xf32>
    %773 = arith.addf %770, %772 : vector<16x512xf32>
    %cst_1293 = arith.constant 0.000000e+00 : f32
    %774 = vector.broadcast %cst_1293 : f32 to vector<16x512xf32>
    %775 = arith.maximumf %773, %774 : vector<16x512xf32>
    %776 = arith.truncf %775 : vector<16x512xf32> to vector<16x512xbf16>
    %c0_1294 = arith.constant 0 : index
    %c0_1295 = arith.constant 0 : index
    %777 = vector.load %arg10[%c0_1294, %c0_1295] : memref<512x128xbf16, #tpu.memory_space<vmem>>, vector<512x128xbf16>
    %cst_1296 = arith.constant dense<0.000000e+00> : vector<16x128xf32>
    %778 = tpu.matmul %776, %777, %cst_1296 {dimension_numbers = #tpu.dot_dimension_numbers<[1], [0], [0], [1], [0, 0, 1, 1], [], []>} : vector<16x512xbf16>, vector<512x128xbf16>, vector<16x128xf32> -> vector<16x128xf32>
    %c0_1297 = arith.constant 0 : index
    %c0_1298 = arith.constant 0 : index
    %779 = vector.load %arg11[%c0_1297, %c0_1298] : memref<1x128xf32, #tpu.memory_space<vmem>>, vector<1x128xf32>
    %780 = vector.broadcast %779 : vector<1x128xf32> to vector<16x128xf32>
    %781 = arith.addf %778, %780 : vector<16x128xf32>
    %c0_1299 = arith.constant 0 : index
    %c0_1300 = arith.constant 0 : index
    %c0_1301 = arith.constant 0 : index
    %782 = vector.load %arg12[%c0_1299, %c0_1300, %c0_1301] : memref<1x16x128xf32, #tpu.memory_space<vmem>>, vector<1x16x128xf32>
    %783 = vector.shape_cast %782 : vector<1x16x128xf32> to vector<16x128xf32>
    %784 = vector.shape_cast %781 : vector<16x128xf32> to vector<1x16x128xf32>
    tpu.vector_store %arg12[%c0_1299, %c0_1300, %c0_1301], %784 {strides = array<i32>} : memref<1x16x128xf32, #tpu.memory_space<vmem>>, vector<1x16x128xf32>,
    return
  }
  func.func @transform_0(%arg0: i32) -> (i32, i32, i32, i32, i32) {
    %c0_i32 = arith.constant 0 : i32
    %c0_i32_0 = arith.constant 0 : i32
    %c0_i32_1 = arith.constant 0 : i32
    %c0_i32_2 = arith.constant 0 : i32
    %c0_i32_3 = arith.constant 0 : i32
    return %arg0, %c0_i32, %c0_i32_0, %c0_i32_1, %c0_i32_2 : i32, i32, i32, i32, i32
  }
  func.func @transform_1(%arg0: i32) -> (i32, i32) {
    %c0_i32 = arith.constant 0 : i32
    %c0_i32_0 = arith.constant 0 : i32
    %c0_i32_1 = arith.constant 0 : i32
    return %c0_i32, %c0_i32_0 : i32, i32
  }
  func.func @transform_2(%arg0: i32) -> (i32, i32) {
    %c0_i32 = arith.constant 0 : i32
    %c0_i32_0 = arith.constant 0 : i32
    %c0_i32_1 = arith.constant 0 : i32
    return %c0_i32, %c0_i32_0 : i32, i32
  }
  func.func @transform_3(%arg0: i32) -> (i32, i32) {
    %c0_i32 = arith.constant 0 : i32
    %c0_i32_0 = arith.constant 0 : i32
    %c0_i32_1 = arith.constant 0 : i32
    return %c0_i32, %c0_i32_0 : i32, i32
  }
  func.func @transform_4(%arg0: i32) -> (i32, i32) {
    %c0_i32 = arith.constant 0 : i32
    %c0_i32_0 = arith.constant 0 : i32
    %c0_i32_1 = arith.constant 0 : i32
    return %c0_i32, %c0_i32_0 : i32, i32
  }
  func.func @transform_5(%arg0: i32) -> (i32, i32) {
    %c0_i32 = arith.constant 0 : i32
    %c0_i32_0 = arith.constant 0 : i32
    %c0_i32_1 = arith.constant 0 : i32
    return %c0_i32, %c0_i32_0 : i32, i32
  }
  func.func @transform_6(%arg0: i32) -> (i32, i32) {
    %c0_i32 = arith.constant 0 : i32
    %c0_i32_0 = arith.constant 0 : i32
    %c0_i32_1 = arith.constant 0 : i32
    return %c0_i32, %c0_i32_0 : i32, i32
  }
  func.func @transform_7(%arg0: i32) -> (i32, i32) {
    %c0_i32 = arith.constant 0 : i32
    %c0_i32_0 = arith.constant 0 : i32
    %c0_i32_1 = arith.constant 0 : i32
    return %c0_i32, %c0_i32_0 : i32, i32
  }
  func.func @transform_8(%arg0: i32) -> (i32, i32) {
    %c0_i32 = arith.constant 0 : i32
    %c0_i32_0 = arith.constant 0 : i32
    %c0_i32_1 = arith.constant 0 : i32
    return %c0_i32, %c0_i32_0 : i32, i32
  }
  func.func @transform_9(%arg0: i32) -> (i32, i32) {
    %c0_i32 = arith.constant 0 : i32
    %c0_i32_0 = arith.constant 0 : i32
    %c0_i32_1 = arith.constant 0 : i32
    return %c0_i32, %c0_i32_0 : i32, i32
  }
  func.func @transform_10(%arg0: i32) -> (i32, i32) {
    %c0_i32 = arith.constant 0 : i32
    %c0_i32_0 = arith.constant 0 : i32
    %c0_i32_1 = arith.constant 0 : i32
    return %c0_i32, %c0_i32_0 : i32, i32
  }
  func.func @transform_11(%arg0: i32) -> (i32, i32, i32) {
    %c0_i32 = arith.constant 0 : i32
    %c0_i32_0 = arith.constant 0 : i32
    %c0_i32_1 = arith.constant 0 : i32
    return %arg0, %c0_i32, %c0_i32_0 : i32, i32, i32
  }
}

</mosaic_0001>

<bundles_post_ra>
// kernel: dqn_forward.1
= control target key start
LH: loop header
LB: loop body
LE: loop exit
PB: predicated region body
PF: predicated region fallthrough
CT: control target
= control target key end

     0   :  { %v6759_v1 = vmov 0   ;;  %s4795_s21 = smov 64   ;;  %vm74_vm0 = vcmask 523264   ;;  %s4796_s25 = smov 32   ;;  %vm2027_vm1 = vcmask 261120   ;;  %vm2033_vm2 = vcmask 785408   ;;  %s6747_s0 = inlined_call_operand.vmem [shape: bf16[1,9,9,16,64], index: 0, kind: input, shape index: {}]   ;;  %s6748_s1 = inlined_call_operand.vmem [shape: bf16[256,32], index: 1, kind: input, shape index: {}]   ;;  %s6749_s2 = inlined_call_operand.vmem [shape: f32[1,32], index: 2, kind: input, shape index: {}]   ;;  %s6750_s3 = inlined_call_operand.vmem [shape: bf16[512,64], index: 3, kind: input, shape index: {}]   ;;  %s6751_s5 = inlined_call_operand.vmem [shape: bf16[576,64], index: 5, kind: input, shape index: {}]   ;;  %s6752_s4 = inlined_call_operand.vmem [shape: f32[1,64], index: 4, kind: input, shape index: {}]   ;;  %s6753_s7 = inlined_call_operand.vmem [shape: bf16[64,512], index: 7, kind: input, shape index: {}]   ;;  %s6754_s9 = inlined_call_operand.vmem [shape: bf16[512,128], index: 9, kind: input, shape index: {}]   ;;  %s6755_s6 = inlined_call_operand.vmem [shape: f32[1,64], index: 6, kind: input, shape index: {}]   ;;  %s6756_s8 = inlined_call_operand.vmem [shape: f32[1,512], index: 8, kind: input, shape index: {}]   ;;  %s6757_s10 = inlined_call_operand.vmem [shape: f32[1,128], index: 10, kind: input, shape index: {}]   ;;  %s6758_s11 = inlined_call_operand.vmem [shape: f32[1,16,128], index: 11, kind: output, shape index: {}]  }
   0x1   :  { %v4863_v0 = vld [vmem:[%s6747_s0 + $0x50] sm:$0xff]   ;;  %1254 = vmatprep.subr.bf16.mxu0 %v6759_v1  ;;  %4532 = vmatprep.subr.bf16.mxu1 %v6759_v1  ;;  %v4870_v2 = vld [vmem:[%s6747_s0 + $0x8] sm:$0xff]   ;;  %v4877_v3 = vld [vmem:[%s6747_s0 + $0x58] sm:$0xff]   ;;  %s4797_s28 = smov 96   ;;  %vm4799_vm3 = vmmov 0  }
   0x2   :  { %72 = vrot.lane.b32.xlu0 %v4863_v0, %s4795_s21  ;;  %101 = vrot.lane.b32.xlu1 %v4877_v3, %s4795_s21  ;;  %v4884_v4 = vld [vmem:[%s6747_s0 + $0x10] sm:$0xff]   ;;  %v4891_v5 = vld [vmem:[%s6747_s0 + $0x60] sm:$0xff]  }
   0x3   :  { %v4898_v6 = vld [vmem:[%s6747_s0 + $0x18] sm:$0xff]   ;;  %v4905_v7 = vld [vmem:[%s6747_s0 + $0x68] sm:$0xff]   ;;  %v4912_v8 = vld [vmem:[%s6747_s0 + $0x20] sm:$0xff]  }
   0x4   :  { %v4917_v9 = vld [vmem:[%s6747_s0 + $0x70] sm:$0xff]   ;;  %v4584_v10 = vld [vmem:[%s6748_s1] sm:$0xff]   ;;  %v4929_v11 = vld [vmem:[%s6747_s0 + $0x28] sm:$0xff]  }
   0x5   :  { %1255 = vmatpush1.bf16.msra.mxu0 %v4584_v10  ;;  %v4587_v12 = vld [vmem:[%s6748_s1 + $0x8] sm:$0xff]   ;;  %4548 = vmatpush1.bf16.msra.mxu1 %v4584_v10  ;;  %v4940_v13 = vld [vmem:[%s6747_s0 + $0x78] sm:$0xff]   ;;  %v4946_v14 = vld [vmem:[%s6747_s0 + $0x30] sm:$0xff]  }
   0x6   :  { %60 = vrot.lane.b32.xlu0 %v4870_v2, %s4795_s21  ;;  %94 = vrot.lane.b32.xlu1 %v4884_v4, %s4795_s21  ;;  %v4588_v15 = vld [vmem:[%s6748_s1 + $0x10] sm:$0xff]   ;;  %v4959_v16 = vld [vmem:[%s6747_s0 + $0x80] sm:$0xff]  }
   0x7   :  { %1256 = vmatprep.subr.bf16.mxu0 %v6759_v1  ;;  %4533 = vmatprep.subr.bf16.mxu1 %v6759_v1  ;;  %v4965_v17 = vld [vmem:[%s6747_s0 + $0x38] sm:$0xff]   ;;  %v4585_v19 = vld [vmem:[%s6747_s0 + $0x88] sm:$0xff]   ;;  %v4586_v20 = vld [vmem:[%s6747_s0 + $0x40] sm:$0xff]  }
   0x8   :  { %v4590_v18 = vld [vmem:[%s6748_s1 + $0x18] sm:$0xff]   ;;  %v4591_v21 = vld [vmem:[%s6748_s1 + $0x20] sm:$0xff]   ;;  %v4593_v24 = vld [vmem:[%s6748_s1 + $0x28] sm:$0xff]  }
   0x9   :  { %1257 = vmatpush1.bf16.msra.mxu0 %v4587_v12  ;;  %4549 = vmatpush1.bf16.msra.mxu1 %v4587_v12  ;;  %v4992_v22 = vld [vmem:[%s6747_s0 + $0x98] sm:$0xff]   ;;  %v4998_v23 = vld [vmem:[%s6747_s0 + $0xa0] sm:$0xff]   ;;  %v5010_v25 = vld [vmem:[%s6747_s0 + $0xa8] sm:$0xff]  }
   0xa   :  { %129 = vrot.lane.b32.xlu0 %v4891_v5, %s4795_s21  ;;  %122 = vrot.lane.b32.xlu1 %v4898_v6, %s4795_s21  ;;  %v4594_v26 = vld [vmem:[%s6748_s1 + $0x30] sm:$0xff]   ;;  %v5029_v28 = vld [vmem:[%s6747_s0 + $0xb8] sm:$0xff]  }
   0xb   :  { %1258 = vmatprep.subr.bf16.mxu0 %v6759_v1  ;;  %4534 = vmatprep.subr.bf16.mxu1 %v6759_v1  ;;  %v5021_v27 = vld [vmem:[%s6747_s0 + $0xb0] sm:$0xff]   ;;  %v4596_v29 = vld [vmem:[%s6748_s1 + $0x38] sm:$0xff]   ;;  %v5040_v30 = vld [vmem:[%s6747_s0 + $0xc0] sm:$0xff]  }
   0xc   :  { %v5048_v31 = vld [vmem:[%s6747_s0 + $0xc8] sm:$0xff]   ;;  %v4597_v32 = vld [vmem:[%s6748_s1 + $0x40] sm:$0xff]   ;;  %v4611_v33 = vld [vmem:[%s6747_s0 + $0xd0] sm:$0xff]  }
   0xd   :  { %1259 = vmatpush1.bf16.msra.mxu0 %v4588_v15  ;;  %4550 = vmatpush1.bf16.msra.mxu1 %v4588_v15  ;;  %v4599_v34 = vld [vmem:[%s6748_s1 + $0x48] sm:$0xff]   ;;  %v5068_v35 = vld [vmem:[%s6747_s0 + $0xe0] sm:$0xff]   ;;  %v4600_v37 = vld [vmem:[%s6748_s1 + $0x50] sm:$0xff]  }
   0xe   :  { %157 = vrot.lane.b32.xlu0 %v4905_v7, %s4795_s21  ;;  %150 = vrot.lane.b32.xlu1 %v4912_v8, %s4795_s21  ;;  %v5074_v36 = vld [vmem:[%s6747_s0 + $0xe8] sm:$0xff]   ;;  %v5086_v38 = vld [vmem:[%s6747_s0 + $0xf0] sm:$0xff]  }
   0xf   :  { %1260 = vmatprep.subr.bf16.mxu0 %v6759_v1  ;;  %4535 = vmatprep.subr.bf16.mxu1 %v6759_v1  ;;  %v5091_v39 = vld [vmem:[%s6747_s0 + $0xf8] sm:$0xff]   ;;  %v5099_v40 = vld [vmem:[%s6747_s0 + $0x100] sm:$0xff]   ;;  %v5110_v42 = vld [vmem:[%s6747_s0 + $0x108] sm:$0xff]  }
  0x10   :  { %v4602_v41 = vld [vmem:[%s6748_s1 + $0x58] sm:$0xff]   ;;  %v5118_v43 = vld [vmem:[%s6747_s0 + $0x110] sm:$0xff]   ;;  %v4603_v44 = vld [vmem:[%s6748_s1 + $0x60] sm:$0xff]  }
  0x11   :  { %1261 = vmatpush1.bf16.msra.mxu0 %v4590_v18  ;;  %4551 = vmatpush1.bf16.msra.mxu1 %v4590_v18  ;;  %v4620_v45 = vld [vmem:[%s6747_s0 + $0x118] sm:$0xff]   ;;  %v4605_v46 = vld [vmem:[%s6748_s1 + $0x68] sm:$0xff]   ;;  %v4606_v47 = vld [vmem:[%s6748_s1 + $0x70] sm:$0xff]  }
  0x12   :  { %185 = vrot.lane.b32.xlu0 %v4917_v9, %s4795_s21  ;;  %178 = vrot.lane.b32.xlu1 %v4929_v11, %s4795_s21  ;;  %v5147_v48 = vld [vmem:[%s6747_s0 + $0x128] sm:$0xff]   ;;  %v4609_v49 = vld [vmem:[%s6748_s1 + $0x78] sm:$0xff]  }
  0x13   :  { %1262 = vmatprep.subr.bf16.mxu0 %v6759_v1  ;;  %4536 = vmatprep.subr.bf16.mxu1 %v6759_v1  ;;  %v5161_v50 = vld [vmem:[%s6747_s0 + $0x130] sm:$0xff]   ;;  %v5169_v51 = vld [vmem:[%s6747_s0 + $0x138] sm:$0xff]   ;;  %v5176_v52 = vld [vmem:[%s6747_s0 + $0x140] sm:$0xff]  }
  0x14   :  { %v5183_v53 = vld [vmem:[%s6747_s0 + $0x148] sm:$0xff]   ;;  %v5190_v54 = vld [vmem:[%s6747_s0 + $0x150] sm:$0xff]   ;;  %v5200_v56 = vld [vmem:[%s6747_s0 + $0x158] sm:$0xff]  }
  0x15   :  { %1263 = vmatpush1.bf16.msra.mxu0 %v4591_v21  ;;  %4552 = vmatpush1.bf16.msra.mxu1 %v4591_v21  ;;  %v4608_v55 = vld [vmem:[%s6747_s0 + $0x48] sm:$0xff]   ;;  %v4610_v59 = vld [vmem:[%s6747_s0] sm:$0xff]  }
  0x16   :  { %213 = vrot.lane.b32.xlu0 %v4940_v13, %s4795_s21  ;;  %206 = vrot.lane.b32.xlu1 %v4946_v14, %s4795_s21  ;;  %v4629_v10 = vld [vmem:[%s6747_s0 + $0x160] sm:$0xff]  }
  0x17   :  { %1264 = vmatprep.subr.bf16.mxu0 %v6759_v1  ;;  %4537 = vmatprep.subr.bf16.mxu1 %v6759_v1 }
  0x19   :  { %1265 = vmatpush1.bf16.msra.mxu0 %v4593_v24  ;;  %4553 = vmatpush1.bf16.msra.mxu1 %v4593_v24  ;;  %v5244_v24 = vld [vmem:[%s6747_s0 + $0x178] sm:$0xff]  }
  0x1a   :  { %241 = vrot.lane.b32.xlu0 %v4959_v16, %s4795_s21  ;;  %234 = vrot.lane.b32.xlu1 %v4965_v17, %s4795_s21 }
  0x1b   :  { %1266 = vmatprep.subr.bf16.mxu0 %v6759_v1  ;;  %4538 = vmatprep.subr.bf16.mxu1 %v6759_v1 }
  0x1d   :  { %1267 = vmatpush1.bf16.msra.mxu0 %v4594_v26  ;;  %4554 = vmatpush1.bf16.msra.mxu1 %v4594_v26  ;;  %v5249_v26 = vld [vmem:[%s6747_s0 + $0x180] sm:$0xff]  }
  0x1e   :  { %269 = vrot.lane.b32.xlu0 %v4585_v19, %s4795_s21  ;;  %262 = vrot.lane.b32.xlu1 %v4586_v20, %s4795_s21  ;;  %v5230_v19 = vld [vmem:[%s6747_s0 + $0x170] sm:$0xff]   ;;  %6766 = vst [vmem:[#allocation2_spill] sm:$0xff] %v5249_v26 }
  0x1f   :  { %1268 = vmatprep.subr.bf16.mxu0 %v6759_v1  ;;  %4539 = vmatprep.subr.bf16.mxu1 %v6759_v1 }
  0x21   :  { %1269 = vmatpush1.bf16.msra.mxu0 %v4596_v29  ;;  %4555 = vmatpush1.bf16.msra.mxu1 %v4596_v29 }
  0x22   :  { %295 = vrot.lane.b32.xlu0 %v4992_v22, %s4795_s21  ;;  %309 = vrot.lane.b32.xlu1 %v4998_v23, %s4795_s21 }
  0x23   :  { %1270 = vmatprep.subr.bf16.mxu0 %v6759_v1  ;;  %4540 = vmatprep.subr.bf16.mxu1 %v6759_v1 }
  0x25   :  { %1271 = vmatpush1.bf16.msra.mxu0 %v4597_v32  ;;  %4556 = vmatpush1.bf16.msra.mxu1 %v4597_v32 }
  0x26   :  { %323 = vrot.lane.b32.xlu0 %v5010_v25, %s4795_s21  ;;  %337 = vrot.lane.b32.xlu1 %v5021_v27, %s4795_s21 }
  0x27   :  { %1272 = vmatprep.subr.bf16.mxu0 %v6759_v1  ;;  %4541 = vmatprep.subr.bf16.mxu1 %v6759_v1 }
  0x29   :  { %1273 = vmatpush1.bf16.msra.mxu0 %v4599_v34  ;;  %4557 = vmatpush1.bf16.msra.mxu1 %v4599_v34  ;;  %v5271_v34 = vld [vmem:[%s6747_s0 + $0x188] sm:$0xff]  }
  0x2a   :  { %351 = vrot.lane.b32.xlu0 %v5029_v28, %s4795_s21  ;;  %365 = vrot.lane.b32.xlu1 %v5040_v30, %s4795_s21  ;;  %6768 = vst [vmem:[#allocation4_spill] sm:$0xff] %v5271_v34 }
  0x2b   :  { %1274 = vmatprep.subr.bf16.mxu0 %v6759_v1  ;;  %4542 = vmatprep.subr.bf16.mxu1 %v6759_v1 }
  0x2d   :  { %1275 = vmatpush1.bf16.msra.mxu0 %v4600_v37  ;;  %4558 = vmatpush1.bf16.msra.mxu1 %v4600_v37 }
  0x2e   :  { %379 = vrot.lane.b32.xlu0 %v5048_v31, %s4795_s21  ;;  %393 = vrot.lane.b32.xlu1 %v4611_v33, %s4795_s21  ;;  %v5265_v33 = vld [vmem:[%s6747_s0 + $0x190] sm:$0xff]  }
  0x2f   :  { %1276 = vmatprep.subr.bf16.mxu0 %v6759_v1  ;;  %4543 = vmatprep.subr.bf16.mxu1 %v6759_v1  ;;  %6767 = vst [vmem:[#allocation3_spill] sm:$0xff] %v5265_v33 }
  0x31   :  { %1277 = vmatpush1.bf16.msra.mxu0 %v4602_v41  ;;  %4559 = vmatpush1.bf16.msra.mxu1 %v4602_v41 }
  0x32   :  { %415 = vrot.lane.b32.xlu0 %v5068_v35, %s4795_s21  ;;  %429 = vrot.lane.b32.xlu1 %v5074_v36, %s4795_s21 }
  0x33   :  { %1278 = vmatprep.subr.bf16.mxu0 %v6759_v1  ;;  %4544 = vmatprep.subr.bf16.mxu1 %v6759_v1 }
  0x35   :  { %1279 = vmatpush1.bf16.msra.mxu0 %v4603_v44  ;;  %4560 = vmatpush1.bf16.msra.mxu1 %v4603_v44 }
  0x36   :  { %443 = vrot.lane.b32.xlu0 %v5086_v38, %s4795_s21  ;;  %457 = vrot.lane.b32.xlu1 %v5091_v39, %s4795_s21 }
  0x37   :  { %1280 = vmatprep.subr.bf16.mxu0 %v6759_v1  ;;  %4545 = vmatprep.subr.bf16.mxu1 %v6759_v1 }
  0x39   :  { %1281 = vmatpush1.bf16.msra.mxu0 %v4605_v46  ;;  %4561 = vmatpush1.bf16.msra.mxu1 %v4605_v46  ;;  %v5296_v46 = vld [vmem:[%s6747_s0 + $0x198] sm:$0xff]  }
  0x3a   :  { %471 = vrot.lane.b32.xlu0 %v5099_v40, %s4795_s21  ;;  %485 = vrot.lane.b32.xlu1 %v5110_v42, %s4795_s21  ;;  %6770 = vst [vmem:[#allocation6_spill] sm:$0xff] %v5296_v46 }
  0x3b   :  { %1282 = vmatprep.subr.bf16.mxu0 %v6759_v1  ;;  %4546 = vmatprep.subr.bf16.mxu1 %v6759_v1 }
  0x3d   :  { %1283 = vmatpush1.bf16.msra.mxu0 %v4606_v47  ;;  %4562 = vmatpush1.bf16.msra.mxu1 %v4606_v47  ;;  %v4639_v47 = vld [vmem:[%s6747_s0 + $0x1a8] sm:$0xff]  }
  0x3e   :  { %499 = vrot.lane.b32.xlu0 %v5118_v43, %s4795_s21  ;;  %513 = vrot.lane.b32.xlu1 %v4620_v45, %s4795_s21  ;;  %v4636_v45 = vld [vmem:[%s6747_s0 + $0x1b8] sm:$0xff]  }
  0x3f   :  { %1284 = vmatprep.subr.bf16.mxu0 %v6759_v1  ;;  %4547 = vmatprep.subr.bf16.mxu1 %v6759_v1  ;;  %v5541_v1 = vld [vmem:[%s6747_s0 + $0x278] sm:$0xff]  }
  0x41   :  { %1285 = vmatpush1.bf16.msra.mxu0 %v4609_v49  ;;  %4563 = vmatpush1.bf16.msra.mxu1 %v4609_v49 }
  0x42   :  { %535 = vrot.lane.b32.xlu0 %v5147_v48, %s4795_s21  ;;  %549 = vrot.lane.b32.xlu1 %v5161_v50, %s4795_s21 }
  0x46   :  { %563 = vrot.lane.b32.xlu0 %v5169_v51, %s4795_s21  ;;  %577 = vrot.lane.b32.xlu1 %v5176_v52, %s4795_s21 }
  0x4a   :  { %591 = vrot.lane.b32.xlu0 %v5183_v53, %s4795_s21  ;;  %605 = vrot.lane.b32.xlu1 %v5190_v54, %s4795_s21 }
  0x4e   :  { %619 = vrot.lane.b32.xlu0 %v5200_v56, %s4795_s21  ;;  %633 = vrot.lane.b32.xlu1 %v4629_v10, %s4795_s21 }
  0x52   :  { %655 = vrot.lane.b32.xlu0 %v5230_v19, %s4795_s21  ;;  %669 = vrot.lane.b32.xlu1 %v5244_v24, %s4795_s21 }
  0x56   :  { %683 = vrot.lane.b32.xlu0 %v5249_v26, %s4795_s21  ;;  %697 = vrot.lane.b32.xlu1 %v5271_v34, %s4795_s21 }
  0x5a   :  { %711 = vrot.lane.b32.xlu0 %v5265_v33, %s4795_s21  ;;  %725 = vrot.lane.b32.xlu1 %v5296_v46, %s4795_s21 }
  0x5e   :  { %753 = vrot.lane.b32.xlu1 %v4639_v47, %s4795_s21  ;;  %v5439_v47 = vld [vmem:[%s6747_s0 + $0x258] sm:$0xff]  }
  0x74   :  { %v73_v57 = vpop.permute.xlu0 %72  ;;  %v102_v60 = vpop.permute.xlu1 %101 }
  0x75   :  { %v5205_v58 = vsel %vm74_vm0, %v4608_v55, %v73_v57  ;;  %v5213_v62 = vsel %vm74_vm0, %v4863_v0, %v102_v60  ;;  %v4641_v60 = vld [vmem:[%s6747_s0 + $0x1c0] sm:$0xff]  }
  0x76   :  { %1286 = vmatprep.mubr.bf16.mxu0 %v5205_v58  ;;  %789 = vrot.lane.b32.xlu1 %v4641_v60, %s4795_s21 }
  0x78   :  { %v61_v61 = vpop.permute.xlu0 %60  ;;  %v95_v12 = vpop.permute.xlu1 %94 }
  0x79   :  { %v77_v63 = vsel %vm74_vm0, %v4610_v59, %v61_v61  ;;  %v105_v18 = vsel %vm74_vm0, %v4870_v2, %v95_v12  ;;  %v5322_v59 = vld [vmem:[%s6747_s0 + $0x1d8] sm:$0xff]   ;;  %v5339_v61 = vld [vmem:[%s6747_s0 + $0x1d0] sm:$0xff]  }
  0x7a   :  { %1287 = vmatmul.mubr.bf16.vlgmr.msra.gmra.mrb[0].mxu0 %v77_v63  ;;  %817 = vrot.lane.b32.xlu1 %v5339_v61, %s4795_s21 }
  0x7b   :  { %1294 = vmatprep.mubr.bf16.mxu0 %v5213_v62 }
  0x7c   :  { %v130_v15 = vpop.permute.xlu0 %129  ;;  %v123_v20 = vpop.permute.xlu1 %122 }
  0x7d   :  { %v5225_v0 = vsel %vm74_vm0, %v4877_v3, %v130_v15  ;;  %v133_v2 = vsel %vm74_vm0, %v4884_v4, %v123_v20  ;;  %v5354_v15 = vld [vmem:[%s6747_s0 + $0x220] sm:$0xff]  }
  0x80   :  { %v158_v21 = vpop.permute.xlu0 %157  ;;  %v151_v29 = vpop.permute.xlu1 %150 }
  0x81   :  { %v5239_v3 = vsel %vm74_vm0, %v4891_v5, %v158_v21  ;;  %v161_v5 = vsel %vm74_vm0, %v4898_v6, %v151_v29  ;;  %v5278_v6 = vld [vmem:[%s6747_s0 + $0x1a0] sm:$0xff]   ;;  %v5375_v29 = vld [vmem:[%s6747_s0 + $0x228] sm:$0xff]  }
  0x82   :  { %1295 = vmatmul.mubr.bf16.gmra.mrb[4].mxu0 %v105_v18  ;;  %6769 = vst [vmem:[#allocation5_spill] sm:$0xff] %v5278_v6  ;;  %739 = vrot.lane.b32.xlu0 %v5278_v6, %s4795_s21 }
  0x83   :  { %1302 = vmatprep.mubr.bf16.mxu0 %v5225_v0 }
  0x84   :  { %v186_v4 = vpop.permute.xlu0 %185  ;;  %v179_v37 = vpop.permute.xlu1 %178 }
  0x85   :  { %v5260_v32 = vsel %vm74_vm0, %v4905_v7, %v186_v4  ;;  %v189_v41 = vsel %vm74_vm0, %v4912_v8, %v179_v37  ;;  %v4649_v37 = vld [vmem:[%s6747_s0 + $0x1f0] sm:$0xff]  }
  0x86   :  { %775 = vrot.lane.b32.xlu0 %v4636_v45, %s4795_s21  ;;  %v4652_v45 = vld [vmem:[%s6747_s0 + $0x238] sm:$0xff]  }
  0x88   :  { %v214_v7 = vpop.permute.xlu0 %213  ;;  %v207_v8 = vpop.permute.xlu1 %206 }
  0x89   :  { %v5286_v44 = vsel %vm74_vm0, %v4917_v9, %v214_v7  ;;  %v5305_v9 = vld [vmem:[%s6747_s0 + $0x1c8] sm:$0xff]   ;;  %v217_v55 = vsel %vm74_vm0, %v4929_v11, %v207_v8  ;;  %v5402_v7 = vld [vmem:[%s6747_s0 + $0x230] sm:$0xff]  }
  0x8a   :  { %1303 = vmatmul.mubr.bf16.gmra.mrb[8].mxu0 %v133_v2  ;;  %803 = vrot.lane.b32.xlu0 %v5305_v9, %s4795_s21  ;;  %v5370_v2 = vld [vmem:[%s6747_s0 + $0x1e0] sm:$0xff]  }
  0x8b   :  { %1310 = vmatprep.mubr.bf16.mxu0 %v5239_v3  ;;  %845 = vrot.lane.b32.xlu1 %v5370_v2, %s4795_s21 }
  0x8c   :  { %v242_v49 = vpop.permute.xlu0 %241  ;;  %v235_v11 = vpop.permute.xlu1 %234 }
  0x8d   :  { %v5314_v57 = vsel %vm74_vm0, %v4940_v13, %v242_v49  ;;  %v5334_v13 = vld [vmem:[%s6747_s0 + $0x218] sm:$0xff]   ;;  %v245_v10 = vsel %vm74_vm0, %v4946_v14, %v235_v11  ;;  %v4619_v14 = vld [vmem:[%s6747_s0 + $0x90] sm:$0xff]   ;;  %v4658_v11 = vld [vmem:[%s6747_s0 + $0x280] sm:$0xff]  }
  0x8e   :  { %831 = vrot.lane.b32.xlu0 %v5322_v59, %s4795_s21 }
  0x90   :  { %v270_v63 = vpop.permute.xlu0 %269  ;;  %v263_v18 = vpop.permute.xlu1 %262 }
  0x91   :  { %v5345_v12 = vsel %vm74_vm0, %v4959_v16, %v270_v63  ;;  %v273_v20 = vsel %vm74_vm0, %v4965_v17, %v263_v18  ;;  %v5383_v17 = vld [vmem:[%s6747_s0 + $0x1e8] sm:$0xff]  }
  0x92   :  { %1311 = vmatmul.mubr.bf16.gmra.mrb[12].mxu0 %v161_v5  ;;  %937 = vrot.lane.b32.xlu0 %v5334_v13, %s4795_s21  ;;  %v5480_v63 = vld [vmem:[%s6747_s0 + $0x208] sm:$0xff]  }
  0x93   :  { %1318 = vmatprep.mubr.bf16.mxu0 %v5260_v32  ;;  %859 = vrot.lane.b32.xlu1 %v5383_v17, %s4795_s21 }
  0x94   :  { %v296_v16 = vpop.permute.xlu0 %295  ;;  %v310_v4 = vpop.permute.xlu1 %309 }
  0x95   :  { %v5365_v21 = vsel %vm74_vm0, %v4619_v14, %v296_v16  ;;  %v5389_v5 = vsel %vm74_vm0, %v4992_v22, %v310_v4  ;;  %v4660_v14 = vld [vmem:[%s6747_s0 + $0x210] sm:$0xff]  }
  0x96   :  { %951 = vrot.lane.b32.xlu0 %v5354_v15, %s4795_s21 }
  0x97   :  { %873 = vrot.lane.b32.xlu1 %v4649_v37, %s4795_s21 }
  0x98   :  { %v324_v22 = vpop.permute.xlu0 %323 }
  0x9a   :  { %1319 = vmatmul.mubr.bf16.gmra.mrb[16].mxu0 %v189_v41  ;;  %965 = vrot.lane.b32.xlu0 %v5375_v29, %s4795_s21  ;;  %v5406_v41 = vsel %vm74_vm0, %v4998_v23, %v324_v22  ;;  %v5426_v23 = vld [vmem:[%s6747_s0 + $0x250] sm:$0xff]  }
  0x9b   :  { %1326 = vmatprep.mubr.bf16.mxu0 %v5286_v44  ;;  %979 = vrot.lane.b32.xlu1 %v5402_v7, %s4795_s21 }
  0x9c   :  { %v352_v49 = vpop.permute.xlu0 %351 }
  0x9e   :  { %993 = vrot.lane.b32.xlu0 %v4652_v45, %s4795_s21 }
  0xa2   :  { %1327 = vmatmul.mubr.bf16.gmra.mrb[20].mxu0 %v217_v55  ;;  %v5450_v55 = vld [vmem:[%s6747_s0 + $0x260] sm:$0xff]  }
  0xa3   :  { %1334 = vmatprep.mubr.bf16.mxu0 %v5314_v57 }
  0xaa   :  { %1335 = vmatmul.mubr.bf16.gmra.mrb[24].mxu0 %v245_v10  ;;  %v380_v10 = vpop.permute.xlu0 %379 }
  0xab   :  { %1342 = vmatprep.mubr.bf16.mxu0 %v5345_v12  ;;  %v5489_v18 = vsel %vm74_vm0, %v5040_v30, %v380_v10 }
  0xb2   :  { %1343 = vmatmul.mubr.bf16.gmra.mrb[28].mxu0 %v273_v20 }
  0xb3   :  { %1350 = vmatprep.mubr.bf16.mxu0 %v5365_v21 }
  0xba   :  { %1351 = vmatmul.mubr.bf16.gmra.mrb[32].mxu0 %v5205_v58  ;;  %v5414_v58 = vld [vmem:[%s6747_s0 + $0x248] sm:$0xff]  }
  0xbb   :  { %1358 = vmatprep.mubr.bf16.mxu0 %v5389_v5  ;;  %1015 = vrot.lane.b32.xlu1 %v5414_v58, %s4795_s21 }
  0xbf   :  { %1029 = vrot.lane.b32.xlu1 %v5426_v23, %s4795_s21 }
  0xc2   :  { %1359 = vmatmul.mubr.bf16.gmra.mrb[36].mxu0 %v5213_v62  ;;  %v338_v62 = vpop.permute.xlu1 %337 }
  0xc3   :  { %1366 = vmatprep.mubr.bf16.mxu0 %v5406_v41  ;;  %v5430_v8 = vsel %vm74_vm0, %v5010_v25, %v338_v62  ;;  %1043 = vrot.lane.b32.xlu1 %v5439_v47, %s4795_s21  ;;  %v5445_v25 = vsel %vm74_vm0, %v5021_v27, %v352_v49  ;;  %v5466_v27 = vld [vmem:[%s6747_s0 + $0x270] sm:$0xff]   ;;  %v5511_v62 = vld [vmem:[%s6747_s0 + $0x268] sm:$0xff]  }
  0xc6   :  { %v366_v60 = vpop.permute.xlu1 %365 }
  0xc7   :  { %1057 = vrot.lane.b32.xlu1 %v5450_v55, %s4795_s21 }
  0xca   :  { %1367 = vmatmul.mubr.bf16.gmra.mrb[40].mxu0 %v5225_v0  ;;  %v5455_v0 = vld [vmem:[%s6747_s0 + $0x200] sm:$0xff]   ;;  %v394_v16 = vpop.permute.xlu1 %393 }
  0xcb   :  { %1374 = vmatprep.mubr.bf16.mxu0 %v5430_v8  ;;  %895 = vrot.lane.b32.xlu0 %v5455_v0, %s4795_s21  ;;  %v5499_v4 = vsel %vm74_vm0, %v5048_v31, %v394_v16 }
  0xcc   :  { %1085 = vrot.lane.b32.xlu1 %v5466_v27, %s4795_s21 }
  0xce   :  { %v430_v37 = vpop.permute.xlu1 %429 }
  0xcf   :  { %909 = vrot.lane.b32.xlu0 %v5480_v63, %s4795_s21  ;;  %v5526_v10 = vsel %vm74_vm0, %v5068_v35, %v430_v37 }
  0xd0   :  { %1113 = vrot.lane.b32.xlu1 %v4658_v11, %s4795_s21 }
  0xd2   :  { %1375 = vmatmul.mubr.bf16.gmra.mrb[44].mxu0 %v5239_v3  ;;  %v5472_v3 = vsel %vm74_vm0, %v5029_v28, %v366_v60  ;;  %v416_v28 = vpop.permute.xlu0 %415  ;;  %v458_v22 = vpop.permute.xlu1 %457 }
  0xd3   :  { %1382 = vmatprep.mubr.bf16.mxu0 %v5445_v25  ;;  %923 = vrot.lane.b32.xlu0 %v4660_v14, %s4795_s21  ;;  %v5561_v33 = vsel %vm74_vm0, %v5086_v38, %v458_v22 }
  0xd6   :  { %v486_v49 = vpop.permute.xlu1 %485 }
  0xd7   :  { %1071 = vrot.lane.b32.xlu0 %v5511_v62, %s4795_s21 }
  0xda   :  { %1383 = vmatmul.mubr.bf16.gmra.mrb[48].mxu0 %v5260_v32  ;;  %v444_v32 = vpop.permute.xlu0 %443  ;;  %v514_v60 = vpop.permute.xlu1 %513 }
  0xdb   :  { %1390 = vmatprep.mubr.bf16.mxu0 %v5472_v3  ;;  %v5545_v35 = vsel %vm74_vm0, %v5074_v36, %v444_v32  ;;  %1099 = vrot.lane.b32.xlu0 %v5541_v1, %s4795_s21 }
  0xde   :  { %v472_v20 = vpop.permute.xlu0 %471  ;;  %v5528_v16 = vpop.permute.xlu1 %549 }
  0xdf   :  { %v5575_v26 = vsel %vm74_vm0, %v5091_v39, %v472_v20 }
  0xe2   :  { %1391 = vmatmul.mubr.bf16.gmra.mrb[52].mxu0 %v5286_v44  ;;  %v500_v30 = vpop.permute.xlu0 %499  ;;  %v4628_v44 = vld [vmem:[%s6747_s0 + $0xd8] sm:$0xff]  }
  0xe3   :  { %1398 = vmatprep.mubr.bf16.mxu0 %v5489_v18  ;;  %v5514_v31 = vsel %vm74_vm0, %v4628_v44, %v416_v28 }
  0xe6   :  { %v5506_v45 = vpop.permute.xlu0 %535 }
  0xea   :  { %1399 = vmatmul.mubr.bf16.gmra.mrb[56].mxu0 %v5314_v57  ;;  %v5520_v57 = vpop.permute.xlu0 %563 }
  0xeb   :  { %1406 = vmatprep.mubr.bf16.mxu0 %v5499_v4 }
  0xee   :  { %v5522_v11 = vpop.permute.xlu0 %591 }
  0xf2   :  { %1407 = vmatmul.mubr.bf16.gmra.mrb[60].mxu0 %v5345_v12  ;;  %v5532_v28 = vpop.permute.xlu0 %619  ;;  %v5534_v12 = vpop.permute.xlu1 %577 }
  0xf3   :  { %1414 = vmatprep.mubr.bf16.mxu0 %v5514_v31 }
  0xf6   :  { %v5536_v44 = vpop.permute.xlu0 %655  ;;  %v5547_v37 = vpop.permute.xlu1 %605 }
  0xfa   :  { %1415 = vmatmul.mubr.bf16.gmra.mrb[64].mxu0 %v5365_v21  ;;  %v5553_v21 = vpop.permute.xlu0 %683  ;;  %v5555_v6 = vpop.permute.xlu1 %633 }
  0xfb   :  { %1422 = vmatprep.mubr.bf16.mxu0 %v5526_v10 }
  0xfe   :  { %v5557_v46 = vpop.permute.xlu0 %711  ;;  %v5563_v36 = vpop.permute.xlu1 %669 }
  0xff   :  { %6771 = vst [vmem:[#allocation7_spill] sm:$0xff] %v5557_v46 }
 0x102   :  { %1423 = vmatmul.mubr.bf16.gmra.mrb[68].mxu0 %v5389_v5  ;;  %v5567_v32 = vpop.permute.xlu0 %739  ;;  %v5569_v5 = vpop.permute.xlu1 %697 }
 0x103   :  { %1430 = vmatprep.mubr.bf16.mxu0 %v5545_v35  ;;  %6772 = vst [vmem:[#allocation8_spill] sm:$0xff] %v5567_v32  ;;  %v5587_v32 = vsel %vm74_vm0, %v5099_v40, %v486_v49  ;;  %v5604_v40 = vsel %vm74_vm0, %v5110_v42, %v500_v30  ;;  %v5620_v42 = vsel %vm74_vm0, %v5118_v43, %v514_v60  ;;  %v4648_v30 = vld [vmem:[%s6747_s0 + $0x120] sm:$0xff]  }
 0x104   :  { %v5639_v60 = vsel %vm74_vm0, %v4648_v30, %v5506_v45  ;;  %v5656_v45 = vsel %vm74_vm0, %v5147_v48, %v5528_v16  ;;  %v5673_v48 = vsel %vm74_vm0, %v5161_v50, %v5520_v57  ;;  %v5691_v57 = vsel %vm74_vm0, %v5169_v51, %v5534_v12 }
 0x106   :  { %v5571_v34 = vpop.permute.xlu0 %775  ;;  %v5577_v46 = vpop.permute.xlu1 %725 }
 0x107   :  { %6773 = vst [vmem:[#allocation9_spill] sm:$0xff] %v5571_v34 }
 0x10a   :  { %1431 = vmatmul.mubr.bf16.gmra.mrb[72].mxu0 %v5406_v41  ;;  %v5581_v38 = vpop.permute.xlu0 %803  ;;  %v5583_v41 = vpop.permute.xlu1 %753 }
 0x10b   :  { %1438 = vmatprep.mubr.bf16.mxu0 %v5561_v33  ;;  %6774 = vst [vmem:[#allocation10_spill] sm:$0xff] %v5581_v38 }
 0x10e   :  { %v832_v22 = vpop.permute.xlu0 %831  ;;  %v5589_v34 = vpop.permute.xlu1 %789 }
 0x112   :  { %1439 = vmatmul.mubr.bf16.gmra.mrb[76].mxu0 %v5430_v8  ;;  %v938_v39 = vpop.permute.xlu0 %937  ;;  %v818_v20 = vpop.permute.xlu1 %817 }
 0x113   :  { %1446 = vmatprep.mubr.bf16.mxu0 %v5575_v26  ;;  %v5594_v8 = vsel %vm74_vm0, %v4660_v14, %v938_v39  ;;  %v5599_v38 = vsel %vm74_vm0, %v5305_v9, %v818_v20  ;;  %v5615_v9 = vsel %vm74_vm0, %v5339_v61, %v832_v22 }
 0x114   :  { %1694 = vmatprep.mubr.bf16.mxu1 %v5594_v8 }
 0x115   :  { %1695 = vmatmul.mubr.bf16.vlgmr.msra.gmra.mrb[0].mxu1 %v5599_v38 }
 0x116   :  { %v846_v49 = vpop.permute.xlu1 %845 }
 0x117   :  { %v5634_v43 = vsel %vm74_vm0, %v5322_v59, %v846_v49 }
 0x11a   :  { %1447 = vmatmul.mubr.bf16.gmra.mrb[80].mxu0 %v5445_v25  ;;  %v952_v25 = vpop.permute.xlu0 %951 }
 0x11b   :  { %1454 = vmatprep.mubr.bf16.mxu0 %v5587_v32  ;;  %v5610_v14 = vsel %vm74_vm0, %v5334_v13, %v952_v25 }
 0x11c   :  { %1702 = vmatprep.mubr.bf16.mxu1 %v5610_v14 }
 0x11d   :  { %1703 = vmatmul.mubr.bf16.gmra.mrb[4].mxu1 %v5615_v9 }
 0x11e   :  { %v966_v13 = vpop.permute.xlu0 %965 }
 0x11f   :  { %v5629_v61 = vsel %vm74_vm0, %v5354_v15, %v966_v13 }
 0x120   :  { %1710 = vmatprep.mubr.bf16.mxu1 %v5629_v61 }
 0x122   :  { %1455 = vmatmul.mubr.bf16.gmra.mrb[84].mxu0 %v5472_v3  ;;  %v860_v3 = vpop.permute.xlu1 %859 }
 0x123   :  { %1462 = vmatprep.mubr.bf16.mxu0 %v5604_v40  ;;  %v5650_v59 = vsel %vm74_vm0, %v5370_v2, %v860_v3 }
 0x125   :  { %1711 = vmatmul.mubr.bf16.gmra.mrb[8].mxu1 %v5634_v43 }
 0x12a   :  { %1463 = vmatmul.mubr.bf16.gmra.mrb[88].mxu0 %v5489_v18  ;;  %v874_v18 = vpop.permute.xlu1 %873 }
 0x12b   :  { %1470 = vmatprep.mubr.bf16.mxu0 %v5620_v42  ;;  %v5667_v2 = vsel %vm74_vm0, %v5383_v17, %v874_v18  ;;  %v4666_v17 = vld [vmem:[%s6747_s0 + $0x1f8] sm:$0xff]  }
 0x12e   :  { %v980_v22 = vpop.permute.xlu1 %979 }
 0x12f   :  { %v5645_v15 = vsel %vm74_vm0, %v5375_v29, %v980_v22 }
 0x130   :  { %1718 = vmatprep.mubr.bf16.mxu1 %v5645_v15 }
 0x131   :  { %1719 = vmatmul.mubr.bf16.gmra.mrb[12].mxu1 %v5650_v59 }
 0x132   :  { %1471 = vmatmul.mubr.bf16.gmra.mrb[92].mxu0 %v5499_v4  ;;  %v994_v4 = vpop.permute.xlu0 %993 }
 0x133   :  { %1478 = vmatprep.mubr.bf16.mxu0 %v5639_v60  ;;  %v5662_v29 = vsel %vm74_vm0, %v5402_v7, %v994_v4  ;;  %v4665_v7 = vld [vmem:[%s6747_s0 + $0x240] sm:$0xff]  }
 0x134   :  { %1726 = vmatprep.mubr.bf16.mxu1 %v5662_v29 }
 0x139   :  { %1727 = vmatmul.mubr.bf16.gmra.mrb[16].mxu1 %v5667_v2 }
 0x13a   :  { %1479 = vmatmul.mubr.bf16.gmra.mrb[96].mxu0 %v5514_v31  ;;  %v1016_v31 = vpop.permute.xlu1 %1015 }
 0x13b   :  { %1486 = vmatprep.mubr.bf16.mxu0 %v5656_v45  ;;  %v1019_v16 = vsel %vm74_vm0, %v4665_v7, %v1016_v31 }
 0x13c   :  { %1734 = vmatprep.mubr.bf16.mxu1 %v1019_v16 }
 0x13d   :  { %v896_v39 = vpop.permute.xlu0 %895 }
 0x13e   :  { %v5685_v50 = vsel %vm74_vm0, %v4666_v17, %v896_v39  ;;  %v1030_v20 = vpop.permute.xlu1 %1029 }
 0x13f   :  { %v1033_v25 = vsel %vm74_vm0, %v5414_v58, %v1030_v20  ;;  %v5712_v58 = vsel %vm74_vm0, %v5176_v52, %v5522_v11 }
 0x141   :  { %1735 = vmatmul.mubr.bf16.gmra.mrb[20].mxu1 %v5685_v50  ;;  %v910_v3 = vpop.permute.xlu0 %909 }
 0x142   :  { %1487 = vmatmul.mubr.bf16.gmra.mrb[100].mxu0 %v5526_v10  ;;  %v5697_v10 = vld [vmem:[%s6749_s2] ss:$0 sm:$0xff]  ;;  %1742 = vmatprep.mubr.bf16.mxu1 %v1033_v25  ;;  %v5705_v12 = vsel %vm74_vm0, %v5455_v0, %v910_v3  ;;  %v1044_v7 = vpop.permute.xlu1 %1043 }
 0x143   :  { %1494 = vmatprep.mubr.bf16.mxu0 %v5673_v48  ;;  %v1047_v17 = vsel %vm74_vm0, %v5426_v23, %v1044_v7 }
 0x145   :  { %v924_v31 = vpop.permute.xlu0 %923 }
 0x146   :  { %v5722_v39 = vsel %vm74_vm0, %v5480_v63, %v924_v31  ;;  %v1058_v63 = vpop.permute.xlu1 %1057 }
 0x149   :  { %1743 = vmatmul.mubr.bf16.gmra.mrb[24].mxu1 %v5705_v12  ;;  %v1072_v7 = vpop.permute.xlu0 %1071 }
 0x14a   :  { %1495 = vmatmul.mubr.bf16.gmra.mrb[104].mxu0 %v5545_v35  ;;  %1750 = vmatprep.mubr.bf16.mxu1 %v1047_v17 }
 0x14b   :  { %1502 = vmatprep.mubr.bf16.mxu0 %v5691_v57 }
 0x14d   :  { %v1288_v49 = vpop.f32.mrb[0].mxu0 }
 0x14e   :  { %v1289_v13 = vadd.f32 %v5697_v10, %v1288_v49  ;;  %v1290_v51 = vpop.f32.mrb[1].mxu0  ;;  %v5730_v49 = vsel %vm74_vm0, %v5183_v53, %v5547_v37 }
 0x14f   :  { %v1291_v35 = vpop.f32.mrb[2].mxu0  ;;  %v1061_v51 = vsel %vm74_vm0, %v5439_v47, %v1058_v63 }
 0x150   :  { %v1292_v30 = vadd.f32 %v5697_v10, %v1291_v35  ;;  %v1293_v18 = vpop.f32.mrb[3].mxu0  ;;  %v1799_v22 = vmax.f32 %v1289_v13, 0.0 }
 0x151   :  { %1751 = vmatmul.mubr.bf16.gmra.mrb[28].mxu1 %v5722_v39 }
 0x152   :  { %v1800_v4 = vmax.f32 %v1292_v30, 0.0  ;;  %1503 = vmatmul.mubr.bf16.gmra.mrb[108].mxu0 %v5561_v33  ;;  %1758 = vmatprep.mubr.bf16.mxu1 %v1061_v51 }
 0x153   :  { %1510 = vmatprep.mubr.bf16.mxu0 %v5712_v58 }
 0x154   :  { %v5716_v0 = vpack.c.bf16 %v1800_v4, %v1799_v22  ;;  %v5743_v22 = vsel %vm74_vm0, %v5190_v54, %v5532_v28 }
 0x155   :  { %v1296_v16 = vpop.f32.mrb[4].mxu0 }
 0x156   :  { %v1297_v52 = vadd.f32 %v5697_v10, %v1296_v16  ;;  %v1298_v11 = vpop.f32.mrb[5].mxu0 }
 0x157   :  { %v1299_v20 = vpop.f32.mrb[6].mxu0  ;;  %v5759_v11 = vsel %vm74_vm0, %v5200_v56, %v5555_v6 }
 0x158   :  { %v1300_v33 = vadd.f32 %v5697_v10, %v1299_v20  ;;  %v1301_v25 = vpop.f32.mrb[7].mxu0  ;;  %v1801_v23 = vmax.f32 %v1297_v52, 0.0 }
 0x159   :  { %1759 = vmatmul.mubr.bf16.gmra.mrb[32].mxu1 %v5594_v8  ;;  %v1075_v8 = vsel %vm74_vm0, %v5450_v55, %v1072_v7 }
 0x15a   :  { %v1802_v3 = vmax.f32 %v1300_v33, 0.0  ;;  %1511 = vmatmul.mubr.bf16.gmra.mrb[112].mxu0 %v5575_v26  ;;  %1766 = vmatprep.mubr.bf16.mxu1 %v1075_v8  ;;  %v1086_v33 = vpop.permute.xlu1 %1085 }
 0x15b   :  { %1518 = vmatprep.mubr.bf16.mxu0 %v5730_v49 }
 0x15c   :  { %v1928_v13 = vpack.c.bf16 %v1802_v3, %v1801_v23  ;;  %v1089_v23 = vsel %vm74_vm0, %v5511_v62, %v1086_v33 }
 0x15d   :  { %v1304_v35 = vpop.f32.mrb[8].mxu0 }
 0x15e   :  { %v1305_v30 = vadd.f32 %v5697_v10, %v1304_v35  ;;  %v1306_v18 = vpop.f32.mrb[9].mxu0  ;;  %1992 = vrot.lane.b32.xlu1 %v1928_v13, %s4796_s25  ;;  %v1114_v8 = vpop.permute.xlu1 %1113 }
 0x15f   :  { %v1307_v53 = vpop.f32.mrb[10].mxu0 }
 0x160   :  { %v1308_v26 = vadd.f32 %v5697_v10, %v1307_v53  ;;  %v1309_v37 = vpop.f32.mrb[11].mxu0  ;;  %v1803_v47 = vmax.f32 %v1305_v30, 0.0  ;;  %v1100_v30 = vpop.permute.xlu0 %1099 }
 0x161   :  { %1767 = vmatmul.mubr.bf16.gmra.mrb[36].mxu1 %v5610_v14  ;;  %v4662_v14 = vld [vmem:[%s6747_s0 + $0x168] sm:$0xff]  }
 0x162   :  { %v1804_v4 = vmax.f32 %v1308_v26, 0.0  ;;  %1519 = vmatmul.mubr.bf16.gmra.mrb[116].mxu0 %v5587_v32  ;;  %1774 = vmatprep.mubr.bf16.mxu1 %v1089_v23  ;;  %v5774_v51 = vsel %vm74_vm0, %v4662_v14, %v5536_v44 }
 0x163   :  { %1526 = vmatprep.mubr.bf16.mxu0 %v5743_v22 }
 0x164   :  { %v5747_v31 = vpack.c.bf16 %v1804_v4, %v1803_v47  ;;  %v5791_v4 = vsel %vm74_vm0, %v5230_v19, %v5563_v36 }
 0x165   :  { %v1312_v17 = vpop.f32.mrb[12].mxu0 }
 0x166   :  { %v1313_v16 = vadd.f32 %v5697_v10, %v1312_v17  ;;  %v1314_v52 = vpop.f32.mrb[13].mxu0  ;;  %1995 = vrot.lane.b32.xlu1 %v5747_v31, %s4795_s21 }
 0x167   :  { %v1315_v54 = vpop.f32.mrb[14].mxu0 }
 0x168   :  { %v1316_v28 = vadd.f32 %v5697_v10, %v1315_v54  ;;  %v1317_v32 = vpop.f32.mrb[15].mxu0  ;;  %v1805_v55 = vmax.f32 %v1313_v16, 0.0  ;;  %v1117_v16 = vsel %vm74_vm0, %v5541_v1, %v1114_v8  ;;  %v4667_v1 = vld [vmem:[%s6750_s3 + $0x40] sm:$0xff]  }
 0x169   :  { %1775 = vmatmul.mubr.bf16.gmra.mrb[40].mxu1 %v5629_v61  ;;  %v1103_v61 = vsel %vm74_vm0, %v5466_v27, %v1100_v30  ;;  %4287 = vmatprep.subr.bf16.mxu1 %v4667_v1  ;;  %v4673_v30 = vld [vmem:[%s6750_s3 + $0x58] sm:$0xff]   ;;  %v4675_v8 = vld [vmem:[%s6750_s3 + $0x60] sm:$0xff]  }
 0x16a   :  { %v1806_v20 = vmax.f32 %v1316_v28, 0.0  ;;  %1527 = vmatmul.mubr.bf16.gmra.mrb[120].mxu0 %v5604_v40  ;;  %1782 = vmatprep.mubr.bf16.mxu1 %v1103_v61  ;;  %v5804_v28 = vsel %vm74_vm0, %v5244_v24, %v5553_v21  ;;  %v4669_v21 = vld [vmem:[%s6750_s3 + $0x48] sm:$0xff]  }
 0x16b   :  { %1534 = vmatprep.mubr.bf16.mxu0 %v5759_v11 }
 0x16c   :  { %v1930_v25 = vpack.c.bf16 %v1806_v20, %v1805_v55 }
 0x16d   :  { %v1320_v3 = vpop.f32.mrb[16].mxu0 }
 0x16e   :  { %v1321_v56 = vadd.f32 %v5697_v10, %v1320_v3  ;;  %v1322_v6 = vpop.f32.mrb[17].mxu0  ;;  %1998 = vrot.lane.b32.xlu1 %v1930_v25, %s4797_s28 }
 0x16f   :  { %v1323_v40 = vpop.f32.mrb[18].mxu0 }
 0x170   :  { %v1324_v63 = vadd.f32 %v5697_v10, %v1323_v40  ;;  %v1325_v13 = vpop.f32.mrb[19].mxu0  ;;  %v1807_v35 = vmax.f32 %v1321_v56, 0.0  ;;  %v6775_v56 = vld [vmem:[#allocation2_spill] sm:$0xff] }
 0x171   :  { %1783 = vmatmul.mubr.bf16.gmra.mrb[44].mxu1 %v5645_v15  ;;  %v5827_v6 = vsel %vm74_vm0, %v6775_v56, %v5569_v5 }
 0x172   :  { %v1808_v62 = vmax.f32 %v1324_v63, 0.0  ;;  %1535 = vmatmul.mubr.bf16.gmra.mrb[124].mxu0 %v5620_v42  ;;  %2061 = vrot.lane.b32.xlu1 %v1930_v25, %s4796_s25  ;;  %v4671_v63 = vld [vmem:[%s6750_s3 + $0x50] sm:$0xff]  }
 0x173   :  { %1542 = vmatprep.mubr.bf16.mxu0 %v5774_v51  ;;  %1790 = vmatprep.mubr.bf16.mxu1 %v1117_v16  ;;  %v4676_v16 = vld [vmem:[%s6750_s3 + $0x20] sm:$0xff]  }
 0x174   :  { %v5779_v18 = vpack.c.bf16 %v1808_v62, %v1807_v35  ;;  %v4672_v35 = vld [vmem:[%s6750_s3 + $0x10] sm:$0xff]  }
 0x175   :  { %v1328_v53 = vpop.f32.mrb[20].mxu0 }
 0x176   :  { %v1329_v26 = vadd.f32 %v5697_v10, %v1328_v53  ;;  %v1330_v44 = vpop.f32.mrb[21].mxu0  ;;  %2064 = vrot.lane.b32.xlu1 %v5779_v18, %s4795_s21 }
 0x177   :  { %v1331_v37 = vpop.f32.mrb[22].mxu0 }
 0x178   :  { %v1332_v42 = vadd.f32 %v5697_v10, %v1331_v37  ;;  %v1333_v47 = vpop.f32.mrb[23].mxu0  ;;  %v1809_v27 = vmax.f32 %v1329_v26, 0.0 }
 0x179   :  { %1791 = vmatmul.mubr.bf16.gmra.mrb[48].mxu1 %v5662_v29  ;;  %v4668_v29 = vld [vmem:[%s6750_s3] sm:$0xff]   ;;  %v6777_v47 = vld [vmem:[#allocation4_spill] sm:$0xff] }
 0x17a   :  { %v1810_v7 = vmax.f32 %v1332_v42, 0.0  ;;  %1543 = vmatmul.mubr.bf16.gmra.mrb[128].mxu0 %v5639_v60  ;;  %4288 = vmatpush3.bf16.msra.mxu1 %v4668_v29  ;;  %v6776_v42 = vld [vmem:[#allocation7_spill] sm:$0xff] }
 0x17b   :  { %1550 = vmatprep.mubr.bf16.mxu0 %v5791_v4  ;;  %4289 = vmatprep.subr.bf16.mxu1 %v4669_v21 }
 0x17c   :  { %v1932_v17 = vpack.c.bf16 %v1810_v7, %v1809_v27  ;;  %v5849_v27 = vsel %vm74_vm0, %v6777_v47, %v6776_v42  ;;  %v6781_v42 = vld [vmem:[#allocation5_spill] sm:$0xff] }
 0x17d   :  { %v1336_v15 = vpop.f32.mrb[24].mxu0  ;;  %v5907_v47 = vsel %vm74_vm0, %v6781_v42, %v5583_v41 }
 0x17e   :  { %v1337_v52 = vadd.f32 %v5697_v10, %v1336_v15  ;;  %v1338_v54 = vpop.f32.mrb[25].mxu0  ;;  %2067 = vrot.lane.b32.xlu1 %v1932_v17, %s4797_s28 }
 0x17f   :  { %v1339_v19 = vpop.f32.mrb[26].mxu0  ;;  %v4677_v54 = vld [vmem:[%s6750_s3 + $0x68] sm:$0xff]  }
 0x180   :  { %v1340_v36 = vadd.f32 %v5697_v10, %v1339_v19  ;;  %v1341_v60 = vpop.f32.mrb[27].mxu0  ;;  %v1811_v32 = vmax.f32 %v1337_v52, 0.0 }
 0x182   :  { %v1812_v55 = vmax.f32 %v1340_v36, 0.0  ;;  %1551 = vmatmul.mubr.bf16.gmra.mrb[132].mxu0 %v5656_v45  ;;  %2125 = vrot.lane.b32.xlu1 %v1932_v17, %s4796_s25  ;;  %v4670_v45 = vld [vmem:[%s6750_s3 + $0x8] sm:$0xff]  }
 0x183   :  { %1558 = vmatprep.mubr.bf16.mxu0 %v5804_v28  ;;  %4290 = vmatpush3.bf16.msra.mxu1 %v4670_v45  ;;  %v4681_v45 = vld [vmem:[%s6750_s3 + $0x78] sm:$0xff]  }
 0x184   :  { %v1933_v20 = vpack.c.bf16 %v1812_v55, %v1811_v32  ;;  %4291 = vmatprep.subr.bf16.mxu1 %v4671_v63  ;;  %v6778_v55 = vld [vmem:[#allocation3_spill] sm:$0xff]  ;;  %v6779_v63 = vld [vmem:[#allocation8_spill] sm:$0xff] }
 0x185   :  { %v1344_v24 = vpop.f32.mrb[28].mxu0  ;;  %v5872_v29 = vsel %vm74_vm0, %v6778_v55, %v5577_v46 }
 0x186   :  { %v1345_v33 = vadd.f32 %v5697_v10, %v1344_v24  ;;  %v1346_v25 = vpop.f32.mrb[29].mxu0  ;;  %2128 = vrot.lane.b32.xlu1 %v1933_v20, %s4795_s21  ;;  %v4679_v24 = vld [vmem:[%s6750_s3 + $0x70] sm:$0xff]  }
 0x187   :  { %v1347_v14 = vpop.f32.mrb[30].mxu0  ;;  %4292 = vmatpush3.bf16.msra.mxu1 %v4672_v35 }
 0x188   :  { %v1348_v23 = vadd.f32 %v5697_v10, %v1347_v14  ;;  %v1349_v3 = vpop.f32.mrb[31].mxu0  ;;  %v1813_v40 = vmax.f32 %v1345_v33, 0.0  ;;  %4293 = vmatprep.subr.bf16.mxu1 %v4673_v30  ;;  %v4680_v33 = vld [vmem:[%s6750_s3 + $0x30] sm:$0xff]  }
 0x18a   :  { %v1814_v13 = vmax.f32 %v1348_v23, 0.0  ;;  %1559 = vmatmul.mubr.bf16.gmra.mrb[136].mxu0 %v5673_v48  ;;  %v4674_v48 = vld [vmem:[%s6750_s3 + $0x18] sm:$0xff]  }
 0x18b   :  { %1566 = vmatprep.mubr.bf16.mxu0 %v5827_v6  ;;  %4294 = vmatpush3.bf16.msra.mxu1 %v4674_v48 }
 0x18c   :  { %v1934_v62 = vpack.c.bf16 %v1814_v13, %v1813_v40  ;;  %4295 = vmatprep.subr.bf16.mxu1 %v4675_v8  ;;  %v6780_v13 = vld [vmem:[#allocation6_spill] sm:$0xff] }
 0x18d   :  { %v1352_v5 = vpop.f32.mrb[32].mxu0  ;;  %v5894_v35 = vsel %vm74_vm0, %v6780_v13, %v6779_v63 }
 0x18e   :  { %v1353_v61 = vadd.f32 %v5697_v10, %v1352_v5  ;;  %v1354_v53 = vpop.f32.mrb[33].mxu0  ;;  %2131 = vrot.lane.b32.xlu1 %v1934_v62, %s4797_s28 }
 0x18f   :  { %v1355_v26 = vpop.f32.mrb[34].mxu0  ;;  %4296 = vmatpush3.bf16.msra.mxu1 %v4676_v16 }
 0x190   :  { %v1356_v44 = vadd.f32 %v5697_v10, %v1355_v26  ;;  %v1357_v37 = vpop.f32.mrb[35].mxu0  ;;  %v1815_v7 = vmax.f32 %v1353_v61, 0.0  ;;  %4297 = vmatprep.subr.bf16.mxu1 %v4677_v54 }
 0x192   :  { %v1816_v17 = vmax.f32 %v1356_v44, 0.0  ;;  %1567 = vmatmul.mubr.bf16.gmra.mrb[140].mxu0 %v5691_v57  ;;  %v4678_v57 = vld [vmem:[%s6750_s3 + $0x28] sm:$0xff]  }
 0x193   :  { %1574 = vmatprep.mubr.bf16.mxu0 %v5849_v27  ;;  %4298 = vmatpush3.bf16.msra.mxu1 %v4678_v57  ;;  %v6782_v57 = vld [vmem:[#allocation9_spill] sm:$0xff] }
 0x194   :  { %v5859_v15 = vpack.c.bf16 %v1816_v17, %v1815_v7  ;;  %4299 = vmatprep.subr.bf16.mxu1 %v4679_v24  ;;  %v4664_v17 = vld [vmem:[%s6747_s0 + $0x1b0] sm:$0xff]  }
 0x195   :  { %v1360_v52 = vpop.f32.mrb[36].mxu0 }
 0x196   :  { %v1361_v19 = vadd.f32 %v5697_v10, %v1360_v52  ;;  %v1362_v36 = vpop.f32.mrb[37].mxu0 }
 0x197   :  { %v1363_v60 = vpop.f32.mrb[38].mxu0  ;;  %4300 = vmatpush3.bf16.msra.mxu1 %v4680_v33 }
 0x198   :  { %v1364_v32 = vadd.f32 %v5697_v10, %v1363_v60  ;;  %v1365_v1 = vpop.f32.mrb[39].mxu0  ;;  %v1817_v20 = vmax.f32 %v1361_v19, 0.0  ;;  %4301 = vmatprep.subr.bf16.mxu1 %v4681_v45 }
 0x19a   :  { %v1818_v21 = vmax.f32 %v1364_v32, 0.0  ;;  %1575 = vmatmul.mubr.bf16.gmra.mrb[144].mxu0 %v5712_v58  ;;  %v4682_v58 = vld [vmem:[%s6750_s3 + $0x38] sm:$0xff]  }
 0x19b   :  { %1582 = vmatprep.mubr.bf16.mxu0 %v5872_v29  ;;  %4302 = vmatpush3.bf16.msra.mxu1 %v4682_v58 }
 0x19c   :  { %v1936_v25 = vpack.c.bf16 %v1818_v21, %v1817_v20 }
 0x19d   :  { %v1368_v46 = vpop.f32.mrb[40].mxu0 }
 0x19e   :  { %v1369_v14 = vadd.f32 %v5697_v10, %v1368_v46  ;;  %v1370_v23 = vpop.f32.mrb[41].mxu0  ;;  %2001 = vrot.lane.b32.xlu0 %v1936_v25, %s4796_s25 }
 0x19f   :  { %v1371_v3 = vpop.f32.mrb[42].mxu0 }
 0x1a0   :  { %v1372_v56 = vadd.f32 %v5697_v10, %v1371_v3  ;;  %v1373_v40 = vpop.f32.mrb[43].mxu0  ;;  %v1819_v62 = vmax.f32 %v1369_v14, 0.0 }
 0x1a2   :  { %v1820_v5 = vmax.f32 %v1372_v56, 0.0  ;;  %1583 = vmatmul.mubr.bf16.gmra.mrb[148].mxu0 %v5730_v49 }
 0x1a3   :  { %1590 = vmatprep.mubr.bf16.mxu0 %v5894_v35 }
 0x1a4   :  { %v5898_v30 = vpack.c.bf16 %v1820_v5, %v1819_v62  ;;  %v6783_v62 = vld [vmem:[#allocation10_spill] sm:$0xff] }
 0x1a5   :  { %v1376_v61 = vpop.f32.mrb[44].mxu0 }
 0x1a6   :  { %v1377_v53 = vadd.f32 %v5697_v10, %v1376_v61  ;;  %v1378_v48 = vpop.f32.mrb[45].mxu0  ;;  %2004 = vrot.lane.b32.xlu0 %v5898_v30, %s4795_s21 }
 0x1a7   :  { %v1379_v26 = vpop.f32.mrb[46].mxu0 }
 0x1a8   :  { %v1380_v44 = vadd.f32 %v5697_v10, %v1379_v26  ;;  %v1381_v37 = vpop.f32.mrb[47].mxu0  ;;  %v1821_v49 = vmax.f32 %v1377_v53, 0.0 }
 0x1aa   :  { %v1822_v7 = vmax.f32 %v1380_v44, 0.0  ;;  %1591 = vmatmul.mubr.bf16.gmra.mrb[152].mxu0 %v5743_v22  ;;  %v5919_v22 = vsel %vm74_vm0, %v4664_v17, %v6782_v57 }
 0x1ab   :  { %1598 = vmatprep.mubr.bf16.mxu0 %v5907_v47 }
 0x1ac   :  { %v1938_v8 = vpack.c.bf16 %v1822_v7, %v1821_v49 }
 0x1ad   :  { %v1384_v16 = vpop.f32.mrb[48].mxu0 }
 0x1ae   :  { %v1385_v52 = vadd.f32 %v5697_v10, %v1384_v16  ;;  %v1386_v54 = vpop.f32.mrb[49].mxu0  ;;  %2007 = vrot.lane.b32.xlu0 %v1938_v8, %s4797_s28 }
 0x1af   :  { %v1387_v19 = vpop.f32.mrb[50].mxu0 }
 0x1b0   :  { %v1388_v41 = vadd.f32 %v5697_v10, %v1387_v19  ;;  %v1389_v36 = vpop.f32.mrb[51].mxu0  ;;  %v1823_v60 = vmax.f32 %v1385_v52, 0.0 }
 0x1b2   :  { %v1824_v32 = vmax.f32 %v1388_v41, 0.0  ;;  %1599 = vmatmul.mubr.bf16.gmra.mrb[156].mxu0 %v5759_v11  ;;  %2069 = vrot.lane.b32.xlu0 %v1938_v8, %s4796_s25  ;;  %v4791_v11 = vld [vmem:[%s6747_s0 + $0x1b8] sm:$0xff]  }
 0x1b3   :  { %1606 = vmatprep.mubr.bf16.mxu0 %v5919_v22  ;;  %v5935_v46 = vsel %vm74_vm0, %v4791_v11, %v5589_v34  ;;  %v4792_v34 = vld [vmem:[%s6747_s0 + $0x1c0] sm:$0xff]  }
 0x1b4   :  { %v5924_v1 = vpack.c.bf16 %v1824_v32, %v1823_v60 }
 0x1b5   :  { %v1392_v55 = vpop.f32.mrb[52].mxu0 }
 0x1b6   :  { %v1393_v20 = vadd.f32 %v5697_v10, %v1392_v55  ;;  %v1394_v24 = vpop.f32.mrb[53].mxu0  ;;  %2072 = vrot.lane.b32.xlu0 %v5924_v1, %s4795_s21 }
 0x1b7   :  { %v1395_v21 = vpop.f32.mrb[54].mxu0 }
 0x1b8   :  { %v1396_v33 = vadd.f32 %v5697_v10, %v1395_v21  ;;  %v1397_v25 = vpop.f32.mrb[55].mxu0  ;;  %v1825_v45 = vmax.f32 %v1393_v20, 0.0 }
 0x1ba   :  { %v1826_v14 = vmax.f32 %v1396_v33, 0.0  ;;  %1607 = vmatmul.mubr.bf16.gmra.mrb[160].mxu0 %v5774_v51  ;;  %v5947_v51 = vsel %vm74_vm0, %v4792_v34, %v6783_v62 }
 0x1bb   :  { %1614 = vmatprep.mubr.bf16.mxu0 %v5935_v46 }
 0x1bc   :  { %v1940_v23 = vpack.c.bf16 %v1826_v14, %v1825_v45 }
 0x1bd   :  { %v1400_v58 = vpop.f32.mrb[56].mxu0 }
 0x1be   :  { %v1401_v3 = vadd.f32 %v5697_v10, %v1400_v58  ;;  %v1402_v56 = vpop.f32.mrb[57].mxu0  ;;  %2075 = vrot.lane.b32.xlu0 %v1940_v23, %s4797_s28 }
 0x1bf   :  { %v1403_v40 = vpop.f32.mrb[58].mxu0 }
 0x1c0   :  { %v1404_v63 = vadd.f32 %v5697_v10, %v1403_v40  ;;  %v1405_v13 = vpop.f32.mrb[59].mxu0  ;;  %v1827_v5 = vmax.f32 %v1401_v3, 0.0 }
 0x1c2   :  { %v1828_v61 = vmax.f32 %v1404_v63, 0.0  ;;  %1615 = vmatmul.mubr.bf16.gmra.mrb[164].mxu0 %v5791_v4  ;;  %2133 = vrot.lane.b32.xlu0 %v1940_v23, %s4796_s25 }
 0x1c3   :  { %1622 = vmatprep.mubr.bf16.mxu0 %v5947_v51 }
 0x1c4   :  { %v1941_v53 = vpack.c.bf16 %v1828_v61, %v1827_v5 }
 0x1c5   :  { %v1408_v48 = vpop.f32.mrb[60].mxu0 }
 0x1c6   :  { %v1409_v26 = vadd.f32 %v5697_v10, %v1408_v48  ;;  %v1410_v44 = vpop.f32.mrb[61].mxu0  ;;  %2136 = vrot.lane.b32.xlu0 %v1941_v53, %s4795_s21 }
 0x1c7   :  { %v1411_v37 = vpop.f32.mrb[62].mxu0 }
 0x1c8   :  { %v1412_v42 = vadd.f32 %v5697_v10, %v1411_v37  ;;  %v1413_v49 = vpop.f32.mrb[63].mxu0  ;;  %v1829_v7 = vmax.f32 %v1409_v26, 0.0 }
 0x1ca   :  { %v1830_v8 = vmax.f32 %v1412_v42, 0.0  ;;  %1623 = vmatmul.mubr.bf16.gmra.mrb[168].mxu0 %v5804_v28 }
 0x1cb   :  { %1630 = vmatprep.mubr.bf16.mxu0 %v5599_v38 }
 0x1cc   :  { %v1942_v4 = vpack.c.bf16 %v1830_v8, %v1829_v7 }
 0x1cd   :  { %v1416_v17 = vpop.f32.mrb[64].mxu0 }
 0x1ce   :  { %v1417_v16 = vadd.f32 %v5697_v10, %v1416_v17  ;;  %v1418_v52 = vpop.f32.mrb[65].mxu0  ;;  %2139 = vrot.lane.b32.xlu0 %v1942_v4, %s4797_s28 }
 0x1cf   :  { %v1419_v54 = vpop.f32.mrb[66].mxu0 }
 0x1d0   :  { %v1420_v19 = vadd.f32 %v5697_v10, %v1419_v54  ;;  %v1421_v41 = vpop.f32.mrb[67].mxu0  ;;  %v1831_v36 = vmax.f32 %v1417_v16, 0.0 }
 0x1d2   :  { %v1832_v57 = vmax.f32 %v1420_v19, 0.0  ;;  %1631 = vmatmul.mubr.bf16.gmra.mrb[172].mxu0 %v5827_v6 }
 0x1d3   :  { %1638 = vmatprep.mubr.bf16.mxu0 %v5615_v9 }
 0x1d4   :  { %v5962_v28 = vpack.c.bf16 %v1832_v57, %v1831_v36 }
 0x1d5   :  { %v1424_v38 = vpop.f32.mrb[68].mxu0 }
 0x1d6   :  { %v1425_v60 = vadd.f32 %v5697_v10, %v1424_v38  ;;  %v1426_v32 = vpop.f32.mrb[69].mxu0 }
 0x1d7   :  { %v1427_v55 = vpop.f32.mrb[70].mxu0 }
 0x1d8   :  { %v1428_v20 = vadd.f32 %v5697_v10, %v1427_v55  ;;  %v1429_v24 = vpop.f32.mrb[71].mxu0  ;;  %v1833_v21 = vmax.f32 %v1425_v60, 0.0 }
 0x1da   :  { %v1834_v33 = vmax.f32 %v1428_v20, 0.0  ;;  %1639 = vmatmul.mubr.bf16.gmra.mrb[176].mxu0 %v5849_v27 }
 0x1db   :  { %1646 = vmatprep.mubr.bf16.mxu0 %v5634_v43 }
 0x1dc   :  { %v1944_v25 = vpack.c.bf16 %v1834_v33, %v1833_v21 }
 0x1dd   :  { %v1432_v6 = vpop.f32.mrb[72].mxu0 }
 0x1de   :  { %v1433_v9 = vadd.f32 %v5697_v10, %v1432_v6  ;;  %v1434_v11 = vpop.f32.mrb[73].mxu0  ;;  %2010 = vrot.lane.b32.xlu1 %v1944_v25, %s4796_s25 }
 0x1df   :  { %v1435_v45 = vpop.f32.mrb[74].mxu0 }
 0x1e0   :  { %v1436_v14 = vadd.f32 %v5697_v10, %v1435_v45  ;;  %v1437_v23 = vpop.f32.mrb[75].mxu0  ;;  %v1835_v58 = vmax.f32 %v1433_v9, 0.0 }
 0x1e2   :  { %v1836_v3 = vmax.f32 %v1436_v14, 0.0  ;;  %1647 = vmatmul.mubr.bf16.gmra.mrb[180].mxu0 %v5872_v29 }
 0x1e3   :  { %1654 = vmatprep.mubr.bf16.mxu0 %v5650_v59 }
 0x1e4   :  { %v5973_v27 = vpack.c.bf16 %v1836_v3, %v1835_v58 }
 0x1e5   :  { %v1440_v43 = vpop.f32.mrb[76].mxu0 }
 0x1e6   :  { %v1441_v56 = vadd.f32 %v5697_v10, %v1440_v43  ;;  %v1442_v40 = vpop.f32.mrb[77].mxu0  ;;  %2013 = vrot.lane.b32.xlu1 %v5973_v27, %s4795_s21 }
 0x1e7   :  { %v1443_v63 = vpop.f32.mrb[78].mxu0 }
 0x1e8   :  { %v1444_v13 = vadd.f32 %v5697_v10, %v1443_v63  ;;  %v1445_v34 = vpop.f32.mrb[79].mxu0  ;;  %v1837_v62 = vmax.f32 %v1441_v56, 0.0  ;;  %v1696_v3 = vpop.f32.mrb[0].mxu1 }
 0x1e9   :  { %v1698_v40 = vpop.f32.mrb[1].mxu1  ;;  %v1697_v34 = vadd.f32 %v5697_v10, %v1696_v3 }
 0x1ea   :  { %v1838_v5 = vmax.f32 %v1444_v13, 0.0  ;;  %1655 = vmatmul.mubr.bf16.gmra.mrb[184].mxu0 %v5894_v35  ;;  %v1699_v63 = vpop.f32.mrb[2].mxu1 }
 0x1eb   :  { %1662 = vmatprep.mubr.bf16.mxu0 %v5667_v2 }
 0x1ec   :  { %v1946_v59 = vpack.c.bf16 %v1838_v5, %v1837_v62  ;;  %v1700_v62 = vadd.f32 %v5697_v10, %v1699_v63  ;;  %v1701_v5 = vpop.f32.mrb[3].mxu1 }
 0x1ed   :  { %v1448_v29 = vpop.f32.mrb[80].mxu0 }
 0x1ee   :  { %v1449_v61 = vadd.f32 %v5697_v10, %v1448_v29  ;;  %v1450_v53 = vpop.f32.mrb[81].mxu0  ;;  %2016 = vrot.lane.b32.xlu1 %v1946_v59, %s4797_s28 }
 0x1ef   :  { %v1451_v48 = vpop.f32.mrb[82].mxu0 }
 0x1f0   :  { %v1452_v26 = vadd.f32 %v5697_v10, %v1451_v48  ;;  %v1453_v44 = vpop.f32.mrb[83].mxu0  ;;  %v1839_v37 = vmax.f32 %v1449_v61, 0.0  ;;  %v1704_v29 = vpop.f32.mrb[4].mxu1  ;;  %v1901_v48 = vmax.f32 %v1697_v34, 0.0 }
 0x1f1   :  { %v1706_v44 = vpop.f32.mrb[5].mxu1 }
 0x1f2   :  { %v1840_v42 = vmax.f32 %v1452_v26, 0.0  ;;  %1663 = vmatmul.mubr.bf16.gmra.mrb[188].mxu0 %v5907_v47  ;;  %2077 = vrot.lane.b32.xlu1 %v1946_v59, %s4796_s25  ;;  %v1902_v26 = vmax.f32 %v1700_v62, 0.0 }
 0x1f3   :  { %1670 = vmatprep.mubr.bf16.mxu0 %v5685_v50 }
 0x1f4   :  { %v5987_v2 = vpack.c.bf16 %v1840_v42, %v1839_v37  ;;  %v1707_v42 = vpop.f32.mrb[6].mxu1 }
 0x1f5   :  { %v1456_v35 = vpop.f32.mrb[84].mxu0 }
 0x1f6   :  { %v1457_v49 = vadd.f32 %v5697_v10, %v1456_v35  ;;  %v1458_v7 = vpop.f32.mrb[85].mxu0  ;;  %2080 = vrot.lane.b32.xlu1 %v5987_v2, %s4795_s21 }
 0x1f7   :  { %v1459_v8 = vpop.f32.mrb[86].mxu0 }
 0x1f8   :  { %v1460_v4 = vadd.f32 %v5697_v10, %v1459_v8  ;;  %v1461_v17 = vpop.f32.mrb[87].mxu0  ;;  %v1841_v16 = vmax.f32 %v1457_v49, 0.0  ;;  %v6014_v8 = vpack.c.bf16 %v1902_v26, %v1901_v48 }
 0x1f9   :  { %v1709_v17 = vpop.f32.mrb[7].mxu1 }
 0x1fa   :  { %v1842_v52 = vmax.f32 %v1460_v4, 0.0  ;;  %1671 = vmatmul.mubr.bf16.gmra.mrb[192].mxu0 %v5919_v22  ;;  %v1705_v4 = vadd.f32 %v5697_v10, %v1704_v29 }
 0x1fb   :  { %1678 = vmatprep.mubr.bf16.mxu0 %v5705_v12 }
 0x1fc   :  { %v1948_v50 = vpack.c.bf16 %v1842_v52, %v1841_v16 }
 0x1fd   :  { %v1464_v47 = vpop.f32.mrb[88].mxu0 }
 0x1fe   :  { %v1465_v54 = vadd.f32 %v5697_v10, %v1464_v47  ;;  %v1466_v19 = vpop.f32.mrb[89].mxu0  ;;  %2083 = vrot.lane.b32.xlu1 %v1948_v50, %s4797_s28 }
 0x1ff   :  { %v1467_v41 = vpop.f32.mrb[90].mxu0 }
 0x200   :  { %v1468_v36 = vadd.f32 %v5697_v10, %v1467_v41  ;;  %v1469_v57 = vpop.f32.mrb[91].mxu0  ;;  %v1843_v38 = vmax.f32 %v1465_v54, 0.0 }
 0x201   :  { %v1708_v57 = vadd.f32 %v5697_v10, %v1707_v42 }
 0x202   :  { %v1844_v60 = vmax.f32 %v1468_v36, 0.0  ;;  %1679 = vmatmul.mubr.bf16.gmra.mrb[196].mxu0 %v5935_v46  ;;  %2141 = vrot.lane.b32.xlu1 %v1948_v50, %s4796_s25  ;;  %v1993_v46 = vpop.permute.xlu1 %1992  ;;  %v1712_v50 = vpop.f32.mrb[8].mxu1  ;;  %v1903_v36 = vmax.f32 %v1705_v4, 0.0 }
 0x203   :  { %1686 = vmatprep.mubr.bf16.mxu0 %v5722_v39  ;;  %v1714_v54 = vpop.f32.mrb[9].mxu1 }
 0x204   :  { %v1949_v12 = vpack.c.bf16 %v1844_v60, %v1843_v38  ;;  %v1713_v38 = vadd.f32 %v5697_v10, %v1712_v50  ;;  %v1715_v60 = vpop.f32.mrb[10].mxu1 }
 0x205   :  { %v1472_v22 = vpop.f32.mrb[92].mxu0 }
 0x206   :  { %v1473_v32 = vadd.f32 %v5697_v10, %v1472_v22  ;;  %v1474_v55 = vpop.f32.mrb[93].mxu0  ;;  %2144 = vrot.lane.b32.xlu1 %v1949_v12, %s4795_s21  ;;  %v1996_v14 = vpop.permute.xlu1 %1995  ;;  %v1716_v22 = vadd.f32 %v5697_v10, %v1715_v60 }
 0x207   :  { %v1475_v20 = vpop.f32.mrb[94].mxu0 }
 0x208   :  { %v1476_v24 = vadd.f32 %v5697_v10, %v1475_v20  ;;  %v1477_v21 = vpop.f32.mrb[95].mxu0  ;;  %v1845_v33 = vmax.f32 %v1473_v32, 0.0  ;;  %v1717_v32 = vpop.f32.mrb[11].mxu1 }
 0x209   :  { %v1905_v21 = vmax.f32 %v1713_v38, 0.0 }
 0x20a   :  { %v1846_v25 = vmax.f32 %v1476_v24, 0.0  ;;  %1687 = vmatmul.mubr.bf16.gmra.mrb[200].mxu0 %v5947_v51  ;;  %v1999_v13 = vpop.permute.xlu1 %1998  ;;  %v1904_v24 = vmax.f32 %v1708_v57, 0.0 }
 0x20c   :  { %v1950_v6 = vpack.c.bf16 %v1846_v25, %v1845_v33  ;;  %v1720_v33 = vpop.f32.mrb[12].mxu1  ;;  %v2030_v25 = vsel %vm2027_vm1, %v5716_v0, %v1993_v46 }
 0x20d   :  { %v1480_v9 = vpop.f32.mrb[96].mxu0  ;;  %v2032_v40 = vsel %vm74_vm0, %v2030_v25, %v1996_v14  ;;  %v6043_v14 = vld [vmem:[%s6749_s2] ss:$0 sm:$0xff] }
 0x20e   :  { %v1481_v39 = vadd.f32 %v5697_v10, %v1480_v9  ;;  %v1482_v11 = vpop.f32.mrb[97].mxu0  ;;  %2147 = vrot.lane.b32.xlu1 %v1950_v6, %s4797_s28  ;;  %v6017_v47 = vpop.permute.xlu1 %2061  ;;  %v2035_v63 = vsel %vm2033_vm2, %v2032_v40, %v1999_v13 }
 0x20f   :  { %v1483_v45 = vpop.f32.mrb[98].mxu0  ;;  %v1722_v11 = vpop.f32.mrb[13].mxu1 }
 0x210   :  { %v1484_v23 = vadd.f32 %v5697_v10, %v1483_v45  ;;  %v1485_v58 = vpop.f32.mrb[99].mxu0  ;;  %v1847_v43 = vmax.f32 %v1481_v39, 0.0  ;;  %v2002_v35 = vpop.permute.xlu0 %2001  ;;  %v1906_v39 = vmax.f32 %v1716_v22, 0.0 }
 0x211   :  { %v2039_v6 = vsel %vm2027_vm1, %v5859_v15, %v2002_v35  ;;  %v1723_v15 = vpop.f32.mrb[14].mxu1 }
 0x212   :  { %v1848_v56 = vmax.f32 %v1484_v23, 0.0  ;;  %v6035_v46 = vpack.c.bf16 %v1906_v39, %v1905_v21  ;;  %v1725_v5 = vpop.f32.mrb[15].mxu1  ;;  %v1724_v48 = vadd.f32 %v6043_v14, %v1723_v15 }
 0x213   :  { %v1728_v29 = vpop.f32.mrb[16].mxu1 }
 0x214   :  { %v6008_v51 = vpack.c.bf16 %v1848_v56, %v1847_v43  ;;  %v6030_v43 = vpack.c.bf16 %v1904_v24, %v1903_v36  ;;  %v1721_v56 = vadd.f32 %v5697_v10, %v1720_v33  ;;  %v1729_v13 = vadd.f32 %v6043_v14, %v1728_v29  ;;  %v1730_v26 = vpop.f32.mrb[17].mxu1 }
 0x215   :  { %v1488_v59 = vpop.f32.mrb[100].mxu0 }
 0x216   :  { %v1489_v61 = vadd.f32 %v5697_v10, %v1488_v59  ;;  %v1490_v53 = vpop.f32.mrb[101].mxu0  ;;  %v2065_v59 = vpop.permute.xlu1 %2064 }
 0x217   :  { %v1491_v37 = vpop.f32.mrb[102].mxu0 }
 0x218   :  { %v1492_v49 = vadd.f32 %v5697_v10, %v1491_v37  ;;  %v1493_v7 = vpop.f32.mrb[103].mxu0  ;;  %v1849_v16 = vmax.f32 %v1489_v61, 0.0  ;;  %v2005_v41 = vpop.permute.xlu0 %2004 }
 0x219   :  { %v2041_v45 = vsel %vm74_vm0, %v2039_v6, %v2005_v41  ;;  %v1731_v37 = vpop.f32.mrb[18].mxu1  ;;  %v1909_v7 = vmax.f32 %v1729_v13, 0.0 }
 0x21a   :  { %v1850_v52 = vmax.f32 %v1492_v49, 0.0  ;;  %v1908_v49 = vmax.f32 %v1724_v48, 0.0  ;;  %v1732_v4 = vadd.f32 %v6043_v14, %v1731_v37  ;;  %v1733_v17 = vpop.f32.mrb[19].mxu1  ;;  %v2068_v32 = vpop.permute.xlu1 %2067 }
 0x21c   :  { %v1952_v19 = vpack.c.bf16 %v1850_v52, %v1849_v16  ;;  %v1736_v52 = vpop.f32.mrb[20].mxu1  ;;  %v1910_v41 = vmax.f32 %v1732_v4, 0.0 }
 0x21d   :  { %v1496_v12 = vpop.f32.mrb[104].mxu0  ;;  %v1737_v36 = vadd.f32 %v6043_v14, %v1736_v52  ;;  %v1738_v57 = vpop.f32.mrb[21].mxu1 }
 0x21e   :  { %v1497_v55 = vadd.f32 %v5697_v10, %v1496_v12  ;;  %v1498_v20 = vpop.f32.mrb[105].mxu0  ;;  %2019 = vrot.lane.b32.xlu0 %v1952_v19, %s4796_s25  ;;  %v6055_v12 = vpack.c.bf16 %v1910_v41, %v1909_v7  ;;  %v1739_v22 = vpop.f32.mrb[22].mxu1 }
 0x21f   :  { %v1499_v9 = vpop.f32.mrb[106].mxu0  ;;  %v1911_v21 = vmax.f32 %v1737_v36, 0.0  ;;  %v1740_v33 = vadd.f32 %v6043_v14, %v1739_v22 }
 0x220   :  { %v1500_v23 = vadd.f32 %v5697_v10, %v1499_v9  ;;  %v1501_v58 = vpop.f32.mrb[107].mxu0  ;;  %v2008_v3 = vpop.permute.xlu0 %2007  ;;  %v1851_v34 = vmax.f32 %v1497_v55, 0.0  ;;  %v1907_v10 = vmax.f32 %v1721_v56, 0.0 }
 0x221   :  { %v2043_v0 = vsel %vm2033_vm2, %v2041_v45, %v2008_v3  ;;  %v1741_v55 = vpop.f32.mrb[23].mxu1 }
 0x222   :  { %v1852_v62 = vmax.f32 %v1500_v23, 0.0  ;;  %2680 = vmatprep.mubr.bf16.mxu1 %v2043_v0  ;;  %v6052_v19 = vpack.c.bf16 %v1908_v49, %v1907_v10  ;;  %v1744_v25 = vpop.f32.mrb[24].mxu1  ;;  %v1912_v23 = vmax.f32 %v1740_v33, 0.0 }
 0x223   :  { %2681 = vmatmul.mubr.bf16.vlgmr.msra.gmra.mrb[52].mxu1 %v2035_v63  ;;  %v1745_v9 = vadd.f32 %v6043_v14, %v1744_v25  ;;  %v1746_v39 = vpop.f32.mrb[25].mxu1  ;;  %v2095_v63 = vsel %vm2027_vm1, %v5747_v31, %v6017_v47 }
 0x224   :  { %v6038_v61 = vpack.c.bf16 %v1852_v62, %v1851_v34  ;;  %v2070_v53 = vpop.permute.xlu0 %2069  ;;  %v1747_v58 = vpop.f32.mrb[26].mxu1  ;;  %v6069_v10 = vpack.c.bf16 %v1912_v23, %v1911_v21  ;;  %v2097_v48 = vsel %vm74_vm0, %v2095_v63, %v2065_v59 }
 0x225   :  { %v1504_v44 = vpop.f32.mrb[108].mxu0  ;;  %v2103_v3 = vsel %vm2027_vm1, %v5898_v30, %v2070_v53  ;;  %v1913_v40 = vmax.f32 %v1745_v9, 0.0  ;;  %v1748_v0 = vadd.f32 %v6043_v14, %v1747_v58  ;;  %v1749_v15 = vpop.f32.mrb[27].mxu1  ;;  %v2099_v31 = vsel %vm2033_vm2, %v2097_v48, %v2068_v32 }
 0x226   :  { %v1505_v42 = vadd.f32 %v6043_v14, %v1504_v44  ;;  %v1506_v35 = vpop.f32.mrb[109].mxu0  ;;  %2022 = vrot.lane.b32.xlu0 %v6038_v61, %s4795_s21  ;;  %v1752_v13 = vpop.f32.mrb[28].mxu1 }
 0x227   :  { %v1507_v16 = vpop.f32.mrb[110].mxu0  ;;  %v1914_v53 = vmax.f32 %v1748_v0, 0.0  ;;  %v1753_v47 = vadd.f32 %v6043_v14, %v1752_v13  ;;  %v1754_v37 = vpop.f32.mrb[29].mxu1 }
 0x228   :  { %v1508_v50 = vadd.f32 %v6043_v14, %v1507_v16  ;;  %v1509_v54 = vpop.f32.mrb[111].mxu0  ;;  %v1853_v38 = vmax.f32 %v1505_v42, 0.0  ;;  %v2073_v24 = vpop.permute.xlu0 %2072 }
 0x229   :  { %v2105_v34 = vsel %vm74_vm0, %v2103_v3, %v2073_v24  ;;  %v2126_v42 = vpop.permute.xlu1 %2125  ;;  %v6076_v35 = vpack.c.bf16 %v1914_v53, %v1913_v40  ;;  %v1755_v49 = vpop.f32.mrb[30].mxu1  ;;  %v1915_v4 = vmax.f32 %v1753_v47, 0.0 }
 0x22a   :  { %v1854_v60 = vmax.f32 %v1508_v50, 0.0  ;;  %v1756_v17 = vadd.f32 %v6043_v14, %v1755_v49  ;;  %v1757_v16 = vpop.f32.mrb[31].mxu1  ;;  %v2159_v13 = vsel %vm2027_vm1, %v5779_v18, %v2126_v42 }
 0x22c   :  { %v1954_v20 = vpack.c.bf16 %v1854_v60, %v1853_v38  ;;  %v1760_v50 = vpop.f32.mrb[32].mxu1  ;;  %v1916_v36 = vmax.f32 %v1756_v17, 0.0 }
 0x22d   :  { %v1512_v6 = vpop.f32.mrb[112].mxu0  ;;  %v1761_v57 = vadd.f32 %v6043_v14, %v1760_v50  ;;  %v1762_v38 = vpop.f32.mrb[33].mxu1 }
 0x22e   :  { %v1513_v11 = vadd.f32 %v6043_v14, %v1512_v6  ;;  %v1514_v45 = vpop.f32.mrb[113].mxu0  ;;  %2025 = vrot.lane.b32.xlu0 %v1954_v20, %s4797_s28  ;;  %v1763_v22 = vpop.f32.mrb[34].mxu1 }
 0x22f   :  { %v1515_v56 = vpop.f32.mrb[114].mxu0  ;;  %v1917_v24 = vmax.f32 %v1761_v57, 0.0  ;;  %v1764_v21 = vadd.f32 %v6043_v14, %v1763_v22  ;;  %v1765_v33 = vpop.f32.mrb[35].mxu1 }
 0x230   :  { %v1516_v62 = vadd.f32 %v6043_v14, %v1515_v56  ;;  %v1517_v5 = vpop.f32.mrb[115].mxu0  ;;  %v2076_v29 = vpop.permute.xlu0 %2075  ;;  %v1855_v26 = vmax.f32 %v1513_v11, 0.0 }
 0x231   :  { %v2107_v30 = vsel %vm2033_vm2, %v2105_v34, %v2076_v29  ;;  %v2129_v39 = vpop.permute.xlu1 %2128  ;;  %v1918_v11 = vmax.f32 %v1764_v21, 0.0 }
 0x232   :  { %v1856_v44 = vmax.f32 %v1516_v62, 0.0  ;;  %2085 = vrot.lane.b32.xlu0 %v1954_v20, %s4796_s25  ;;  %2688 = vmatprep.mubr.bf16.mxu1 %v2107_v30  ;;  %v6086_v20 = vpack.c.bf16 %v1916_v36, %v1915_v4  ;;  %v2161_v37 = vsel %vm74_vm0, %v2159_v13, %v2129_v39 }
 0x233   :  { %2689 = vmatmul.mubr.bf16.gmra.mrb[56].mxu1 %v2099_v31  ;;  %v6090_v0 = vpack.c.bf16 %v1918_v11, %v1917_v24 }
 0x234   :  { %v6078_v59 = vpack.c.bf16 %v1856_v44, %v1855_v26  ;;  %v2134_v7 = vpop.permute.xlu0 %2133  ;;  %v1768_v9 = vpop.f32.mrb[36].mxu1 }
 0x235   :  { %v1520_v52 = vpop.f32.mrb[116].mxu0  ;;  %v1770_v45 = vpop.f32.mrb[37].mxu1  ;;  %v1769_v3 = vadd.f32 %v6043_v14, %v1768_v9  ;;  %v2167_v48 = vsel %vm2027_vm1, %v5924_v1, %v2134_v7 }
 0x236   :  { %v1521_v54 = vadd.f32 %v6043_v14, %v1520_v52  ;;  %v1522_v41 = vpop.f32.mrb[117].mxu0  ;;  %2088 = vrot.lane.b32.xlu0 %v6078_v59, %s4795_s21  ;;  %v1771_v56 = vpop.f32.mrb[38].mxu1 }
 0x237   :  { %v1523_v60 = vpop.f32.mrb[118].mxu0  ;;  %v1772_v15 = vadd.f32 %v6043_v14, %v1771_v56  ;;  %v1773_v63 = vpop.f32.mrb[39].mxu1  ;;  %v1919_v5 = vmax.f32 %v1769_v3, 0.0 }
 0x238   :  { %v1524_v32 = vadd.f32 %v6043_v14, %v1523_v60  ;;  %v1525_v55 = vpop.f32.mrb[119].mxu0  ;;  %v1857_v25 = vmax.f32 %v1521_v54, 0.0  ;;  %v2137_v58 = vpop.permute.xlu0 %2136 }
 0x239   :  { %v2132_v29 = vpop.permute.xlu1 %2131  ;;  %v1920_v53 = vmax.f32 %v1772_v15, 0.0  ;;  %v2169_v26 = vsel %vm74_vm0, %v2167_v48, %v2137_v58 }
 0x23a   :  { %v1858_v6 = vmax.f32 %v1524_v32, 0.0  ;;  %v2163_v1 = vsel %vm2033_vm2, %v2161_v37, %v2132_v29 }
 0x23b   :  { %v6103_v4 = vpack.c.bf16 %v1920_v53, %v1919_v5 }
 0x23c   :  { %v1956_v23 = vpack.c.bf16 %v1858_v6, %v1857_v25  ;;  %v1776_v18 = vpop.f32.mrb[40].mxu1 }
 0x23d   :  { %v1528_v40 = vpop.f32.mrb[120].mxu0  ;;  %v1778_v42 = vpop.f32.mrb[41].mxu1  ;;  %v1777_v52 = vadd.f32 %v6043_v14, %v1776_v18 }
 0x23e   :  { %v1529_v34 = vadd.f32 %v6043_v14, %v1528_v40  ;;  %v1530_v62 = vpop.f32.mrb[121].mxu0  ;;  %2091 = vrot.lane.b32.xlu0 %v1956_v23, %s4797_s28  ;;  %v1779_v50 = vpop.f32.mrb[42].mxu1 }
 0x23f   :  { %v1531_v30 = vpop.f32.mrb[122].mxu0  ;;  %v1780_v41 = vadd.f32 %v6043_v14, %v1779_v50  ;;  %v1781_v36 = vpop.f32.mrb[43].mxu1  ;;  %v1921_v60 = vmax.f32 %v1777_v52, 0.0 }
 0x240   :  { %v1532_v44 = vadd.f32 %v6043_v14, %v1531_v30  ;;  %v1533_v31 = vpop.f32.mrb[123].mxu0  ;;  %v2140_v47 = vpop.permute.xlu0 %2139  ;;  %v1859_v17 = vmax.f32 %v1529_v34, 0.0 }
 0x241   :  { %v2171_v49 = vsel %vm2033_vm2, %v2169_v26, %v2140_v47  ;;  %v1922_v32 = vmax.f32 %v1780_v41, 0.0 }
 0x242   :  { %v1860_v16 = vmax.f32 %v1532_v44, 0.0  ;;  %2149 = vrot.lane.b32.xlu0 %v1956_v23, %s4796_s25  ;;  %2696 = vmatprep.mubr.bf16.mxu1 %v2171_v49 }
 0x243   :  { %2697 = vmatmul.mubr.bf16.gmra.mrb[60].mxu1 %v2163_v1  ;;  %v6112_v21 = vpack.c.bf16 %v1922_v32, %v1921_v60 }
 0x244   :  { %v1957_v7 = vpack.c.bf16 %v1860_v16, %v1859_v17  ;;  %v1784_v6 = vpop.f32.mrb[44].mxu1 }
 0x245   :  { %v1536_v54 = vpop.f32.mrb[124].mxu0  ;;  %v1786_v9 = vpop.f32.mrb[45].mxu1  ;;  %v1785_v11 = vadd.f32 %v6043_v14, %v1784_v6 }
 0x246   :  { %v1537_v57 = vadd.f32 %v6043_v14, %v1536_v54  ;;  %v1538_v38 = vpop.f32.mrb[125].mxu0  ;;  %2152 = vrot.lane.b32.xlu0 %v1957_v7, %s4795_s21  ;;  %v1787_v45 = vpop.f32.mrb[46].mxu1 }
 0x247   :  { %v1539_v22 = vpop.f32.mrb[126].mxu0  ;;  %v1788_v58 = vadd.f32 %v6043_v14, %v1787_v45  ;;  %v1789_v3 = vpop.f32.mrb[47].mxu1  ;;  %v1923_v15 = vmax.f32 %v1785_v11, 0.0 }
 0x248   :  { %v1540_v55 = vadd.f32 %v6043_v14, %v1539_v22  ;;  %v1541_v24 = vpop.f32.mrb[127].mxu0  ;;  %v1861_v33 = vmax.f32 %v1537_v57, 0.0 }
 0x249   :  { %v1924_v34 = vmax.f32 %v1788_v58, 0.0 }
 0x24a   :  { %v1862_v25 = vmax.f32 %v1540_v55, 0.0 }
 0x24b   :  { %v6119_v29 = vpack.c.bf16 %v1924_v34, %v1923_v15 }
 0x24c   :  { %v1958_v39 = vpack.c.bf16 %v1862_v25, %v1861_v33  ;;  %v1792_v53 = vpop.f32.mrb[48].mxu1 }
 0x24d   :  { %v1544_v23 = vpop.f32.mrb[128].mxu0  ;;  %v1794_v13 = vpop.f32.mrb[49].mxu1  ;;  %v1793_v44 = vadd.f32 %v6043_v14, %v1792_v53 }
 0x24e   :  { %v1545_v56 = vadd.f32 %v6043_v14, %v1544_v23  ;;  %v1546_v40 = vpop.f32.mrb[129].mxu0  ;;  %2155 = vrot.lane.b32.xlu0 %v1958_v39, %s4797_s28  ;;  %v1795_v31 = vpop.f32.mrb[50].mxu1 }
 0x24f   :  { %v1547_v63 = vpop.f32.mrb[130].mxu0  ;;  %v1796_v37 = vadd.f32 %v6043_v14, %v1795_v31  ;;  %v1797_v49 = vpop.f32.mrb[51].mxu1  ;;  %v1925_v1 = vmax.f32 %v1793_v44, 0.0 }
 0x250   :  { %v1548_v62 = vadd.f32 %v6043_v14, %v1547_v63  ;;  %v1549_v5 = vpop.f32.mrb[131].mxu0  ;;  %v1863_v48 = vmax.f32 %v1545_v56, 0.0 }
 0x251   :  { %v1926_v42 = vmax.f32 %v1796_v37, 0.0 }
 0x252   :  { %v1864_v30 = vmax.f32 %v1548_v62, 0.0 }
 0x253   :  { %v6127_v50 = vpack.c.bf16 %v1926_v42, %v1925_v1 }
 0x254   :  { %v6121_v26 = vpack.c.bf16 %v1864_v30, %v1863_v48 }
 0x255   :  { %v1552_v47 = vpop.f32.mrb[132].mxu0 }
 0x256   :  { %v1553_v17 = vadd.f32 %v6043_v14, %v1552_v47  ;;  %v1554_v16 = vpop.f32.mrb[133].mxu0 }
 0x257   :  { %v1555_v18 = vpop.f32.mrb[134].mxu0 }
 0x258   :  { %v1556_v7 = vadd.f32 %v6043_v14, %v1555_v18  ;;  %v1557_v52 = vpop.f32.mrb[135].mxu0  ;;  %v1865_v54 = vmax.f32 %v1553_v17, 0.0 }
 0x25a   :  { %v1866_v41 = vmax.f32 %v1556_v7, 0.0 }
 0x25c   :  { %v1960_v36 = vpack.c.bf16 %v1866_v41, %v1865_v54 }
 0x25d   :  { %v1560_v57 = vpop.f32.mrb[136].mxu0 }
 0x25e   :  { %v1561_v38 = vadd.f32 %v6043_v14, %v1560_v57  ;;  %v1562_v60 = vpop.f32.mrb[137].mxu0  ;;  %2190 = vrot.lane.b32.xlu1 %v1960_v36, %s4796_s25  ;;  %v4683_v36 = vld [vmem:[%s6750_s3 + $0xc0] sm:$0xff]  }
 0x25f   :  { %v1563_v22 = vpop.f32.mrb[138].mxu0  ;;  %v4684_v57 = vld [vmem:[%s6750_s3 + $0x80] sm:$0xff]   ;;  %4357 = vmatprep.subr.bf16.mxu1 %v4683_v36  ;;  %v4690_v36 = vld [vmem:[%s6750_s3 + $0x98] sm:$0xff]  }
 0x260   :  { %v1564_v32 = vadd.f32 %v6043_v14, %v1563_v22  ;;  %v1565_v55 = vpop.f32.mrb[139].mxu0  ;;  %v1867_v24 = vmax.f32 %v1561_v38, 0.0  ;;  %4358 = vmatpush3.bf16.msra.mxu1 %v4684_v57 }
 0x262   :  { %v1868_v33 = vmax.f32 %v1564_v32, 0.0 }
 0x264   :  { %v6132_v25 = vpack.c.bf16 %v1868_v33, %v1867_v24 }
 0x265   :  { %v1568_v6 = vpop.f32.mrb[140].mxu0 }
 0x266   :  { %v1569_v9 = vadd.f32 %v6043_v14, %v1568_v6  ;;  %v1570_v39 = vpop.f32.mrb[141].mxu0  ;;  %2193 = vrot.lane.b32.xlu1 %v6132_v25, %s4795_s21 }
 0x267   :  { %v1571_v11 = vpop.f32.mrb[142].mxu0 }
 0x268   :  { %v1572_v45 = vadd.f32 %v6043_v14, %v1571_v11  ;;  %v1573_v23 = vpop.f32.mrb[143].mxu0  ;;  %v1869_v58 = vmax.f32 %v1569_v9, 0.0 }
 0x269   :  { %v4685_v23 = vld [vmem:[%s6750_s3 + $0xc8] sm:$0xff]  }
 0x26a   :  { %v1870_v3 = vmax.f32 %v1572_v45, 0.0  ;;  %4359 = vmatprep.subr.bf16.mxu1 %v4685_v23 }
 0x26c   :  { %v1962_v56 = vpack.c.bf16 %v1870_v3, %v1869_v58  ;;  %v4686_v58 = vld [vmem:[%s6750_s3 + $0x88] sm:$0xff]  }
 0x26d   :  { %v1576_v40 = vpop.f32.mrb[144].mxu0  ;;  %4360 = vmatpush3.bf16.msra.mxu1 %v4686_v58 }
 0x26e   :  { %v1577_v15 = vadd.f32 %v6043_v14, %v1576_v40  ;;  %v1578_v63 = vpop.f32.mrb[145].mxu0  ;;  %2196 = vrot.lane.b32.xlu1 %v1962_v56, %s4797_s28 }
 0x26f   :  { %v1579_v34 = vpop.f32.mrb[146].mxu0 }
 0x270   :  { %v1580_v62 = vadd.f32 %v6043_v14, %v1579_v34  ;;  %v1581_v5 = vpop.f32.mrb[147].mxu0  ;;  %v1871_v48 = vmax.f32 %v1577_v15, 0.0 }
 0x271   :  { %v4688_v5 = vld [vmem:[%s6750_s3 + $0x90] sm:$0xff]  }
 0x272   :  { %v1872_v30 = vmax.f32 %v1580_v62, 0.0  ;;  %2223 = vrot.lane.b32.xlu1 %v1962_v56, %s4796_s25  ;;  %v4687_v62 = vld [vmem:[%s6750_s3 + $0xd0] sm:$0xff]  }
 0x273   :  { %4361 = vmatprep.subr.bf16.mxu1 %v4687_v62 }
 0x274   :  { %v6142_v53 = vpack.c.bf16 %v1872_v30, %v1871_v48  ;;  %4362 = vmatpush3.bf16.msra.mxu1 %v4688_v5 }
 0x275   :  { %v1584_v13 = vpop.f32.mrb[148].mxu0 }
 0x276   :  { %v1585_v44 = vadd.f32 %v6043_v14, %v1584_v13  ;;  %v1586_v31 = vpop.f32.mrb[149].mxu0  ;;  %2226 = vrot.lane.b32.xlu1 %v6142_v53, %s4795_s21 }
 0x277   :  { %v1587_v47 = vpop.f32.mrb[150].mxu0 }
 0x278   :  { %v1588_v37 = vadd.f32 %v6043_v14, %v1587_v47  ;;  %v1589_v49 = vpop.f32.mrb[151].mxu0  ;;  %v1873_v17 = vmax.f32 %v1585_v44, 0.0 }
 0x27a   :  { %v1874_v16 = vmax.f32 %v1588_v37, 0.0  ;;  %v2011_v37 = vpop.permute.xlu1 %2010 }
 0x27c   :  { %v1964_v1 = vpack.c.bf16 %v1874_v16, %v1873_v17 }
 0x27d   :  { %v1592_v18 = vpop.f32.mrb[152].mxu0 }
 0x27e   :  { %v1593_v42 = vadd.f32 %v6043_v14, %v1592_v18  ;;  %v1594_v7 = vpop.f32.mrb[153].mxu0  ;;  %2229 = vrot.lane.b32.xlu1 %v1964_v1, %s4797_s28 }
 0x27f   :  { %v1595_v52 = vpop.f32.mrb[154].mxu0  ;;  %v2014_v7 = vpop.permute.xlu1 %2013 }
 0x280   :  { %v1596_v54 = vadd.f32 %v6043_v14, %v1595_v52  ;;  %v1597_v41 = vpop.f32.mrb[155].mxu0  ;;  %v1875_v38 = vmax.f32 %v1593_v42, 0.0 }
 0x281   :  { %v4689_v41 = vld [vmem:[%s6750_s3 + $0xd8] sm:$0xff]  }
 0x282   :  { %v1876_v60 = vmax.f32 %v1596_v54, 0.0  ;;  %2255 = vrot.lane.b32.xlu1 %v1964_v1, %s4796_s25  ;;  %4363 = vmatprep.subr.bf16.mxu1 %v4689_v41 }
 0x283   :  { %4364 = vmatpush3.bf16.msra.mxu1 %v4690_v36 }
 0x284   :  { %v1965_v22 = vpack.c.bf16 %v1876_v60, %v1875_v38 }
 0x285   :  { %v1600_v32 = vpop.f32.mrb[156].mxu0 }
 0x286   :  { %v1601_v55 = vadd.f32 %v6043_v14, %v1600_v32  ;;  %v1602_v24 = vpop.f32.mrb[157].mxu0  ;;  %2258 = vrot.lane.b32.xlu1 %v1965_v22, %s4795_s21  ;;  %v2017_v22 = vpop.permute.xlu1 %2016 }
 0x287   :  { %v1603_v33 = vpop.f32.mrb[158].mxu0  ;;  %v2047_v24 = vsel %vm2027_vm1, %v5962_v28, %v2011_v37 }
 0x288   :  { %v1604_v6 = vadd.f32 %v6043_v14, %v1603_v33  ;;  %v1605_v9 = vpop.f32.mrb[159].mxu0  ;;  %v1877_v39 = vmax.f32 %v1601_v55, 0.0 }
 0x28a   :  { %v1878_v11 = vmax.f32 %v1604_v6, 0.0 }
 0x28c   :  { %v1966_v45 = vpack.c.bf16 %v1878_v11, %v1877_v39  ;;  %v2049_v11 = vsel %vm74_vm0, %v2047_v24, %v2014_v7 }
 0x28d   :  { %v1608_v3 = vpop.f32.mrb[160].mxu0 }
 0x28e   :  { %v1609_v56 = vadd.f32 %v6043_v14, %v1608_v3  ;;  %v1610_v40 = vpop.f32.mrb[161].mxu0  ;;  %2261 = vrot.lane.b32.xlu1 %v1966_v45, %s4797_s28  ;;  %v2078_v3 = vpop.permute.xlu1 %2077 }
 0x28f   :  { %v1611_v15 = vpop.f32.mrb[162].mxu0  ;;  %v4691_v40 = vld [vmem:[%s6750_s3 + $0xe0] sm:$0xff]  }
 0x290   :  { %v1612_v63 = vadd.f32 %v6043_v14, %v1611_v15  ;;  %v1613_v34 = vpop.f32.mrb[163].mxu0  ;;  %v1879_v48 = vmax.f32 %v1609_v56, 0.0  ;;  %v2020_v17 = vpop.permute.xlu0 %2019  ;;  %v4692_v15 = vld [vmem:[%s6750_s3 + $0xa0] sm:$0xff]   ;;  %4365 = vmatprep.subr.bf16.mxu1 %v4691_v40  ;;  %v4696_v40 = vld [vmem:[%s6750_s3 + $0xb0] sm:$0xff]  }
 0x291   :  { %v2055_v32 = vsel %vm2027_vm1, %v6008_v51, %v2020_v17  ;;  %v6202_v51 = vsel %vm2033_vm2, %v2049_v11, %v2017_v22  ;;  %4366 = vmatpush3.bf16.msra.mxu1 %v4692_v15 }
 0x292   :  { %v1880_v30 = vmax.f32 %v1612_v63, 0.0  ;;  %2294 = vrot.lane.b32.xlu1 %v6014_v8, %s4797_s28  ;;  %v2081_v37 = vpop.permute.xlu1 %2080 }
 0x294   :  { %v6178_v13 = vpack.c.bf16 %v1880_v30, %v1879_v48 }
 0x295   :  { %v1616_v44 = vpop.f32.mrb[164].mxu0 }
 0x296   :  { %v1617_v31 = vadd.f32 %v6043_v14, %v1616_v44  ;;  %v1618_v47 = vpop.f32.mrb[165].mxu0  ;;  %v4693_v44 = vld [vmem:[%s6750_s3 + $0xe8] sm:$0xff]  }
 0x297   :  { %v1619_v49 = vpop.f32.mrb[166].mxu0  ;;  %4367 = vmatprep.subr.bf16.mxu1 %v4693_v44 }
 0x298   :  { %v1620_v16 = vadd.f32 %v6043_v14, %v1619_v49  ;;  %v1621_v1 = vpop.f32.mrb[167].mxu0  ;;  %v1881_v18 = vmax.f32 %v1617_v31, 0.0  ;;  %v2023_v54 = vpop.permute.xlu0 %2022 }
 0x299   :  { %v2057_v33 = vsel %vm74_vm0, %v2055_v32, %v2023_v54  ;;  %v2111_v54 = vsel %vm2027_vm1, %v5973_v27, %v2078_v3 }
 0x29a   :  { %v1882_v42 = vmax.f32 %v1620_v16, 0.0  ;;  %v2113_v22 = vsel %vm74_vm0, %v2111_v54, %v2081_v37 }
 0x29c   :  { %v1968_v52 = vpack.c.bf16 %v1882_v42, %v1881_v18  ;;  %v2084_v42 = vpop.permute.xlu1 %2083 }
 0x29d   :  { %v1624_v57 = vpop.f32.mrb[168].mxu0  ;;  %v6238_v27 = vsel %vm2033_vm2, %v2113_v22, %v2084_v42  ;;  %v4697_v42 = vld [vmem:[%s6750_s3 + $0xf8] sm:$0xff]  }
 0x29e   :  { %v1625_v38 = vadd.f32 %v6043_v14, %v1624_v57  ;;  %v1626_v60 = vpop.f32.mrb[169].mxu0  ;;  %2199 = vrot.lane.b32.xlu0 %v1968_v52, %s4796_s25 }
 0x29f   :  { %v1627_v55 = vpop.f32.mrb[170].mxu0  ;;  %v4694_v60 = vld [vmem:[%s6750_s3 + $0xa8] sm:$0xff]  }
 0x2a0   :  { %v1628_v6 = vadd.f32 %v6043_v14, %v1627_v55  ;;  %v1629_v9 = vpop.f32.mrb[171].mxu0  ;;  %v2026_v39 = vpop.permute.xlu0 %2025  ;;  %v1883_v23 = vmax.f32 %v1625_v38, 0.0  ;;  %4368 = vmatpush3.bf16.msra.mxu1 %v4694_v60 }
 0x2a1   :  { %v6198_v45 = vsel %vm2033_vm2, %v2057_v33, %v2026_v39  ;;  %v2142_v33 = vpop.permute.xlu1 %2141 }
 0x2a2   :  { %v1884_v58 = vmax.f32 %v1628_v6, 0.0  ;;  %2704 = vmatprep.mubr.bf16.mxu1 %v6198_v45 }
 0x2a3   :  { %2705 = vmatmul.mubr.bf16.gmra.mrb[64].mxu1 %v6202_v51 }
 0x2a4   :  { %v6205_v28 = vpack.c.bf16 %v1884_v58, %v1883_v23  ;;  %v2086_v63 = vpop.permute.xlu0 %2085 }
 0x2a5   :  { %v1632_v56 = vpop.f32.mrb[172].mxu0  ;;  %v2119_v7 = vsel %vm2027_vm1, %v6038_v61, %v2086_v63 }
 0x2a6   :  { %v1633_v34 = vadd.f32 %v6043_v14, %v1632_v56  ;;  %v1634_v62 = vpop.f32.mrb[173].mxu0  ;;  %2202 = vrot.lane.b32.xlu0 %v6205_v28, %s4795_s21  ;;  %v4695_v56 = vld [vmem:[%s6750_s3 + $0xf0] sm:$0xff]  }
 0x2a7   :  { %v1635_v5 = vpop.f32.mrb[174].mxu0  ;;  %4369 = vmatprep.subr.bf16.mxu1 %v4695_v56 }
 0x2a8   :  { %v1636_v48 = vadd.f32 %v6043_v14, %v1635_v5  ;;  %v1637_v30 = vpop.f32.mrb[175].mxu0  ;;  %v1885_v31 = vmax.f32 %v1633_v34, 0.0  ;;  %v2089_v17 = vpop.permute.xlu0 %2088  ;;  %4370 = vmatpush3.bf16.msra.mxu1 %v4696_v40 }
 0x2a9   :  { %v2121_v41 = vsel %vm74_vm0, %v2119_v7, %v2089_v17  ;;  %v2145_v34 = vpop.permute.xlu1 %2144  ;;  %4371 = vmatprep.subr.bf16.mxu1 %v4697_v42 }
 0x2aa   :  { %v1886_v47 = vmax.f32 %v1636_v48, 0.0 }
 0x2ac   :  { %v1970_v49 = vpack.c.bf16 %v1886_v47, %v1885_v31 }
 0x2ad   :  { %v1640_v16 = vpop.f32.mrb[176].mxu0  ;;  %v2148_v31 = vpop.permute.xlu1 %2147 }
 0x2ae   :  { %v1641_v1 = vadd.f32 %v6043_v14, %v1640_v16  ;;  %v1642_v18 = vpop.f32.mrb[177].mxu0  ;;  %2205 = vrot.lane.b32.xlu0 %v1970_v49, %s4797_s28 }
 0x2af   :  { %v1643_v52 = vpop.f32.mrb[178].mxu0 }
 0x2b0   :  { %v1644_v36 = vadd.f32 %v6043_v14, %v1643_v52  ;;  %v1645_v57 = vpop.f32.mrb[179].mxu0  ;;  %v2092_v38 = vpop.permute.xlu0 %2091  ;;  %v1887_v61 = vmax.f32 %v1641_v1, 0.0 }
 0x2b1   :  { %v6233_v32 = vsel %vm2033_vm2, %v2121_v41, %v2092_v38  ;;  %v4698_v41 = vld [vmem:[%s6750_s3 + $0xb8] sm:$0xff]  }
 0x2b2   :  { %v1888_v55 = vmax.f32 %v1644_v36, 0.0  ;;  %2231 = vrot.lane.b32.xlu0 %v1970_v49, %s4796_s25  ;;  %2712 = vmatprep.mubr.bf16.mxu1 %v6233_v32  ;;  %v2175_v49 = vsel %vm2027_vm1, %v5987_v2, %v2142_v33 }
 0x2b3   :  { %2713 = vmatmul.mubr.bf16.gmra.mrb[68].mxu1 %v6238_v27  ;;  %v2177_v7 = vsel %vm74_vm0, %v2175_v49, %v2145_v34 }
 0x2b4   :  { %v6241_v24 = vpack.c.bf16 %v1888_v55, %v1887_v61  ;;  %v2150_v9 = vpop.permute.xlu0 %2149  ;;  %v6271_v2 = vsel %vm2033_vm2, %v2177_v7, %v2148_v31  ;;  %4372 = vmatpush3.bf16.msra.mxu1 %v4698_v41 }
 0x2b5   :  { %v1648_v6 = vpop.f32.mrb[180].mxu0  ;;  %v2183_v47 = vsel %vm2027_vm1, %v6078_v59, %v2150_v9 }
 0x2b6   :  { %v1649_v39 = vadd.f32 %v6043_v14, %v1648_v6  ;;  %v1650_v11 = vpop.f32.mrb[181].mxu0  ;;  %2234 = vrot.lane.b32.xlu0 %v6241_v24, %s4795_s21 }
 0x2b7   :  { %v1651_v23 = vpop.f32.mrb[182].mxu0 }
 0x2b8   :  { %v1652_v58 = vadd.f32 %v6043_v14, %v1651_v23  ;;  %v1653_v3 = vpop.f32.mrb[183].mxu0  ;;  %v1889_v15 = vmax.f32 %v1649_v39, 0.0  ;;  %v2153_v5 = vpop.permute.xlu0 %2152 }
 0x2b9   :  { %v2185_v17 = vsel %vm74_vm0, %v2183_v47, %v2153_v5 }
 0x2ba   :  { %v1890_v63 = vmax.f32 %v1652_v58, 0.0 }
 0x2bc   :  { %v1972_v62 = vpack.c.bf16 %v1890_v63, %v1889_v15 }
 0x2bd   :  { %v1656_v48 = vpop.f32.mrb[184].mxu0 }
 0x2be   :  { %v1657_v30 = vadd.f32 %v6043_v14, %v1656_v48  ;;  %v1658_v44 = vpop.f32.mrb[185].mxu0  ;;  %2237 = vrot.lane.b32.xlu0 %v1972_v62, %s4797_s28 }
 0x2bf   :  { %v1659_v37 = vpop.f32.mrb[186].mxu0 }
 0x2c0   :  { %v1660_v16 = vadd.f32 %v6043_v14, %v1659_v37  ;;  %v1661_v1 = vpop.f32.mrb[187].mxu0  ;;  %v2156_v18 = vpop.permute.xlu0 %2155  ;;  %v1891_v59 = vmax.f32 %v1657_v30, 0.0 }
 0x2c1   :  { %v6266_v52 = vsel %vm2033_vm2, %v2185_v17, %v2156_v18 }
 0x2c2   :  { %v1892_v54 = vmax.f32 %v1660_v16, 0.0  ;;  %2263 = vrot.lane.b32.xlu0 %v1972_v62, %s4796_s25  ;;  %2720 = vmatprep.mubr.bf16.mxu1 %v6266_v52 }
 0x2c3   :  { %2721 = vmatmul.mubr.bf16.gmra.mrb[72].mxu1 %v6271_v2 }
 0x2c4   :  { %v1973_v36 = vpack.c.bf16 %v1892_v54, %v1891_v59 }
 0x2c5   :  { %v1664_v57 = vpop.f32.mrb[188].mxu0 }
 0x2c6   :  { %v1665_v38 = vadd.f32 %v6043_v14, %v1664_v57  ;;  %v1666_v60 = vpop.f32.mrb[189].mxu0  ;;  %2266 = vrot.lane.b32.xlu0 %v1973_v36, %s4795_s21 }
 0x2c7   :  { %v1667_v22 = vpop.f32.mrb[190].mxu0 }
 0x2c8   :  { %v1668_v61 = vadd.f32 %v6043_v14, %v1667_v22  ;;  %v1669_v55 = vpop.f32.mrb[191].mxu0  ;;  %v1893_v33 = vmax.f32 %v1665_v38, 0.0 }
 0x2ca   :  { %v1894_v6 = vmax.f32 %v1668_v61, 0.0 }
 0x2cc   :  { %v1974_v9 = vpack.c.bf16 %v1894_v6, %v1893_v33 }
 0x2cd   :  { %v1672_v39 = vpop.f32.mrb[192].mxu0 }
 0x2ce   :  { %v1673_v11 = vadd.f32 %v6043_v14, %v1672_v39  ;;  %v1674_v23 = vpop.f32.mrb[193].mxu0  ;;  %2269 = vrot.lane.b32.xlu0 %v1974_v9, %s4797_s28 }
 0x2cf   :  { %v1675_v58 = vpop.f32.mrb[194].mxu0 }
 0x2d0   :  { %v1676_v3 = vadd.f32 %v6043_v14, %v1675_v58  ;;  %v1677_v56 = vpop.f32.mrb[195].mxu0  ;;  %v1895_v40 = vmax.f32 %v1673_v11, 0.0  ;;  %v2191_v22 = vpop.permute.xlu1 %2190 }
 0x2d1   :  { %v2209_v58 = vsel %vm2027_vm1, %v6121_v26, %v2191_v22 }
 0x2d2   :  { %v1896_v15 = vmax.f32 %v1676_v3, 0.0  ;;  %2297 = vrot.lane.b32.xlu0 %v6076_v35, %s4796_s25 }
 0x2d4   :  { %v6285_v63 = vpack.c.bf16 %v1896_v15, %v1895_v40 }
 0x2d5   :  { %v1680_v34 = vpop.f32.mrb[196].mxu0 }
 0x2d6   :  { %v1681_v62 = vadd.f32 %v6043_v14, %v1680_v34  ;;  %v1682_v5 = vpop.f32.mrb[197].mxu0  ;;  %2300 = vrot.lane.b32.xlu0 %v6086_v20, %s4795_s21 }
 0x2d7   :  { %v1683_v48 = vpop.f32.mrb[198].mxu0 }
 0x2d8   :  { %v1684_v30 = vadd.f32 %v6043_v14, %v1683_v48  ;;  %v1685_v44 = vpop.f32.mrb[199].mxu0  ;;  %v1897_v31 = vmax.f32 %v1681_v62, 0.0  ;;  %v2194_v39 = vpop.permute.xlu1 %2193 }
 0x2d9   :  { %v2211_v40 = vsel %vm74_vm0, %v2209_v58, %v2194_v39 }
 0x2da   :  { %v1898_v47 = vmax.f32 %v1684_v30, 0.0  ;;  %2303 = vrot.lane.b32.xlu0 %v6090_v0, %s4797_s28 }
 0x2dc   :  { %v1976_v37 = vpack.c.bf16 %v1898_v47, %v1897_v31 }
 0x2dd   :  { %v1688_v35 = vpop.f32.mrb[200].mxu0 }
 0x2de   :  { %v1689_v49 = vadd.f32 %v6043_v14, %v1688_v35  ;;  %v1690_v17 = vpop.f32.mrb[201].mxu0  ;;  %2329 = vrot.lane.b32.xlu0 %v6090_v0, %s4796_s25  ;;  %2288 = vrot.lane.b32.xlu1 %v1976_v37, %s4796_s25 }
 0x2df   :  { %v1691_v16 = vpop.f32.mrb[202].mxu0 }
 0x2e0   :  { %v1692_v1 = vadd.f32 %v6043_v14, %v1691_v16  ;;  %v1693_v18 = vpop.f32.mrb[203].mxu0  ;;  %v1899_v42 = vmax.f32 %v1689_v49, 0.0  ;;  %v2197_v11 = vpop.permute.xlu1 %2196 }
 0x2e1   :  { %v2213_v34 = vsel %vm2033_vm2, %v2211_v40, %v2197_v11 }
 0x2e2   :  { %v1900_v7 = vmax.f32 %v1692_v1, 0.0  ;;  %2332 = vrot.lane.b32.xlu0 %v6103_v4, %s4795_s21 }
 0x2e4   :  { %v6300_v59 = vpack.c.bf16 %v1900_v7, %v1899_v42  ;;  %v2224_v62 = vpop.permute.xlu1 %2223 }
 0x2e5   :  { %v2241_v26 = vsel %vm2027_vm1, %v6132_v25, %v2224_v62 }
 0x2e6   :  { %2335 = vrot.lane.b32.xlu0 %v6112_v21, %s4797_s28  ;;  %2291 = vrot.lane.b32.xlu1 %v6300_v59, %s4795_s21 }
 0x2e8   :  { %v2227_v48 = vpop.permute.xlu1 %2226 }
 0x2e9   :  { %v2243_v37 = vsel %vm74_vm0, %v2241_v26, %v2227_v48 }
 0x2ea   :  { %2361 = vrot.lane.b32.xlu0 %v6112_v21, %s4796_s25  ;;  %2321 = vrot.lane.b32.xlu1 %v6014_v8, %s4796_s25 }
 0x2ee   :  { %2364 = vrot.lane.b32.xlu0 %v6119_v29, %s4795_s21  ;;  %2324 = vrot.lane.b32.xlu1 %v6030_v43, %s4795_s21 }
 0x2f0   :  { %v2230_v44 = vpop.permute.xlu1 %2229 }
 0x2f1   :  { %v2245_v49 = vsel %vm2033_vm2, %v2243_v37, %v2230_v44 }
 0x2f2   :  { %2367 = vrot.lane.b32.xlu0 %v6127_v50, %s4797_s28  ;;  %2327 = vrot.lane.b32.xlu1 %v6035_v46, %s4797_s28 }
 0x2f4   :  { %v2256_v17 = vpop.permute.xlu1 %2255 }
 0x2f5   :  { %v2273_v25 = vsel %vm2027_vm1, %v6142_v53, %v2256_v17 }
 0x2f6   :  { %2353 = vrot.lane.b32.xlu1 %v6035_v46, %s4796_s25  ;;  %v4303_v14 = vpop.f32.mrb[52].mxu1 }
 0x2f7   :  { %v4304_v0 = vpop.f32.mrb[53].mxu1 }
 0x2f8   :  { %v6320_v21 = vadd.f32 %v4304_v0, %v4303_v14  ;;  %v4306_v8 = vpop.f32.mrb[54].mxu1  ;;  %v2259_v1 = vpop.permute.xlu1 %2258 }
 0x2f9   :  { %v4307_v54 = vpop.f32.mrb[55].mxu1  ;;  %v2275_v0 = vsel %vm74_vm0, %v2273_v25, %v2259_v1 }
 0x2fa   :  { %v6322_v41 = vadd.f32 %v4307_v54, %v4306_v8  ;;  %2356 = vrot.lane.b32.xlu1 %v6052_v19, %s4795_s21 }
 0x2fe   :  { %2359 = vrot.lane.b32.xlu1 %v6055_v12, %s4797_s28 }
 0x300   :  { %v2262_v42 = vpop.permute.xlu1 %2261 }
 0x301   :  { %v2277_v54 = vsel %vm2033_vm2, %v2275_v0, %v2262_v42  ;;  %v4700_v0 = vld [vmem:[%s6751_s5] sm:$0xff]  }
 0x306   :  { %v4309_v29 = vpop.f32.mrb[56].mxu1 }
 0x307   :  { %v4310_v50 = vpop.f32.mrb[57].mxu1 }
 0x308   :  { %v6328_v36 = vadd.f32 %v4310_v50, %v4309_v29  ;;  %v4312_v57 = vpop.f32.mrb[58].mxu1  ;;  %v2295_v29 = vpop.permute.xlu1 %2294 }
 0x309   :  { %v4313_v46 = vpop.f32.mrb[59].mxu1 }
 0x30a   :  { %v6330_v38 = vadd.f32 %v4313_v46, %v4312_v57 }
 0x310   :  { %v2200_v55 = vpop.permute.xlu0 %2199 }
 0x311   :  { %v2217_v23 = vsel %vm2027_vm1, %v6178_v13, %v2200_v55 }
 0x316   :  { %v4315_v60 = vpop.f32.mrb[60].mxu1 }
 0x317   :  { %v4316_v61 = vpop.f32.mrb[61].mxu1 }
 0x318   :  { %v6332_v33 = vadd.f32 %v4316_v61, %v4315_v60  ;;  %v4318_v6 = vpop.f32.mrb[62].mxu1  ;;  %v2203_v12 = vpop.permute.xlu0 %2202 }
 0x319   :  { %v4319_v9 = vpop.f32.mrb[63].mxu1  ;;  %v2219_v3 = vsel %vm74_vm0, %v2217_v23, %v2203_v12 }
 0x31a   :  { %v6334_v19 = vadd.f32 %v4319_v9, %v4318_v6 }
 0x320   :  { %v2206_v56 = vpop.permute.xlu0 %2205 }
 0x321   :  { %v2221_v15 = vsel %vm2033_vm2, %v2219_v3, %v2206_v56 }
 0x322   :  { %2728 = vmatprep.mubr.bf16.mxu1 %v2221_v15 }
 0x323   :  { %2729 = vmatmul.mubr.bf16.gmra.mrb[76].mxu1 %v2213_v34 }
 0x324   :  { %v2232_v5 = vpop.permute.xlu0 %2231 }
 0x325   :  { %v2249_v13 = vsel %vm2027_vm1, %v6205_v28, %v2232_v5 }
 0x328   :  { %v2235_v30 = vpop.permute.xlu0 %2234 }
 0x329   :  { %v2251_v31 = vsel %vm74_vm0, %v2249_v13, %v2235_v30 }
 0x330   :  { %v2238_v47 = vpop.permute.xlu0 %2237 }
 0x331   :  { %v2253_v35 = vsel %vm2033_vm2, %v2251_v31, %v2238_v47 }
 0x332   :  { %2736 = vmatprep.mubr.bf16.mxu1 %v2253_v35 }
 0x333   :  { %2737 = vmatmul.mubr.bf16.gmra.mrb[80].mxu1 %v2245_v49 }
 0x334   :  { %v2264_v16 = vpop.permute.xlu0 %2263 }
 0x335   :  { %v2281_v28 = vsel %vm2027_vm1, %v6241_v24, %v2264_v16 }
 0x338   :  { %v2267_v18 = vpop.permute.xlu0 %2266 }
 0x339   :  { %v2283_v7 = vsel %vm74_vm0, %v2281_v28, %v2267_v18 }
 0x340   :  { %v2270_v14 = vpop.permute.xlu0 %2269 }
 0x341   :  { %v2285_v8 = vsel %vm2033_vm2, %v2283_v7, %v2270_v14 }
 0x342   :  { %2744 = vmatprep.mubr.bf16.mxu1 %v2285_v8 }
 0x343   :  { %2745 = vmatmul.mubr.bf16.gmra.mrb[84].mxu1 %v2277_v54 }
 0x344   :  { %2785 = vmatprep.mubr.bf16.mxu1 %v6198_v45  ;;  %v2298_v24 = vpop.permute.xlu0 %2297 }
 0x348   :  { %v2301_v53 = vpop.permute.xlu0 %2300 }
 0x34b   :  { %2786 = vmatmul.mubr.bf16.vlgmr.msra.gmra.mrb[88].mxu1 %v6202_v51 }
 0x34c   :  { %2793 = vmatprep.mubr.bf16.mxu1 %v6233_v32  ;;  %v2304_v50 = vpop.permute.xlu0 %2303 }
 0x350   :  { %v2289_v57 = vpop.permute.xlu1 %2288  ;;  %v2330_v46 = vpop.permute.xlu0 %2329 }
 0x351   :  { %v2307_v6 = vsel %vm2027_vm1, %v6285_v63, %v2289_v57  ;;  %v4707_v57 = vld [vmem:[%s6751_s5 + $0x60] sm:$0xff]  }
 0x353   :  { %2794 = vmatmul.mubr.bf16.gmra.mrb[92].mxu1 %v6238_v27  ;;  %v2315_v27 = vsel %vm2027_vm1, %v6069_v10, %v2298_v24  ;;  %v2347_v10 = vsel %vm2027_vm1, %v6086_v20, %v2330_v46  ;;  %v4703_v24 = vld [vmem:[%s6751_s5 + $0x50] sm:$0xff]  }
 0x354   :  { %2801 = vmatprep.mubr.bf16.mxu1 %v6266_v52  ;;  %v2333_v45 = vpop.permute.xlu0 %2332  ;;  %v2317_v52 = vsel %vm74_vm0, %v2315_v27, %v2301_v53  ;;  %v4704_v53 = vld [vmem:[%s6751_s5 + $0x10] sm:$0xff]   ;;  %v4709_v27 = vld [vmem:[%s6751_s5 + $0x68] sm:$0xff]  }
 0x355   :  { %v2349_v3 = vsel %vm74_vm0, %v2347_v10, %v2333_v45 }
 0x358   :  { %v2292_v60 = vpop.permute.xlu1 %2291  ;;  %v2336_v32 = vpop.permute.xlu0 %2335 }
 0x359   :  { %v2309_v39 = vsel %vm74_vm0, %v2307_v6, %v2292_v60  ;;  %v2351_v63 = vsel %vm2033_vm2, %v2349_v3, %v2336_v32  ;;  %v4708_v32 = vld [vmem:[%s6751_s5 + $0x20] sm:$0xff]  }
 0x35b   :  { %2802 = vmatmul.mubr.bf16.gmra.mrb[96].mxu1 %v6271_v2  ;;  %v2319_v2 = vsel %vm2033_vm2, %v2317_v52, %v2304_v50  ;;  %v4706_v50 = vld [vmem:[%s6751_s5 + $0x18] sm:$0xff]  }
 0x35c   :  { %2809 = vmatprep.mubr.bf16.mxu1 %v2221_v15  ;;  %v2322_v51 = vpop.permute.xlu1 %2321  ;;  %v2362_v61 = vpop.permute.xlu0 %2361  ;;  %v2311_v15 = vsel %vm2033_vm2, %v2309_v39, %v2295_v29  ;;  %v4705_v29 = vld [vmem:[%s6751_s5 + $0x58] sm:$0xff]  }
 0x35d   :  { %v2339_v62 = vsel %vm2027_vm1, %v6300_v59, %v2322_v51  ;;  %v2379_v20 = vsel %vm2027_vm1, %v6103_v4, %v2362_v61  ;;  %v4711_v61 = vld [vmem:[%s6751_s5 + $0x70] sm:$0xff]  }
 0x360   :  { %v2325_v22 = vpop.permute.xlu1 %2324  ;;  %v2365_v56 = vpop.permute.xlu0 %2364 }
 0x361   :  { %v2341_v48 = vsel %vm74_vm0, %v2339_v62, %v2325_v22  ;;  %v2381_v44 = vsel %vm74_vm0, %v2379_v20, %v2365_v56 }
 0x363   :  { %2810 = vmatmul.mubr.bf16.gmra.mrb[100].mxu1 %v2213_v34 }
 0x364   :  { %2817 = vmatprep.mubr.bf16.mxu1 %v2253_v35  ;;  %v2328_v55 = vpop.permute.xlu1 %2327  ;;  %v2368_v5 = vpop.permute.xlu0 %2367 }
 0x365   :  { %v2343_v13 = vsel %vm2033_vm2, %v2341_v48, %v2328_v55  ;;  %v2383_v26 = vsel %vm2033_vm2, %v2381_v44, %v2368_v5 }
 0x368   :  { %v2354_v34 = vpop.permute.xlu1 %2353 }
 0x369   :  { %v2371_v59 = vsel %vm2027_vm1, %v6030_v43, %v2354_v34  ;;  %v4699_v43 = vld [vmem:[%s6751_s5 + $0x40] sm:$0xff]  }
 0x36a   :  { %4427 = vmatprep.subr.bf16.mxu1 %v4699_v43 }
 0x36b   :  { %2818 = vmatmul.mubr.bf16.gmra.mrb[104].mxu1 %v2245_v49 }
 0x36c   :  { %2825 = vmatprep.mubr.bf16.mxu1 %v2285_v8  ;;  %v2357_v30 = vpop.permute.xlu1 %2356  ;;  %v4701_v8 = vld [vmem:[%s6751_s5 + $0x48] sm:$0xff]   ;;  %4428 = vmatpush3.bf16.msra.mxu1 %v4700_v0 }
 0x36d   :  { %v2373_v49 = vsel %vm74_vm0, %v2371_v59, %v2357_v30  ;;  %4429 = vmatprep.subr.bf16.mxu1 %v4701_v8  ;;  %v4713_v59 = vld [vmem:[%s6751_s5 + $0x78] sm:$0xff]  }
 0x370   :  { %v2360_v47 = vpop.permute.xlu1 %2359 }
 0x371   :  { %v2375_v1 = vsel %vm2033_vm2, %v2373_v49, %v2360_v47 }
 0x373   :  { %2826 = vmatmul.mubr.bf16.gmra.mrb[108].mxu1 %v2277_v54  ;;  %v4702_v54 = vld [vmem:[%s6751_s5 + $0x8] sm:$0xff]  }
 0x374   :  { %2833 = vmatprep.mubr.bf16.mxu1 %v2319_v2  ;;  %4430 = vmatpush3.bf16.msra.mxu1 %v4702_v54  ;;  %v4710_v2 = vld [vmem:[%s6751_s5 + $0x28] sm:$0xff]  }
 0x375   :  { %4431 = vmatprep.subr.bf16.mxu1 %v4703_v24 }
 0x376   :  { %v4321_v9 = vpop.f32.mrb[64].mxu1 }
 0x377   :  { %v4322_v12 = vpop.f32.mrb[65].mxu1 }
 0x378   :  { %v6373_v11 = vadd.f32 %v4322_v12, %v4321_v9  ;;  %v4324_v23 = vpop.f32.mrb[66].mxu1  ;;  %4432 = vmatpush3.bf16.msra.mxu1 %v4704_v53 }
 0x379   :  { %v4325_v58 = vpop.f32.mrb[67].mxu1  ;;  %4433 = vmatprep.subr.bf16.mxu1 %v4705_v29 }
 0x37a   :  { %v6378_v40 = vadd.f32 %v4325_v58, %v4324_v23 }
 0x37b   :  { %2834 = vmatmul.mubr.bf16.gmra.mrb[112].mxu1 %v2311_v15 }
 0x37c   :  { %2841 = vmatprep.mubr.bf16.mxu1 %v2351_v63  ;;  %4434 = vmatpush3.bf16.msra.mxu1 %v4706_v50  ;;  %v6456_v63 = vld [vmem:[%s6752_s4] ss:$0 sm:$0xff] }
 0x37d   :  { %4435 = vmatprep.subr.bf16.mxu1 %v4707_v57  ;;  %v2683_v20 = vadd.f32 %v6320_v21, %v6456_v63  ;;  %v2694_v43 = vadd.f32 %v6330_v38, %v6456_v63 }
 0x380   :  { %4436 = vmatpush3.bf16.msra.mxu1 %v4708_v32  ;;  %v2702_v32 = vadd.f32 %v6334_v19, %v6456_v63 }
 0x381   :  { %4437 = vmatprep.subr.bf16.mxu1 %v4709_v27 }
 0x383   :  { %2842 = vmatmul.mubr.bf16.gmra.mrb[116].mxu1 %v2343_v13  ;;  %v2686_v13 = vadd.f32 %v6322_v41, %v6456_v63  ;;  %v4714_v41 = vld [vmem:[%s6751_s5 + $0x38] sm:$0xff]  }
 0x384   :  { %2849 = vmatprep.mubr.bf16.mxu1 %v2383_v26  ;;  %4438 = vmatpush3.bf16.msra.mxu1 %v4710_v2  ;;  %v4715_v2 = vld [vmem:[%s6751_s5 + $0xc0] sm:$0xff]  }
 0x385   :  { %4439 = vmatprep.subr.bf16.mxu1 %v4711_v61 }
 0x386   :  { %v4327_v31 = vpop.f32.mrb[68].mxu1 }
 0x387   :  { %v4328_v37 = vpop.f32.mrb[69].mxu1 }
 0x388   :  { %v6392_v35 = vadd.f32 %v4328_v37, %v4327_v31  ;;  %v4330_v4 = vpop.f32.mrb[70].mxu1  ;;  %v4712_v37 = vld [vmem:[%s6751_s5 + $0x30] sm:$0xff]  }
 0x389   :  { %v4331_v17 = vpop.f32.mrb[71].mxu1  ;;  %4440 = vmatpush3.bf16.msra.mxu1 %v4712_v37 }
 0x38a   :  { %v6395_v16 = vadd.f32 %v4331_v17, %v4330_v4  ;;  %4441 = vmatprep.subr.bf16.mxu1 %v4713_v59 }
 0x38b   :  { %2850 = vmatmul.mubr.bf16.gmra.mrb[120].mxu1 %v2375_v1  ;;  %v2691_v1 = vadd.f32 %v6328_v36, %v6456_v63  ;;  %v2699_v36 = vadd.f32 %v6332_v33, %v6456_v63 }
 0x38c   :  { %v2718_v37 = vadd.f32 %v6395_v16, %v6456_v63 }
 0x38d   :  { %4442 = vmatpush3.bf16.msra.mxu1 %v4714_v41 }
 0x38e   :  { %4449 = vmatprep.subr.bf16.mxu1 %v4715_v2 }
 0x396   :  { %v4333_v18 = vpop.f32.mrb[72].mxu1 }
 0x397   :  { %v4334_v42 = vpop.f32.mrb[73].mxu1 }
 0x398   :  { %v6398_v28 = vadd.f32 %v4334_v42, %v4333_v18  ;;  %v4336_v25 = vpop.f32.mrb[74].mxu1 }
 0x399   :  { %v4337_v7 = vpop.f32.mrb[75].mxu1 }
 0x39a   :  { %v6400_v14 = vadd.f32 %v4337_v7, %v4336_v25 }
 0x39c   :  { %v2726_v16 = vadd.f32 %v6400_v14, %v6456_v63 }
 0x3f6   :  { %v4339_v46 = vpop.f32.mrb[76].mxu1 }
 0x3f7   :  { %v4340_v60 = vpop.f32.mrb[77].mxu1 }
 0x3f8   :  { %v6429_v45 = vadd.f32 %v4340_v60, %v4339_v46  ;;  %v4342_v51 = vpop.f32.mrb[78].mxu1 }
 0x3f9   :  { %v4343_v22 = vpop.f32.mrb[79].mxu1 }
 0x3fa   :  { %v6437_v52 = vadd.f32 %v4343_v22, %v4342_v51 }
 0x406   :  { %v4345_v55 = vpop.f32.mrb[80].mxu1 }
 0x407   :  { %v4346_v6 = vpop.f32.mrb[81].mxu1 }
 0x408   :  { %v6445_v9 = vadd.f32 %v4346_v6, %v4345_v55  ;;  %v4348_v39 = vpop.f32.mrb[82].mxu1 }
 0x409   :  { %v4349_v12 = vpop.f32.mrb[83].mxu1 }
 0x40a   :  { %v6447_v23 = vadd.f32 %v4349_v12, %v4348_v39  ;;  %v2707_v39 = vadd.f32 %v6373_v11, %v6456_v63 }
 0x416   :  { %v4351_v10 = vpop.f32.mrb[84].mxu1 }
 0x417   :  { %v4352_v58 = vpop.f32.mrb[85].mxu1 }
 0x418   :  { %v6449_v3 = vadd.f32 %v4352_v58, %v4351_v10  ;;  %v4354_v56 = vpop.f32.mrb[86].mxu1 }
 0x419   :  { %v4355_v15 = vpop.f32.mrb[87].mxu1 }
 0x41a   :  { %v6451_v34 = vadd.f32 %v4355_v15, %v4354_v56  ;;  %v2710_v56 = vadd.f32 %v6378_v40, %v6456_v63 }
 0x41e   :  { %v4373_v62 = vpop.f32.mrb[88].mxu1 }
 0x41f   :  { %v4374_v5 = vpop.f32.mrb[89].mxu1 }
 0x420   :  { %v4375_v48 = vadd.f32 %v4374_v5, %v4373_v62  ;;  %v4376_v30 = vpop.f32.mrb[90].mxu1 }
 0x421   :  { %v4377_v44 = vpop.f32.mrb[91].mxu1 }
 0x422   :  { %v2788_v26 = vadd.f32 %v4375_v48, %v2683_v20  ;;  %v4378_v31 = vadd.f32 %v4377_v44, %v4376_v30 }
 0x424   :  { %v2791_v47 = vadd.f32 %v4378_v31, %v2686_v13  ;;  %v2858_v4 = vmax.f32 %v2788_v26, 0.0  ;;  %v2715_v13 = vadd.f32 %v6392_v35, %v6456_v63 }
 0x426   :  { %v2859_v49 = vmax.f32 %v2791_v47, 0.0  ;;  %v4379_v21 = vpop.f32.mrb[92].mxu1 }
 0x427   :  { %v4380_v17 = vpop.f32.mrb[93].mxu1 }
 0x428   :  { %v6473_v18 = vpack.c.bf16 %v2859_v49, %v2858_v4  ;;  %v4381_v42 = vadd.f32 %v4380_v17, %v4379_v21  ;;  %v4382_v25 = vpop.f32.mrb[94].mxu1 }
 0x429   :  { %v4383_v7 = vpop.f32.mrb[95].mxu1 }
 0x42a   :  { %v2796_v0 = vadd.f32 %v4381_v42, %v2691_v1  ;;  %v4384_v8 = vadd.f32 %v4383_v7, %v4382_v25  ;;  %v2723_v1 = vadd.f32 %v6398_v28, %v6456_v63 }
 0x42c   :  { %v2799_v54 = vadd.f32 %v4384_v8, %v2694_v43  ;;  %v2860_v24 = vmax.f32 %v2796_v0, 0.0 }
 0x42e   :  { %v2861_v53 = vmax.f32 %v2799_v54, 0.0  ;;  %v4385_v29 = vpop.f32.mrb[96].mxu1 }
 0x42f   :  { %v4386_v50 = vpop.f32.mrb[97].mxu1 }
 0x430   :  { %v2877_v57 = vpack.c.bf16 %v2861_v53, %v2860_v24  ;;  %v4387_v46 = vadd.f32 %v4386_v50, %v4385_v29  ;;  %v4388_v60 = vpop.f32.mrb[98].mxu1  ;;  %v2731_v50 = vadd.f32 %v6429_v45, %v6456_v63 }
 0x431   :  { %v4389_v51 = vpop.f32.mrb[99].mxu1 }
 0x432   :  { %v2804_v22 = vadd.f32 %v4387_v46, %v2699_v36  ;;  %v4390_v38 = vadd.f32 %v4389_v51, %v4388_v60  ;;  %2886 = vrot.lane.b32.xlu1 %v2877_v57, %s4795_s21  ;;  %v2734_v60 = vadd.f32 %v6437_v52, %v6456_v63  ;;  %v2742_v52 = vadd.f32 %v6447_v23, %v6456_v63 }
 0x434   :  { %v2807_v27 = vadd.f32 %v4390_v38, %v2702_v32  ;;  %v2862_v61 = vmax.f32 %v2804_v22, 0.0 }
 0x436   :  { %v2863_v55 = vmax.f32 %v2807_v27, 0.0  ;;  %v4391_v6 = vpop.f32.mrb[100].mxu1 }
 0x437   :  { %v4392_v33 = vpop.f32.mrb[101].mxu1 }
 0x438   :  { %v6487_v12 = vpack.c.bf16 %v2863_v55, %v2862_v61  ;;  %v4393_v19 = vadd.f32 %v4392_v33, %v4391_v6  ;;  %v4394_v10 = vpop.f32.mrb[102].mxu1  ;;  %v2739_v61 = vadd.f32 %v6445_v9, %v6456_v63 }
 0x439   :  { %v4395_v58 = vpop.f32.mrb[103].mxu1 }
 0x43a   :  { %v2812_v15 = vadd.f32 %v4393_v19, %v2707_v39  ;;  %v4396_v62 = vadd.f32 %v4395_v58, %v4394_v10 }
 0x43c   :  { %v2815_v5 = vadd.f32 %v4396_v62, %v2710_v56  ;;  %v2864_v20 = vmax.f32 %v2812_v15, 0.0 }
 0x43e   :  { %v2865_v48 = vmax.f32 %v2815_v5, 0.0  ;;  %v4397_v30 = vpop.f32.mrb[104].mxu1  ;;  %v2747_v5 = vadd.f32 %v6449_v3, %v6456_v63  ;;  %v4716_v3 = vld [vmem:[%s6751_s5 + $0x80] sm:$0xff]  }
 0x43f   :  { %v4398_v44 = vpop.f32.mrb[105].mxu1 }
 0x440   :  { %v2879_v26 = vpack.c.bf16 %v2865_v48, %v2864_v20  ;;  %v4399_v11 = vadd.f32 %v4398_v44, %v4397_v30  ;;  %v4400_v31 = vpop.f32.mrb[106].mxu1  ;;  %v2750_v44 = vadd.f32 %v6451_v34, %v6456_v63  ;;  %v4717_v34 = vld [vmem:[%s6751_s5 + $0xc8] sm:$0xff]  }
 0x441   :  { %v4401_v47 = vpop.f32.mrb[107].mxu1 }
 0x442   :  { %v2820_v59 = vadd.f32 %v4399_v11, %v2715_v13  ;;  %v4402_v4 = vadd.f32 %v4401_v47, %v4400_v31  ;;  %2889 = vrot.lane.b32.xlu0 %v2879_v26, %s4795_s21 }
 0x444   :  { %v2823_v40 = vadd.f32 %v4402_v4, %v2718_v37  ;;  %v2866_v49 = vmax.f32 %v2820_v59, 0.0 }
 0x446   :  { %v2867_v21 = vmax.f32 %v2823_v40, 0.0  ;;  %v4403_v17 = vpop.f32.mrb[108].mxu1  ;;  %v4718_v40 = vld [vmem:[%s6751_s5 + $0x88] sm:$0xff]  }
 0x447   :  { %v4404_v41 = vpop.f32.mrb[109].mxu1 }
 0x448   :  { %v6498_v35 = vpack.c.bf16 %v2867_v21, %v2866_v49  ;;  %v4405_v42 = vadd.f32 %v4404_v41, %v4403_v17  ;;  %v4406_v25 = vpop.f32.mrb[110].mxu1  ;;  %v4719_v49 = vld [vmem:[%s6751_s5 + $0xd0] sm:$0xff]   ;;  %v4722_v21 = vld [vmem:[%s6751_s5 + $0x98] sm:$0xff]   ;;  %v4723_v17 = vld [vmem:[%s6751_s5 + $0xe0] sm:$0xff]  }
 0x449   :  { %v4407_v7 = vpop.f32.mrb[111].mxu1  ;;  %v4724_v41 = vld [vmem:[%s6751_s5 + $0xa0] sm:$0xff]  }
 0x44a   :  { %v2828_v43 = vadd.f32 %v4405_v42, %v2723_v1  ;;  %v4408_v0 = vadd.f32 %v4407_v7, %v4406_v25  ;;  %v4725_v1 = vld [vmem:[%s6751_s5 + $0xe8] sm:$0xff]   ;;  %v4727_v25 = vld [vmem:[%s6751_s5 + $0xf0] sm:$0xff]  }
 0x44b   :  { %v4726_v42 = vld [vmem:[%s6751_s5 + $0xa8] sm:$0xff]   ;;  %v4728_v7 = vld [vmem:[%s6751_s5 + $0xb0] sm:$0xff]  }
 0x44c   :  { %v2831_v8 = vadd.f32 %v4408_v0, %v2726_v16  ;;  %v2868_v54 = vmax.f32 %v2828_v43, 0.0  ;;  %v4729_v16 = vld [vmem:[%s6751_s5 + $0xf8] sm:$0xff]  }
 0x44d   :  { %v4730_v43 = vld [vmem:[%s6751_s5 + $0xb8] sm:$0xff]  }
 0x44e   :  { %v2869_v24 = vmax.f32 %v2831_v8, 0.0  ;;  %v4409_v53 = vpop.f32.mrb[112].mxu1 }
 0x44f   :  { %v4410_v29 = vpop.f32.mrb[113].mxu1 }
 0x450   :  { %v2881_v36 = vpack.c.bf16 %v2869_v24, %v2868_v54  ;;  %v4411_v28 = vadd.f32 %v4410_v29, %v4409_v53  ;;  %v4412_v57 = vpop.f32.mrb[114].mxu1  ;;  %v4731_v54 = vld [vmem:[%s6751_s5 + $0x100] sm:$0xff]   ;;  %v4798_v53 = vmov 0.0  }
 0x451   :  { %v4413_v46 = vpop.f32.mrb[115].mxu1 }
 0x452   :  { %v2836_v51 = vadd.f32 %v4411_v28, %v2731_v50  ;;  %v4414_v32 = vadd.f32 %v4413_v46, %v4412_v57  ;;  %2892 = vrot.lane.b32.xlu1 %v2881_v36, %s4795_s21  ;;  %v4732_v50 = vld [vmem:[%s6751_s5 + $0x108] sm:$0xff]   ;;  %v4733_v36 = vld [vmem:[%s6751_s5 + $0x110] sm:$0xff]   ;;  %v6784_v28 = vmov 0  }
 0x453   :  { %v4735_v57 = vld [vmem:[%s6753_s7] ss:$16 sps:$4 sm:$0xff]   ;;  %v4737_v46 = vld [vmem:[%s6753_s7 + $0x4] ss:$16 sps:$4 sm:$0xff]  }
 0x454   :  { %v2839_v14 = vadd.f32 %v4414_v32, %v2734_v60  ;;  %v2870_v22 = vmax.f32 %v2836_v51, 0.0  ;;  %v4738_v60 = vld [vmem:[%s6753_s7 + $0x20] ss:$16 sps:$4 sm:$0xff]   ;;  %v4740_v51 = vld [vmem:[%s6753_s7 + $0x24] ss:$16 sps:$4 sm:$0xff]  }
 0x455   :  { %v4743_v32 = vld [vmem:[%s6753_s7 + $0x44] ss:$16 sps:$4 sm:$0xff]  }
 0x456   :  { %v2871_v38 = vmax.f32 %v2839_v14, 0.0  ;;  %v4415_v27 = vpop.f32.mrb[116].mxu1  ;;  %v4741_v14 = vld [vmem:[%s6753_s7 + $0x40] ss:$16 sps:$4 sm:$0xff]  }
 0x457   :  { %v4416_v2 = vpop.f32.mrb[117].mxu1 }
 0x458   :  { %v6509_v45 = vpack.c.bf16 %v2871_v38, %v2870_v22  ;;  %v4417_v55 = vadd.f32 %v4416_v2, %v4415_v27  ;;  %v4418_v6 = vpop.f32.mrb[118].mxu1  ;;  %v4746_v22 = vld [vmem:[%s6753_s7 + $0x64] ss:$16 sps:$4 sm:$0xff]   ;;  %v4744_v38 = vld [vmem:[%s6753_s7 + $0x60] ss:$16 sps:$4 sm:$0xff]  }
 0x459   :  { %v4419_v33 = vpop.f32.mrb[119].mxu1  ;;  %v4749_v27 = vld [vmem:[%s6753_s7 + $0xc] ss:$16 sps:$4 sm:$0xff]  }
 0x45a   :  { %v2844_v39 = vadd.f32 %v4417_v55, %v2739_v61  ;;  %v4420_v19 = vadd.f32 %v4419_v33, %v4418_v6 }
 0x45c   :  { %v2847_v10 = vadd.f32 %v4420_v19, %v2742_v52  ;;  %v2872_v58 = vmax.f32 %v2844_v39, 0.0  ;;  %v4198_v52 = vld [vmem:[%s6755_s6] ss:$0 sm:$0xff] }
 0x45e   :  { %v2873_v56 = vmax.f32 %v2847_v10, 0.0  ;;  %v4421_v15 = vpop.f32.mrb[120].mxu1 }
 0x45f   :  { %v4422_v62 = vpop.f32.mrb[121].mxu1 }
 0x460   :  { %v2883_v20 = vpack.c.bf16 %v2873_v56, %v2872_v58  ;;  %v4423_v9 = vadd.f32 %v4422_v62, %v4421_v15  ;;  %v4424_v48 = vpop.f32.mrb[122].mxu1 }
 0x461   :  { %v4425_v30 = vpop.f32.mrb[123].mxu1 }
 0x462   :  { %v2852_v13 = vadd.f32 %v4423_v9, %v2747_v5  ;;  %v4426_v26 = vadd.f32 %v4425_v30, %v4424_v48  ;;  %2895 = vrot.lane.b32.xlu0 %v2883_v20, %s4795_s21 }
 0x464   :  { %v2855_v23 = vadd.f32 %v4426_v26, %v2750_v44  ;;  %v2874_v11 = vmax.f32 %v2852_v13, 0.0 }
 0x466   :  { %v2875_v31 = vmax.f32 %v2855_v23, 0.0 }
 0x468   :  { %v2884_v47 = vpack.c.bf16 %v2875_v31, %v2874_v11 }
 0x4a4   :  { %v2887_v37 = vpop.permute.xlu1 %2886 }
 0x4a5   :  { %v2899_v63 = vsel %vm74_vm0, %v6473_v18, %v2887_v37  ;;  %v4721_v18 = vld [vmem:[%s6751_s5 + $0xd8] sm:$0xff]  }
 0x4b4   :  { %v2890_v59 = vpop.permute.xlu0 %2889 }
 0x4b5   :  { %v2903_v4 = vsel %vm74_vm0, %v6487_v12, %v2890_v59  ;;  %v4720_v12 = vld [vmem:[%s6751_s5 + $0x90] sm:$0xff]   ;;  %v4752_v59 = vld [vmem:[%s6753_s7 + $0x2c] ss:$16 sps:$4 sm:$0xff]  }
 0x4b6   :  { %3243 = vmatprep.mubr.bf16.mxu1 %v2903_v4  ;;  %v4755_v4 = vld [vmem:[%s6753_s7 + $0x4c] ss:$16 sps:$4 sm:$0xff]  }
 0x4b7   :  { %3244 = vmatmul.mubr.bf16.vlgmr.msra.gmra.mrb[124].mxu1 %v2899_v63  ;;  %v4758_v63 = vld [vmem:[%s6753_s7 + $0x6c] ss:$16 sps:$4 sm:$0xff]  }
 0x4b8   :  { %4450 = vmatpush3.bf16.msra.mxu1 %v4716_v3  ;;  %v4750_v3 = vld [vmem:[%s6753_s7 + $0x28] ss:$16 sps:$4 sm:$0xff]  }
 0x4b9   :  { %4451 = vmatprep.subr.bf16.mxu1 %v4717_v34  ;;  %v4753_v34 = vld [vmem:[%s6753_s7 + $0x48] ss:$16 sps:$4 sm:$0xff]  }
 0x4bc   :  { %4452 = vmatpush3.bf16.msra.mxu1 %v4718_v40  ;;  %v4756_v40 = vld [vmem:[%s6753_s7 + $0x68] ss:$16 sps:$4 sm:$0xff]  }
 0x4bd   :  { %4453 = vmatprep.subr.bf16.mxu1 %v4719_v49  ;;  %v4759_v49 = vld [vmem:[%s6754_s9 + $0x40] sm:$0xff]  }
 0x4c0   :  { %4454 = vmatpush3.bf16.msra.mxu1 %v4720_v12  ;;  %v4760_v12 = vld [vmem:[%s6754_s9] sm:$0xff]  }
 0x4c1   :  { %4455 = vmatprep.subr.bf16.mxu1 %v4721_v18  ;;  %v4761_v18 = vld [vmem:[%s6754_s9 + $0x48] sm:$0xff]  }
 0x4c4   :  { %4456 = vmatpush3.bf16.msra.mxu1 %v4722_v21  ;;  %v2893_v0 = vpop.permute.xlu1 %2892  ;;  %v4762_v21 = vld [vmem:[%s6754_s9 + $0x8] sm:$0xff]  }
 0x4c5   :  { %4457 = vmatprep.subr.bf16.mxu1 %v4723_v17  ;;  %v2907_v29 = vsel %vm74_vm0, %v6498_v35, %v2893_v0  ;;  %v4734_v35 = vld [vmem:[%s6751_s5 + $0x118] sm:$0xff]   ;;  %v4763_v17 = vld [vmem:[%s6754_s9 + $0x50] sm:$0xff]  }
 0x4c6   :  { %v4771_v0 = vld [vmem:[%s6754_s9 + $0x70] sm:$0xff]  }
 0x4c8   :  { %4458 = vmatpush3.bf16.msra.mxu1 %v4724_v41  ;;  %v4764_v41 = vld [vmem:[%s6754_s9 + $0x10] sm:$0xff]  }
 0x4c9   :  { %4459 = vmatprep.subr.bf16.mxu1 %v4725_v1  ;;  %v4765_v1 = vld [vmem:[%s6754_s9 + $0x58] sm:$0xff]  }
 0x4cc   :  { %4460 = vmatpush3.bf16.msra.mxu1 %v4726_v42  ;;  %v4766_v42 = vld [vmem:[%s6754_s9 + $0x18] sm:$0xff]  }
 0x4cd   :  { %4461 = vmatprep.subr.bf16.mxu1 %v4727_v25  ;;  %v4767_v25 = vld [vmem:[%s6754_s9 + $0x60] sm:$0xff]  }
 0x4d0   :  { %4462 = vmatpush3.bf16.msra.mxu1 %v4728_v7  ;;  %v4768_v7 = vld [vmem:[%s6754_s9 + $0x20] sm:$0xff]  }
 0x4d1   :  { %4463 = vmatprep.subr.bf16.mxu1 %v4729_v16  ;;  %v4769_v16 = vld [vmem:[%s6754_s9 + $0x68] sm:$0xff]  }
 0x4d4   :  { %4464 = vmatpush3.bf16.msra.mxu1 %v4730_v43  ;;  %v2896_v8 = vpop.permute.xlu0 %2895  ;;  %v4770_v43 = vld [vmem:[%s6754_s9 + $0x28] sm:$0xff]  }
 0x4d5   :  { %v2911_v24 = vsel %vm74_vm0, %v6509_v45, %v2896_v8  ;;  %4520 = vmatprep.subr.bf16.mxu1 %v4798_v53  ;;  %v4772_v8 = vld [vmem:[%s6754_s9 + $0x30] sm:$0xff]  }
 0x4d6   :  { %3284 = vmatprep.mubr.bf16.mxu1 %v2911_v24  ;;  %v4774_v24 = vld [vmem:[%s6754_s9 + $0x38] sm:$0xff]  }
 0x4d7   :  { %3285 = vmatmul.mubr.bf16.vlgmr.msra.gmra.mrb[128].mxu1 %v2907_v29  ;;  %v3355_v29 = vlaneseq }
 0x4d8   :  { %4521 = vmatpush3.bf16.msra.mxu1 %v4731_v54  ;;  %4528 = vmatprep.mubr.msk.bf16.mxu1 %vm4799_vm3, %v4798_v53  ;;  %v4773_v54 = vld [vmem:[%s6754_s9 + $0x78] sm:$0xff]  }
 0x4d9   :  { %4522 = vmatprep.subr.bf16.mxu1 %v4798_v53 }
 0x4dc   :  { %4523 = vmatpush3.bf16.msra.mxu1 %v4732_v50  ;;  %v3356_v50 = vshrl.u32 %v3355_v29, 7 }
 0x4dd   :  { %4524 = vmatprep.subr.bf16.mxu1 %v4798_v53 }
 0x4e0   :  { %4525 = vmatpush3.bf16.msra.mxu1 %v4733_v36  ;;  %v3357_v36 = vsub.s32 0, %v3356_v50 }
 0x4e1   :  { %4526 = vmatprep.subr.bf16.mxu1 %v4798_v53  ;;  %v4775_v53 = vld [vmem:[%s6754_s9 + $0xc0] sm:$0xff]  }
 0x4e4   :  { %4527 = vmatpush3.bf16.msra.mxu1 %v4734_v35  ;;  %v3353_v35 = vld [vmem:[%s6756_s8] sm:$0xf] }
 0x4e5   :  { %3458 = vmatprep.subr.bf16.mxu1 %v4737_v46 }
 0x4e7   :  { %4529 = vmatmul.mubr.msk.bf16.vlgmr.msra.gmra.mrb[132].mxu1 %vm74_vm0, %v2884_v47  ;;  %v4747_v47 = vld [vmem:[%s6753_s7 + $0x8] ss:$16 sps:$4 sm:$0xff]  }
 0x4e8   :  { %3490 = vmatprep.mubr.bf16.mxu1 %v6784_v28  ;;  %3459 = vmatpush1.bf16.msra.mxu1 %v4735_v57  ;;  %v3358_v57 = vrot.slane %v3353_v35, %v3357_v36 }
 0x4e9   :  { %3460 = vmatprep.subr.bf16.mxu1 %v4740_v51 }
 0x4ec   :  { %3461 = vmatpush1.bf16.msra.mxu1 %v4738_v60 }
 0x4ed   :  { %3462 = vmatprep.subr.bf16.mxu1 %v4743_v32 }
 0x4f0   :  { %3463 = vmatpush1.bf16.msra.mxu1 %v4741_v14 }
 0x4f1   :  { %3464 = vmatprep.subr.bf16.mxu1 %v4746_v22 }
 0x4f4   :  { %3465 = vmatpush1.bf16.msra.mxu1 %v4744_v38 }
 0x4f5   :  { %3501 = vmatprep.subr.bf16.mxu1 %v4749_v27 }
 0x58a   :  { %v4443_v2 = vpop.f32.mrb[124].mxu1 }
 0x58b   :  { %v4444_v61 = vpop.f32.mrb[125].mxu1 }
 0x58c   :  { %v4445_v45 = vadd.f32 %v4444_v61, %v4443_v2  ;;  %v4446_v55 = vpop.f32.mrb[126].mxu1 }
 0x58d   :  { %v4447_v6 = vpop.f32.mrb[127].mxu1 }
 0x58e   :  { %v4448_v33 = vadd.f32 %v4447_v6, %v4446_v55  ;;  %v3246_v10 = vadd.f32 %v4445_v45, %v4198_v52 }
 0x590   :  { %v3249_v62 = vadd.f32 %v4448_v33, %v4198_v52 }
 0x5aa   :  { %v4465_v39 = vpop.f32.mrb[128].mxu1 }
 0x5ab   :  { %v4466_v19 = vpop.f32.mrb[129].mxu1 }
 0x5ac   :  { %v4467_v58 = vadd.f32 %v4466_v19, %v4465_v39  ;;  %v4468_v56 = vpop.f32.mrb[130].mxu1  ;;  %v4776_v39 = vld [vmem:[%s6754_s9 + $0x80] sm:$0xff]   ;;  %v4777_v19 = vld [vmem:[%s6754_s9 + $0xc8] sm:$0xff]  }
 0x5ad   :  { %v4469_v15 = vpop.f32.mrb[131].mxu1 }
 0x5ae   :  { %v4470_v5 = vadd.f32 %v4469_v15, %v4468_v56  ;;  %v3287_v20 = vadd.f32 %v4467_v58, %v3246_v10  ;;  %v3365_v10 = vsub.s32 2, %v3356_v50  ;;  %v3369_v58 = vsub.s32 3, %v3356_v50  ;;  %v4778_v56 = vld [vmem:[%s6754_s9 + $0x88] sm:$0xff]  }
 0x5b0   :  { %v3290_v9 = vadd.f32 %v4470_v5, %v3249_v62  ;;  %v3366_v15 = vrot.slane %v3353_v35, %v3365_v10  ;;  %v4779_v62 = vld [vmem:[%s6754_s9 + $0xd0] sm:$0xff]   ;;  %v3370_v5 = vrot.slane %v3353_v35, %v3369_v58 }
 0x5ba   :  { %v3327_v48 = vpop.f32.mrb[132].mxu1 }
 0x5bb   :  { %v3328_v30 = vadd.f32 %v3327_v48, %v3287_v20  ;;  %v4530_v44 = vpop.f32.mrb[133].mxu1 }
 0x5bc   :  { %v3330_v13 = vpop.f32.mrb[134].mxu1  ;;  %v4781_v44 = vld [vmem:[%s6754_s9 + $0xd8] sm:$0xff]  }
 0x5bd   :  { %v3331_v26 = vadd.f32 %v3330_v13, %v3290_v9  ;;  %v4531_v23 = vpop.f32.mrb[135].mxu1  ;;  %v3334_v11 = vmax.f32 %v3328_v30, 0.0  ;;  %v4780_v9 = vld [vmem:[%s6754_s9 + $0x90] sm:$0xff]  }
 0x5bf   :  { %v3335_v31 = vmax.f32 %v3331_v26, 0.0 }
 0x5c1   :  { %v3336_v37 = vpack.c.bf16 %v3335_v31, %v3334_v11 }
 0x5c3   :  { %4252 = vmatmul.mubr.msk.bf16.vlgmr.msra.gmra.mrb[136].mxu1 %vm74_vm0, %v3336_v37 }
 0x5c4   :  { %3502 = vmatpush1.bf16.msra.mxu1 %v4747_v47  ;;  %3533 = vmatprep.mubr.bf16.mxu1 %v6784_v28  ;;  %v3361_v28 = vsub.s32 1, %v3356_v50  ;;  %v4782_v47 = vld [vmem:[%s6754_s9 + $0x98] sm:$0xff]  }
 0x5c5   :  { %3503 = vmatprep.subr.bf16.mxu1 %v4752_v59 }
 0x5c6   :  { %v3362_v46 = vrot.slane %v3353_v35, %v3361_v28 }
 0x5c8   :  { %3504 = vmatpush1.bf16.msra.mxu1 %v4750_v3  ;;  %v4783_v3 = vld [vmem:[%s6754_s9 + $0xe0] sm:$0xff]  }
 0x5c9   :  { %3505 = vmatprep.subr.bf16.mxu1 %v4755_v4 }
 0x5cc   :  { %3506 = vmatpush1.bf16.msra.mxu1 %v4753_v34 }
 0x5cd   :  { %3507 = vmatprep.subr.bf16.mxu1 %v4758_v63 }
 0x5d0   :  { %3508 = vmatpush1.bf16.msra.mxu1 %v4756_v40 }
 0x5d1   :  { %4476 = vmatprep.subr.bf16.mxu1 %v4759_v49  ;;  %v4784_v49 = vld [vmem:[%s6754_s9 + $0xa0] sm:$0xff]  }
 0x5d3   :  { %4253 = vmatmul.mubr.msk.bf16.vlgmr.msra.gmra.mrb[140].mxu1 %vm74_vm0, %v3336_v37 }
 0x5d4   :  { %4477 = vmatpush3.bf16.msra.mxu1 %v4760_v12  ;;  %v4785_v12 = vld [vmem:[%s6754_s9 + $0xe8] sm:$0xff]  }
 0x5d5   :  { %4478 = vmatprep.subr.bf16.mxu1 %v4761_v18  ;;  %v4786_v18 = vld [vmem:[%s6754_s9 + $0xa8] sm:$0xff]  }
 0x5d8   :  { %4479 = vmatpush3.bf16.msra.mxu1 %v4762_v21  ;;  %v4787_v21 = vld [vmem:[%s6754_s9 + $0xf0] sm:$0xff]  }
 0x5d9   :  { %4480 = vmatprep.subr.bf16.mxu1 %v4763_v17  ;;  %v4788_v17 = vld [vmem:[%s6754_s9 + $0xb0] sm:$0xff]  }
 0x5dc   :  { %4481 = vmatpush3.bf16.msra.mxu1 %v4764_v41  ;;  %v4789_v41 = vld [vmem:[%s6754_s9 + $0xf8] sm:$0xff]  }
 0x5dd   :  { %4482 = vmatprep.subr.bf16.mxu1 %v4765_v1  ;;  %v4790_v1 = vld [vmem:[%s6754_s9 + $0xb8] sm:$0xff]  }
 0x5e0   :  { %4483 = vmatpush3.bf16.msra.mxu1 %v4766_v42 }
 0x5e1   :  { %4484 = vmatprep.subr.bf16.mxu1 %v4767_v25 }
 0x5e4   :  { %4485 = vmatpush3.bf16.msra.mxu1 %v4768_v7 }
 0x5e5   :  { %4486 = vmatprep.subr.bf16.mxu1 %v4769_v16 }
 0x5e8   :  { %4487 = vmatpush3.bf16.msra.mxu1 %v4770_v43 }
 0x5e9   :  { %4488 = vmatprep.subr.bf16.mxu1 %v4771_v0 }
 0x5ec   :  { %4489 = vmatpush3.bf16.msra.mxu1 %v4772_v8  ;;  %v4254_v8 = vld [vmem:[%s6757_s10] ss:$0 sm:$0xff] }
 0x5ed   :  { %4490 = vmatprep.subr.bf16.mxu1 %v4773_v54 }
 0x5f0   :  { %4491 = vmatpush3.bf16.msra.mxu1 %v4774_v24 }
 0x5f1   :  { %4498 = vmatprep.subr.bf16.mxu1 %v4775_v53 }
 0x696   :  { %v3492_v60 = vpop.f32.mrb[136].mxu1 }
 0x697   :  { %v3493_v51 = vadd.f32 %v3492_v60, %v3358_v57  ;;  %v3494_v32 = vpop.f32.mrb[137].mxu1 }
 0x698   :  { %v3495_v14 = vadd.f32 %v3494_v32, %v3362_v46  ;;  %v3496_v22 = vpop.f32.mrb[138].mxu1 }
 0x699   :  { %v3497_v38 = vadd.f32 %v3496_v22, %v3358_v57  ;;  %v3498_v27 = vpop.f32.mrb[139].mxu1  ;;  %v3544_v61 = vmax.f32 %v3493_v51, 0.0 }
 0x69a   :  { %v3499_v2 = vadd.f32 %v3498_v27, %v3362_v46  ;;  %v3545_v55 = vmax.f32 %v3495_v14, 0.0 }
 0x69b   :  { %v3548_v45 = vmax.f32 %v3497_v38, 0.0 }
 0x69c   :  { %v3549_v6 = vmax.f32 %v3499_v2, 0.0 }
 0x69d   :  { %v3552_v33 = vpack.c.bf16 %v3548_v45, %v3544_v61 }
 0x69e   :  { %v3553_v52 = vpack.c.bf16 %v3549_v6, %v3545_v55 }
 0x6a0   :  { %3851 = vmatprep.mubr.bf16.mxu1 %v3553_v52 }
 0x6a1   :  { %3852 = vmatmul.mubr.bf16.vlgmr.msra.gmra.mrb[144].mxu1 %v3552_v33 }
 0x6a2   :  { %4499 = vmatpush3.bf16.msra.mxu1 %v4776_v39 }
 0x6a3   :  { %4500 = vmatprep.subr.bf16.mxu1 %v4777_v19 }
 0x6a6   :  { %v3535_v20 = vpop.f32.mrb[140].mxu1  ;;  %4501 = vmatpush3.bf16.msra.mxu1 %v4778_v56 }
 0x6a7   :  { %v3536_v48 = vadd.f32 %v3535_v20, %v3366_v15  ;;  %v3537_v30 = vpop.f32.mrb[141].mxu1  ;;  %4502 = vmatprep.subr.bf16.mxu1 %v4779_v62 }
 0x6a8   :  { %v3538_v13 = vadd.f32 %v3537_v30, %v3370_v5  ;;  %v3539_v26 = vpop.f32.mrb[142].mxu1 }
 0x6a9   :  { %v3540_v23 = vadd.f32 %v3539_v26, %v3366_v15  ;;  %v3541_v11 = vpop.f32.mrb[143].mxu1  ;;  %v3546_v37 = vmax.f32 %v3536_v48, 0.0 }
 0x6aa   :  { %v3542_v31 = vadd.f32 %v3541_v11, %v3370_v5  ;;  %4503 = vmatpush3.bf16.msra.mxu1 %v4780_v9  ;;  %v3547_v4 = vmax.f32 %v3538_v13, 0.0 }
 0x6ab   :  { %v3550_v59 = vmax.f32 %v3540_v23, 0.0  ;;  %4504 = vmatprep.subr.bf16.mxu1 %v4781_v44 }
 0x6ac   :  { %v3551_v34 = vmax.f32 %v3542_v31, 0.0 }
 0x6ad   :  { %v3554_v63 = vpack.c.bf16 %v3550_v59, %v3546_v37 }
 0x6ae   :  { %v3555_v40 = vpack.c.bf16 %v3551_v34, %v3547_v4  ;;  %4505 = vmatpush3.bf16.msra.mxu1 %v4782_v47 }
 0x6af   :  { %4506 = vmatprep.subr.bf16.mxu1 %v4783_v3 }
 0x6b0   :  { %3892 = vmatprep.mubr.bf16.mxu1 %v3555_v40 }
 0x6b2   :  { %4507 = vmatpush3.bf16.msra.mxu1 %v4784_v49 }
 0x6b3   :  { %4508 = vmatprep.subr.bf16.mxu1 %v4785_v12 }
 0x6b6   :  { %4509 = vmatpush3.bf16.msra.mxu1 %v4786_v18 }
 0x6b7   :  { %4510 = vmatprep.subr.bf16.mxu1 %v4787_v21 }
 0x6ba   :  { %4511 = vmatpush3.bf16.msra.mxu1 %v4788_v17 }
 0x6bb   :  { %4512 = vmatprep.subr.bf16.mxu1 %v4789_v41 }
 0x6be   :  { %4513 = vmatpush3.bf16.msra.mxu1 %v4790_v1 }
 0x6c1   :  { %3893 = vmatmul.mubr.bf16.vlgmr.msra.gmra.mrb[148].mxu1 %v3554_v63 }
 0x774   :  { %v4492_v42 = vpop.f32.mrb[144].mxu1 }
 0x775   :  { %v4493_v25 = vpop.f32.mrb[145].mxu1 }
 0x776   :  { %v4494_v7 = vadd.f32 %v4493_v25, %v4492_v42  ;;  %v4495_v16 = vpop.f32.mrb[146].mxu1 }
 0x777   :  { %v4496_v43 = vpop.f32.mrb[147].mxu1 }
 0x778   :  { %v4497_v0 = vadd.f32 %v4496_v43, %v4495_v16  ;;  %v3854_v53 = vadd.f32 %v4494_v7, %v4254_v8 }
 0x77a   :  { %v3857_v35 = vadd.f32 %v4497_v0, %v4254_v8 }
 0x794   :  { %v4514_v54 = vpop.f32.mrb[148].mxu1 }
 0x795   :  { %v4515_v24 = vpop.f32.mrb[149].mxu1 }
 0x796   :  { %v4516_v29 = vadd.f32 %v4515_v24, %v4514_v54  ;;  %v4517_v50 = vpop.f32.mrb[150].mxu1 }
 0x797   :  { %v4518_v36 = vpop.f32.mrb[151].mxu1 }
 0x798   :  { %v3895_v28 = vadd.f32 %v4516_v29, %v3854_v53  ;;  %v4519_v57 = vadd.f32 %v4518_v36, %v4517_v50 }
 0x79a   :  { %3901 = vst [vmem:[%s6758_s11] sm:$0xff] %v3895_v28  ;;  %v3898_v46 = vadd.f32 %v4519_v57, %v3857_v35 }
 0x79c   :  { %3902 = vst [vmem:[%s6758_s11 + $0x8] sm:$0xff] %v3898_v46 }

</bundles_post_ra>
